<compile_context>
chip_gen: v7x
topology: tpu7x:2x2x1
jax: 0.10.0
libtpu: 0.0.40
codegen_flags: <defaults>
</compile_context>

<pallas_src>
import jax
import jax.numpy as jnp
from jax.experimental import pallas as pl
from jax.experimental.pallas import tpu as pltpu

EPS = 1e-5


def _vmem_limit_bytes():
    # ~40 MiB on v7x (64 MiB physical VMEM), ~100 MiB on v5e/v6e (128 MiB).
    try:
        cap = pltpu.get_tpu_info().vmem_capacity_bytes
    except Exception:
        cap = 64 * 1024 * 1024
    return int(max(32 * 1024 * 1024,
                   min(cap - 24 * 1024 * 1024, 100 * 1024 * 1024)))


def _max_cout_tile():
    # 256-wide N tiles match the 2x256^2 MXUs of v6e/v7x; v5e (4x128^2) -> 128.
    try:
        kind = jax.devices()[0].device_kind.lower()
    except Exception:
        return 128
    if any(v in kind for v in ("v2", "v3", "v4", "v5")):
        return 128
    return 256


VMEM_LIMIT = _vmem_limit_bytes()
COUT_TILE = _max_cout_tile()


# ----------------------------- Pallas kernels -----------------------------

def _conv_stats_kernel(slab_ref, w_ref, conv_ref, stats_ref):
    # slab: (tr, kkc) bf16   w: (kkc, tc) bf16
    # conv: (tr, tc) f32     stats: (1, 2, tc) f32  (per-row-tile sum / sumsq)
    acc = jnp.dot(slab_ref[...], w_ref[...],
                  preferred_element_type=jnp.float32)
    conv_ref[...] = acc
    s = jnp.sum(acc, axis=0, keepdims=True)            # (1, tc)
    s2 = jnp.sum(acc * acc, axis=0, keepdims=True)     # (1, tc)
    stats_ref[...] = jnp.concatenate([s, s2], axis=0)[None]


def _bn_lrelu_kernel(conv_ref, a_ref, c_ref, o_ref):
    # Folded BatchNorm (scale/shift) + LeakyReLU(0.2).
    y = conv_ref[...] * a_ref[...] + c_ref[...]
    o_ref[...] = jnp.maximum(y, 0.2 * y).astype(o_ref.dtype)


def _head_kernel(x_ref, w1_ref, b1_ref, w2_ref, b2_ref, o_ref, acc_ref):
    # Contraction-tiled Linear(dim,2048); finalize: +b1, LeakyReLU,
    # Linear(2048,1), Sigmoid.
    k = pl.program_id(0)

    @pl.when(k == 0)
    def _():
        acc_ref[...] = jnp.zeros_like(acc_ref)

    acc_ref[...] += jnp.dot(x_ref[...], w1_ref[...],
                            preferred_element_type=jnp.float32)

    @pl.when(k == pl.num_programs(0) - 1)
    def _():
        h = acc_ref[...] + b1_ref[...]
        h = jnp.maximum(h, 0.2 * h)                     # LeakyReLU(0.2)
        y = jnp.dot(h.astype(w2_ref.dtype), w2_ref[...],
                    preferred_element_type=jnp.float32) + b2_ref[...]
        o_ref[...] = jax.nn.sigmoid(y)


# ------------------------------ JAX wrappers -------------------------------

def _im2col(x, k, stride, padding):
    # x: (N, H, W, C) -> slab (N*Ho*Wo, k*k*C), strided slices only (no
    # zero-inserted dilation -> no wasted FLOPs downstream).
    n, h, w, c = x.shape
    xp = jnp.pad(x, ((0, 0), (padding, padding), (padding, padding), (0, 0)))
    ho = (h + 2 * padding - k) // stride + 1
    wo = (w + 2 * padding - k) // stride + 1
    cols = []
    for kh in range(k):
        for kw in range(k):
            cols.append(xp[:, kh:kh + stride * (ho - 1) + 1:stride,
                            kw:kw + stride * (wo - 1) + 1:stride, :])
    slab = jnp.concatenate(cols, axis=-1)               # (N, ho, wo, k*k*C)
    return slab.reshape(n * ho * wo, k * k * c), ho, wo


def _row_tile(rows):
    # Target 512-row tiles (>=85% HBM roofline); small toy layers use their
    # full (sublane-padded) extent.
    if rows >= 512:
        return 512
    return max(8, ((rows + 7) // 8) * 8)


def conv_bn_lrelu(x, w_mat, gamma, beta, *, stride, k=5, padding=2):
    # x: (N, H, W, Cin) -> (N, Ho, Wo, Cout), bf16 activations out.
    n = x.shape[0]
    cout = w_mat.shape[1]
    slab, ho, wo = _im2col(x.astype(jnp.bfloat16), k, stride, padding)
    rows, kkc = slab.shape

    tr = _row_tile(rows)
    rows_p = pl.cdiv(rows, tr) * tr
    if rows_p != rows:
        # Zero rows contribute nothing to sum/sumsq -> BN stats stay exact.
        slab = jnp.pad(slab, ((0, rows_p - rows), (0, 0)))
    tc = min(cout, COUT_TILE)
    gr, gc = rows_p // tr, cout // tc

    # Pass 1: tiled MXU matmul + per-row-tile partial BN statistics.
    conv, stats = pl.pallas_call(
        _conv_stats_kernel,
        out_shape=(jax.ShapeDtypeStruct((rows_p, cout), jnp.float32),
                   jax.ShapeDtypeStruct((gr, 2, cout), jnp.float32)),
        grid_spec=pltpu.PrefetchScalarGridSpec(
            num_scalar_prefetch=0,
            grid=(gr, gc),
            in_specs=[
                pl.BlockSpec((tr, kkc), lambda i, j: (i, 0)),
                pl.BlockSpec((kkc, tc), lambda i, j: (0, j)),
            ],
            out_specs=(
                pl.BlockSpec((tr, tc), lambda i, j: (i, j)),
                pl.BlockSpec((1, 2, tc), lambda i, j: (i, 0, j)),
            ),
        ),
        compiler_params=pltpu.CompilerParams(
            dimension_semantics=("parallel", "parallel"),
            vmem_limit_bytes=VMEM_LIMIT,
        ),
    )(slab, w_mat)

    # Fold BN into a single per-channel scale/shift (tiny, done in JAX).
    tot = jnp.sum(stats, axis=0)                         # (2, cout)
    mean = tot[0] / rows
    var = tot[1] / rows - mean * mean
    a = gamma * jax.lax.rsqrt(var + EPS)                 # (cout,)
    c = beta - a * mean                                  # (cout,)
    a = a.reshape(1, cout)
    c = c.reshape(1, cout)

    # Pass 2: cheap fused scale/shift + LeakyReLU finalize over the same grid.
    out = pl.pallas_call(
        _bn_lrelu_kernel,
        out_shape=jax.ShapeDtypeStruct((rows_p, cout), jnp.bfloat16),
        grid_spec=pltpu.PrefetchScalarGridSpec(
            num_scalar_prefetch=0,
            grid=(gr, gc),
            in_specs=[
                pl.BlockSpec((tr, tc), lambda i, j: (i, j)),
                pl.BlockSpec((1, tc), lambda i, j: (0, j)),
                pl.BlockSpec((1, tc), lambda i, j: (0, j)),
            ],
            out_specs=pl.BlockSpec((tr, tc), lambda i, j: (i, j)),
        ),
        compiler_params=pltpu.CompilerParams(
            dimension_semantics=("parallel", "parallel"),
            vmem_limit_bytes=VMEM_LIMIT,
        ),
    )(conv, a, c)

    return out[:rows].reshape(n, ho, wo, cout)


def head(feats, w1, b1, w2, b2):
    # feats: (N, dim) in NHWC-flatten order (w1 rows pre-permuted to match).
    n, dim = feats.shape
    tk = 512 if dim % 512 == 0 else dim
    gk = dim // tk
    return pl.pallas_call(
        _head_kernel,
        out_shape=jax.ShapeDtypeStruct((n, 1), jnp.float32),
        grid_spec=pltpu.PrefetchScalarGridSpec(
            num_scalar_prefetch=0,
            grid=(gk,),
            in_specs=[
                pl.BlockSpec((n, tk), lambda k: (0, k)),
                pl.BlockSpec((tk, 2048), lambda k: (k, 0)),
                pl.BlockSpec((1, 2048), lambda k: (0, 0)),
                pl.BlockSpec((2048, 1), lambda k: (0, 0)),
                pl.BlockSpec((1, 1), lambda k: (0, 0)),
            ],
            out_specs=pl.BlockSpec((n, 1), lambda k: (0, 0)),
            scratch_shapes=[pltpu.VMEM((n, 2048), jnp.float32)],
        ),
        compiler_params=pltpu.CompilerParams(
            dimension_semantics=("arbitrary",),
            vmem_limit_bytes=VMEM_LIMIT,
        ),
    )(feats.astype(jnp.bfloat16), w1, b1, w2, b2)


# --------------------------- Discriminator module ---------------------------

def init_discriminator_params(key, input_channels, representation_size):
    c_r, h_r, w_r = representation_size
    dim = c_r * h_r * w_r
    ks = jax.random.split(key, 14)
    rn = lambda k, shape, s: jax.random.normal(k, shape, jnp.float32) * s
    p = {}
    # Conv2d weights in PyTorch layout (Cout, Cin, K, K).  Conv biases exist
    # in the PyTorch module but are exactly cancelled by the batch-stat
    # BatchNorm mean subtraction right after, so they are omitted.
    p["c1_w"] = rn(ks[0], (32, input_channels, 5, 5), 0.1)
    p["bn1_g"] = 1.0 + rn(ks[1], (32,), 0.1)
    p["bn1_b"] = rn(ks[2], (32,), 0.1)
    p["c2_w"] = rn(ks[3], (128, 32, 5, 5), 0.05)
    p["bn2_g"] = 1.0 + rn(ks[4], (128,), 0.1)
    p["bn2_b"] = rn(ks[5], (128,), 0.1)
    p["c3_w"] = rn(ks[6], (256, 128, 5, 5), 0.02)
    p["bn3_g"] = 1.0 + rn(ks[7], (256,), 0.1)
    p["bn3_b"] = rn(ks[8], (256,), 0.1)
    p["c4_w"] = rn(ks[9], (256, 256, 5, 5), 0.02)
    p["bn4_g"] = 1.0 + rn(ks[10], (256,), 0.1)
    p["bn4_b"] = rn(ks[11], (256,), 0.1)
    # Linear layers in PyTorch layout (out, in) + bias.
    p["l1_w"] = rn(ks[12], (2048, dim), 0.02)
    p["l1_b"] = jnp.zeros((2048,), jnp.float32)
    p["l2_w"] = rn(ks[13], (1, 2048), 0.02)
    p["l2_b"] = jnp.zeros((1,), jnp.float32)
    return p


def prepare_params(p, representation_size):
    # One-time (outside jit) weight re-layouts + bf16 casts.
    c_r, h_r, w_r = representation_size

    def conv_w(w):
        cout, cin, k, _ = w.shape
        # (Cout, Cin, K, K) -> (K, K, Cin, Cout) -> (K*K*Cin, Cout), matching
        # the (kh, kw, ci) im2col concatenation order.
        return w.transpose(2, 3, 1, 0).reshape(k * k * cin, cout).astype(
            jnp.bfloat16)

    q = {}
    for i in (1, 2, 3, 4):
        q[f"c{i}_w"] = conv_w(p[f"c{i}_w"])
        q[f"bn{i}_g"] = p[f"bn{i}_g"].astype(jnp.float32)
        q[f"bn{i}_b"] = p[f"bn{i}_b"].astype(jnp.float32)
    # Permute l1_w rows so feats can be flattened directly from NHWC
    # (removes the per-forward activation transpose): PyTorch column order is
    # (C, H, W); reorder to (H, W, C), then transpose to (dim, 2048).
    l1 = p["l1_w"].reshape(2048, c_r, h_r, w_r).transpose(0, 2, 3, 1)
    q["l1_w"] = l1.reshape(2048, -1).T.astype(jnp.bfloat16)     # (dim, 2048)
    q["l1_b"] = p["l1_b"].reshape(1, -1).astype(jnp.float32)
    q["l2_w"] = p["l2_w"].T.astype(jnp.bfloat16)                # (2048, 1)
    q["l2_b"] = p["l2_b"].reshape(1, -1).astype(jnp.float32)
    return q


def discriminator_forward(prep, x_nchw):
    bs = x_nchw.shape[0]
    x = x_nchw.transpose(0, 2, 3, 1)                             # NHWC
    x = conv_bn_lrelu(x, prep["c1_w"], prep["bn1_g"], prep["bn1_b"], stride=1)
    x = conv_bn_lrelu(x, prep["c2_w"], prep["bn2_g"], prep["bn2_b"], stride=2)
    x = conv_bn_lrelu(x, prep["c3_w"], prep["bn3_g"], prep["bn3_b"], stride=2)
    x = conv_bn_lrelu(x, prep["c4_w"], prep["bn4_g"], prep["bn4_b"], stride=2)
    feats = x.reshape(bs, -1)          # NHWC flatten; l1_w rows pre-permuted
    return head(feats, prep["l1_w"], prep["l1_b"], prep["l2_w"], prep["l2_b"])


# ----------------------------------- main -----------------------------------

if __name__ == "__main__":
    key = jax.random.PRNGKey(0)
    batch = 2
    input_channels = 3
    spatial = 16                                   # small stand-in for 128x128
    # Three stride-2 convs: 16 -> 8 -> 4 -> 2, so representation is (256, 2, 2)
    representation_size = (256, spatial // 8, spatial // 8)

    kp, kx = jax.random.split(key)
    params = init_discriminator_params(kp, input_channels, representation_size)
    prep = prepare_params(params, representation_size)     # outside jit
    x = jax.random.normal(kx, (batch, input_channels, spatial, spatial),
                          jnp.float32)

    fwd = jax.jit(discriminator_forward)
    out = jax.block_until_ready(fwd(prep, x))

    assert out.shape == (batch, 1), out.shape
    assert bool(jnp.all(jnp.isfinite(out)))
    assert bool(jnp.all((out >= 0.0) & (out <= 1.0)))   # sigmoid range
    print("KERNEL_OK")
</pallas_src>

<mosaic_0001>
module attributes {stable_mosaic.version = 11 : i64} {
  func.func @_conv_stats_kernel(%arg0: i32, %arg1: i32, %arg2: memref<512x75xbf16, #tpu.memory_space<vmem>>, %arg3: memref<75x32xbf16, #tpu.memory_space<vmem>>, %arg4: memref<512x32xf32, #tpu.memory_space<vmem>>, %arg5: memref<1x2x32xf32, #tpu.memory_space<vmem>>) attributes {dimension_semantics = [#tpu.dimension_semantics<parallel>, #tpu.dimension_semantics<parallel>], iteration_bounds = array<i64: 1, 1>, scalar_prefetch = 0 : i64, scratch_operands = 0 : i64, tpu.core_type = #tpu.core_type<tc>, window_params = [{transform_indices = @transform_0, window_bounds = array<i64: 512, 75>}, {transform_indices = @transform_1, window_bounds = array<i64: 75, 32>}, {transform_indices = @transform_2, window_bounds = array<i64: 512, 32>}, {transform_indices = @transform_3, window_bounds = array<i64: 1, 2, 32>}]} {
    %c0 = arith.constant 0 : index
    %c0_0 = arith.constant 0 : index
    %0 = vector.load %arg2[%c0, %c0_0] : memref<512x75xbf16, #tpu.memory_space<vmem>>, vector<512x75xbf16>
    %c0_1 = arith.constant 0 : index
    %c0_2 = arith.constant 0 : index
    %1 = vector.load %arg3[%c0_1, %c0_2] : memref<75x32xbf16, #tpu.memory_space<vmem>>, vector<75x32xbf16>
    %cst = arith.constant dense<0.000000e+00> : vector<512x32xf32>
    %2 = tpu.matmul %0, %1, %cst {dimension_numbers = #tpu.dot_dimension_numbers<[1], [0], [0], [1], [0, 0, 1, 1], [], []>} : vector<512x75xbf16>, vector<75x32xbf16>, vector<512x32xf32> -> vector<512x32xf32>
    %c0_3 = arith.constant 0 : index
    %c0_4 = arith.constant 0 : index
    %3 = vector.load %arg4[%c0_3, %c0_4] : memref<512x32xf32, #tpu.memory_space<vmem>>, vector<512x32xf32>
    tpu.vector_store %arg4[%c0_3, %c0_4], %2 {strides = array<i32>} : memref<512x32xf32, #tpu.memory_space<vmem>>, vector<512x32xf32>,
    %cst_5 = arith.constant dense<0.000000e+00> : vector<32xf32>
    %4 = vector.multi_reduction <add>, %2, %cst_5 [0] : vector<512x32xf32> to vector<32xf32>
    %5 = vector.shape_cast %4 : vector<32xf32> to vector<1x32xf32>
    %6 = arith.mulf %2, %2 : vector<512x32xf32>
    %cst_6 = arith.constant dense<0.000000e+00> : vector<32xf32>
    %7 = vector.multi_reduction <add>, %6, %cst_6 [0] : vector<512x32xf32> to vector<32xf32>
    %8 = vector.shape_cast %7 : vector<32xf32> to vector<1x32xf32>
    %9 = tpu.concatenate %5, %8 in 0 : vector<1x32xf32>, vector<1x32xf32> -> vector<2x32xf32>
    %10 = vector.shape_cast %9 : vector<2x32xf32> to vector<1x2x32xf32>
    %c0_7 = arith.constant 0 : index
    %c0_8 = arith.constant 0 : index
    %c0_9 = arith.constant 0 : index
    %11 = vector.load %arg5[%c0_7, %c0_8, %c0_9] : memref<1x2x32xf32, #tpu.memory_space<vmem>>, vector<1x2x32xf32>
    tpu.vector_store %arg5[%c0_7, %c0_8, %c0_9], %10 {strides = array<i32>} : memref<1x2x32xf32, #tpu.memory_space<vmem>>, vector<1x2x32xf32>,
    return
  }
  func.func @transform_0(%arg0: i32, %arg1: i32) -> (i32, i32) {
    %c0_i32 = arith.constant 0 : i32
    %c0_i32_0 = arith.constant 0 : i32
    return %arg0, %c0_i32 : i32, i32
  }
  func.func @transform_1(%arg0: i32, %arg1: i32) -> (i32, i32) {
    %c0_i32 = arith.constant 0 : i32
    %c0_i32_0 = arith.constant 0 : i32
    return %c0_i32, %arg1 : i32, i32
  }
  func.func @transform_2(%arg0: i32, %arg1: i32) -> (i32, i32) {
    %c0_i32 = arith.constant 0 : i32
    return %arg0, %arg1 : i32, i32
  }
  func.func @transform_3(%arg0: i32, %arg1: i32) -> (i32, i32, i32) {
    %c0_i32 = arith.constant 0 : i32
    %c0_i32_0 = arith.constant 0 : i32
    return %arg0, %c0_i32, %arg1 : i32, i32, i32
  }
}

module attributes {stable_mosaic.version = 11 : i64} {
  func.func @_bn_lrelu_kernel(%arg0: i32, %arg1: i32, %arg2: memref<512x32xf32, #tpu.memory_space<vmem>>, %arg3: memref<1x32xf32, #tpu.memory_space<vmem>>, %arg4: memref<1x32xf32, #tpu.memory_space<vmem>>, %arg5: memref<512x32xbf16, #tpu.memory_space<vmem>>) attributes {dimension_semantics = [#tpu.dimension_semantics<parallel>, #tpu.dimension_semantics<parallel>], iteration_bounds = array<i64: 1, 1>, scalar_prefetch = 0 : i64, scratch_operands = 0 : i64, tpu.core_type = #tpu.core_type<tc>, window_params = [{transform_indices = @transform_0, window_bounds = array<i64: 512, 32>}, {transform_indices = @transform_1, window_bounds = array<i64: 1, 32>}, {transform_indices = @transform_2, window_bounds = array<i64: 1, 32>}, {transform_indices = @transform_3, window_bounds = array<i64: 512, 32>}]} {
    %c0 = arith.constant 0 : index
    %c0_0 = arith.constant 0 : index
    %0 = vector.load %arg2[%c0, %c0_0] : memref<512x32xf32, #tpu.memory_space<vmem>>, vector<512x32xf32>
    %c0_1 = arith.constant 0 : index
    %c0_2 = arith.constant 0 : index
    %1 = vector.load %arg3[%c0_1, %c0_2] : memref<1x32xf32, #tpu.memory_space<vmem>>, vector<1x32xf32>
    %2 = vector.broadcast %1 : vector<1x32xf32> to vector<512x32xf32>
    %3 = arith.mulf %0, %2 : vector<512x32xf32>
    %c0_3 = arith.constant 0 : index
    %c0_4 = arith.constant 0 : index
    %4 = vector.load %arg4[%c0_3, %c0_4] : memref<1x32xf32, #tpu.memory_space<vmem>>, vector<1x32xf32>
    %5 = vector.broadcast %4 : vector<1x32xf32> to vector<512x32xf32>
    %6 = arith.addf %3, %5 : vector<512x32xf32>
    %cst = arith.constant 2.000000e-01 : f32
    %7 = vector.broadcast %cst : f32 to vector<512x32xf32>
    %8 = arith.mulf %7, %6 : vector<512x32xf32>
    %9 = arith.maximumf %6, %8 : vector<512x32xf32>
    %10 = arith.truncf %9 : vector<512x32xf32> to vector<512x32xbf16>
    %c0_5 = arith.constant 0 : index
    %c0_6 = arith.constant 0 : index
    %11 = vector.load %arg5[%c0_5, %c0_6] : memref<512x32xbf16, #tpu.memory_space<vmem>>, vector<512x32xbf16>
    tpu.vector_store %arg5[%c0_5, %c0_6], %10 {strides = array<i32>} : memref<512x32xbf16, #tpu.memory_space<vmem>>, vector<512x32xbf16>,
    return
  }
  func.func @transform_0(%arg0: i32, %arg1: i32) -> (i32, i32) {
    %c0_i32 = arith.constant 0 : i32
    return %arg0, %arg1 : i32, i32
  }
  func.func @transform_1(%arg0: i32, %arg1: i32) -> (i32, i32) {
    %c0_i32 = arith.constant 0 : i32
    %c0_i32_0 = arith.constant 0 : i32
    return %c0_i32, %arg1 : i32, i32
  }
  func.func @transform_2(%arg0: i32, %arg1: i32) -> (i32, i32) {
    %c0_i32 = arith.constant 0 : i32
    %c0_i32_0 = arith.constant 0 : i32
    return %c0_i32, %arg1 : i32, i32
  }
  func.func @transform_3(%arg0: i32, %arg1: i32) -> (i32, i32) {
    %c0_i32 = arith.constant 0 : i32
    return %arg0, %arg1 : i32, i32
  }
}

module attributes {stable_mosaic.version = 11 : i64} {
  func.func @_conv_stats_kernel(%arg0: i32, %arg1: i32, %arg2: memref<128x800xbf16, #tpu.memory_space<vmem>>, %arg3: memref<800x128xbf16, #tpu.memory_space<vmem>>, %arg4: memref<128x128xf32, #tpu.memory_space<vmem>>, %arg5: memref<1x2x128xf32, #tpu.memory_space<vmem>>) attributes {dimension_semantics = [#tpu.dimension_semantics<parallel>, #tpu.dimension_semantics<parallel>], iteration_bounds = array<i64: 1, 1>, scalar_prefetch = 0 : i64, scratch_operands = 0 : i64, tpu.core_type = #tpu.core_type<tc>, window_params = [{transform_indices = @transform_0, window_bounds = array<i64: 128, 800>}, {transform_indices = @transform_1, window_bounds = array<i64: 800, 128>}, {transform_indices = @transform_2, window_bounds = array<i64: 128, 128>}, {transform_indices = @transform_3, window_bounds = array<i64: 1, 2, 128>}]} {
    %c0 = arith.constant 0 : index
    %c0_0 = arith.constant 0 : index
    %0 = vector.load %arg2[%c0, %c0_0] : memref<128x800xbf16, #tpu.memory_space<vmem>>, vector<128x800xbf16>
    %c0_1 = arith.constant 0 : index
    %c0_2 = arith.constant 0 : index
    %1 = vector.load %arg3[%c0_1, %c0_2] : memref<800x128xbf16, #tpu.memory_space<vmem>>, vector<800x128xbf16>
    %cst = arith.constant dense<0.000000e+00> : vector<128x128xf32>
    %2 = tpu.matmul %0, %1, %cst {dimension_numbers = #tpu.dot_dimension_numbers<[1], [0], [0], [1], [0, 0, 1, 1], [], []>} : vector<128x800xbf16>, vector<800x128xbf16>, vector<128x128xf32> -> vector<128x128xf32>
    %c0_3 = arith.constant 0 : index
    %c0_4 = arith.constant 0 : index
    %3 = vector.load %arg4[%c0_3, %c0_4] : memref<128x128xf32, #tpu.memory_space<vmem>>, vector<128x128xf32>
    tpu.vector_store %arg4[%c0_3, %c0_4], %2 {strides = array<i32>} : memref<128x128xf32, #tpu.memory_space<vmem>>, vector<128x128xf32>,
    %cst_5 = arith.constant dense<0.000000e+00> : vector<128xf32>
    %4 = vector.multi_reduction <add>, %2, %cst_5 [0] : vector<128x128xf32> to vector<128xf32>
    %5 = vector.shape_cast %4 : vector<128xf32> to vector<1x128xf32>
    %6 = arith.mulf %2, %2 : vector<128x128xf32>
    %cst_6 = arith.constant dense<0.000000e+00> : vector<128xf32>
    %7 = vector.multi_reduction <add>, %6, %cst_6 [0] : vector<128x128xf32> to vector<128xf32>
    %8 = vector.shape_cast %7 : vector<128xf32> to vector<1x128xf32>
    %9 = tpu.concatenate %5, %8 in 0 : vector<1x128xf32>, vector<1x128xf32> -> vector<2x128xf32>
    %10 = vector.shape_cast %9 : vector<2x128xf32> to vector<1x2x128xf32>
    %c0_7 = arith.constant 0 : index
    %c0_8 = arith.constant 0 : index
    %c0_9 = arith.constant 0 : index
    %11 = vector.load %arg5[%c0_7, %c0_8, %c0_9] : memref<1x2x128xf32, #tpu.memory_space<vmem>>, vector<1x2x128xf32>
    tpu.vector_store %arg5[%c0_7, %c0_8, %c0_9], %10 {strides = array<i32>} : memref<1x2x128xf32, #tpu.memory_space<vmem>>, vector<1x2x128xf32>,
    return
  }
  func.func @transform_0(%arg0: i32, %arg1: i32) -> (i32, i32) {
    %c0_i32 = arith.constant 0 : i32
    %c0_i32_0 = arith.constant 0 : i32
    return %arg0, %c0_i32 : i32, i32
  }
  func.func @transform_1(%arg0: i32, %arg1: i32) -> (i32, i32) {
    %c0_i32 = arith.constant 0 : i32
    %c0_i32_0 = arith.constant 0 : i32
    return %c0_i32, %arg1 : i32, i32
  }
  func.func @transform_2(%arg0: i32, %arg1: i32) -> (i32, i32) {
    %c0_i32 = arith.constant 0 : i32
    return %arg0, %arg1 : i32, i32
  }
  func.func @transform_3(%arg0: i32, %arg1: i32) -> (i32, i32, i32) {
    %c0_i32 = arith.constant 0 : i32
    %c0_i32_0 = arith.constant 0 : i32
    return %arg0, %c0_i32, %arg1 : i32, i32, i32
  }
}

module attributes {stable_mosaic.version = 11 : i64} {
  func.func @_bn_lrelu_kernel(%arg0: i32, %arg1: i32, %arg2: memref<128x128xf32, #tpu.memory_space<vmem>>, %arg3: memref<1x128xf32, #tpu.memory_space<vmem>>, %arg4: memref<1x128xf32, #tpu.memory_space<vmem>>, %arg5: memref<128x128xbf16, #tpu.memory_space<vmem>>) attributes {dimension_semantics = [#tpu.dimension_semantics<parallel>, #tpu.dimension_semantics<parallel>], iteration_bounds = array<i64: 1, 1>, scalar_prefetch = 0 : i64, scratch_operands = 0 : i64, tpu.core_type = #tpu.core_type<tc>, window_params = [{transform_indices = @transform_0, window_bounds = array<i64: 128, 128>}, {transform_indices = @transform_1, window_bounds = array<i64: 1, 128>}, {transform_indices = @transform_2, window_bounds = array<i64: 1, 128>}, {transform_indices = @transform_3, window_bounds = array<i64: 128, 128>}]} {
    %c0 = arith.constant 0 : index
    %c0_0 = arith.constant 0 : index
    %0 = vector.load %arg2[%c0, %c0_0] : memref<128x128xf32, #tpu.memory_space<vmem>>, vector<128x128xf32>
    %c0_1 = arith.constant 0 : index
    %c0_2 = arith.constant 0 : index
    %1 = vector.load %arg3[%c0_1, %c0_2] : memref<1x128xf32, #tpu.memory_space<vmem>>, vector<1x128xf32>
    %2 = vector.broadcast %1 : vector<1x128xf32> to vector<128x128xf32>
    %3 = arith.mulf %0, %2 : vector<128x128xf32>
    %c0_3 = arith.constant 0 : index
    %c0_4 = arith.constant 0 : index
    %4 = vector.load %arg4[%c0_3, %c0_4] : memref<1x128xf32, #tpu.memory_space<vmem>>, vector<1x128xf32>
    %5 = vector.broadcast %4 : vector<1x128xf32> to vector<128x128xf32>
    %6 = arith.addf %3, %5 : vector<128x128xf32>
    %cst = arith.constant 2.000000e-01 : f32
    %7 = vector.broadcast %cst : f32 to vector<128x128xf32>
    %8 = arith.mulf %7, %6 : vector<128x128xf32>
    %9 = arith.maximumf %6, %8 : vector<128x128xf32>
    %10 = arith.truncf %9 : vector<128x128xf32> to vector<128x128xbf16>
    %c0_5 = arith.constant 0 : index
    %c0_6 = arith.constant 0 : index
    %11 = vector.load %arg5[%c0_5, %c0_6] : memref<128x128xbf16, #tpu.memory_space<vmem>>, vector<128x128xbf16>
    tpu.vector_store %arg5[%c0_5, %c0_6], %10 {strides = array<i32>} : memref<128x128xbf16, #tpu.memory_space<vmem>>, vector<128x128xbf16>,
    return
  }
  func.func @transform_0(%arg0: i32, %arg1: i32) -> (i32, i32) {
    %c0_i32 = arith.constant 0 : i32
    return %arg0, %arg1 : i32, i32
  }
  func.func @transform_1(%arg0: i32, %arg1: i32) -> (i32, i32) {
    %c0_i32 = arith.constant 0 : i32
    %c0_i32_0 = arith.constant 0 : i32
    return %c0_i32, %arg1 : i32, i32
  }
  func.func @transform_2(%arg0: i32, %arg1: i32) -> (i32, i32) {
    %c0_i32 = arith.constant 0 : i32
    %c0_i32_0 = arith.constant 0 : i32
    return %c0_i32, %arg1 : i32, i32
  }
  func.func @transform_3(%arg0: i32, %arg1: i32) -> (i32, i32) {
    %c0_i32 = arith.constant 0 : i32
    return %arg0, %arg1 : i32, i32
  }
}

module attributes {stable_mosaic.version = 11 : i64} {
  func.func @_conv_stats_kernel(%arg0: i32, %arg1: i32, %arg2: memref<32x3200xbf16, #tpu.memory_space<vmem>>, %arg3: memref<3200x256xbf16, #tpu.memory_space<vmem>>, %arg4: memref<32x256xf32, #tpu.memory_space<vmem>>, %arg5: memref<1x2x256xf32, #tpu.memory_space<vmem>>) attributes {dimension_semantics = [#tpu.dimension_semantics<parallel>, #tpu.dimension_semantics<parallel>], iteration_bounds = array<i64: 1, 1>, scalar_prefetch = 0 : i64, scratch_operands = 0 : i64, tpu.core_type = #tpu.core_type<tc>, window_params = [{transform_indices = @transform_0, window_bounds = array<i64: 32, 3200>}, {transform_indices = @transform_1, window_bounds = array<i64: 3200, 256>}, {transform_indices = @transform_2, window_bounds = array<i64: 32, 256>}, {transform_indices = @transform_3, window_bounds = array<i64: 1, 2, 256>}]} {
    %c0 = arith.constant 0 : index
    %c0_0 = arith.constant 0 : index
    %0 = vector.load %arg2[%c0, %c0_0] : memref<32x3200xbf16, #tpu.memory_space<vmem>>, vector<32x3200xbf16>
    %c0_1 = arith.constant 0 : index
    %c0_2 = arith.constant 0 : index
    %1 = vector.load %arg3[%c0_1, %c0_2] : memref<3200x256xbf16, #tpu.memory_space<vmem>>, vector<3200x256xbf16>
    %cst = arith.constant dense<0.000000e+00> : vector<32x256xf32>
    %2 = tpu.matmul %0, %1, %cst {dimension_numbers = #tpu.dot_dimension_numbers<[1], [0], [0], [1], [0, 0, 1, 1], [], []>} : vector<32x3200xbf16>, vector<3200x256xbf16>, vector<32x256xf32> -> vector<32x256xf32>
    %c0_3 = arith.constant 0 : index
    %c0_4 = arith.constant 0 : index
    %3 = vector.load %arg4[%c0_3, %c0_4] : memref<32x256xf32, #tpu.memory_space<vmem>>, vector<32x256xf32>
    tpu.vector_store %arg4[%c0_3, %c0_4], %2 {strides = array<i32>} : memref<32x256xf32, #tpu.memory_space<vmem>>, vector<32x256xf32>,
    %cst_5 = arith.constant dense<0.000000e+00> : vector<256xf32>
    %4 = vector.multi_reduction <add>, %2, %cst_5 [0] : vector<32x256xf32> to vector<256xf32>
    %5 = vector.shape_cast %4 : vector<256xf32> to vector<1x256xf32>
    %6 = arith.mulf %2, %2 : vector<32x256xf32>
    %cst_6 = arith.constant dense<0.000000e+00> : vector<256xf32>
    %7 = vector.multi_reduction <add>, %6, %cst_6 [0] : vector<32x256xf32> to vector<256xf32>
    %8 = vector.shape_cast %7 : vector<256xf32> to vector<1x256xf32>
    %9 = tpu.concatenate %5, %8 in 0 : vector<1x256xf32>, vector<1x256xf32> -> vector<2x256xf32>
    %10 = vector.shape_cast %9 : vector<2x256xf32> to vector<1x2x256xf32>
    %c0_7 = arith.constant 0 : index
    %c0_8 = arith.constant 0 : index
    %c0_9 = arith.constant 0 : index
    %11 = vector.load %arg5[%c0_7, %c0_8, %c0_9] : memref<1x2x256xf32, #tpu.memory_space<vmem>>, vector<1x2x256xf32>
    tpu.vector_store %arg5[%c0_7, %c0_8, %c0_9], %10 {strides = array<i32>} : memref<1x2x256xf32, #tpu.memory_space<vmem>>, vector<1x2x256xf32>,
    return
  }
  func.func @transform_0(%arg0: i32, %arg1: i32) -> (i32, i32) {
    %c0_i32 = arith.constant 0 : i32
    %c0_i32_0 = arith.constant 0 : i32
    return %arg0, %c0_i32 : i32, i32
  }
  func.func @transform_1(%arg0: i32, %arg1: i32) -> (i32, i32) {
    %c0_i32 = arith.constant 0 : i32
    %c0_i32_0 = arith.constant 0 : i32
    return %c0_i32, %arg1 : i32, i32
  }
  func.func @transform_2(%arg0: i32, %arg1: i32) -> (i32, i32) {
    %c0_i32 = arith.constant 0 : i32
    return %arg0, %arg1 : i32, i32
  }
  func.func @transform_3(%arg0: i32, %arg1: i32) -> (i32, i32, i32) {
    %c0_i32 = arith.constant 0 : i32
    %c0_i32_0 = arith.constant 0 : i32
    return %arg0, %c0_i32, %arg1 : i32, i32, i32
  }
}

module attributes {stable_mosaic.version = 11 : i64} {
  func.func @_bn_lrelu_kernel(%arg0: i32, %arg1: i32, %arg2: memref<32x256xf32, #tpu.memory_space<vmem>>, %arg3: memref<1x256xf32, #tpu.memory_space<vmem>>, %arg4: memref<1x256xf32, #tpu.memory_space<vmem>>, %arg5: memref<32x256xbf16, #tpu.memory_space<vmem>>) attributes {dimension_semantics = [#tpu.dimension_semantics<parallel>, #tpu.dimension_semantics<parallel>], iteration_bounds = array<i64: 1, 1>, scalar_prefetch = 0 : i64, scratch_operands = 0 : i64, tpu.core_type = #tpu.core_type<tc>, window_params = [{transform_indices = @transform_0, window_bounds = array<i64: 32, 256>}, {transform_indices = @transform_1, window_bounds = array<i64: 1, 256>}, {transform_indices = @transform_2, window_bounds = array<i64: 1, 256>}, {transform_indices = @transform_3, window_bounds = array<i64: 32, 256>}]} {
    %c0 = arith.constant 0 : index
    %c0_0 = arith.constant 0 : index
    %0 = vector.load %arg2[%c0, %c0_0] : memref<32x256xf32, #tpu.memory_space<vmem>>, vector<32x256xf32>
    %c0_1 = arith.constant 0 : index
    %c0_2 = arith.constant 0 : index
    %1 = vector.load %arg3[%c0_1, %c0_2] : memref<1x256xf32, #tpu.memory_space<vmem>>, vector<1x256xf32>
    %2 = vector.broadcast %1 : vector<1x256xf32> to vector<32x256xf32>
    %3 = arith.mulf %0, %2 : vector<32x256xf32>
    %c0_3 = arith.constant 0 : index
    %c0_4 = arith.constant 0 : index
    %4 = vector.load %arg4[%c0_3, %c0_4] : memref<1x256xf32, #tpu.memory_space<vmem>>, vector<1x256xf32>
    %5 = vector.broadcast %4 : vector<1x256xf32> to vector<32x256xf32>
    %6 = arith.addf %3, %5 : vector<32x256xf32>
    %cst = arith.constant 2.000000e-01 : f32
    %7 = vector.broadcast %cst : f32 to vector<32x256xf32>
    %8 = arith.mulf %7, %6 : vector<32x256xf32>
    %9 = arith.maximumf %6, %8 : vector<32x256xf32>
    %10 = arith.truncf %9 : vector<32x256xf32> to vector<32x256xbf16>
    %c0_5 = arith.constant 0 : index
    %c0_6 = arith.constant 0 : index
    %11 = vector.load %arg5[%c0_5, %c0_6] : memref<32x256xbf16, #tpu.memory_space<vmem>>, vector<32x256xbf16>
    tpu.vector_store %arg5[%c0_5, %c0_6], %10 {strides = array<i32>} : memref<32x256xbf16, #tpu.memory_space<vmem>>, vector<32x256xbf16>,
    return
  }
  func.func @transform_0(%arg0: i32, %arg1: i32) -> (i32, i32) {
    %c0_i32 = arith.constant 0 : i32
    return %arg0, %arg1 : i32, i32
  }
  func.func @transform_1(%arg0: i32, %arg1: i32) -> (i32, i32) {
    %c0_i32 = arith.constant 0 : i32
    %c0_i32_0 = arith.constant 0 : i32
    return %c0_i32, %arg1 : i32, i32
  }
  func.func @transform_2(%arg0: i32, %arg1: i32) -> (i32, i32) {
    %c0_i32 = arith.constant 0 : i32
    %c0_i32_0 = arith.constant 0 : i32
    return %c0_i32, %arg1 : i32, i32
  }
  func.func @transform_3(%arg0: i32, %arg1: i32) -> (i32, i32) {
    %c0_i32 = arith.constant 0 : i32
    return %arg0, %arg1 : i32, i32
  }
}

module attributes {stable_mosaic.version = 11 : i64} {
  func.func @_conv_stats_kernel(%arg0: i32, %arg1: i32, %arg2: memref<8x6400xbf16, #tpu.memory_space<vmem>>, %arg3: memref<6400x256xbf16, #tpu.memory_space<vmem>>, %arg4: memref<8x256xf32, #tpu.memory_space<vmem>>, %arg5: memref<1x2x256xf32, #tpu.memory_space<vmem>>) attributes {dimension_semantics = [#tpu.dimension_semantics<parallel>, #tpu.dimension_semantics<parallel>], iteration_bounds = array<i64: 1, 1>, scalar_prefetch = 0 : i64, scratch_operands = 0 : i64, tpu.core_type = #tpu.core_type<tc>, window_params = [{transform_indices = @transform_0, window_bounds = array<i64: 8, 6400>}, {transform_indices = @transform_1, window_bounds = array<i64: 6400, 256>}, {transform_indices = @transform_2, window_bounds = array<i64: 8, 256>}, {transform_indices = @transform_3, window_bounds = array<i64: 1, 2, 256>}]} {
    %c0 = arith.constant 0 : index
    %c0_0 = arith.constant 0 : index
    %0 = vector.load %arg2[%c0, %c0_0] : memref<8x6400xbf16, #tpu.memory_space<vmem>>, vector<8x6400xbf16>
    %c0_1 = arith.constant 0 : index
    %c0_2 = arith.constant 0 : index
    %1 = vector.load %arg3[%c0_1, %c0_2] : memref<6400x256xbf16, #tpu.memory_space<vmem>>, vector<6400x256xbf16>
    %cst = arith.constant dense<0.000000e+00> : vector<8x256xf32>
    %2 = tpu.matmul %0, %1, %cst {dimension_numbers = #tpu.dot_dimension_numbers<[1], [0], [0], [1], [0, 0, 1, 1], [], []>} : vector<8x6400xbf16>, vector<6400x256xbf16>, vector<8x256xf32> -> vector<8x256xf32>
    %c0_3 = arith.constant 0 : index
    %c0_4 = arith.constant 0 : index
    %3 = vector.load %arg4[%c0_3, %c0_4] : memref<8x256xf32, #tpu.memory_space<vmem>>, vector<8x256xf32>
    tpu.vector_store %arg4[%c0_3, %c0_4], %2 {strides = array<i32>} : memref<8x256xf32, #tpu.memory_space<vmem>>, vector<8x256xf32>,
    %cst_5 = arith.constant dense<0.000000e+00> : vector<256xf32>
    %4 = vector.multi_reduction <add>, %2, %cst_5 [0] : vector<8x256xf32> to vector<256xf32>
    %5 = vector.shape_cast %4 : vector<256xf32> to vector<1x256xf32>
    %6 = arith.mulf %2, %2 : vector<8x256xf32>
    %cst_6 = arith.constant dense<0.000000e+00> : vector<256xf32>
    %7 = vector.multi_reduction <add>, %6, %cst_6 [0] : vector<8x256xf32> to vector<256xf32>
    %8 = vector.shape_cast %7 : vector<256xf32> to vector<1x256xf32>
    %9 = tpu.concatenate %5, %8 in 0 : vector<1x256xf32>, vector<1x256xf32> -> vector<2x256xf32>
    %10 = vector.shape_cast %9 : vector<2x256xf32> to vector<1x2x256xf32>
    %c0_7 = arith.constant 0 : index
    %c0_8 = arith.constant 0 : index
    %c0_9 = arith.constant 0 : index
    %11 = vector.load %arg5[%c0_7, %c0_8, %c0_9] : memref<1x2x256xf32, #tpu.memory_space<vmem>>, vector<1x2x256xf32>
    tpu.vector_store %arg5[%c0_7, %c0_8, %c0_9], %10 {strides = array<i32>} : memref<1x2x256xf32, #tpu.memory_space<vmem>>, vector<1x2x256xf32>,
    return
  }
  func.func @transform_0(%arg0: i32, %arg1: i32) -> (i32, i32) {
    %c0_i32 = arith.constant 0 : i32
    %c0_i32_0 = arith.constant 0 : i32
    return %arg0, %c0_i32 : i32, i32
  }
  func.func @transform_1(%arg0: i32, %arg1: i32) -> (i32, i32) {
    %c0_i32 = arith.constant 0 : i32
    %c0_i32_0 = arith.constant 0 : i32
    return %c0_i32, %arg1 : i32, i32
  }
  func.func @transform_2(%arg0: i32, %arg1: i32) -> (i32, i32) {
    %c0_i32 = arith.constant 0 : i32
    return %arg0, %arg1 : i32, i32
  }
  func.func @transform_3(%arg0: i32, %arg1: i32) -> (i32, i32, i32) {
    %c0_i32 = arith.constant 0 : i32
    %c0_i32_0 = arith.constant 0 : i32
    return %arg0, %c0_i32, %arg1 : i32, i32, i32
  }
}

module attributes {stable_mosaic.version = 11 : i64} {
  func.func @_bn_lrelu_kernel(%arg0: i32, %arg1: i32, %arg2: memref<8x256xf32, #tpu.memory_space<vmem>>, %arg3: memref<1x256xf32, #tpu.memory_space<vmem>>, %arg4: memref<1x256xf32, #tpu.memory_space<vmem>>, %arg5: memref<8x256xbf16, #tpu.memory_space<vmem>>) attributes {dimension_semantics = [#tpu.dimension_semantics<parallel>, #tpu.dimension_semantics<parallel>], iteration_bounds = array<i64: 1, 1>, scalar_prefetch = 0 : i64, scratch_operands = 0 : i64, tpu.core_type = #tpu.core_type<tc>, window_params = [{transform_indices = @transform_0, window_bounds = array<i64: 8, 256>}, {transform_indices = @transform_1, window_bounds = array<i64: 1, 256>}, {transform_indices = @transform_2, window_bounds = array<i64: 1, 256>}, {transform_indices = @transform_3, window_bounds = array<i64: 8, 256>}]} {
    %c0 = arith.constant 0 : index
    %c0_0 = arith.constant 0 : index
    %0 = vector.load %arg2[%c0, %c0_0] : memref<8x256xf32, #tpu.memory_space<vmem>>, vector<8x256xf32>
    %c0_1 = arith.constant 0 : index
    %c0_2 = arith.constant 0 : index
    %1 = vector.load %arg3[%c0_1, %c0_2] : memref<1x256xf32, #tpu.memory_space<vmem>>, vector<1x256xf32>
    %2 = vector.broadcast %1 : vector<1x256xf32> to vector<8x256xf32>
    %3 = arith.mulf %0, %2 : vector<8x256xf32>
    %c0_3 = arith.constant 0 : index
    %c0_4 = arith.constant 0 : index
    %4 = vector.load %arg4[%c0_3, %c0_4] : memref<1x256xf32, #tpu.memory_space<vmem>>, vector<1x256xf32>
    %5 = vector.broadcast %4 : vector<1x256xf32> to vector<8x256xf32>
    %6 = arith.addf %3, %5 : vector<8x256xf32>
    %cst = arith.constant 2.000000e-01 : f32
    %7 = vector.broadcast %cst : f32 to vector<8x256xf32>
    %8 = arith.mulf %7, %6 : vector<8x256xf32>
    %9 = arith.maximumf %6, %8 : vector<8x256xf32>
    %10 = arith.truncf %9 : vector<8x256xf32> to vector<8x256xbf16>
    %c0_5 = arith.constant 0 : index
    %c0_6 = arith.constant 0 : index
    %11 = vector.load %arg5[%c0_5, %c0_6] : memref<8x256xbf16, #tpu.memory_space<vmem>>, vector<8x256xbf16>
    tpu.vector_store %arg5[%c0_5, %c0_6], %10 {strides = array<i32>} : memref<8x256xbf16, #tpu.memory_space<vmem>>, vector<8x256xbf16>,
    return
  }
  func.func @transform_0(%arg0: i32, %arg1: i32) -> (i32, i32) {
    %c0_i32 = arith.constant 0 : i32
    return %arg0, %arg1 : i32, i32
  }
  func.func @transform_1(%arg0: i32, %arg1: i32) -> (i32, i32) {
    %c0_i32 = arith.constant 0 : i32
    %c0_i32_0 = arith.constant 0 : i32
    return %c0_i32, %arg1 : i32, i32
  }
  func.func @transform_2(%arg0: i32, %arg1: i32) -> (i32, i32) {
    %c0_i32 = arith.constant 0 : i32
    %c0_i32_0 = arith.constant 0 : i32
    return %c0_i32, %arg1 : i32, i32
  }
  func.func @transform_3(%arg0: i32, %arg1: i32) -> (i32, i32) {
    %c0_i32 = arith.constant 0 : i32
    return %arg0, %arg1 : i32, i32
  }
}

module attributes {stable_mosaic.version = 11 : i64} {
  func.func @_head_kernel(%arg0: i32, %arg1: memref<2x512xbf16, #tpu.memory_space<vmem>>, %arg2: memref<512x2048xbf16, #tpu.memory_space<vmem>>, %arg3: memref<1x2048xf32, #tpu.memory_space<vmem>>, %arg4: memref<2048x1xbf16, #tpu.memory_space<vmem>>, %arg5: memref<1x1xf32, #tpu.memory_space<vmem>>, %arg6: memref<2x1xf32, #tpu.memory_space<vmem>>, %arg7: memref<2x2048xf32, #tpu.memory_space<vmem>>) attributes {dimension_semantics = [#tpu.dimension_semantics<arbitrary>], iteration_bounds = array<i64: 2>, scalar_prefetch = 0 : i64, scratch_operands = 1 : i64, tpu.core_type = #tpu.core_type<tc>, window_params = [{transform_indices = @transform_0, window_bounds = array<i64: 2, 512>}, {transform_indices = @transform_1, window_bounds = array<i64: 512, 2048>}, {pipeline_mode = #tpu.pipeline_mode<synchronous>, transform_indices = @transform_2, window_bounds = array<i64: 1, 2048>}, {pipeline_mode = #tpu.pipeline_mode<synchronous>, transform_indices = @transform_3, window_bounds = array<i64: 2048, 1>}, {pipeline_mode = #tpu.pipeline_mode<synchronous>, transform_indices = @transform_4, window_bounds = array<i64: 1, 1>}, {pipeline_mode = #tpu.pipeline_mode<synchronous>, transform_indices = @transform_5, window_bounds = array<i64: 2, 1>}]} {
    %c0_i32 = arith.constant 0 : i32
    %0 = arith.cmpi eq, %arg0, %c0_i32 : i32
    %1 = arith.extui %0 : i1 to i32
    %c0_i32_0 = arith.constant 0 : i32
    %2 = arith.cmpi ne, %1, %c0_i32_0 : i32
    scf.if %2 {
      %cst_9 = arith.constant 0.000000e+00 : f32
      %12 = vector.broadcast %cst_9 : f32 to vector<2x2048xf32>
      %c0_10 = arith.constant 0 : index
      %c0_11 = arith.constant 0 : index
      %13 = vector.load %arg7[%c0_10, %c0_11] : memref<2x2048xf32, #tpu.memory_space<vmem>>, vector<2x2048xf32>
      tpu.vector_store %arg7[%c0_10, %c0_11], %12 {strides = array<i32>} : memref<2x2048xf32, #tpu.memory_space<vmem>>, vector<2x2048xf32>,
    } else {
    }
    %c0 = arith.constant 0 : index
    %c0_1 = arith.constant 0 : index
    %3 = vector.load %arg7[%c0, %c0_1] : memref<2x2048xf32, #tpu.memory_space<vmem>>, vector<2x2048xf32>
    %c0_2 = arith.constant 0 : index
    %c0_3 = arith.constant 0 : index
    %4 = vector.load %arg1[%c0_2, %c0_3] : memref<2x512xbf16, #tpu.memory_space<vmem>>, vector<2x512xbf16>
    %c0_4 = arith.constant 0 : index
    %c0_5 = arith.constant 0 : index
    %5 = vector.load %arg2[%c0_4, %c0_5] : memref<512x2048xbf16, #tpu.memory_space<vmem>>, vector<512x2048xbf16>
    %cst = arith.constant dense<0.000000e+00> : vector<2x2048xf32>
    %6 = tpu.matmul %4, %5, %cst {dimension_numbers = #tpu.dot_dimension_numbers<[1], [0], [0], [1], [0, 0, 1, 1], [], []>} : vector<2x512xbf16>, vector<512x2048xbf16>, vector<2x2048xf32> -> vector<2x2048xf32>
    %7 = arith.addf %3, %6 : vector<2x2048xf32>
    %c0_6 = arith.constant 0 : index
    %c0_7 = arith.constant 0 : index
    %8 = vector.load %arg7[%c0_6, %c0_7] : memref<2x2048xf32, #tpu.memory_space<vmem>>, vector<2x2048xf32>
    tpu.vector_store %arg7[%c0_6, %c0_7], %7 {strides = array<i32>} : memref<2x2048xf32, #tpu.memory_space<vmem>>, vector<2x2048xf32>,
    %c1_i32 = arith.constant 1 : i32
    %9 = arith.cmpi eq, %arg0, %c1_i32 : i32
    %10 = arith.extui %9 : i1 to i32
    %c0_i32_8 = arith.constant 0 : i32
    %11 = arith.cmpi ne, %10, %c0_i32_8 : i32
    scf.if %11 {
      %c0_9 = arith.constant 0 : index
      %c0_10 = arith.constant 0 : index
      %12 = vector.load %arg7[%c0_9, %c0_10] : memref<2x2048xf32, #tpu.memory_space<vmem>>, vector<2x2048xf32>
      %c0_11 = arith.constant 0 : index
      %c0_12 = arith.constant 0 : index
      %13 = vector.load %arg3[%c0_11, %c0_12] : memref<1x2048xf32, #tpu.memory_space<vmem>>, vector<1x2048xf32>
      %14 = vector.broadcast %13 : vector<1x2048xf32> to vector<2x2048xf32>
      %15 = arith.addf %12, %14 : vector<2x2048xf32>
      %cst_13 = arith.constant 2.000000e-01 : f32
      %16 = vector.broadcast %cst_13 : f32 to vector<2x2048xf32>
      %17 = arith.mulf %16, %15 : vector<2x2048xf32>
      %18 = arith.maximumf %15, %17 : vector<2x2048xf32>
      %19 = arith.truncf %18 : vector<2x2048xf32> to vector<2x2048xbf16>
      %c0_14 = arith.constant 0 : index
      %c0_15 = arith.constant 0 : index
      %20 = vector.load %arg4[%c0_14, %c0_15] : memref<2048x1xbf16, #tpu.memory_space<vmem>>, vector<2048x1xbf16>
      %cst_16 = arith.constant dense<0.000000e+00> : vector<2x1xf32>
      %21 = tpu.matmul %19, %20, %cst_16 {dimension_numbers = #tpu.dot_dimension_numbers<[1], [0], [0], [1], [0, 0, 1, 1], [], []>} : vector<2x2048xbf16>, vector<2048x1xbf16>, vector<2x1xf32> -> vector<2x1xf32>
      %c0_17 = arith.constant 0 : index
      %c0_18 = arith.constant 0 : index
      %22 = vector.load %arg5[%c0_17, %c0_18] : memref<1x1xf32, #tpu.memory_space<vmem>>, vector<1x1xf32>
      %23 = vector.broadcast %22 : vector<1x1xf32> to vector<2x1xf32>
      %24 = arith.addf %21, %23 : vector<2x1xf32>
      %25 = arith.negf %24 : vector<2x1xf32>
      %26 = math.exp %25 : vector<2x1xf32>
      %cst_19 = arith.constant 1.000000e+00 : f32
      %27 = vector.broadcast %cst_19 : f32 to vector<2x1xf32>
      %28 = arith.addf %27, %26 : vector<2x1xf32>
      %29 = arith.divf %27, %28 : vector<2x1xf32>
      %c0_20 = arith.constant 0 : index
      %c0_21 = arith.constant 0 : index
      %30 = vector.load %arg6[%c0_20, %c0_21] : memref<2x1xf32, #tpu.memory_space<vmem>>, vector<2x1xf32>
      tpu.vector_store %arg6[%c0_20, %c0_21], %29 {strides = array<i32>} : memref<2x1xf32, #tpu.memory_space<vmem>>, vector<2x1xf32>,
    } else {
    }
    return
  }
  func.func @transform_0(%arg0: i32) -> (i32, i32) {
    %c0_i32 = arith.constant 0 : i32
    %c0_i32_0 = arith.constant 0 : i32
    return %c0_i32, %arg0 : i32, i32
  }
  func.func @transform_1(%arg0: i32) -> (i32, i32) {
    %c0_i32 = arith.constant 0 : i32
    %c0_i32_0 = arith.constant 0 : i32
    return %arg0, %c0_i32 : i32, i32
  }
  func.func @transform_2(%arg0: i32) -> (i32, i32) {
    %c0_i32 = arith.constant 0 : i32
    %c0_i32_0 = arith.constant 0 : i32
    %c0_i32_1 = arith.constant 0 : i32
    return %c0_i32, %c0_i32_0 : i32, i32
  }
  func.func @transform_3(%arg0: i32) -> (i32, i32) {
    %c0_i32 = arith.constant 0 : i32
    %c0_i32_0 = arith.constant 0 : i32
    %c0_i32_1 = arith.constant 0 : i32
    return %c0_i32, %c0_i32_0 : i32, i32
  }
  func.func @transform_4(%arg0: i32) -> (i32, i32) {
    %c0_i32 = arith.constant 0 : i32
    %c0_i32_0 = arith.constant 0 : i32
    %c0_i32_1 = arith.constant 0 : i32
    return %c0_i32, %c0_i32_0 : i32, i32
  }
  func.func @transform_5(%arg0: i32) -> (i32, i32) {
    %c0_i32 = arith.constant 0 : i32
    %c0_i32_0 = arith.constant 0 : i32
    %c0_i32_1 = arith.constant 0 : i32
    return %c0_i32, %c0_i32_0 : i32, i32
  }
}

</mosaic_0001>

<bundles_post_ra>
// kernel: discriminator_forward.10
= control target key start
LH: loop header
LB: loop body
LE: loop exit
PB: predicated region body
PF: predicated region fallthrough
CT: control target
= control target key end

     0   :  { %vm604_vm0 = vcmask 257024   ;;  %s1409_s0 = inlined_call_operand.vmem [shape: f32[512,32], index: 0, kind: input, shape index: {}]   ;;  %s1410_s1 = inlined_call_operand.vmem [shape: f32[1,32], index: 1, kind: input, shape index: {}]   ;;  %s1411_s2 = inlined_call_operand.vmem [shape: f32[1,32], index: 2, kind: input, shape index: {}]   ;;  %s1412_s3 = inlined_call_operand.vmem [shape: bf16[512,32], index: 3, kind: output, shape index: {}]  }
   0x1   :  { %v14_v0 = vld [vmem:[%s1409_s0] sm:$0xff]  ;;  %v15_v4 = vld [vmem:[%s1409_s0 + $0x8] sm:$0xff]  ;;  %v16_v5 = vld [vmem:[%s1409_s0 + $0x10] sm:$0xff] }
   0x2   :  { %v829_v1 = vld [vmem:[%s1410_s1] ss:$0 sm:$0xff]  ;;  %v17_v6 = vld [vmem:[%s1409_s0 + $0x18] sm:$0xff]  ;;  %v19_v11 = vld [vmem:[%s1409_s0 + $0x28] sm:$0xff] }
   0x3   :  { %v834_v2 = vld [vmem:[%s1411_s2] ss:$0 sm:$0xff]  ;;  %v85_v3 = vmul.f32 %v829_v1, %v14_v0  ;;  %v86_v7 = vmul.f32 %v829_v1, %v15_v4  ;;  %v87_v8 = vmul.f32 %v829_v1, %v16_v5  ;;  %v88_v9 = vmul.f32 %v829_v1, %v17_v6  ;;  %v20_v12 = vld [vmem:[%s1409_s0 + $0x30] sm:$0xff]  ;;  %v21_v17 = vld [vmem:[%s1409_s0 + $0x38] sm:$0xff] }
   0x4   :  { %v18_v10 = vld [vmem:[%s1409_s0 + $0x20] sm:$0xff]  ;;  %v90_v15 = vmul.f32 %v829_v1, %v19_v11  ;;  %v91_v16 = vmul.f32 %v829_v1, %v20_v12  ;;  %v92_v21 = vmul.f32 %v829_v1, %v21_v17  ;;  %v23_v43 = vld [vmem:[%s1409_s0 + $0x48] sm:$0xff]  ;;  %v24_v44 = vld [vmem:[%s1409_s0 + $0x50] sm:$0xff] }
   0x5   :  { %v156_v13 = vadd.f32 %v834_v2, %v85_v3  ;;  %v89_v14 = vmul.f32 %v829_v1, %v18_v10  ;;  %v157_v18 = vadd.f32 %v834_v2, %v86_v7  ;;  %v158_v19 = vadd.f32 %v834_v2, %v87_v8  ;;  %v22_v38 = vld [vmem:[%s1409_s0 + $0x40] sm:$0xff]  ;;  %v25_v45 = vld [vmem:[%s1409_s0 + $0x58] sm:$0xff]  ;;  %v27_v51 = vld [vmem:[%s1409_s0 + $0x68] sm:$0xff] }
   0x6   :  { %v159_v20 = vadd.f32 %v834_v2, %v88_v9  ;;  %v161_v24 = vadd.f32 %v834_v2, %v90_v15  ;;  %v162_v25 = vadd.f32 %v834_v2, %v91_v16  ;;  %v163_v29 = vadd.f32 %v834_v2, %v92_v21  ;;  %v26_v50 = vld [vmem:[%s1409_s0 + $0x60] sm:$0xff]  ;;  %v28_v52 = vld [vmem:[%s1409_s0 + $0x70] sm:$0xff]  ;;  %v29_v57 = vld [vmem:[%s1409_s0 + $0x78] sm:$0xff] }
   0x7   :  { %v220_v22 = vmul.f32 0.2, %v156_v13  ;;  %v160_v23 = vadd.f32 %v834_v2, %v89_v14  ;;  %v221_v26 = vmul.f32 0.2, %v157_v18  ;;  %v222_v27 = vmul.f32 0.2, %v158_v19 }
   0x8   :  { %v223_v28 = vmul.f32 0.2, %v159_v20  ;;  %v225_v32 = vmul.f32 0.2, %v161_v24  ;;  %v226_v33 = vmul.f32 0.2, %v162_v25  ;;  %v93_v56 = vmul.f32 %v829_v1, %v22_v38 }
   0x9   :  { %v284_v30 = vmax.f32 %v156_v13, %v220_v22  ;;  %v224_v31 = vmul.f32 0.2, %v160_v23  ;;  %v285_v34 = vmax.f32 %v157_v18, %v221_v26  ;;  %v286_v35 = vmax.f32 %v158_v19, %v222_v27  ;;  %v36_v38 = vld [vmem:[%s1409_s0 + $0xb0] sm:$0xff] }
   0xa   :  { %v287_v36 = vmax.f32 %v159_v20, %v223_v28  ;;  %v227_v37 = vmul.f32 0.2, %v163_v29  ;;  %v289_v41 = vmax.f32 %v161_v24, %v225_v32  ;;  %v290_v42 = vmax.f32 %v162_v25, %v226_v33  ;;  %v30_v24 = vld [vmem:[%s1409_s0 + $0x80] sm:$0xff] }
   0xb   :  { %v739_v39 = vpack.c.bf16 %v284_v30, %v284_v30  ;;  %v288_v40 = vmax.f32 %v160_v23, %v224_v31  ;;  %v740_v46 = vpack.c.bf16 %v285_v34, %v285_v34  ;;  %v741_v47 = vpack.c.bf16 %v286_v35, %v286_v35  ;;  %v32_v30 = vld [vmem:[%s1409_s0 + $0x90] sm:$0xff]  ;;  %v33_v31 = vld [vmem:[%s1409_s0 + $0x98] sm:$0xff] }
   0xc   :  { %v742_v48 = vpack.c.bf16 %v287_v36, %v287_v36  ;;  %v291_v49 = vmax.f32 %v163_v29, %v227_v37  ;;  %v744_v54 = vpack.c.bf16 %v289_v41, %v289_v41  ;;  %v745_v55 = vpack.c.bf16 %v290_v42, %v290_v42  ;;  %v31_v29 = vld [vmem:[%s1409_s0 + $0x88] sm:$0xff]  ;;  %v34_v36 = vld [vmem:[%s1409_s0 + $0xa0] sm:$0xff] }
   0xd   :  { %605 = vst.msk [vmem:[%s1412_s3] sm:$0xf] %vm604_vm0, %v739_v39  ;;  %v743_v53 = vpack.c.bf16 %v288_v40, %v288_v40  ;;  %606 = vst.msk [vmem:[%s1412_s3 + $0x4] sm:$0xf] %vm604_vm0, %v740_v46  ;;  %v94_v59 = vmul.f32 %v829_v1, %v23_v43  ;;  %v95_v60 = vmul.f32 %v829_v1, %v24_v44  ;;  %v35_v37 = vld [vmem:[%s1409_s0 + $0xa8] sm:$0xff]  ;;  %v37_v43 = vld [vmem:[%s1409_s0 + $0xb8] sm:$0xff] }
   0xe   :  { %607 = vst.msk [vmem:[%s1412_s3 + $0x8] sm:$0xf] %vm604_vm0, %v741_v47  ;;  %608 = vst.msk [vmem:[%s1412_s3 + $0xc] sm:$0xf] %vm604_vm0, %v742_v48  ;;  %v746_v58 = vpack.c.bf16 %v291_v49, %v291_v49  ;;  %v96_v61 = vmul.f32 %v829_v1, %v25_v45  ;;  %v164_v62 = vadd.f32 %v834_v2, %v93_v56 }
   0xf   :  { %609 = vst.msk [vmem:[%s1412_s3 + $0x10] sm:$0xf] %vm604_vm0, %v743_v53  ;;  %610 = vst.msk [vmem:[%s1412_s3 + $0x14] sm:$0xf] %vm604_vm0, %v744_v54  ;;  %v97_v63 = vmul.f32 %v829_v1, %v26_v50  ;;  %v98_v0 = vmul.f32 %v829_v1, %v27_v51  ;;  %v99_v3 = vmul.f32 %v829_v1, %v28_v52 }
  0x10   :  { %611 = vst.msk [vmem:[%s1412_s3 + $0x18] sm:$0xf] %vm604_vm0, %v745_v55  ;;  %612 = vst.msk [vmem:[%s1412_s3 + $0x1c] sm:$0xf] %vm604_vm0, %v746_v58  ;;  %v165_v4 = vadd.f32 %v834_v2, %v94_v59  ;;  %v166_v5 = vadd.f32 %v834_v2, %v95_v60  ;;  %v167_v6 = vadd.f32 %v834_v2, %v96_v61  ;;  %v228_v8 = vmul.f32 0.2, %v164_v62 }
  0x11   :  { %v100_v7 = vmul.f32 %v829_v1, %v29_v57  ;;  %v168_v9 = vadd.f32 %v834_v2, %v97_v63  ;;  %v169_v10 = vadd.f32 %v834_v2, %v98_v0  ;;  %v170_v11 = vadd.f32 %v834_v2, %v99_v3 }
  0x12   :  { %v229_v12 = vmul.f32 0.2, %v165_v4  ;;  %v230_v13 = vmul.f32 0.2, %v166_v5  ;;  %v231_v14 = vmul.f32 0.2, %v167_v6  ;;  %v292_v16 = vmax.f32 %v164_v62, %v228_v8 }
  0x13   :  { %v171_v15 = vadd.f32 %v834_v2, %v100_v7  ;;  %v232_v17 = vmul.f32 0.2, %v168_v9  ;;  %v233_v18 = vmul.f32 0.2, %v169_v10  ;;  %v234_v19 = vmul.f32 0.2, %v170_v11 }
  0x14   :  { %v293_v20 = vmax.f32 %v165_v4, %v229_v12  ;;  %v294_v21 = vmax.f32 %v166_v5, %v230_v13  ;;  %v295_v22 = vmax.f32 %v167_v6, %v231_v14  ;;  %v747_v25 = vpack.c.bf16 %v292_v16, %v292_v16  ;;  %v40_v16 = vld [vmem:[%s1409_s0 + $0xd0] sm:$0xff] }
  0x15   :  { %v235_v23 = vmul.f32 0.2, %v171_v15  ;;  %v296_v26 = vmax.f32 %v168_v9, %v232_v17  ;;  %v297_v27 = vmax.f32 %v169_v10, %v233_v18  ;;  %v298_v28 = vmax.f32 %v170_v11, %v234_v19  ;;  %v38_v10 = vld [vmem:[%s1409_s0 + $0xc0] sm:$0xff]  ;;  %v41_v17 = vld [vmem:[%s1409_s0 + $0xd8] sm:$0xff] }
  0x16   :  { %v748_v32 = vpack.c.bf16 %v293_v20, %v293_v20  ;;  %v749_v33 = vpack.c.bf16 %v294_v21, %v294_v21  ;;  %v750_v34 = vpack.c.bf16 %v295_v22, %v295_v22  ;;  %613 = vst.msk [vmem:[%s1412_s3 + $0x20] sm:$0xf] %vm604_vm0, %v747_v25  ;;  %v101_v42 = vmul.f32 %v829_v1, %v30_v24  ;;  %v42_v22 = vld [vmem:[%s1409_s0 + $0xe0] sm:$0xff]  ;;  %v44_v24 = vld [vmem:[%s1409_s0 + $0xf0] sm:$0xff] }
  0x17   :  { %v299_v35 = vmax.f32 %v171_v15, %v235_v23  ;;  %v751_v39 = vpack.c.bf16 %v296_v26, %v296_v26  ;;  %v752_v40 = vpack.c.bf16 %v297_v27, %v297_v27  ;;  %v753_v41 = vpack.c.bf16 %v298_v28, %v298_v28  ;;  %v39_v15 = vld [vmem:[%s1409_s0 + $0xc8] sm:$0xff] }
  0x18   :  { %614 = vst.msk [vmem:[%s1412_s3 + $0x24] sm:$0xf] %vm604_vm0, %v748_v32  ;;  %615 = vst.msk [vmem:[%s1412_s3 + $0x28] sm:$0xf] %vm604_vm0, %v749_v33  ;;  %v102_v45 = vmul.f32 %v829_v1, %v31_v29  ;;  %v103_v46 = vmul.f32 %v829_v1, %v32_v30  ;;  %v104_v47 = vmul.f32 %v829_v1, %v33_v31  ;;  %v43_v23 = vld [vmem:[%s1409_s0 + $0xe8] sm:$0xff]  ;;  %v45_v29 = vld [vmem:[%s1409_s0 + $0xf8] sm:$0xff] }
  0x19   :  { %616 = vst.msk [vmem:[%s1412_s3 + $0x2c] sm:$0xf] %vm604_vm0, %v750_v34  ;;  %v754_v44 = vpack.c.bf16 %v299_v35, %v299_v35  ;;  %617 = vst.msk [vmem:[%s1412_s3 + $0x30] sm:$0xf] %vm604_vm0, %v751_v39  ;;  %v172_v48 = vadd.f32 %v834_v2, %v101_v42  ;;  %v105_v49 = vmul.f32 %v829_v1, %v34_v36 }
  0x1a   :  { %618 = vst.msk [vmem:[%s1412_s3 + $0x34] sm:$0xf] %vm604_vm0, %v752_v40  ;;  %619 = vst.msk [vmem:[%s1412_s3 + $0x38] sm:$0xf] %vm604_vm0, %v753_v41  ;;  %v106_v50 = vmul.f32 %v829_v1, %v35_v37  ;;  %v107_v51 = vmul.f32 %v829_v1, %v36_v38  ;;  %v173_v52 = vadd.f32 %v834_v2, %v102_v45 }
  0x1b   :  { %620 = vst.msk [vmem:[%s1412_s3 + $0x3c] sm:$0xf] %vm604_vm0, %v754_v44  ;;  %v174_v53 = vadd.f32 %v834_v2, %v103_v46  ;;  %v175_v54 = vadd.f32 %v834_v2, %v104_v47  ;;  %v108_v55 = vmul.f32 %v829_v1, %v37_v43  ;;  %v236_v56 = vmul.f32 0.2, %v172_v48 }
  0x1c   :  { %v176_v57 = vadd.f32 %v834_v2, %v105_v49  ;;  %v177_v58 = vadd.f32 %v834_v2, %v106_v50  ;;  %v178_v59 = vadd.f32 %v834_v2, %v107_v51  ;;  %v237_v60 = vmul.f32 0.2, %v173_v52 }
  0x1d   :  { %v238_v61 = vmul.f32 0.2, %v174_v53  ;;  %v239_v62 = vmul.f32 0.2, %v175_v54  ;;  %v179_v63 = vadd.f32 %v834_v2, %v108_v55  ;;  %v300_v0 = vmax.f32 %v172_v48, %v236_v56 }
  0x1e   :  { %v240_v3 = vmul.f32 0.2, %v176_v57  ;;  %v241_v4 = vmul.f32 0.2, %v177_v58  ;;  %v242_v5 = vmul.f32 0.2, %v178_v59  ;;  %v301_v6 = vmax.f32 %v173_v52, %v237_v60 }
  0x1f   :  { %v302_v7 = vmax.f32 %v174_v53, %v238_v61  ;;  %v303_v8 = vmax.f32 %v175_v54, %v239_v62  ;;  %v243_v9 = vmul.f32 0.2, %v179_v63  ;;  %v755_v11 = vpack.c.bf16 %v300_v0, %v300_v0  ;;  %v48_v0 = vld [vmem:[%s1409_s0 + $0x110] sm:$0xff] }
  0x20   :  { %v304_v12 = vmax.f32 %v176_v57, %v240_v3  ;;  %v305_v13 = vmax.f32 %v177_v58, %v241_v4  ;;  %v306_v14 = vmax.f32 %v178_v59, %v242_v5  ;;  %v756_v18 = vpack.c.bf16 %v301_v6, %v301_v6  ;;  %v46_v58 = vld [vmem:[%s1409_s0 + $0x100] sm:$0xff]  ;;  %v49_v3 = vld [vmem:[%s1409_s0 + $0x118] sm:$0xff] }
  0x21   :  { %v757_v19 = vpack.c.bf16 %v302_v7, %v302_v7  ;;  %v758_v20 = vpack.c.bf16 %v303_v8, %v303_v8  ;;  %v307_v21 = vmax.f32 %v179_v63, %v243_v9  ;;  %621 = vst.msk [vmem:[%s1412_s3 + $0x40] sm:$0xf] %vm604_vm0, %v755_v11  ;;  %v109_v28 = vmul.f32 %v829_v1, %v38_v10  ;;  %v47_v63 = vld [vmem:[%s1409_s0 + $0x108] sm:$0xff]  ;;  %v50_v8 = vld [vmem:[%s1409_s0 + $0x120] sm:$0xff]  ;;  %v52_v10 = vld [vmem:[%s1409_s0 + $0x130] sm:$0xff] }
  0x22   :  { %v759_v25 = vpack.c.bf16 %v304_v12, %v304_v12  ;;  %v760_v26 = vpack.c.bf16 %v305_v13, %v305_v13  ;;  %v761_v27 = vpack.c.bf16 %v306_v14, %v306_v14  ;;  %622 = vst.msk [vmem:[%s1412_s3 + $0x44] sm:$0xf] %vm604_vm0, %v756_v18  ;;  %v110_v31 = vmul.f32 %v829_v1, %v39_v15  ;;  %v51_v9 = vld [vmem:[%s1409_s0 + $0x128] sm:$0xff]  ;;  %v53_v15 = vld [vmem:[%s1409_s0 + $0x138] sm:$0xff] }
  0x23   :  { %623 = vst.msk [vmem:[%s1412_s3 + $0x48] sm:$0xf] %vm604_vm0, %v757_v19  ;;  %624 = vst.msk [vmem:[%s1412_s3 + $0x4c] sm:$0xf] %vm604_vm0, %v758_v20  ;;  %v762_v30 = vpack.c.bf16 %v307_v21, %v307_v21  ;;  %v111_v32 = vmul.f32 %v829_v1, %v40_v16  ;;  %v112_v33 = vmul.f32 %v829_v1, %v41_v17 }
  0x24   :  { %625 = vst.msk [vmem:[%s1412_s3 + $0x50] sm:$0xf] %vm604_vm0, %v759_v25  ;;  %626 = vst.msk [vmem:[%s1412_s3 + $0x54] sm:$0xf] %vm604_vm0, %v760_v26  ;;  %v180_v34 = vadd.f32 %v834_v2, %v109_v28  ;;  %v113_v35 = vmul.f32 %v829_v1, %v42_v22  ;;  %v114_v36 = vmul.f32 %v829_v1, %v43_v23 }
  0x25   :  { %627 = vst.msk [vmem:[%s1412_s3 + $0x58] sm:$0xf] %vm604_vm0, %v761_v27  ;;  %v115_v37 = vmul.f32 %v829_v1, %v44_v24  ;;  %628 = vst.msk [vmem:[%s1412_s3 + $0x5c] sm:$0xf] %vm604_vm0, %v762_v30  ;;  %v181_v38 = vadd.f32 %v834_v2, %v110_v31  ;;  %v182_v39 = vadd.f32 %v834_v2, %v111_v32 }
  0x26   :  { %v183_v40 = vadd.f32 %v834_v2, %v112_v33  ;;  %v116_v41 = vmul.f32 %v829_v1, %v45_v29  ;;  %v244_v42 = vmul.f32 0.2, %v180_v34  ;;  %v184_v43 = vadd.f32 %v834_v2, %v113_v35 }
  0x27   :  { %v185_v44 = vadd.f32 %v834_v2, %v114_v36  ;;  %v186_v45 = vadd.f32 %v834_v2, %v115_v37  ;;  %v245_v46 = vmul.f32 0.2, %v181_v38  ;;  %v246_v47 = vmul.f32 0.2, %v182_v39 }
  0x28   :  { %v247_v48 = vmul.f32 0.2, %v183_v40  ;;  %v187_v49 = vadd.f32 %v834_v2, %v116_v41  ;;  %v308_v50 = vmax.f32 %v180_v34, %v244_v42  ;;  %v248_v51 = vmul.f32 0.2, %v184_v43 }
  0x29   :  { %v249_v52 = vmul.f32 0.2, %v185_v44  ;;  %v250_v53 = vmul.f32 0.2, %v186_v45  ;;  %v309_v54 = vmax.f32 %v181_v38, %v245_v46  ;;  %v310_v55 = vmax.f32 %v182_v39, %v246_v47 }
  0x2a   :  { %v311_v56 = vmax.f32 %v183_v40, %v247_v48  ;;  %v251_v57 = vmul.f32 0.2, %v187_v49  ;;  %v763_v59 = vpack.c.bf16 %v308_v50, %v308_v50  ;;  %v312_v60 = vmax.f32 %v184_v43, %v248_v51  ;;  %v56_v50 = vld [vmem:[%s1409_s0 + $0x150] sm:$0xff]  ;;  %v57_v51 = vld [vmem:[%s1409_s0 + $0x158] sm:$0xff] }
  0x2b   :  { %v313_v61 = vmax.f32 %v185_v44, %v249_v52  ;;  %v314_v62 = vmax.f32 %v186_v45, %v250_v53  ;;  %v764_v4 = vpack.c.bf16 %v309_v54, %v309_v54  ;;  %v765_v5 = vpack.c.bf16 %v310_v55, %v310_v55  ;;  %v54_v44 = vld [vmem:[%s1409_s0 + $0x140] sm:$0xff] }
  0x2c   :  { %v766_v6 = vpack.c.bf16 %v311_v56, %v311_v56  ;;  %v315_v7 = vmax.f32 %v187_v49, %v251_v57  ;;  %629 = vst.msk [vmem:[%s1412_s3 + $0x60] sm:$0xf] %vm604_vm0, %v763_v59  ;;  %v767_v11 = vpack.c.bf16 %v312_v60, %v312_v60  ;;  %v117_v14 = vmul.f32 %v829_v1, %v46_v58  ;;  %v55_v49 = vld [vmem:[%s1409_s0 + $0x148] sm:$0xff]  ;;  %v58_v56 = vld [vmem:[%s1409_s0 + $0x160] sm:$0xff]  ;;  %v60_v58 = vld [vmem:[%s1409_s0 + $0x170] sm:$0xff] }
  0x2d   :  { %v768_v12 = vpack.c.bf16 %v313_v61, %v313_v61  ;;  %v769_v13 = vpack.c.bf16 %v314_v62, %v314_v62  ;;  %630 = vst.msk [vmem:[%s1412_s3 + $0x64] sm:$0xf] %vm604_vm0, %v764_v4  ;;  %631 = vst.msk [vmem:[%s1412_s3 + $0x68] sm:$0xf] %vm604_vm0, %v765_v5  ;;  %v118_v17 = vmul.f32 %v829_v1, %v47_v63  ;;  %v59_v57 = vld [vmem:[%s1409_s0 + $0x168] sm:$0xff]  ;;  %v61_v63 = vld [vmem:[%s1409_s0 + $0x178] sm:$0xff] }
  0x2e   :  { %632 = vst.msk [vmem:[%s1412_s3 + $0x6c] sm:$0xf] %vm604_vm0, %v766_v6  ;;  %v770_v16 = vpack.c.bf16 %v315_v7, %v315_v7  ;;  %v119_v18 = vmul.f32 %v829_v1, %v48_v0  ;;  %v120_v19 = vmul.f32 %v829_v1, %v49_v3  ;;  %633 = vst.msk [vmem:[%s1412_s3 + $0x70] sm:$0xf] %vm604_vm0, %v767_v11 }
  0x2f   :  { %634 = vst.msk [vmem:[%s1412_s3 + $0x74] sm:$0xf] %vm604_vm0, %v768_v12  ;;  %635 = vst.msk [vmem:[%s1412_s3 + $0x78] sm:$0xf] %vm604_vm0, %v769_v13  ;;  %v188_v20 = vadd.f32 %v834_v2, %v117_v14  ;;  %v121_v21 = vmul.f32 %v829_v1, %v50_v8  ;;  %v122_v22 = vmul.f32 %v829_v1, %v51_v9 }
  0x30   :  { %v123_v23 = vmul.f32 %v829_v1, %v52_v10  ;;  %636 = vst.msk [vmem:[%s1412_s3 + $0x7c] sm:$0xf] %vm604_vm0, %v770_v16  ;;  %v189_v24 = vadd.f32 %v834_v2, %v118_v17  ;;  %v190_v25 = vadd.f32 %v834_v2, %v119_v18  ;;  %v191_v26 = vadd.f32 %v834_v2, %v120_v19 }
  0x31   :  { %v124_v27 = vmul.f32 %v829_v1, %v53_v15  ;;  %v252_v28 = vmul.f32 0.2, %v188_v20  ;;  %v192_v29 = vadd.f32 %v834_v2, %v121_v21  ;;  %v193_v30 = vadd.f32 %v834_v2, %v122_v22 }
  0x32   :  { %v194_v31 = vadd.f32 %v834_v2, %v123_v23  ;;  %v253_v32 = vmul.f32 0.2, %v189_v24  ;;  %v254_v33 = vmul.f32 0.2, %v190_v25  ;;  %v255_v34 = vmul.f32 0.2, %v191_v26 }
  0x33   :  { %v195_v35 = vadd.f32 %v834_v2, %v124_v27  ;;  %v316_v36 = vmax.f32 %v188_v20, %v252_v28  ;;  %v256_v37 = vmul.f32 0.2, %v192_v29  ;;  %v257_v38 = vmul.f32 0.2, %v193_v30 }
  0x34   :  { %v258_v39 = vmul.f32 0.2, %v194_v31  ;;  %v317_v40 = vmax.f32 %v189_v24, %v253_v32  ;;  %v318_v41 = vmax.f32 %v190_v25, %v254_v33  ;;  %v319_v42 = vmax.f32 %v191_v26, %v255_v34 }
  0x35   :  { %v259_v43 = vmul.f32 0.2, %v195_v35  ;;  %v771_v45 = vpack.c.bf16 %v316_v36, %v316_v36  ;;  %v320_v46 = vmax.f32 %v192_v29, %v256_v37  ;;  %v321_v47 = vmax.f32 %v193_v30, %v257_v38  ;;  %v62_v30 = vld [vmem:[%s1409_s0 + $0x180] sm:$0xff]  ;;  %v64_v36 = vld [vmem:[%s1409_s0 + $0x190] sm:$0xff]  ;;  %v65_v37 = vld [vmem:[%s1409_s0 + $0x198] sm:$0xff] }
  0x36   :  { %v322_v48 = vmax.f32 %v194_v31, %v258_v39  ;;  %v772_v52 = vpack.c.bf16 %v317_v40, %v317_v40  ;;  %v773_v53 = vpack.c.bf16 %v318_v41, %v318_v41  ;;  %v774_v54 = vpack.c.bf16 %v319_v42, %v319_v42  ;;  %v66_v42 = vld [vmem:[%s1409_s0 + $0x1a0] sm:$0xff] }
  0x37   :  { %v323_v55 = vmax.f32 %v195_v35, %v259_v43  ;;  %637 = vst.msk [vmem:[%s1412_s3 + $0x80] sm:$0xf] %vm604_vm0, %v771_v45  ;;  %v775_v59 = vpack.c.bf16 %v320_v46, %v320_v46  ;;  %v776_v60 = vpack.c.bf16 %v321_v47, %v321_v47  ;;  %v125_v62 = vmul.f32 %v829_v1, %v54_v44  ;;  %v63_v35 = vld [vmem:[%s1409_s0 + $0x188] sm:$0xff]  ;;  %v68_v44 = vld [vmem:[%s1409_s0 + $0x1b0] sm:$0xff] }
  0x38   :  { %v777_v61 = vpack.c.bf16 %v322_v48, %v322_v48  ;;  %638 = vst.msk [vmem:[%s1412_s3 + $0x84] sm:$0xf] %vm604_vm0, %v772_v52  ;;  %639 = vst.msk [vmem:[%s1412_s3 + $0x88] sm:$0xf] %vm604_vm0, %v773_v53  ;;  %v126_v3 = vmul.f32 %v829_v1, %v55_v49  ;;  %v127_v4 = vmul.f32 %v829_v1, %v56_v50  ;;  %v67_v43 = vld [vmem:[%s1409_s0 + $0x1a8] sm:$0xff]  ;;  %v69_v49 = vld [vmem:[%s1409_s0 + $0x1b8] sm:$0xff] }
  0x39   :  { %640 = vst.msk [vmem:[%s1412_s3 + $0x8c] sm:$0xf] %vm604_vm0, %v774_v54  ;;  %v778_v0 = vpack.c.bf16 %v323_v55, %v323_v55  ;;  %v128_v5 = vmul.f32 %v829_v1, %v57_v51  ;;  %641 = vst.msk [vmem:[%s1412_s3 + $0x90] sm:$0xf] %vm604_vm0, %v775_v59  ;;  %v196_v6 = vadd.f32 %v834_v2, %v125_v62 }
  0x3a   :  { %642 = vst.msk [vmem:[%s1412_s3 + $0x94] sm:$0xf] %vm604_vm0, %v776_v60  ;;  %643 = vst.msk [vmem:[%s1412_s3 + $0x98] sm:$0xf] %vm604_vm0, %v777_v61  ;;  %v129_v7 = vmul.f32 %v829_v1, %v58_v56  ;;  %v130_v8 = vmul.f32 %v829_v1, %v59_v57  ;;  %v131_v9 = vmul.f32 %v829_v1, %v60_v58 }
  0x3b   :  { %644 = vst.msk [vmem:[%s1412_s3 + $0x9c] sm:$0xf] %vm604_vm0, %v778_v0  ;;  %v197_v10 = vadd.f32 %v834_v2, %v126_v3  ;;  %v198_v11 = vadd.f32 %v834_v2, %v127_v4  ;;  %v199_v12 = vadd.f32 %v834_v2, %v128_v5  ;;  %v132_v13 = vmul.f32 %v829_v1, %v61_v63 }
  0x3c   :  { %v260_v14 = vmul.f32 0.2, %v196_v6  ;;  %v200_v15 = vadd.f32 %v834_v2, %v129_v7  ;;  %v201_v16 = vadd.f32 %v834_v2, %v130_v8  ;;  %v202_v17 = vadd.f32 %v834_v2, %v131_v9 }
  0x3d   :  { %v261_v18 = vmul.f32 0.2, %v197_v10  ;;  %v262_v19 = vmul.f32 0.2, %v198_v11  ;;  %v263_v20 = vmul.f32 0.2, %v199_v12  ;;  %v203_v21 = vadd.f32 %v834_v2, %v132_v13 }
  0x3e   :  { %v324_v22 = vmax.f32 %v196_v6, %v260_v14  ;;  %v264_v23 = vmul.f32 0.2, %v200_v15  ;;  %v265_v24 = vmul.f32 0.2, %v201_v16  ;;  %v266_v25 = vmul.f32 0.2, %v202_v17 }
  0x3f   :  { %v325_v26 = vmax.f32 %v197_v10, %v261_v18  ;;  %v326_v27 = vmax.f32 %v198_v11, %v262_v19  ;;  %v327_v28 = vmax.f32 %v199_v12, %v263_v20  ;;  %v267_v29 = vmul.f32 0.2, %v203_v21 }
  0x40   :  { %v779_v31 = vpack.c.bf16 %v324_v22, %v324_v22  ;;  %v328_v32 = vmax.f32 %v200_v15, %v264_v23  ;;  %v329_v33 = vmax.f32 %v201_v16, %v265_v24  ;;  %v330_v34 = vmax.f32 %v202_v17, %v266_v25  ;;  %v70_v16 = vld [vmem:[%s1409_s0 + $0x1c0] sm:$0xff]  ;;  %v72_v22 = vld [vmem:[%s1409_s0 + $0x1d0] sm:$0xff]  ;;  %v73_v23 = vld [vmem:[%s1409_s0 + $0x1d8] sm:$0xff] }
  0x41   :  { %v780_v38 = vpack.c.bf16 %v325_v26, %v325_v26  ;;  %v781_v39 = vpack.c.bf16 %v326_v27, %v326_v27  ;;  %v782_v40 = vpack.c.bf16 %v327_v28, %v327_v28  ;;  %v331_v41 = vmax.f32 %v203_v21, %v267_v29  ;;  %v71_v21 = vld [vmem:[%s1409_s0 + $0x1c8] sm:$0xff]  ;;  %v74_v28 = vld [vmem:[%s1409_s0 + $0x1e0] sm:$0xff] }
  0x42   :  { %645 = vst.msk [vmem:[%s1412_s3 + $0xa0] sm:$0xf] %vm604_vm0, %v779_v31  ;;  %v783_v45 = vpack.c.bf16 %v328_v32, %v328_v32  ;;  %v784_v46 = vpack.c.bf16 %v329_v33, %v329_v33  ;;  %v785_v47 = vpack.c.bf16 %v330_v34, %v330_v34  ;;  %v133_v48 = vmul.f32 %v829_v1, %v62_v30  ;;  %v75_v29 = vld [vmem:[%s1409_s0 + $0x1e8] sm:$0xff]  ;;  %v76_v30 = vld [vmem:[%s1409_s0 + $0x1f0] sm:$0xff] }
  0x43   :  { %646 = vst.msk [vmem:[%s1412_s3 + $0xa4] sm:$0xf] %vm604_vm0, %v780_v38  ;;  %647 = vst.msk [vmem:[%s1412_s3 + $0xa8] sm:$0xf] %vm604_vm0, %v781_v39  ;;  %v786_v50 = vpack.c.bf16 %v331_v41, %v331_v41  ;;  %v134_v51 = vmul.f32 %v829_v1, %v63_v35  ;;  %v135_v52 = vmul.f32 %v829_v1, %v64_v36  ;;  %v77_v35 = vld [vmem:[%s1409_s0 + $0x1f8] sm:$0xff] }
  0x44   :  { %648 = vst.msk [vmem:[%s1412_s3 + $0xac] sm:$0xf] %vm604_vm0, %v782_v40  ;;  %v136_v53 = vmul.f32 %v829_v1, %v65_v37  ;;  %649 = vst.msk [vmem:[%s1412_s3 + $0xb0] sm:$0xf] %vm604_vm0, %v783_v45  ;;  %v204_v54 = vadd.f32 %v834_v2, %v133_v48  ;;  %v137_v55 = vmul.f32 %v829_v1, %v66_v42 }
  0x45   :  { %650 = vst.msk [vmem:[%s1412_s3 + $0xb4] sm:$0xf] %vm604_vm0, %v784_v46  ;;  %651 = vst.msk [vmem:[%s1412_s3 + $0xb8] sm:$0xf] %vm604_vm0, %v785_v47  ;;  %v138_v56 = vmul.f32 %v829_v1, %v67_v43  ;;  %v139_v57 = vmul.f32 %v829_v1, %v68_v44  ;;  %v205_v58 = vadd.f32 %v834_v2, %v134_v51 }
  0x46   :  { %652 = vst.msk [vmem:[%s1412_s3 + $0xbc] sm:$0xf] %vm604_vm0, %v786_v50  ;;  %v206_v59 = vadd.f32 %v834_v2, %v135_v52  ;;  %v207_v60 = vadd.f32 %v834_v2, %v136_v53  ;;  %v140_v61 = vmul.f32 %v829_v1, %v69_v49  ;;  %v268_v62 = vmul.f32 0.2, %v204_v54 }
  0x47   :  { %v208_v63 = vadd.f32 %v834_v2, %v137_v55  ;;  %v209_v0 = vadd.f32 %v834_v2, %v138_v56  ;;  %v210_v3 = vadd.f32 %v834_v2, %v139_v57  ;;  %v269_v4 = vmul.f32 0.2, %v205_v58 }
  0x48   :  { %v270_v5 = vmul.f32 0.2, %v206_v59  ;;  %v271_v6 = vmul.f32 0.2, %v207_v60  ;;  %v211_v7 = vadd.f32 %v834_v2, %v140_v61  ;;  %v332_v8 = vmax.f32 %v204_v54, %v268_v62 }
  0x49   :  { %v272_v9 = vmul.f32 0.2, %v208_v63  ;;  %v273_v10 = vmul.f32 0.2, %v209_v0  ;;  %v274_v11 = vmul.f32 0.2, %v210_v3  ;;  %v333_v12 = vmax.f32 %v205_v58, %v269_v4 }
  0x4a   :  { %v334_v13 = vmax.f32 %v206_v59, %v270_v5  ;;  %v335_v14 = vmax.f32 %v207_v60, %v271_v6  ;;  %v275_v15 = vmul.f32 0.2, %v211_v7  ;;  %v787_v17 = vpack.c.bf16 %v332_v8, %v332_v8 }
  0x4b   :  { %v336_v18 = vmax.f32 %v208_v63, %v272_v9  ;;  %v337_v19 = vmax.f32 %v209_v0, %v273_v10  ;;  %v338_v20 = vmax.f32 %v210_v3, %v274_v11  ;;  %v788_v24 = vpack.c.bf16 %v333_v12, %v333_v12 }
  0x4c   :  { %v789_v25 = vpack.c.bf16 %v334_v13, %v334_v13  ;;  %v790_v26 = vpack.c.bf16 %v335_v14, %v335_v14  ;;  %v339_v27 = vmax.f32 %v211_v7, %v275_v15  ;;  %653 = vst.msk [vmem:[%s1412_s3 + $0xc0] sm:$0xf] %vm604_vm0, %v787_v17  ;;  %v141_v34 = vmul.f32 %v829_v1, %v70_v16 }
  0x4d   :  { %v791_v31 = vpack.c.bf16 %v336_v18, %v336_v18  ;;  %v792_v32 = vpack.c.bf16 %v337_v19, %v337_v19  ;;  %v793_v33 = vpack.c.bf16 %v338_v20, %v338_v20  ;;  %654 = vst.msk [vmem:[%s1412_s3 + $0xc4] sm:$0xf] %vm604_vm0, %v788_v24  ;;  %v142_v37 = vmul.f32 %v829_v1, %v71_v21 }
  0x4e   :  { %655 = vst.msk [vmem:[%s1412_s3 + $0xc8] sm:$0xf] %vm604_vm0, %v789_v25  ;;  %656 = vst.msk [vmem:[%s1412_s3 + $0xcc] sm:$0xf] %vm604_vm0, %v790_v26  ;;  %v794_v36 = vpack.c.bf16 %v339_v27, %v339_v27  ;;  %v143_v38 = vmul.f32 %v829_v1, %v72_v22  ;;  %v144_v39 = vmul.f32 %v829_v1, %v73_v23 }
  0x4f   :  { %657 = vst.msk [vmem:[%s1412_s3 + $0xd0] sm:$0xf] %vm604_vm0, %v791_v31  ;;  %658 = vst.msk [vmem:[%s1412_s3 + $0xd4] sm:$0xf] %vm604_vm0, %v792_v32  ;;  %v212_v40 = vadd.f32 %v834_v2, %v141_v34  ;;  %v145_v41 = vmul.f32 %v829_v1, %v74_v28  ;;  %v146_v42 = vmul.f32 %v829_v1, %v75_v29 }
  0x50   :  { %659 = vst.msk [vmem:[%s1412_s3 + $0xd8] sm:$0xf] %vm604_vm0, %v793_v33  ;;  %v147_v43 = vmul.f32 %v829_v1, %v76_v30  ;;  %660 = vst.msk [vmem:[%s1412_s3 + $0xdc] sm:$0xf] %vm604_vm0, %v794_v36  ;;  %v213_v44 = vadd.f32 %v834_v2, %v142_v37  ;;  %v214_v45 = vadd.f32 %v834_v2, %v143_v38 }
  0x51   :  { %v215_v46 = vadd.f32 %v834_v2, %v144_v39  ;;  %v148_v47 = vmul.f32 %v829_v1, %v77_v35  ;;  %v276_v48 = vmul.f32 0.2, %v212_v40  ;;  %v216_v49 = vadd.f32 %v834_v2, %v145_v41 }
  0x52   :  { %v217_v50 = vadd.f32 %v834_v2, %v146_v42  ;;  %v218_v51 = vadd.f32 %v834_v2, %v147_v43  ;;  %v277_v52 = vmul.f32 0.2, %v213_v44  ;;  %v278_v53 = vmul.f32 0.2, %v214_v45 }
  0x53   :  { %v279_v54 = vmul.f32 0.2, %v215_v46  ;;  %v219_v55 = vadd.f32 %v834_v2, %v148_v47  ;;  %v340_v56 = vmax.f32 %v212_v40, %v276_v48  ;;  %v280_v57 = vmul.f32 0.2, %v216_v49 }
  0x54   :  { %v281_v58 = vmul.f32 0.2, %v217_v50  ;;  %v282_v59 = vmul.f32 0.2, %v218_v51  ;;  %v341_v60 = vmax.f32 %v213_v44, %v277_v52  ;;  %v342_v61 = vmax.f32 %v214_v45, %v278_v53 }
  0x55   :  { %v343_v62 = vmax.f32 %v215_v46, %v279_v54  ;;  %v283_v1 = vmul.f32 0.2, %v219_v55  ;;  %v795_v63 = vpack.c.bf16 %v340_v56, %v340_v56  ;;  %v344_v0 = vmax.f32 %v216_v49, %v280_v57 }
  0x56   :  { %v345_v3 = vmax.f32 %v217_v50, %v281_v58  ;;  %v346_v4 = vmax.f32 %v218_v51, %v282_v59  ;;  %v796_v5 = vpack.c.bf16 %v341_v60, %v341_v60  ;;  %v797_v6 = vpack.c.bf16 %v342_v61, %v342_v61 }
  0x57   :  { %v798_v7 = vpack.c.bf16 %v343_v62, %v343_v62  ;;  %v347_v8 = vmax.f32 %v219_v55, %v283_v1  ;;  %661 = vst.msk [vmem:[%s1412_s3 + $0xe0] sm:$0xf] %vm604_vm0, %v795_v63  ;;  %v799_v2 = vpack.c.bf16 %v344_v0, %v344_v0 }
  0x58   :  { %v800_v9 = vpack.c.bf16 %v345_v3, %v345_v3  ;;  %v801_v10 = vpack.c.bf16 %v346_v4, %v346_v4  ;;  %662 = vst.msk [vmem:[%s1412_s3 + $0xe4] sm:$0xf] %vm604_vm0, %v796_v5  ;;  %663 = vst.msk [vmem:[%s1412_s3 + $0xe8] sm:$0xf] %vm604_vm0, %v797_v6 }
  0x59   :  { %664 = vst.msk [vmem:[%s1412_s3 + $0xec] sm:$0xf] %vm604_vm0, %v798_v7  ;;  %v802_v11 = vpack.c.bf16 %v347_v8, %v347_v8  ;;  %665 = vst.msk [vmem:[%s1412_s3 + $0xf0] sm:$0xf] %vm604_vm0, %v799_v2 }
  0x5a   :  { %666 = vst.msk [vmem:[%s1412_s3 + $0xf4] sm:$0xf] %vm604_vm0, %v800_v9  ;;  %667 = vst.msk [vmem:[%s1412_s3 + $0xf8] sm:$0xf] %vm604_vm0, %v801_v10 }
  0x5b   :  { %668 = vst.msk [vmem:[%s1412_s3 + $0xfc] sm:$0xf] %vm604_vm0, %v802_v11 }

// kernel: discriminator_forward.9
= control target key start
LH: loop header
LB: loop body
LE: loop exit
PB: predicated region body
PF: predicated region fallthrough
CT: control target
= control target key end

     0   :  { %vm374_vm0 = vcmask 1044480   ;;  %vm277_vm1 = vcmask 613376   ;;  %vm375_vm2 = vcmask 1045504   ;;  %v1305_v4 = vmov 65535   ;;  %s2048_s1 = inlined_call_operand.vmem [shape: bf16[75,32], index: 1, kind: input, shape index: {}]   ;;  %s2049_s0 = inlined_call_operand.vmem [shape: bf16[512,75], index: 0, kind: input, shape index: {}]   ;;  %s2050_s2 = inlined_call_operand.vmem [shape: f32[512,32], index: 2, kind: output, shape index: {0}]   ;;  %s2051_s3 = inlined_call_operand.vmem [shape: f32[1,2,32], index: 3, kind: output, shape index: {1}]  }
   0x1   :  { %v1268_v0 = vld [vmem:[%s2048_s1] sm:$0xff]   ;;  %v1269_v1 = vld [vmem:[%s2048_s1 + $0x8] sm:$0xff]   ;;  %v1270_v2 = vld [vmem:[%s2048_s1 + $0x10] sm:$0xff]   ;;  %v376_v5 = vsel %vm374_vm0, 4294967295, %v1305_v4  ;;  %vm670_vm3 = vcmask 261120   ;;  %vm1065_vm4 = vcmask 1040384  }
   0x2   :  { %1183 = vmatprep.subr.bf16.mxu0 %v1268_v0  ;;  %1257 = vmatprep.subr.bf16.mxu1 %v1268_v0  ;;  %v1273_v3 = vld [vmem:[%s2049_s0] sm:$0xff]   ;;  %v1271_v6 = vld [vmem:[%s2048_s1 + $0x18] sm:$0xff]   ;;  %v377_v8 = vsel %vm375_vm2, %v376_v5, 0  ;;  %v1274_v10 = vld [vmem:[%s2049_s0 + $0x8] sm:$0xff]   ;;  %vm1067_vm5 = vcmask 254976  }
   0x3   :  { %1184 = vmatpush3.bf16.msra.mxu0 %v1268_v0  ;;  %1262 = vmatpush3.bf16.msra.mxu1 %v1268_v0  ;;  %v1272_v7 = vld [vmem:[%s2048_s1 + $0x20] sm:$0x3f]   ;;  %v1275_v11 = vld [vmem:[%s2049_s0 + $0x10] sm:$0xff]   ;;  %v1290_v13 = vld [vmem:[%s2049_s0 + $0x88] sm:$0xff]  }
   0x4   :  { %1185 = vmatprep.subr.bf16.mxu0 %v1269_v1  ;;  %1258 = vmatprep.subr.bf16.mxu1 %v1269_v1  ;;  %v379_v9 = vand.u32 %v1272_v7, %v377_v8  ;;  %v1289_v12 = vld [vmem:[%s2049_s0 + $0x80] sm:$0xff]   ;;  %v1291_v14 = vld [vmem:[%s2049_s0 + $0x90] sm:$0xff]   ;;  %v1276_v15 = vld [vmem:[%s2049_s0 + $0x18] sm:$0xff]  }
   0x5   :  { %1193 = vmatprep.mubr.msk.bf16.mxu0 %vm277_vm1, %v1273_v3  ;;  %1225 = vmatprep.mubr.msk.bf16.mxu1 %vm277_vm1, %v1289_v12  ;;  %v1277_v16 = vld [vmem:[%s2049_s0 + $0x20] sm:$0xff]   ;;  %v1292_v17 = vld [vmem:[%s2049_s0 + $0x98] sm:$0xff]   ;;  %v1278_v19 = vld [vmem:[%s2049_s0 + $0x28] sm:$0xff]  }
   0x6   :  { %v1293_v18 = vld [vmem:[%s2049_s0 + $0xa0] sm:$0xff]   ;;  %v1279_v20 = vld [vmem:[%s2049_s0 + $0x30] sm:$0xff]   ;;  %v1294_v21 = vld [vmem:[%s2049_s0 + $0xa8] sm:$0xff]  }
   0x7   :  { %1186 = vmatpush3.bf16.msra.mxu0 %v1269_v1  ;;  %1263 = vmatpush3.bf16.msra.mxu1 %v1269_v1  ;;  %v1295_v22 = vld [vmem:[%s2049_s0 + $0xb0] sm:$0xff]   ;;  %v1280_v23 = vld [vmem:[%s2049_s0 + $0x38] sm:$0xff]   ;;  %v1281_v24 = vld [vmem:[%s2049_s0 + $0x40] sm:$0xff]  }
   0x8   :  { %1187 = vmatprep.subr.bf16.mxu0 %v1270_v2  ;;  %1259 = vmatprep.subr.bf16.mxu1 %v1270_v2  ;;  %v1296_v25 = vld [vmem:[%s2049_s0 + $0xb8] sm:$0xff]   ;;  %v1297_v26 = vld [vmem:[%s2049_s0 + $0xc0] sm:$0xff]   ;;  %v1282_v27 = vld [vmem:[%s2049_s0 + $0x48] sm:$0xff]  }
   0x9   :  { %v1283_v28 = vld [vmem:[%s2049_s0 + $0x50] sm:$0xff]   ;;  %v1298_v29 = vld [vmem:[%s2049_s0 + $0xc8] sm:$0xff]   ;;  %v1284_v31 = vld [vmem:[%s2049_s0 + $0x58] sm:$0xff]  }
   0xa   :  { %v1299_v30 = vld [vmem:[%s2049_s0 + $0xd0] sm:$0xff]   ;;  %v1285_v32 = vld [vmem:[%s2049_s0 + $0x60] sm:$0xff]   ;;  %v1300_v33 = vld [vmem:[%s2049_s0 + $0xd8] sm:$0xff]  }
   0xb   :  { %1188 = vmatpush3.bf16.msra.mxu0 %v1270_v2  ;;  %1264 = vmatpush3.bf16.msra.mxu1 %v1270_v2  ;;  %v1301_v34 = vld [vmem:[%s2049_s0 + $0xe0] sm:$0xff]   ;;  %v1286_v35 = vld [vmem:[%s2049_s0 + $0x68] sm:$0xff]   ;;  %v1287_v36 = vld [vmem:[%s2049_s0 + $0x70] sm:$0xff]  }
   0xc   :  { %1189 = vmatprep.subr.bf16.mxu0 %v1271_v6  ;;  %1260 = vmatprep.subr.bf16.mxu1 %v1271_v6  ;;  %v1302_v37 = vld [vmem:[%s2049_s0 + $0xe8] sm:$0xff]   ;;  %v1303_v38 = vld [vmem:[%s2049_s0 + $0xf0] sm:$0xff]   ;;  %v1288_v39 = vld [vmem:[%s2049_s0 + $0x78] sm:$0xff]  }
   0xd   :  { %v1304_v40 = vld [vmem:[%s2049_s0 + $0xf8] sm:$0xff]  }
   0xf   :  { %1190 = vmatpush3.bf16.msra.mxu0 %v1271_v6  ;;  %1265 = vmatpush3.bf16.msra.mxu1 %v1271_v6 }
  0x10   :  { %1191 = vmatprep.subr.bf16.mxu0 %v379_v9  ;;  %1261 = vmatprep.subr.bf16.mxu1 %v379_v9 }
  0x13   :  { %1192 = vmatpush3.bf16.msra.mxu0 %v379_v9  ;;  %1266 = vmatpush3.bf16.msra.mxu1 %v379_v9 }
  0x16   :  { %1194 = vmatmul.mubr.msk.bf16.vlgmr.msra.gmra.mrb[0].mxu0 %vm277_vm1, %v1274_v10  ;;  %1226 = vmatmul.mubr.msk.bf16.vlgmr.msra.gmra.mrb[0].mxu1 %vm277_vm1, %v1290_v13 }
  0x17   :  { %1197 = vmatprep.mubr.msk.bf16.mxu0 %vm277_vm1, %v1275_v11  ;;  %1229 = vmatprep.mubr.msk.bf16.mxu1 %vm277_vm1, %v1291_v14 }
  0x1e   :  { %1198 = vmatmul.mubr.msk.bf16.gmra.mrb[4].mxu0 %vm277_vm1, %v1276_v15  ;;  %1230 = vmatmul.mubr.msk.bf16.gmra.mrb[4].mxu1 %vm277_vm1, %v1292_v17 }
  0x1f   :  { %1201 = vmatprep.mubr.msk.bf16.mxu0 %vm277_vm1, %v1277_v16  ;;  %1233 = vmatprep.mubr.msk.bf16.mxu1 %vm277_vm1, %v1293_v18 }
  0x26   :  { %1202 = vmatmul.mubr.msk.bf16.gmra.mrb[8].mxu0 %vm277_vm1, %v1278_v19  ;;  %1234 = vmatmul.mubr.msk.bf16.gmra.mrb[8].mxu1 %vm277_vm1, %v1294_v21 }
  0x27   :  { %1205 = vmatprep.mubr.msk.bf16.mxu0 %vm277_vm1, %v1279_v20  ;;  %1237 = vmatprep.mubr.msk.bf16.mxu1 %vm277_vm1, %v1295_v22 }
  0x2e   :  { %1206 = vmatmul.mubr.msk.bf16.gmra.mrb[12].mxu0 %vm277_vm1, %v1280_v23  ;;  %1238 = vmatmul.mubr.msk.bf16.gmra.mrb[12].mxu1 %vm277_vm1, %v1296_v25 }
  0x2f   :  { %1209 = vmatprep.mubr.msk.bf16.mxu0 %vm277_vm1, %v1281_v24  ;;  %1241 = vmatprep.mubr.msk.bf16.mxu1 %vm277_vm1, %v1297_v26 }
  0x36   :  { %1210 = vmatmul.mubr.msk.bf16.gmra.mrb[16].mxu0 %vm277_vm1, %v1282_v27  ;;  %1242 = vmatmul.mubr.msk.bf16.gmra.mrb[16].mxu1 %vm277_vm1, %v1298_v29 }
  0x37   :  { %1213 = vmatprep.mubr.msk.bf16.mxu0 %vm277_vm1, %v1283_v28  ;;  %1245 = vmatprep.mubr.msk.bf16.mxu1 %vm277_vm1, %v1299_v30 }
  0x3e   :  { %1214 = vmatmul.mubr.msk.bf16.gmra.mrb[20].mxu0 %vm277_vm1, %v1284_v31  ;;  %1246 = vmatmul.mubr.msk.bf16.gmra.mrb[20].mxu1 %vm277_vm1, %v1300_v33 }
  0x3f   :  { %1217 = vmatprep.mubr.msk.bf16.mxu0 %vm277_vm1, %v1285_v32  ;;  %1249 = vmatprep.mubr.msk.bf16.mxu1 %vm277_vm1, %v1301_v34 }
  0x46   :  { %1218 = vmatmul.mubr.msk.bf16.gmra.mrb[24].mxu0 %vm277_vm1, %v1286_v35  ;;  %1250 = vmatmul.mubr.msk.bf16.gmra.mrb[24].mxu1 %vm277_vm1, %v1302_v37 }
  0x47   :  { %1221 = vmatprep.mubr.msk.bf16.mxu0 %vm277_vm1, %v1287_v36  ;;  %1253 = vmatprep.mubr.msk.bf16.mxu1 %vm277_vm1, %v1303_v38 }
  0x4e   :  { %1222 = vmatmul.mubr.msk.bf16.gmra.mrb[28].mxu0 %vm277_vm1, %v1288_v39  ;;  %1254 = vmatmul.mubr.msk.bf16.gmra.mrb[28].mxu1 %vm277_vm1, %v1304_v40 }
  0xe9   :  { %v1195_v41 = vpop.f32.mrb[0].mxu0  ;;  %v1477_v45 = vpop.f32.mrb[0].mxu1 }
  0xea   :  { %673 = vst.msk [vmem:[%s2050_s2 + $0x10] sm:$0xff] %vm670_vm3, %v1195_v41  ;;  %v415_v42 = vpop.f32.mrb[1].mxu0  ;;  %705 = vst.msk [vmem:[%s2050_s2 + $0x110] sm:$0xff] %vm670_vm3, %v1477_v45  ;;  %v1488_v47 = vpop.f32.mrb[1].mxu1  ;;  %v870_v48 = vmul.f32 %v1195_v41, %v1195_v41  ;;  %v738_v55 = vsel %vm670_vm3, %v1195_v41, 0.0 }
  0xeb   :  { %671 = vst.msk [vmem:[%s2050_s2] sm:$0xff] %vm670_vm3, %v415_v42  ;;  %v868_v43 = vmul.f32 %v415_v42, %v415_v42  ;;  %v1196_v44 = vpop.f32.mrb[2].mxu0  ;;  %v735_v49 = vsel %vm670_vm3, %v415_v42, 0.0  ;;  %703 = vst.msk [vmem:[%s2050_s2 + $0x100] sm:$0xff] %vm670_vm3, %v1488_v47  ;;  %v1501_v52 = vpop.f32.mrb[2].mxu1 }
  0xec   :  { %674 = vst.msk [vmem:[%s2050_s2 + $0x18] sm:$0xff] %vm670_vm3, %v1196_v44  ;;  %v418_v46 = vpop.f32.mrb[3].mxu0  ;;  %706 = vst.msk [vmem:[%s2050_s2 + $0x118] sm:$0xff] %vm670_vm3, %v1501_v52  ;;  %v1508_v54 = vpop.f32.mrb[3].mxu1  ;;  %v871_v57 = vmul.f32 %v1196_v44, %v1196_v44  ;;  %v935_v61 = vsel %vm670_vm3, %v870_v48, 0.0  ;;  %v740_v62 = vsel %vm670_vm3, %v1196_v44, 0.0 }
  0xed   :  { %672 = vst.msk [vmem:[%s2050_s2 + $0x8] sm:$0xff] %vm670_vm3, %v418_v46  ;;  %v736_v50 = vsel %vm670_vm3, %v418_v46, 0.0  ;;  %v869_v51 = vmul.f32 %v418_v46, %v418_v46  ;;  %v932_v56 = vsel %vm670_vm3, %v868_v43, 0.0  ;;  %704 = vst.msk [vmem:[%s2050_s2 + $0x108] sm:$0xff] %vm670_vm3, %v1508_v54 }
  0xee   :  { %v737_v53 = vadd.f32 %v736_v50, %v735_v49  ;;  %v937_v3 = vsel %vm670_vm3, %v871_v57, 0.0 }
  0xef   :  { %v933_v58 = vsel %vm670_vm3, %v869_v51, 0.0 }
  0xf0   :  { %v739_v59 = vadd.f32 %v738_v55, %v737_v53  ;;  %v934_v60 = vadd.f32 %v933_v58, %v932_v56 }
  0xf1   :  { %v1199_v63 = vpop.f32.mrb[4].mxu0  ;;  %v1530_v7 = vpop.f32.mrb[4].mxu1 }
  0xf2   :  { %v936_v0 = vadd.f32 %v935_v61, %v934_v60  ;;  %677 = vst.msk [vmem:[%s2050_s2 + $0x30] sm:$0xff] %vm670_vm3, %v1199_v63  ;;  %v431_v1 = vpop.f32.mrb[5].mxu0  ;;  %v741_v2 = vadd.f32 %v740_v62, %v739_v59  ;;  %709 = vst.msk [vmem:[%s2050_s2 + $0x130] sm:$0xff] %vm670_vm3, %v1530_v7  ;;  %v1541_v11 = vpop.f32.mrb[5].mxu1  ;;  %v874_v12 = vmul.f32 %v1199_v63, %v1199_v63  ;;  %v746_v20 = vsel %vm670_vm3, %v1199_v63, 0.0 }
  0xf3   :  { %675 = vst.msk [vmem:[%s2050_s2 + $0x20] sm:$0xff] %vm670_vm3, %v431_v1  ;;  %v742_v4 = vsel %vm670_vm3, %v431_v1, 0.0  ;;  %v872_v5 = vmul.f32 %v431_v1, %v431_v1  ;;  %v1200_v6 = vpop.f32.mrb[6].mxu0  ;;  %707 = vst.msk [vmem:[%s2050_s2 + $0x120] sm:$0xff] %vm670_vm3, %v1541_v11  ;;  %v1554_v16 = vpop.f32.mrb[6].mxu1 }
  0xf4   :  { %v743_v8 = vadd.f32 %v742_v4, %v741_v2  ;;  %v938_v9 = vadd.f32 %v937_v3, %v936_v0  ;;  %678 = vst.msk [vmem:[%s2050_s2 + $0x38] sm:$0xff] %vm670_vm3, %v1200_v6  ;;  %v434_v10 = vpop.f32.mrb[7].mxu0  ;;  %710 = vst.msk [vmem:[%s2050_s2 + $0x138] sm:$0xff] %vm670_vm3, %v1554_v16  ;;  %v1561_v19 = vpop.f32.mrb[7].mxu1  ;;  %v875_v21 = vmul.f32 %v1200_v6, %v1200_v6  ;;  %v943_v25 = vsel %vm670_vm3, %v874_v12, 0.0 }
  0xf5   :  { %v939_v13 = vsel %vm670_vm3, %v872_v5, 0.0  ;;  %676 = vst.msk [vmem:[%s2050_s2 + $0x28] sm:$0xff] %vm670_vm3, %v434_v10  ;;  %v744_v14 = vsel %vm670_vm3, %v434_v10, 0.0  ;;  %v873_v15 = vmul.f32 %v434_v10, %v434_v10  ;;  %708 = vst.msk [vmem:[%s2050_s2 + $0x128] sm:$0xff] %vm670_vm3, %v1561_v19  ;;  %v748_v26 = vsel %vm670_vm3, %v1200_v6, 0.0 }
  0xf6   :  { %v940_v17 = vadd.f32 %v939_v13, %v938_v9  ;;  %v745_v18 = vadd.f32 %v744_v14, %v743_v8  ;;  %v945_v31 = vsel %vm670_vm3, %v875_v21, 0.0 }
  0xf7   :  { %v941_v22 = vsel %vm670_vm3, %v873_v15, 0.0 }
  0xf8   :  { %v747_v23 = vadd.f32 %v746_v20, %v745_v18  ;;  %v942_v24 = vadd.f32 %v941_v22, %v940_v17 }
  0xf9   :  { %v1203_v27 = vpop.f32.mrb[8].mxu0  ;;  %v1582_v35 = vpop.f32.mrb[8].mxu1 }
  0xfa   :  { %v944_v28 = vadd.f32 %v943_v25, %v942_v24  ;;  %681 = vst.msk [vmem:[%s2050_s2 + $0x50] sm:$0xff] %vm670_vm3, %v1203_v27  ;;  %v447_v29 = vpop.f32.mrb[9].mxu0  ;;  %v749_v30 = vadd.f32 %v748_v26, %v747_v23  ;;  %713 = vst.msk [vmem:[%s2050_s2 + $0x150] sm:$0xff] %vm670_vm3, %v1582_v35  ;;  %v1593_v39 = vpop.f32.mrb[9].mxu1  ;;  %v878_v40 = vmul.f32 %v1203_v27, %v1203_v27  ;;  %v754_v50 = vsel %vm670_vm3, %v1203_v27, 0.0 }
  0xfb   :  { %679 = vst.msk [vmem:[%s2050_s2 + $0x40] sm:$0xff] %vm670_vm3, %v447_v29  ;;  %v750_v32 = vsel %vm670_vm3, %v447_v29, 0.0  ;;  %v876_v33 = vmul.f32 %v447_v29, %v447_v29  ;;  %v1204_v34 = vpop.f32.mrb[10].mxu0  ;;  %711 = vst.msk [vmem:[%s2050_s2 + $0x140] sm:$0xff] %vm670_vm3, %v1593_v39  ;;  %v1606_v44 = vpop.f32.mrb[10].mxu1 }
  0xfc   :  { %v751_v36 = vadd.f32 %v750_v32, %v749_v30  ;;  %v946_v37 = vadd.f32 %v945_v31, %v944_v28  ;;  %682 = vst.msk [vmem:[%s2050_s2 + $0x58] sm:$0xff] %vm670_vm3, %v1204_v34  ;;  %v450_v38 = vpop.f32.mrb[11].mxu0  ;;  %714 = vst.msk [vmem:[%s2050_s2 + $0x158] sm:$0xff] %vm670_vm3, %v1606_v44  ;;  %v1613_v49 = vpop.f32.mrb[11].mxu1  ;;  %v879_v51 = vmul.f32 %v1204_v34, %v1204_v34  ;;  %v951_v57 = vsel %vm670_vm3, %v878_v40, 0.0 }
  0xfd   :  { %v947_v41 = vsel %vm670_vm3, %v876_v33, 0.0  ;;  %680 = vst.msk [vmem:[%s2050_s2 + $0x48] sm:$0xff] %vm670_vm3, %v450_v38  ;;  %v752_v42 = vsel %vm670_vm3, %v450_v38, 0.0  ;;  %v877_v43 = vmul.f32 %v450_v38, %v450_v38  ;;  %712 = vst.msk [vmem:[%s2050_s2 + $0x148] sm:$0xff] %vm670_vm3, %v1613_v49  ;;  %v756_v58 = vsel %vm670_vm3, %v1204_v34, 0.0 }
  0xfe   :  { %v948_v46 = vadd.f32 %v947_v41, %v946_v37  ;;  %v753_v48 = vadd.f32 %v752_v42, %v751_v36  ;;  %v953_v63 = vsel %vm670_vm3, %v879_v51, 0.0 }
  0xff   :  { %v949_v53 = vsel %vm670_vm3, %v877_v43, 0.0 }
 0x100   :  { %v755_v55 = vadd.f32 %v754_v50, %v753_v48  ;;  %v950_v56 = vadd.f32 %v949_v53, %v948_v46 }
 0x101   :  { %v1207_v59 = vpop.f32.mrb[12].mxu0  ;;  %v1634_v3 = vpop.f32.mrb[12].mxu1 }
 0x102   :  { %v952_v60 = vadd.f32 %v951_v57, %v950_v56  ;;  %685 = vst.msk [vmem:[%s2050_s2 + $0x70] sm:$0xff] %vm670_vm3, %v1207_v59  ;;  %v463_v61 = vpop.f32.mrb[13].mxu0  ;;  %v757_v62 = vadd.f32 %v756_v58, %v755_v55  ;;  %717 = vst.msk [vmem:[%s2050_s2 + $0x170] sm:$0xff] %vm670_vm3, %v1634_v3  ;;  %v1645_v8 = vpop.f32.mrb[13].mxu1  ;;  %v882_v9 = vmul.f32 %v1207_v59, %v1207_v59  ;;  %v762_v20 = vsel %vm670_vm3, %v1207_v59, 0.0 }
 0x103   :  { %683 = vst.msk [vmem:[%s2050_s2 + $0x60] sm:$0xff] %vm670_vm3, %v463_v61  ;;  %v758_v0 = vsel %vm670_vm3, %v463_v61, 0.0  ;;  %v880_v1 = vmul.f32 %v463_v61, %v463_v61  ;;  %v1208_v2 = vpop.f32.mrb[14].mxu0  ;;  %715 = vst.msk [vmem:[%s2050_s2 + $0x160] sm:$0xff] %vm670_vm3, %v1645_v8  ;;  %v1658_v14 = vpop.f32.mrb[14].mxu1 }
 0x104   :  { %v759_v4 = vadd.f32 %v758_v0, %v757_v62  ;;  %v954_v5 = vadd.f32 %v953_v63, %v952_v60  ;;  %686 = vst.msk [vmem:[%s2050_s2 + $0x78] sm:$0xff] %vm670_vm3, %v1208_v2  ;;  %v466_v6 = vpop.f32.mrb[15].mxu0  ;;  %718 = vst.msk [vmem:[%s2050_s2 + $0x178] sm:$0xff] %vm670_vm3, %v1658_v14  ;;  %v1665_v18 = vpop.f32.mrb[15].mxu1  ;;  %v883_v21 = vmul.f32 %v1208_v2, %v1208_v2  ;;  %v959_v25 = vsel %vm670_vm3, %v882_v9, 0.0 }
 0x105   :  { %v955_v10 = vsel %vm670_vm3, %v880_v1, 0.0  ;;  %684 = vst.msk [vmem:[%s2050_s2 + $0x68] sm:$0xff] %vm670_vm3, %v466_v6  ;;  %v760_v12 = vsel %vm670_vm3, %v466_v6, 0.0  ;;  %v881_v13 = vmul.f32 %v466_v6, %v466_v6  ;;  %716 = vst.msk [vmem:[%s2050_s2 + $0x168] sm:$0xff] %vm670_vm3, %v1665_v18  ;;  %v764_v26 = vsel %vm670_vm3, %v1208_v2, 0.0 }
 0x106   :  { %v956_v15 = vadd.f32 %v955_v10, %v954_v5  ;;  %v761_v17 = vadd.f32 %v760_v12, %v759_v4  ;;  %v961_v31 = vsel %vm670_vm3, %v883_v21, 0.0 }
 0x107   :  { %v957_v22 = vsel %vm670_vm3, %v881_v13, 0.0 }
 0x108   :  { %v763_v23 = vadd.f32 %v762_v20, %v761_v17  ;;  %v958_v24 = vadd.f32 %v957_v22, %v956_v15 }
 0x109   :  { %v1211_v27 = vpop.f32.mrb[16].mxu0  ;;  %v1686_v36 = vpop.f32.mrb[16].mxu1 }
 0x10a   :  { %v960_v28 = vadd.f32 %v959_v25, %v958_v24  ;;  %689 = vst.msk [vmem:[%s2050_s2 + $0x90] sm:$0xff] %vm670_vm3, %v1211_v27  ;;  %v479_v29 = vpop.f32.mrb[17].mxu0  ;;  %v765_v30 = vadd.f32 %v764_v26, %v763_v23  ;;  %721 = vst.msk [vmem:[%s2050_s2 + $0x190] sm:$0xff] %vm670_vm3, %v1686_v36  ;;  %v1697_v41 = vpop.f32.mrb[17].mxu1  ;;  %v886_v42 = vmul.f32 %v1211_v27, %v1211_v27  ;;  %v770_v56 = vsel %vm670_vm3, %v1211_v27, 0.0 }
 0x10b   :  { %687 = vst.msk [vmem:[%s2050_s2 + $0x80] sm:$0xff] %vm670_vm3, %v479_v29  ;;  %v766_v32 = vsel %vm670_vm3, %v479_v29, 0.0  ;;  %v884_v33 = vmul.f32 %v479_v29, %v479_v29  ;;  %v1212_v34 = vpop.f32.mrb[18].mxu0  ;;  %719 = vst.msk [vmem:[%s2050_s2 + $0x180] sm:$0xff] %vm670_vm3, %v1697_v41  ;;  %v1710_v50 = vpop.f32.mrb[18].mxu1 }
 0x10c   :  { %v767_v37 = vadd.f32 %v766_v32, %v765_v30  ;;  %v962_v38 = vadd.f32 %v961_v31, %v960_v28  ;;  %690 = vst.msk [vmem:[%s2050_s2 + $0x98] sm:$0xff] %vm670_vm3, %v1212_v34  ;;  %v482_v40 = vpop.f32.mrb[19].mxu0  ;;  %722 = vst.msk [vmem:[%s2050_s2 + $0x198] sm:$0xff] %vm670_vm3, %v1710_v50  ;;  %v1717_v55 = vpop.f32.mrb[19].mxu1  ;;  %v887_v57 = vmul.f32 %v1212_v34, %v1212_v34  ;;  %v967_v61 = vsel %vm670_vm3, %v886_v42, 0.0 }
 0x10d   :  { %v963_v43 = vsel %vm670_vm3, %v884_v33, 0.0  ;;  %688 = vst.msk [vmem:[%s2050_s2 + $0x88] sm:$0xff] %vm670_vm3, %v482_v40  ;;  %v768_v46 = vsel %vm670_vm3, %v482_v40, 0.0  ;;  %v885_v48 = vmul.f32 %v482_v40, %v482_v40  ;;  %720 = vst.msk [vmem:[%s2050_s2 + $0x188] sm:$0xff] %vm670_vm3, %v1717_v55  ;;  %v772_v62 = vsel %vm670_vm3, %v1212_v34, 0.0 }
 0x10e   :  { %v964_v51 = vadd.f32 %v963_v43, %v962_v38  ;;  %v769_v53 = vadd.f32 %v768_v46, %v767_v37  ;;  %v969_v4 = vsel %vm670_vm3, %v887_v57, 0.0 }
 0x10f   :  { %v965_v58 = vsel %vm670_vm3, %v885_v48, 0.0 }
 0x110   :  { %v771_v59 = vadd.f32 %v770_v56, %v769_v53  ;;  %v966_v60 = vadd.f32 %v965_v58, %v964_v51 }
 0x111   :  { %v1215_v63 = vpop.f32.mrb[20].mxu0  ;;  %v1738_v10 = vpop.f32.mrb[20].mxu1 }
 0x112   :  { %v968_v0 = vadd.f32 %v967_v61, %v966_v60  ;;  %693 = vst.msk [vmem:[%s2050_s2 + $0xb0] sm:$0xff] %vm670_vm3, %v1215_v63  ;;  %v495_v1 = vpop.f32.mrb[21].mxu0  ;;  %v773_v2 = vadd.f32 %v772_v62, %v771_v59  ;;  %725 = vst.msk [vmem:[%s2050_s2 + $0x1b0] sm:$0xff] %vm670_vm3, %v1738_v10  ;;  %v1749_v17 = vpop.f32.mrb[21].mxu1  ;;  %v890_v20 = vmul.f32 %v1215_v63, %v1215_v63  ;;  %v778_v28 = vsel %vm670_vm3, %v1215_v63, 0.0 }
 0x113   :  { %691 = vst.msk [vmem:[%s2050_s2 + $0xa0] sm:$0xff] %vm670_vm3, %v495_v1  ;;  %v774_v5 = vsel %vm670_vm3, %v495_v1, 0.0  ;;  %v888_v6 = vmul.f32 %v495_v1, %v495_v1  ;;  %v1216_v9 = vpop.f32.mrb[22].mxu0  ;;  %723 = vst.msk [vmem:[%s2050_s2 + $0x1a0] sm:$0xff] %vm670_vm3, %v1749_v17  ;;  %v1762_v24 = vpop.f32.mrb[22].mxu1 }
 0x114   :  { %v775_v12 = vadd.f32 %v774_v5, %v773_v2  ;;  %v970_v13 = vadd.f32 %v969_v4, %v968_v0  ;;  %694 = vst.msk [vmem:[%s2050_s2 + $0xb8] sm:$0xff] %vm670_vm3, %v1216_v9  ;;  %v498_v15 = vpop.f32.mrb[23].mxu0  ;;  %726 = vst.msk [vmem:[%s2050_s2 + $0x1b8] sm:$0xff] %vm670_vm3, %v1762_v24  ;;  %v1769_v27 = vpop.f32.mrb[23].mxu1  ;;  %v891_v29 = vmul.f32 %v1216_v9, %v1216_v9  ;;  %v975_v33 = vsel %vm670_vm3, %v890_v20, 0.0 }
 0x115   :  { %v971_v21 = vsel %vm670_vm3, %v888_v6, 0.0  ;;  %692 = vst.msk [vmem:[%s2050_s2 + $0xa8] sm:$0xff] %vm670_vm3, %v498_v15  ;;  %v776_v22 = vsel %vm670_vm3, %v498_v15, 0.0  ;;  %v889_v23 = vmul.f32 %v498_v15, %v498_v15  ;;  %724 = vst.msk [vmem:[%s2050_s2 + $0x1a8] sm:$0xff] %vm670_vm3, %v1769_v27  ;;  %v780_v34 = vsel %vm670_vm3, %v1216_v9, 0.0 }
 0x116   :  { %v972_v25 = vadd.f32 %v971_v21, %v970_v13  ;;  %v777_v26 = vadd.f32 %v776_v22, %v775_v12  ;;  %v977_v43 = vsel %vm670_vm3, %v891_v29, 0.0 }
 0x117   :  { %v973_v30 = vsel %vm670_vm3, %v889_v23, 0.0 }
 0x118   :  { %v779_v31 = vadd.f32 %v778_v28, %v777_v26  ;;  %v974_v32 = vadd.f32 %v973_v30, %v972_v25 }
 0x119   :  { %v1219_v37 = vpop.f32.mrb[24].mxu0  ;;  %v1790_v53 = vpop.f32.mrb[24].mxu1 }
 0x11a   :  { %v976_v38 = vadd.f32 %v975_v33, %v974_v32  ;;  %697 = vst.msk [vmem:[%s2050_s2 + $0xd0] sm:$0xff] %vm670_vm3, %v1219_v37  ;;  %v511_v40 = vpop.f32.mrb[25].mxu0  ;;  %v781_v42 = vadd.f32 %v780_v34, %v779_v31  ;;  %729 = vst.msk [vmem:[%s2050_s2 + $0x1d0] sm:$0xff] %vm670_vm3, %v1790_v53  ;;  %v1801_v59 = vpop.f32.mrb[25].mxu1  ;;  %v894_v60 = vmul.f32 %v1219_v37, %v1219_v37  ;;  %v786_v5 = vsel %vm670_vm3, %v1219_v37, 0.0 }
 0x11b   :  { %695 = vst.msk [vmem:[%s2050_s2 + $0xc0] sm:$0xff] %vm670_vm3, %v511_v40  ;;  %v782_v46 = vsel %vm670_vm3, %v511_v40, 0.0  ;;  %v892_v48 = vmul.f32 %v511_v40, %v511_v40  ;;  %v1220_v51 = vpop.f32.mrb[26].mxu0  ;;  %727 = vst.msk [vmem:[%s2050_s2 + $0x1c0] sm:$0xff] %vm670_vm3, %v1801_v59  ;;  %v1814_v0 = vpop.f32.mrb[26].mxu1 }
 0x11c   :  { %v783_v56 = vadd.f32 %v782_v46, %v781_v42  ;;  %v978_v57 = vadd.f32 %v977_v43, %v976_v38  ;;  %698 = vst.msk [vmem:[%s2050_s2 + $0xd8] sm:$0xff] %vm670_vm3, %v1220_v51  ;;  %v514_v58 = vpop.f32.mrb[27].mxu0  ;;  %730 = vst.msk [vmem:[%s2050_s2 + $0x1d8] sm:$0xff] %vm670_vm3, %v1814_v0  ;;  %v1821_v4 = vpop.f32.mrb[27].mxu1  ;;  %v895_v6 = vmul.f32 %v1220_v51, %v1220_v51  ;;  %v983_v15 = vsel %vm670_vm3, %v894_v60, 0.0 }
 0x11d   :  { %v979_v61 = vsel %vm670_vm3, %v892_v48, 0.0  ;;  %696 = vst.msk [vmem:[%s2050_s2 + $0xc8] sm:$0xff] %vm670_vm3, %v514_v58  ;;  %v784_v62 = vsel %vm670_vm3, %v514_v58, 0.0  ;;  %v893_v63 = vmul.f32 %v514_v58, %v514_v58  ;;  %728 = vst.msk [vmem:[%s2050_s2 + $0x1c8] sm:$0xff] %vm670_vm3, %v1821_v4  ;;  %v788_v20 = vsel %vm670_vm3, %v1220_v51, 0.0 }
 0x11e   :  { %v980_v1 = vadd.f32 %v979_v61, %v978_v57  ;;  %v785_v2 = vadd.f32 %v784_v62, %v783_v56  ;;  %v985_v26 = vsel %vm670_vm3, %v895_v6, 0.0  ;;  %v900_v61 = vmul.f32 %v1488_v47, %v1488_v47 }
 0x11f   :  { %v981_v9 = vsel %vm670_vm3, %v893_v63, 0.0 }
 0x120   :  { %v787_v12 = vadd.f32 %v786_v5, %v785_v2  ;;  %v982_v13 = vadd.f32 %v981_v9, %v980_v1  ;;  %v798_v5 = vsel %vm670_vm3, %v1488_v47, 0.0  ;;  %v802_v47 = vsel %vm670_vm3, %v1477_v45, 0.0 }
 0x121   :  { %v1223_v21 = vpop.f32.mrb[28].mxu0  ;;  %v1842_v31 = vpop.f32.mrb[28].mxu1 }
 0x122   :  { %v984_v22 = vadd.f32 %v983_v15, %v982_v13  ;;  %701 = vst.msk [vmem:[%s2050_s2 + $0xf0] sm:$0xff] %vm670_vm3, %v1223_v21  ;;  %v527_v23 = vpop.f32.mrb[29].mxu0  ;;  %v789_v25 = vadd.f32 %v788_v20, %v787_v12  ;;  %733 = vst.msk [vmem:[%s2050_s2 + $0x1f0] sm:$0xff] %vm670_vm3, %v1842_v31  ;;  %v1853_v37 = vpop.f32.mrb[29].mxu1  ;;  %v898_v38 = vmul.f32 %v1223_v21, %v1223_v21  ;;  %v794_v57 = vsel %vm670_vm3, %v1223_v21, 0.0 }
 0x123   :  { %699 = vst.msk [vmem:[%s2050_s2 + $0xe0] sm:$0xff] %vm670_vm3, %v527_v23  ;;  %v790_v28 = vsel %vm670_vm3, %v527_v23, 0.0  ;;  %v896_v29 = vmul.f32 %v527_v23, %v527_v23  ;;  %v1224_v30 = vpop.f32.mrb[30].mxu0  ;;  %731 = vst.msk [vmem:[%s2050_s2 + $0x1e0] sm:$0xff] %vm670_vm3, %v1853_v37  ;;  %v1866_v46 = vpop.f32.mrb[30].mxu1  ;;  %v995_v13 = vsel %vm670_vm3, %v900_v61, 0.0  ;;  %v901_v15 = vmul.f32 %v1508_v54, %v1508_v54 }
 0x124   :  { %v791_v32 = vadd.f32 %v790_v28, %v789_v25  ;;  %v986_v33 = vadd.f32 %v985_v26, %v984_v22  ;;  %702 = vst.msk [vmem:[%s2050_s2 + $0xf8] sm:$0xff] %vm670_vm3, %v1224_v30  ;;  %v530_v34 = vpop.f32.mrb[31].mxu0  ;;  %734 = vst.msk [vmem:[%s2050_s2 + $0x1f8] sm:$0xff] %vm670_vm3, %v1866_v46  ;;  %v1873_v56 = vpop.f32.mrb[31].mxu1  ;;  %v899_v58 = vmul.f32 %v1224_v30, %v1224_v30  ;;  %v991_v1 = vsel %vm670_vm3, %v898_v38, 0.0 }
 0x125   :  { %v987_v40 = vsel %vm670_vm3, %v896_v29, 0.0  ;;  %700 = vst.msk [vmem:[%s2050_s2 + $0xe8] sm:$0xff] %vm670_vm3, %v530_v34  ;;  %v792_v42 = vsel %vm670_vm3, %v530_v34, 0.0  ;;  %v897_v43 = vmul.f32 %v530_v34, %v530_v34  ;;  %732 = vst.msk [vmem:[%s2050_s2 + $0x1e8] sm:$0xff] %vm670_vm3, %v1873_v56  ;;  %v796_v2 = vsel %vm670_vm3, %v1224_v30, 0.0 }
 0x126   :  { %v988_v48 = vadd.f32 %v987_v40, %v986_v33  ;;  %v793_v51 = vadd.f32 %v792_v42, %v791_v32  ;;  %v993_v12 = vsel %vm670_vm3, %v899_v58, 0.0  ;;  %v902_v22 = vmul.f32 %v1477_v45, %v1477_v45 }
 0x127   :  { %v989_v60 = vsel %vm670_vm3, %v897_v43, 0.0  ;;  %v800_v23 = vsel %vm670_vm3, %v1508_v54, 0.0  ;;  %v903_v28 = vmul.f32 %v1501_v52, %v1501_v52  ;;  %v997_v29 = vsel %vm670_vm3, %v901_v15, 0.0 }
 0x128   :  { %v795_v62 = vadd.f32 %v794_v57, %v793_v51  ;;  %v990_v63 = vadd.f32 %v989_v60, %v988_v48  ;;  %v904_v30 = vmul.f32 %v1541_v11, %v1541_v11  ;;  %v999_v34 = vsel %vm670_vm3, %v902_v22, 0.0 }
 0x129   :  { %v804_v54 = vsel %vm670_vm3, %v1501_v52, 0.0  ;;  %v806_v38 = vsel %vm670_vm3, %v1541_v11, 0.0  ;;  %v1001_v42 = vsel %vm670_vm3, %v903_v28, 0.0  ;;  %v905_v48 = vmul.f32 %v1561_v19, %v1561_v19 }
 0x12a   :  { %v992_v6 = vadd.f32 %v991_v1, %v990_v63  ;;  %v797_v9 = vadd.f32 %v796_v2, %v795_v62  ;;  %v1003_v43 = vsel %vm670_vm3, %v904_v30, 0.0  ;;  %v906_v58 = vmul.f32 %v1530_v7, %v1530_v7 }
 0x12b   :  { %v808_v52 = vsel %vm670_vm3, %v1561_v19, 0.0  ;;  %v810_v11 = vsel %vm670_vm3, %v1530_v7, 0.0  ;;  %v907_v62 = vmul.f32 %v1554_v16, %v1554_v16  ;;  %v1005_v63 = vsel %vm670_vm3, %v905_v48, 0.0 }
 0x12c   :  { %v799_v20 = vadd.f32 %v798_v5, %v797_v9  ;;  %v994_v21 = vadd.f32 %v993_v12, %v992_v6  ;;  %v908_v1 = vmul.f32 %v1593_v39, %v1593_v39  ;;  %v1007_v6 = vsel %vm670_vm3, %v906_v58, 0.0 }
 0x12d   :  { %v812_v19 = vsel %vm670_vm3, %v1554_v16, 0.0  ;;  %v814_v9 = vsel %vm670_vm3, %v1593_v39, 0.0  ;;  %v816_v16 = vsel %vm670_vm3, %v1613_v49, 0.0  ;;  %v818_v39 = vsel %vm670_vm3, %v1582_v35, 0.0 }
 0x12e   :  { %v996_v25 = vadd.f32 %v995_v13, %v994_v21  ;;  %v801_v26 = vadd.f32 %v800_v23, %v799_v20  ;;  %v1009_v13 = vsel %vm670_vm3, %v907_v62, 0.0  ;;  %v1011_v15 = vsel %vm670_vm3, %v908_v1, 0.0 }
 0x12f   :  { %v909_v20 = vmul.f32 %v1613_v49, %v1613_v49  ;;  %v910_v23 = vmul.f32 %v1582_v35, %v1582_v35  ;;  %v820_v49 = vsel %vm670_vm3, %v1606_v44, 0.0  ;;  %v914_v48 = vmul.f32 %v1634_v3, %v1634_v3 }
 0x130   :  { %v803_v32 = vadd.f32 %v802_v47, %v801_v26  ;;  %v998_v33 = vadd.f32 %v997_v29, %v996_v25  ;;  %v911_v47 = vmul.f32 %v1606_v44, %v1606_v44  ;;  %v912_v29 = vmul.f32 %v1645_v8, %v1645_v8 }
 0x131   :  { %v1013_v28 = vsel %vm670_vm3, %v909_v20, 0.0  ;;  %v824_v44 = vsel %vm670_vm3, %v1665_v18, 0.0  ;;  %v915_v58 = vmul.f32 %v1658_v14, %v1658_v14  ;;  %v1023_v62 = vsel %vm670_vm3, %v914_v48, 0.0 }
 0x132   :  { %v1000_v40 = vadd.f32 %v999_v34, %v998_v33  ;;  %v805_v45 = vadd.f32 %v804_v54, %v803_v32  ;;  %v1015_v33 = vsel %vm670_vm3, %v910_v23, 0.0  ;;  %v822_v34 = vsel %vm670_vm3, %v1645_v8, 0.0 }
 0x133   :  { %v826_v8 = vsel %vm670_vm3, %v1634_v3, 0.0 }
 0x134   :  { %v807_v51 = vadd.f32 %v806_v38, %v805_v45  ;;  %v1002_v57 = vadd.f32 %v1001_v42, %v1000_v40  ;;  %v1017_v38 = vsel %vm670_vm3, %v911_v47, 0.0  ;;  %v1019_v40 = vsel %vm670_vm3, %v912_v29, 0.0 }
 0x135   :  { %v913_v45 = vmul.f32 %v1665_v18, %v1665_v18  ;;  %v828_v18 = vsel %vm670_vm3, %v1658_v14, 0.0  ;;  %v832_v14 = vsel %vm670_vm3, %v1717_v55, 0.0 }
 0x136   :  { %v1004_v60 = vadd.f32 %v1003_v43, %v1002_v57  ;;  %v809_v61 = vadd.f32 %v808_v52, %v807_v51 }
 0x137   :  { %v1021_v52 = vsel %vm670_vm3, %v913_v45, 0.0 }
 0x138   :  { %v811_v2 = vadd.f32 %v810_v11, %v809_v61  ;;  %v1006_v5 = vadd.f32 %v1005_v63, %v1004_v60  ;;  %v916_v60 = vmul.f32 %v1697_v41, %v1697_v41  ;;  %v830_v63 = vsel %vm670_vm3, %v1697_v41, 0.0 }
 0x139   :  { %v834_v41 = vsel %vm670_vm3, %v1686_v36, 0.0 }
 0x13a   :  { %v1008_v12 = vadd.f32 %v1007_v6, %v1006_v5  ;;  %v813_v7 = vadd.f32 %v812_v19, %v811_v2  ;;  %v1025_v2 = vsel %vm670_vm3, %v915_v58, 0.0  ;;  %v1027_v5 = vsel %vm670_vm3, %v916_v60, 0.0 }
 0x13b   :  { %v917_v6 = vmul.f32 %v1717_v55, %v1717_v55  ;;  %v836_v55 = vsel %vm670_vm3, %v1710_v50, 0.0  ;;  %v926_v58 = vmul.f32 %v1790_v53, %v1790_v53 }
 0x13c   :  { %v815_v21 = vadd.f32 %v814_v9, %v813_v7  ;;  %v1010_v22 = vadd.f32 %v1009_v13, %v1008_v12  ;;  %v918_v12 = vmul.f32 %v1686_v36, %v1686_v36 }
 0x13d   :  { %v1029_v20 = vsel %vm670_vm3, %v917_v6, 0.0 }
 0x13e   :  { %v1012_v25 = vadd.f32 %v1011_v15, %v1010_v22  ;;  %v817_v26 = vadd.f32 %v816_v16, %v815_v21  ;;  %v919_v15 = vmul.f32 %v1710_v50, %v1710_v50  ;;  %v920_v21 = vmul.f32 %v1749_v17, %v1749_v17 }
 0x13f   :  { %v1031_v16 = vsel %vm670_vm3, %v918_v12, 0.0  ;;  %v840_v50 = vsel %vm670_vm3, %v1769_v27, 0.0 }
 0x140   :  { %v819_v30 = vadd.f32 %v818_v39, %v817_v26  ;;  %v1014_v32 = vadd.f32 %v1013_v28, %v1012_v25  ;;  %v838_v25 = vsel %vm670_vm3, %v1749_v17, 0.0  ;;  %v1033_v39 = vsel %vm670_vm3, %v919_v15, 0.0 }
 0x141   :  { %v1035_v47 = vsel %vm670_vm3, %v920_v21, 0.0  ;;  %v921_v28 = vmul.f32 %v1769_v27, %v1769_v27  ;;  %v842_v17 = vsel %vm670_vm3, %v1738_v10, 0.0  ;;  %v844_v27 = vsel %vm670_vm3, %v1762_v24, 0.0 }
 0x142   :  { %v1016_v54 = vadd.f32 %v1015_v33, %v1014_v32  ;;  %v821_v35 = vadd.f32 %v820_v49, %v819_v30  ;;  %v922_v32 = vmul.f32 %v1738_v10, %v1738_v10 }
 0x144   :  { %v823_v42 = vadd.f32 %v822_v34, %v821_v35  ;;  %v1018_v43 = vadd.f32 %v1017_v38, %v1016_v54  ;;  %v923_v34 = vmul.f32 %v1762_v24, %v1762_v24  ;;  %v1037_v54 = vsel %vm670_vm3, %v921_v28, 0.0 }
 0x145   :  { %v924_v35 = vmul.f32 %v1801_v59, %v1801_v59  ;;  %v1039_v45 = vsel %vm670_vm3, %v922_v32, 0.0  ;;  %v848_v24 = vsel %vm670_vm3, %v1821_v4, 0.0 }
 0x146   :  { %v1020_v51 = vadd.f32 %v1019_v40, %v1018_v43  ;;  %v825_v57 = vadd.f32 %v824_v44, %v823_v42  ;;  %v846_v42 = vsel %vm670_vm3, %v1801_v59, 0.0  ;;  %v1041_v48 = vsel %vm670_vm3, %v923_v34, 0.0 }
 0x147   :  { %v1043_v44 = vsel %vm670_vm3, %v924_v35, 0.0  ;;  %v850_v59 = vsel %vm670_vm3, %v1790_v53, 0.0 }
 0x148   :  { %v827_v61 = vadd.f32 %v826_v8, %v825_v57  ;;  %v1022_v11 = vadd.f32 %v1021_v52, %v1020_v51  ;;  %v925_v51 = vmul.f32 %v1821_v4, %v1821_v4  ;;  %v852_v4 = vsel %vm670_vm3, %v1814_v0, 0.0 }
 0x14a   :  { %v1024_v1 = vadd.f32 %v1023_v62, %v1022_v11  ;;  %v829_v3 = vadd.f32 %v828_v18, %v827_v61  ;;  %v927_v61 = vmul.f32 %v1814_v0, %v1814_v0  ;;  %v1045_v11 = vsel %vm670_vm3, %v925_v51, 0.0 }
 0x14b   :  { %v928_v62 = vmul.f32 %v1853_v37, %v1853_v37  ;;  %v856_v0 = vsel %vm670_vm3, %v1873_v56, 0.0 }
 0x14c   :  { %v831_v19 = vadd.f32 %v830_v63, %v829_v3  ;;  %v1026_v9 = vadd.f32 %v1025_v2, %v1024_v1  ;;  %v1047_v1 = vsel %vm670_vm3, %v926_v58, 0.0  ;;  %v854_v3 = vsel %vm670_vm3, %v1853_v37, 0.0 }
 0x14d   :  { %v1051_v6 = vsel %vm670_vm3, %v928_v62, 0.0  ;;  %v858_v37 = vsel %vm670_vm3, %v1842_v31, 0.0 }
 0x14e   :  { %v1028_v7 = vadd.f32 %v1027_v5, %v1026_v9  ;;  %v833_v13 = vadd.f32 %v832_v14, %v831_v19  ;;  %v1049_v5 = vsel %vm670_vm3, %v927_v61, 0.0  ;;  %v929_v19 = vmul.f32 %v1873_v56, %v1873_v56 }
 0x14f   :  { %v930_v14 = vmul.f32 %v1842_v31, %v1842_v31 }
 0x150   :  { %v835_v22 = vadd.f32 %v834_v41, %v833_v13  ;;  %v1030_v23 = vadd.f32 %v1029_v20, %v1028_v7  ;;  %v931_v41 = vmul.f32 %v1866_v46, %v1866_v46  ;;  %v1053_v15 = vsel %vm670_vm3, %v929_v19, 0.0 }
 0x152   :  { %v1032_v26 = vadd.f32 %v1031_v16, %v1030_v23  ;;  %v837_v36 = vadd.f32 %v836_v55, %v835_v22  ;;  %v1055_v22 = vsel %vm670_vm3, %v930_v14, 0.0  ;;  %v860_v23 = vsel %vm670_vm3, %v1866_v46, 0.0 }
 0x153   :  { %v1057_v56 = vsel %vm670_vm3, %v931_v41, 0.0 }
 0x154   :  { %v839_v29 = vadd.f32 %v838_v25, %v837_v36  ;;  %v1034_v30 = vadd.f32 %v1033_v39, %v1032_v26 }
 0x156   :  { %v1036_v33 = vadd.f32 %v1035_v47, %v1034_v30  ;;  %v841_v49 = vadd.f32 %v840_v50, %v839_v29 }
 0x158   :  { %v843_v38 = vadd.f32 %v842_v17, %v841_v49  ;;  %v1038_v40 = vadd.f32 %v1037_v54, %v1036_v33 }
 0x15a   :  { %v1040_v43 = vadd.f32 %v1039_v45, %v1038_v40  ;;  %v845_v10 = vadd.f32 %v844_v27, %v843_v38 }
 0x15c   :  { %v847_v57 = vadd.f32 %v846_v42, %v845_v10  ;;  %v1042_v8 = vadd.f32 %v1041_v48, %v1040_v43 }
 0x15e   :  { %v1044_v52 = vadd.f32 %v1043_v44, %v1042_v8  ;;  %v849_v60 = vadd.f32 %v848_v24, %v847_v57 }
 0x160   :  { %v851_v18 = vadd.f32 %v850_v59, %v849_v60  ;;  %v1046_v63 = vadd.f32 %v1045_v11, %v1044_v52 }
 0x162   :  { %v1048_v2 = vadd.f32 %v1047_v1, %v1046_v63  ;;  %v853_v53 = vadd.f32 %v852_v4, %v851_v18 }
 0x164   :  { %v855_v9 = vadd.f32 %v854_v3, %v853_v53  ;;  %v1050_v12 = vadd.f32 %v1049_v5, %v1048_v2 }
 0x166   :  { %v1052_v7 = vadd.f32 %v1051_v6, %v1050_v12  ;;  %v857_v13 = vadd.f32 %v856_v0, %v855_v9 }
 0x168   :  { %v859_v20 = vadd.f32 %v858_v37, %v857_v13  ;;  %v1054_v21 = vadd.f32 %v1053_v15, %v1052_v7 }
 0x16a   :  { %v861_v16 = vadd.f32 %v860_v23, %v859_v20  ;;  %v1056_v55 = vadd.f32 %v1055_v22, %v1054_v21 }
 0x16c   :  { %v862_v25 = vrot.slane %v861_v16, 4  ;;  %v1058_v26 = vadd.f32 %v1057_v56, %v1056_v55 }
 0x16e   :  { %v863_v36 = vadd.f32 %v862_v25, %v861_v16  ;;  %v1059_v31 = vrot.slane %v1058_v26, 4 }
 0x170   :  { %v864_v39 = vrot.slane %v863_v36, 2  ;;  %v1060_v47 = vadd.f32 %v1059_v31, %v1058_v26 }
 0x172   :  { %v865_v28 = vadd.f32 %v864_v39, %v863_v36  ;;  %v1061_v29 = vrot.slane %v1060_v47, 2 }
 0x174   :  { %v866_v30 = vrot.slane %v865_v28, 1  ;;  %v1062_v32 = vadd.f32 %v1061_v29, %v1060_v47 }
 0x176   :  { %v1063_v50 = vrot.slane %v1062_v32, 1  ;;  %v867_v33 = vadd.f32 %v866_v30, %v865_v28 }
 0x178   :  { %v1064_v49 = vadd.f32 %v1063_v50, %v1062_v32 }
 0x17a   :  { %v1066_v46 = vsel %vm1065_vm4, %v867_v33, %v1064_v49 }
 0x17b   :  { %1068 = vst.msk [vmem:[%s2051_s3] sm:$0x3] %vm1067_vm5, %v1066_v46 }

// kernel: discriminator_forward.12
= control target key start
LH: loop header
LB: loop body
LE: loop exit
PB: predicated region body
PF: predicated region fallthrough
CT: control target
= control target key end

     0   :  { %s407_s0 = inlined_call_operand.vmem [shape: f32[128,128], index: 0, kind: input, shape index: {}]   ;;  %s408_s1 = inlined_call_operand.vmem [shape: f32[1,128], index: 1, kind: input, shape index: {}]   ;;  %s409_s2 = inlined_call_operand.vmem [shape: f32[1,128], index: 2, kind: input, shape index: {}]   ;;  %s410_s3 = inlined_call_operand.vmem [shape: bf16[128,128], index: 3, kind: output, shape index: {}]  }
   0x1   :  { %v14_v0 = vld [vmem:[%s407_s0] sm:$0xff]  ;;  %v15_v1 = vld [vmem:[%s407_s0 + $0x8] sm:$0xff]  ;;  %v16_v6 = vld [vmem:[%s407_s0 + $0x10] sm:$0xff] }
   0x2   :  { %v302_v2 = vld [vmem:[%s408_s1] ss:$0 sm:$0xff]  ;;  %v17_v7 = vld [vmem:[%s407_s0 + $0x18] sm:$0xff]  ;;  %v19_v11 = vld [vmem:[%s407_s0 + $0x28] sm:$0xff] }
   0x3   :  { %v37_v3 = vmul.f32 %v302_v2, %v14_v0  ;;  %v38_v4 = vmul.f32 %v302_v2, %v15_v1  ;;  %v309_v5 = vld [vmem:[%s409_s2] ss:$0 sm:$0xff]  ;;  %v39_v8 = vmul.f32 %v302_v2, %v16_v6  ;;  %v40_v9 = vmul.f32 %v302_v2, %v17_v7  ;;  %v20_v12 = vld [vmem:[%s407_s0 + $0x30] sm:$0xff]  ;;  %v21_v17 = vld [vmem:[%s407_s0 + $0x38] sm:$0xff] }
   0x4   :  { %v18_v10 = vld [vmem:[%s407_s0 + $0x20] sm:$0xff]  ;;  %v42_v16 = vmul.f32 %v302_v2, %v19_v11  ;;  %v43_v20 = vmul.f32 %v302_v2, %v20_v12  ;;  %v44_v21 = vmul.f32 %v302_v2, %v21_v17  ;;  %v23_v35 = vld [vmem:[%s407_s0 + $0x48] sm:$0xff]  ;;  %v24_v40 = vld [vmem:[%s407_s0 + $0x50] sm:$0xff] }
   0x5   :  { %v60_v13 = vadd.f32 %v309_v5, %v37_v3  ;;  %v61_v14 = vadd.f32 %v309_v5, %v38_v4  ;;  %v41_v15 = vmul.f32 %v302_v2, %v18_v10  ;;  %v62_v18 = vadd.f32 %v309_v5, %v39_v8  ;;  %v22_v30 = vld [vmem:[%s407_s0 + $0x40] sm:$0xff]  ;;  %v25_v41 = vld [vmem:[%s407_s0 + $0x58] sm:$0xff]  ;;  %v27_v47 = vld [vmem:[%s407_s0 + $0x68] sm:$0xff] }
   0x6   :  { %v63_v19 = vadd.f32 %v309_v5, %v40_v9  ;;  %v65_v25 = vadd.f32 %v309_v5, %v42_v16  ;;  %v66_v28 = vadd.f32 %v309_v5, %v43_v20  ;;  %v67_v29 = vadd.f32 %v309_v5, %v44_v21  ;;  %v26_v46 = vld [vmem:[%s407_s0 + $0x60] sm:$0xff]  ;;  %v28_v52 = vld [vmem:[%s407_s0 + $0x70] sm:$0xff]  ;;  %v29_v57 = vld [vmem:[%s407_s0 + $0x78] sm:$0xff] }
   0x7   :  { %v76_v22 = vmul.f32 0.2, %v60_v13  ;;  %v77_v23 = vmul.f32 0.2, %v61_v14  ;;  %v64_v24 = vadd.f32 %v309_v5, %v41_v15  ;;  %v78_v26 = vmul.f32 0.2, %v62_v18 }
   0x8   :  { %v79_v27 = vmul.f32 0.2, %v63_v19  ;;  %v81_v34 = vmul.f32 0.2, %v65_v25  ;;  %v82_v38 = vmul.f32 0.2, %v66_v28  ;;  %v45_v45 = vmul.f32 %v302_v2, %v22_v30 }
   0x9   :  { %v92_v31 = vmax.f32 %v60_v13, %v76_v22  ;;  %v93_v32 = vmax.f32 %v61_v14, %v77_v23  ;;  %v80_v33 = vmul.f32 0.2, %v64_v24  ;;  %v94_v36 = vmax.f32 %v62_v18, %v78_v26 }
   0xa   :  { %v95_v37 = vmax.f32 %v63_v19, %v79_v27  ;;  %v83_v39 = vmul.f32 0.2, %v67_v29  ;;  %v97_v44 = vmax.f32 %v65_v25, %v81_v34  ;;  %v98_v49 = vmax.f32 %v66_v28, %v82_v38 }
   0xb   :  { %v229_v42 = vpack.c.bf16 %v93_v32, %v92_v31  ;;  %v96_v43 = vmax.f32 %v64_v24, %v80_v33  ;;  %v46_v51 = vmul.f32 %v302_v2, %v23_v35  ;;  %v68_v54 = vadd.f32 %v309_v5, %v45_v45 }
   0xc   :  { %v234_v48 = vpack.c.bf16 %v95_v37, %v94_v36  ;;  %v99_v50 = vmax.f32 %v67_v29, %v83_v39  ;;  %v47_v55 = vmul.f32 %v302_v2, %v24_v40  ;;  %v48_v56 = vmul.f32 %v302_v2, %v25_v41 }
   0xd   :  { %230 = vst [vmem:[%s410_s3] sm:$0xff] %v229_v42   ;;  %v239_v53 = vpack.c.bf16 %v97_v44, %v96_v43  ;;  %v69_v59 = vadd.f32 %v309_v5, %v46_v51  ;;  %v49_v60 = vmul.f32 %v302_v2, %v26_v46  ;;  %v50_v61 = vmul.f32 %v302_v2, %v27_v47 }
   0xe   :  { %266 = vst [vmem:[%s410_s3 + $0x8] sm:$0xff] %v234_v48   ;;  %v244_v58 = vpack.c.bf16 %v99_v50, %v98_v49  ;;  %v84_v62 = vmul.f32 0.2, %v68_v54  ;;  %v70_v63 = vadd.f32 %v309_v5, %v47_v55  ;;  %v71_v0 = vadd.f32 %v309_v5, %v48_v56 }
   0xf   :  { %267 = vst [vmem:[%s410_s3 + $0x10] sm:$0xff] %v239_v53   ;;  %v51_v1 = vmul.f32 %v302_v2, %v28_v52  ;;  %v85_v3 = vmul.f32 0.2, %v69_v59  ;;  %v72_v4 = vadd.f32 %v309_v5, %v49_v60  ;;  %v73_v6 = vadd.f32 %v309_v5, %v50_v61 }
  0x10   :  { %268 = vst [vmem:[%s410_s3 + $0x18] sm:$0xff] %v244_v58   ;;  %v52_v7 = vmul.f32 %v302_v2, %v29_v57  ;;  %v100_v8 = vmax.f32 %v68_v54, %v84_v62  ;;  %v86_v9 = vmul.f32 0.2, %v70_v63  ;;  %v87_v10 = vmul.f32 0.2, %v71_v0 }
  0x11   :  { %v74_v11 = vadd.f32 %v309_v5, %v51_v1  ;;  %v101_v12 = vmax.f32 %v69_v59, %v85_v3  ;;  %v88_v13 = vmul.f32 0.2, %v72_v4  ;;  %v89_v14 = vmul.f32 0.2, %v73_v6 }
  0x12   :  { %v75_v15 = vadd.f32 %v309_v5, %v52_v7  ;;  %v102_v16 = vmax.f32 %v70_v63, %v86_v9  ;;  %v103_v17 = vmax.f32 %v71_v0, %v87_v10 }
  0x13   :  { %v90_v18 = vmul.f32 0.2, %v74_v11  ;;  %v249_v19 = vpack.c.bf16 %v101_v12, %v100_v8  ;;  %v104_v20 = vmax.f32 %v72_v4, %v88_v13  ;;  %v105_v21 = vmax.f32 %v73_v6, %v89_v14 }
  0x14   :  { %v91_v22 = vmul.f32 0.2, %v75_v15  ;;  %v254_v23 = vpack.c.bf16 %v103_v17, %v102_v16 }
  0x15   :  { %v106_v24 = vmax.f32 %v74_v11, %v90_v18  ;;  %269 = vst [vmem:[%s410_s3 + $0x20] sm:$0xff] %v249_v19   ;;  %v259_v2 = vpack.c.bf16 %v105_v21, %v104_v20 }
  0x16   :  { %v107_v25 = vmax.f32 %v75_v15, %v91_v22  ;;  %270 = vst [vmem:[%s410_s3 + $0x28] sm:$0xff] %v254_v23  }
  0x17   :  { %271 = vst [vmem:[%s410_s3 + $0x30] sm:$0xff] %v259_v2  }
  0x18   :  { %v264_v5 = vpack.c.bf16 %v107_v25, %v106_v24 }
  0x1a   :  { %272 = vst [vmem:[%s410_s3 + $0x38] sm:$0xff] %v264_v5  }

// kernel: discriminator_forward.11
= control target key start
LH: loop header
LB: loop body
LE: loop exit
PB: predicated region body
PF: predicated region fallthrough
CT: control target
= control target key end

     0   :  { %vm758_vm0 = vcmask 261120   ;;  %vm1245_vm1 = vcmask 1040384   ;;  %s2183_s1 = inlined_call_operand.vmem [shape: bf16[800,128], index: 1, kind: input, shape index: {}]   ;;  %s2184_s0 = inlined_call_operand.vmem [shape: bf16[128,800], index: 0, kind: input, shape index: {}]   ;;  %s2185_s2 = inlined_call_operand.vmem [shape: f32[128,128], index: 2, kind: output, shape index: {0}]   ;;  %s2186_s3 = inlined_call_operand.vmem [shape: f32[1,2,128], index: 3, kind: output, shape index: {1}]  }
   0x1   :  { %v1608_v0 = vld [vmem:[%s2183_s1 + $0x40] sm:$0xff]   ;;  %v1612_v4 = vld [vmem:[%s2183_s1 + $0x48] sm:$0xff]   ;;  %v1616_v8 = vld [vmem:[%s2183_s1 + $0x50] sm:$0xff]  }
   0x2   :  { %v1609_v1 = vld [vmem:[%s2183_s1 + $0xc0] sm:$0xff]   ;;  %1370 = vmatprep.subr.bf16.mxu0 %v1608_v0  ;;  %v1613_v5 = vld [vmem:[%s2183_s1 + $0xc8] sm:$0xff]   ;;  %v1617_v9 = vld [vmem:[%s2183_s1 + $0xd0] sm:$0xff]  }
   0x3   :  { %v1610_v2 = vld [vmem:[%s2183_s1] sm:$0xff]   ;;  %1434 = vmatprep.subr.bf16.mxu1 %v1609_v1  ;;  %v1614_v6 = vld [vmem:[%s2183_s1 + $0x8] sm:$0xff]   ;;  %v1618_v10 = vld [vmem:[%s2183_s1 + $0x10] sm:$0xff]  }
   0x4   :  { %v1611_v3 = vld [vmem:[%s2183_s1 + $0x80] sm:$0xff]   ;;  %1371 = vmatpush3.bf16.msra.mxu0 %v1610_v2  ;;  %v1615_v7 = vld [vmem:[%s2183_s1 + $0x88] sm:$0xff]   ;;  %v1619_v11 = vld [vmem:[%s2183_s1 + $0x90] sm:$0xff]  }
   0x5   :  { %1435 = vmatpush3.bf16.msra.mxu1 %v1611_v3  ;;  %1372 = vmatprep.subr.bf16.mxu0 %v1612_v4  ;;  %v1620_v12 = vld [vmem:[%s2183_s1 + $0x58] sm:$0xff]   ;;  %v1624_v16 = vld [vmem:[%s2183_s1 + $0x60] sm:$0xff]   ;;  %v1628_v20 = vld [vmem:[%s2183_s1 + $0x68] sm:$0xff]  }
   0x6   :  { %1436 = vmatprep.subr.bf16.mxu1 %v1613_v5  ;;  %v1621_v13 = vld [vmem:[%s2183_s1 + $0xd8] sm:$0xff]   ;;  %v1625_v17 = vld [vmem:[%s2183_s1 + $0xe0] sm:$0xff]   ;;  %v1629_v21 = vld [vmem:[%s2183_s1 + $0xe8] sm:$0xff]  }
   0x7   :  { %v1622_v14 = vld [vmem:[%s2183_s1 + $0x18] sm:$0xff]   ;;  %v1626_v18 = vld [vmem:[%s2183_s1 + $0x20] sm:$0xff]   ;;  %v1630_v22 = vld [vmem:[%s2183_s1 + $0x28] sm:$0xff]  }
   0x8   :  { %1373 = vmatpush3.bf16.msra.mxu0 %v1614_v6  ;;  %v1623_v15 = vld [vmem:[%s2183_s1 + $0x98] sm:$0xff]   ;;  %v1627_v19 = vld [vmem:[%s2183_s1 + $0xa0] sm:$0xff]   ;;  %v1631_v23 = vld [vmem:[%s2183_s1 + $0xa8] sm:$0xff]  }
   0x9   :  { %1437 = vmatpush3.bf16.msra.mxu1 %v1615_v7  ;;  %1374 = vmatprep.subr.bf16.mxu0 %v1616_v8  ;;  %v1632_v24 = vld [vmem:[%s2183_s1 + $0x70] sm:$0xff]   ;;  %v1636_v28 = vld [vmem:[%s2183_s1 + $0x78] sm:$0xff]   ;;  %v1642_v33 = vld [vmem:[%s2184_s0 + $0x4] ss:$28 sps:$4 sm:$0xff]  }
   0xa   :  { %1438 = vmatprep.subr.bf16.mxu1 %v1617_v9  ;;  %v1633_v25 = vld [vmem:[%s2183_s1 + $0xf0] sm:$0xff]   ;;  %v1637_v29 = vld [vmem:[%s2183_s1 + $0xf8] sm:$0xff]   ;;  %v1643_v34 = vld [vmem:[%s2184_s0 + $0x8] ss:$28 sps:$4 sm:$0xff]   ;;  %815 = vmatprep.mubr.bf16.mxu0 %v1642_v33 }
   0xb   :  { %v1634_v26 = vld [vmem:[%s2183_s1 + $0x30] sm:$0xff]   ;;  %v1638_v30 = vld [vmem:[%s2183_s1 + $0x38] sm:$0xff]   ;;  %v1645_v35 = vld [vmem:[%s2184_s0 + $0xc] ss:$28 sps:$4 sm:$0xff]  }
   0xc   :  { %1375 = vmatpush3.bf16.msra.mxu0 %v1618_v10  ;;  %v1635_v27 = vld [vmem:[%s2183_s1 + $0xb0] sm:$0xff]   ;;  %v1639_v31 = vld [vmem:[%s2183_s1 + $0xb8] sm:$0xff]   ;;  %v1646_v36 = vld [vmem:[%s2183_s1 + $0x140] sm:$0xff]   ;;  %912 = vmatprep.mubr.bf16.mxu1 %v1645_v35 }
   0xd   :  { %1439 = vmatpush3.bf16.msra.mxu1 %v1619_v11  ;;  %1376 = vmatprep.subr.bf16.mxu0 %v1620_v12  ;;  %v1640_v32 = vld [vmem:[%s2184_s0] ss:$28 sps:$4 sm:$0xff]   ;;  %v1652_v40 = vld [vmem:[%s2184_s0 + $0x38] ss:$28 sps:$4 sm:$0xff]   ;;  %v1654_v42 = vld [vmem:[%s2183_s1 + $0x148] sm:$0xff]  }
   0xe   :  { %1440 = vmatprep.subr.bf16.mxu1 %v1621_v13  ;;  %v1647_v37 = vld [vmem:[%s2183_s1 + $0x100] sm:$0xff]   ;;  %v1648_v38 = vld [vmem:[%s2184_s0 + $0x3c] ss:$28 sps:$4 sm:$0xff]   ;;  %v1655_v43 = vld [vmem:[%s2183_s1 + $0x108] sm:$0xff]  }
   0xf   :  { %v1650_v39 = vld [vmem:[%s2184_s0 + $0x44] ss:$28 sps:$4 sm:$0xff]   ;;  %v1656_v44 = vld [vmem:[%s2184_s0 + $0x74] ss:$28 sps:$4 sm:$0xff]   ;;  %v1658_v45 = vld [vmem:[%s2184_s0 + $0x7c] ss:$28 sps:$4 sm:$0xff]  }
  0x10   :  { %1377 = vmatpush3.bf16.msra.mxu0 %v1622_v14  ;;  %v1653_v41 = vld [vmem:[%s2184_s0 + $0x40] ss:$28 sps:$4 sm:$0xff]   ;;  %v1662_v46 = vld [vmem:[%s2183_s1 + $0x150] sm:$0xff]   ;;  %v1664_v50 = vld [vmem:[%s2184_s0 + $0xac] ss:$28 sps:$4 sm:$0xff]  }
  0x11   :  { %1441 = vmatpush3.bf16.msra.mxu1 %v1623_v15  ;;  %1378 = vmatprep.subr.bf16.mxu0 %v1624_v16  ;;  %v1663_v47 = vld [vmem:[%s2183_s1 + $0x110] sm:$0xff]   ;;  %v1670_v52 = vld [vmem:[%s2183_s1 + $0x158] sm:$0xff]   ;;  %v1678_v54 = vld [vmem:[%s2183_s1 + $0x160] sm:$0xff]  }
  0x12   :  { %1442 = vmatprep.subr.bf16.mxu1 %v1625_v17  ;;  %v1660_v48 = vld [vmem:[%s2184_s0 + $0x70] ss:$28 sps:$4 sm:$0xff]   ;;  %v1661_v49 = vld [vmem:[%s2184_s0 + $0x78] ss:$28 sps:$4 sm:$0xff]   ;;  %v1679_v55 = vld [vmem:[%s2183_s1 + $0x120] sm:$0xff]  }
  0x13   :  { %v1666_v51 = vld [vmem:[%s2184_s0 + $0xb4] ss:$28 sps:$4 sm:$0xff]   ;;  %v1671_v53 = vld [vmem:[%s2183_s1 + $0x118] sm:$0xff]   ;;  %v1668_v56 = vld [vmem:[%s2184_s0 + $0xa8] ss:$28 sps:$4 sm:$0xff]  }
  0x14   :  { %1379 = vmatpush3.bf16.msra.mxu0 %v1626_v18  ;;  %v1669_v57 = vld [vmem:[%s2184_s0 + $0xb0] ss:$28 sps:$4 sm:$0xff]   ;;  %v1672_v58 = vld [vmem:[%s2184_s0 + $0xe4] ss:$28 sps:$4 sm:$0xff]   ;;  %v1680_v2 = vld [vmem:[%s2184_s0 + $0x11c] ss:$28 sps:$4 sm:$0xff]  }
  0x15   :  { %1443 = vmatpush3.bf16.msra.mxu1 %v1627_v19  ;;  %1380 = vmatprep.subr.bf16.mxu0 %v1628_v20  ;;  %v1674_v59 = vld [vmem:[%s2184_s0 + $0xec] ss:$28 sps:$4 sm:$0xff]   ;;  %v1676_v62 = vld [vmem:[%s2184_s0 + $0xe0] ss:$28 sps:$4 sm:$0xff]   ;;  %v1694_v0 = vld [vmem:[%s2183_s1 + $0x170] sm:$0xff]  }
  0x16   :  { %1444 = vmatprep.subr.bf16.mxu1 %v1629_v21  ;;  %v1686_v60 = vld [vmem:[%s2183_s1 + $0x168] sm:$0xff]   ;;  %v1695_v1 = vld [vmem:[%s2183_s1 + $0x130] sm:$0xff]   ;;  %v1682_v3 = vld [vmem:[%s2184_s0 + $0x124] ss:$28 sps:$4 sm:$0xff]  }
  0x17   :  { %v1687_v61 = vld [vmem:[%s2183_s1 + $0x128] sm:$0xff]   ;;  %v1702_v4 = vld [vmem:[%s2183_s1 + $0x178] sm:$0xff]   ;;  %v1688_v8 = vld [vmem:[%s2184_s0 + $0x154] ss:$28 sps:$4 sm:$0xff]  }
  0x18   :  { %1381 = vmatpush3.bf16.msra.mxu0 %v1630_v22  ;;  %v1677_v63 = vld [vmem:[%s2184_s0 + $0xe8] ss:$28 sps:$4 sm:$0xff]   ;;  %v1703_v5 = vld [vmem:[%s2183_s1 + $0x138] sm:$0xff]   ;;  %v1692_v11 = vld [vmem:[%s2184_s0 + $0x150] ss:$28 sps:$4 sm:$0xff]  }
  0x19   :  { %1445 = vmatpush3.bf16.msra.mxu1 %v1631_v23  ;;  %1382 = vmatprep.subr.bf16.mxu0 %v1632_v24  ;;  %v1684_v6 = vld [vmem:[%s2184_s0 + $0x118] ss:$28 sps:$4 sm:$0xff]   ;;  %v1685_v7 = vld [vmem:[%s2184_s0 + $0x120] ss:$28 sps:$4 sm:$0xff]   ;;  %v1696_v13 = vld [vmem:[%s2184_s0 + $0x18c] ss:$28 sps:$4 sm:$0xff]  }
  0x1a   :  { %1446 = vmatprep.subr.bf16.mxu1 %v1633_v25  ;;  %v1690_v9 = vld [vmem:[%s2184_s0 + $0x15c] ss:$28 sps:$4 sm:$0xff]   ;;  %v1716_v10 = vld [vmem:[%s2183_s1 + $0x180] sm:$0xff]   ;;  %v1698_v14 = vld [vmem:[%s2184_s0 + $0x194] ss:$28 sps:$4 sm:$0xff]  }
  0x1b   :  { %v1693_v12 = vld [vmem:[%s2184_s0 + $0x158] ss:$28 sps:$4 sm:$0xff]   ;;  %v1700_v15 = vld [vmem:[%s2184_s0 + $0x188] ss:$28 sps:$4 sm:$0xff]   ;;  %v1701_v16 = vld [vmem:[%s2184_s0 + $0x190] ss:$28 sps:$4 sm:$0xff]  }
  0x1c   :  { %1383 = vmatpush3.bf16.msra.mxu0 %v1634_v26  ;;  %v1706_v17 = vld [vmem:[%s2184_s0 + $0x14] ss:$28 sps:$4 sm:$0xff]   ;;  %v1709_v18 = vld [vmem:[%s2184_s0 + $0x164] ss:$28 sps:$4 sm:$0xff]   ;;  %v1710_v21 = vld [vmem:[%s2184_s0 + $0x4c] ss:$28 sps:$4 sm:$0xff]  }
  0x1d   :  { %1447 = vmatpush3.bf16.msra.mxu1 %v1635_v27  ;;  %1384 = vmatprep.subr.bf16.mxu0 %v1636_v28  ;;  %v1704_v19 = vld [vmem:[%s2184_s0 + $0x10] ss:$28 sps:$4 sm:$0xff]   ;;  %v1707_v20 = vld [vmem:[%s2184_s0 + $0x160] ss:$28 sps:$4 sm:$0xff]   ;;  %v1714_v24 = vld [vmem:[%s2184_s0 + $0x48] ss:$28 sps:$4 sm:$0xff]  }
  0x1e   :  { %1448 = vmatprep.subr.bf16.mxu1 %v1637_v29  ;;  %v1712_v22 = vld [vmem:[%s2184_s0 + $0x19c] ss:$28 sps:$4 sm:$0xff]   ;;  %v1717_v23 = vld [vmem:[%s2183_s1 + $0x188] sm:$0xff]   ;;  %v1718_v26 = vld [vmem:[%s2184_s0 + $0x84] ss:$28 sps:$4 sm:$0xff]  }
  0x1f   :  { %v1715_v25 = vld [vmem:[%s2184_s0 + $0x198] ss:$28 sps:$4 sm:$0xff]   ;;  %v1721_v28 = vld [vmem:[%s2184_s0 + $0x80] ss:$28 sps:$4 sm:$0xff]   ;;  %v1722_v29 = vld [vmem:[%s2184_s0 + $0x50] ss:$28 sps:$4 sm:$0xff]  }
  0x20   :  { %1385 = vmatpush3.bf16.msra.mxu0 %v1638_v30  ;;  %v1720_v27 = vld [vmem:[%s2184_s0 + $0x18] ss:$28 sps:$4 sm:$0xff]   ;;  %v1727_v33 = vld [vmem:[%s2184_s0 + $0xc0] ss:$28 sps:$4 sm:$0xff]  }
  0x21   :  { %1449 = vmatpush3.bf16.msra.mxu1 %v1639_v31  ;;  %1498 = vmatprep.subr.bf16.mxu0 %v1646_v36  ;;  %v1723_v30 = vld [vmem:[%s2184_s0 + $0xbc] ss:$28 sps:$4 sm:$0xff]   ;;  %v1725_v31 = vld [vmem:[%s2184_s0 + $0x88] ss:$28 sps:$4 sm:$0xff]  }
  0x22   :  { %1592 = vmatprep.subr.bf16.mxu1 %v1646_v36  ;;  %v1730_v35 = vld [vmem:[%s2184_s0 + $0xf8] ss:$28 sps:$4 sm:$0xff]   ;;  %v1731_v36 = vld [vmem:[%s2184_s0 + $0xf0] ss:$28 sps:$4 sm:$0xff]  }
  0x23   :  { %816 = vmatmul.mubr.bf16.vlgmr.msra.gmra.mrb[0].mxu0 %v1640_v32  ;;  %v1726_v32 = vld [vmem:[%s2184_s0 + $0xb8] ss:$28 sps:$4 sm:$0xff]  }
  0x24   :  { %913 = vmatmul.mubr.bf16.vlgmr.msra.gmra.mrb[0].mxu1 %v1643_v34  ;;  %1499 = vmatpush3.bf16.msra.mxu0 %v1647_v37  ;;  %v1728_v34 = vld [vmem:[%s2184_s0 + $0xf4] ss:$28 sps:$4 sm:$0xff]  }
  0x25   :  { %823 = vmatprep.mubr.bf16.mxu0 %v1648_v38  ;;  %1600 = vmatpush3.bf16.msra.mxu1 %v1647_v37  ;;  %v1732_v37 = vld [vmem:[%s2184_s0 + $0x130] ss:$28 sps:$4 sm:$0xff]  }
  0x26   :  { %920 = vmatprep.mubr.bf16.mxu1 %v1650_v39  ;;  %1500 = vmatprep.subr.bf16.mxu0 %v1654_v42  ;;  %v1733_v38 = vld [vmem:[%s2184_s0 + $0x12c] ss:$28 sps:$4 sm:$0xff]  }
  0x27   :  { %1593 = vmatprep.subr.bf16.mxu1 %v1654_v42  ;;  %v1735_v39 = vld [vmem:[%s2184_s0 + $0x168] ss:$28 sps:$4 sm:$0xff]  }
  0x28   :  { %1501 = vmatpush3.bf16.msra.mxu0 %v1655_v43 }
  0x29   :  { %1601 = vmatpush3.bf16.msra.mxu1 %v1655_v43  ;;  %1502 = vmatprep.subr.bf16.mxu0 %v1662_v46 }
  0x2a   :  { %1594 = vmatprep.subr.bf16.mxu1 %v1662_v46 }
  0x2b   :  { %824 = vmatmul.mubr.bf16.gmra.mrb[4].mxu0 %v1652_v40  ;;  %v1736_v40 = vld [vmem:[%s2184_s0 + $0x128] ss:$28 sps:$4 sm:$0xff]  }
  0x2c   :  { %921 = vmatmul.mubr.bf16.gmra.mrb[4].mxu1 %v1653_v41  ;;  %831 = vmatprep.mubr.bf16.mxu0 %v1656_v44  ;;  %v1737_v41 = vld [vmem:[%s2184_s0 + $0x1a0] ss:$28 sps:$4 sm:$0xff]  }
  0x2d   :  { %928 = vmatprep.mubr.bf16.mxu1 %v1658_v45  ;;  %1503 = vmatpush3.bf16.msra.mxu0 %v1663_v47 }
  0x2e   :  { %1602 = vmatpush3.bf16.msra.mxu1 %v1663_v47  ;;  %1504 = vmatprep.subr.bf16.mxu0 %v1670_v52 }
  0x2f   :  { %1595 = vmatprep.subr.bf16.mxu1 %v1670_v52 }
  0x31   :  { %1505 = vmatpush3.bf16.msra.mxu0 %v1671_v53 }
  0x32   :  { %1603 = vmatpush3.bf16.msra.mxu1 %v1671_v53  ;;  %1506 = vmatprep.subr.bf16.mxu0 %v1678_v54 }
  0x33   :  { %832 = vmatmul.mubr.bf16.gmra.mrb[8].mxu0 %v1660_v48  ;;  %1596 = vmatprep.subr.bf16.mxu1 %v1678_v54 }
  0x34   :  { %929 = vmatmul.mubr.bf16.gmra.mrb[8].mxu1 %v1661_v49  ;;  %839 = vmatprep.mubr.bf16.mxu0 %v1664_v50 }
  0x35   :  { %936 = vmatprep.mubr.bf16.mxu1 %v1666_v51  ;;  %1507 = vmatpush3.bf16.msra.mxu0 %v1679_v55 }
  0x36   :  { %1604 = vmatpush3.bf16.msra.mxu1 %v1679_v55  ;;  %1508 = vmatprep.subr.bf16.mxu0 %v1686_v60 }
  0x37   :  { %1597 = vmatprep.subr.bf16.mxu1 %v1686_v60 }
  0x39   :  { %1509 = vmatpush3.bf16.msra.mxu0 %v1687_v61 }
  0x3a   :  { %1605 = vmatpush3.bf16.msra.mxu1 %v1687_v61  ;;  %1510 = vmatprep.subr.bf16.mxu0 %v1694_v0 }
  0x3b   :  { %840 = vmatmul.mubr.bf16.gmra.mrb[12].mxu0 %v1668_v56  ;;  %1598 = vmatprep.subr.bf16.mxu1 %v1694_v0 }
  0x3c   :  { %937 = vmatmul.mubr.bf16.gmra.mrb[12].mxu1 %v1669_v57  ;;  %847 = vmatprep.mubr.bf16.mxu0 %v1672_v58 }
  0x3d   :  { %944 = vmatprep.mubr.bf16.mxu1 %v1674_v59  ;;  %1511 = vmatpush3.bf16.msra.mxu0 %v1695_v1 }
  0x3e   :  { %1606 = vmatpush3.bf16.msra.mxu1 %v1695_v1  ;;  %1512 = vmatprep.subr.bf16.mxu0 %v1702_v4 }
  0x3f   :  { %1599 = vmatprep.subr.bf16.mxu1 %v1702_v4 }
  0x41   :  { %1513 = vmatpush3.bf16.msra.mxu0 %v1703_v5 }
  0x42   :  { %1607 = vmatpush3.bf16.msra.mxu1 %v1703_v5 }
  0x43   :  { %848 = vmatmul.mubr.bf16.gmra.mrb[16].mxu0 %v1676_v62  ;;  %1572 = vmatprep.subr.bf16.mxu1 %v1716_v10 }
  0x44   :  { %945 = vmatmul.mubr.bf16.gmra.mrb[16].mxu1 %v1677_v63  ;;  %855 = vmatprep.mubr.bf16.mxu0 %v1680_v2 }
  0x45   :  { %952 = vmatprep.mubr.bf16.mxu1 %v1682_v3 }
  0x4b   :  { %856 = vmatmul.mubr.bf16.gmra.mrb[20].mxu0 %v1684_v6 }
  0x4c   :  { %953 = vmatmul.mubr.bf16.gmra.mrb[20].mxu1 %v1685_v7  ;;  %863 = vmatprep.mubr.bf16.mxu0 %v1688_v8 }
  0x4d   :  { %960 = vmatprep.mubr.bf16.mxu1 %v1690_v9 }
  0x53   :  { %864 = vmatmul.mubr.bf16.gmra.mrb[24].mxu0 %v1692_v11 }
  0x54   :  { %961 = vmatmul.mubr.bf16.gmra.mrb[24].mxu1 %v1693_v12  ;;  %871 = vmatprep.mubr.bf16.mxu0 %v1696_v13 }
  0x55   :  { %968 = vmatprep.mubr.bf16.mxu1 %v1698_v14 }
  0x5b   :  { %872 = vmatmul.mubr.bf16.gmra.mrb[28].mxu0 %v1700_v15 }
  0x5c   :  { %969 = vmatmul.mubr.bf16.gmra.mrb[28].mxu1 %v1701_v16  ;;  %1009 = vmatprep.mubr.bf16.mxu0 %v1706_v17 }
  0x5d   :  { %1057 = vmatprep.mubr.bf16.mxu1 %v1709_v18 }
  0x63   :  { %1010 = vmatmul.mubr.bf16.vlgmr.msra.gmra.mrb[32].mxu0 %v1704_v19 }
  0x64   :  { %1058 = vmatmul.mubr.bf16.vlgmr.msra.gmra.mrb[32].mxu1 %v1707_v20  ;;  %1017 = vmatprep.mubr.bf16.mxu0 %v1710_v21 }
  0x65   :  { %1065 = vmatprep.mubr.bf16.mxu1 %v1712_v22  ;;  %1573 = vmatpush3.bf16.msra.mxu1 %v1716_v10 }
  0x66   :  { %1574 = vmatprep.subr.bf16.mxu1 %v1717_v23 }
  0x69   :  { %1575 = vmatpush3.bf16.msra.mxu1 %v1717_v23 }
  0x6b   :  { %1018 = vmatmul.mubr.bf16.gmra.mrb[36].mxu0 %v1714_v24 }
  0x6c   :  { %1066 = vmatmul.mubr.bf16.gmra.mrb[36].mxu1 %v1715_v25  ;;  %1025 = vmatprep.mubr.bf16.mxu0 %v1718_v26 }
  0x6d   :  { %1576 = vmatprep.mubr.msk.bf16.mxu1 %vm758_vm0, %v1720_v27 }
  0x73   :  { %1026 = vmatmul.mubr.bf16.gmra.mrb[40].mxu0 %v1721_v28 }
  0x74   :  { %1577 = vmatmul.mubr.msk.bf16.vlgmr.msra.gmra.mrb[40].mxu1 %vm758_vm0, %v1722_v29  ;;  %1033 = vmatprep.mubr.bf16.mxu0 %v1723_v30 }
  0x75   :  { %1580 = vmatprep.mubr.msk.bf16.mxu1 %vm758_vm0, %v1725_v31 }
  0x7b   :  { %1034 = vmatmul.mubr.bf16.gmra.mrb[44].mxu0 %v1726_v32 }
  0x7c   :  { %1581 = vmatmul.mubr.msk.bf16.gmra.mrb[44].mxu1 %vm758_vm0, %v1727_v33  ;;  %1041 = vmatprep.mubr.bf16.mxu0 %v1728_v34 }
  0x7d   :  { %1584 = vmatprep.mubr.msk.bf16.mxu1 %vm758_vm0, %v1730_v35 }
  0x83   :  { %1042 = vmatmul.mubr.bf16.gmra.mrb[48].mxu0 %v1731_v36 }
  0x84   :  { %1585 = vmatmul.mubr.msk.bf16.gmra.mrb[48].mxu1 %vm758_vm0, %v1732_v37  ;;  %1049 = vmatprep.mubr.bf16.mxu0 %v1733_v38 }
  0x85   :  { %1588 = vmatprep.mubr.msk.bf16.mxu1 %vm758_vm0, %v1735_v39 }
  0x8b   :  { %1050 = vmatmul.mubr.bf16.gmra.mrb[52].mxu0 %v1736_v40 }
  0x8c   :  { %1589 = vmatmul.mubr.msk.bf16.gmra.mrb[52].mxu1 %vm758_vm0, %v1737_v41 }
  0xf6   :  { %v1386_v42 = vpop.f32.mrb[0].mxu0 }
  0xf7   :  { %v1450_v43 = vpop.f32.mrb[0].mxu1  ;;  %v1387_v44 = vpop.f32.mrb[1].mxu0 }
  0xf8   :  { %v1388_v45 = vadd.f32 %v1387_v44, %v1386_v42  ;;  %v1451_v46 = vpop.f32.mrb[1].mxu1  ;;  %v1389_v47 = vpop.f32.mrb[2].mxu0 }
  0xf9   :  { %v1452_v48 = vadd.f32 %v1451_v46, %v1450_v43  ;;  %v1453_v49 = vpop.f32.mrb[2].mxu1  ;;  %v1390_v50 = vpop.f32.mrb[3].mxu0 }
  0xfa   :  { %v1391_v51 = vadd.f32 %v1390_v50, %v1389_v47  ;;  %v1454_v52 = vpop.f32.mrb[3].mxu1 }
  0xfb   :  { %v2084_v53 = vadd.f32 %v1452_v48, %v1388_v45  ;;  %v1455_v54 = vadd.f32 %v1454_v52, %v1453_v49 }
  0xfd   :  { %v2086_v55 = vadd.f32 %v1455_v54, %v1391_v51 }
  0xfe   :  { %v1392_v56 = vpop.f32.mrb[4].mxu0 }
  0xff   :  { %v1456_v57 = vpop.f32.mrb[4].mxu1  ;;  %v1393_v58 = vpop.f32.mrb[5].mxu0 }
 0x100   :  { %v1394_v59 = vadd.f32 %v1393_v58, %v1392_v56  ;;  %v1457_v60 = vpop.f32.mrb[5].mxu1  ;;  %v1395_v61 = vpop.f32.mrb[6].mxu0 }
 0x101   :  { %v1458_v62 = vadd.f32 %v1457_v60, %v1456_v57  ;;  %v1459_v63 = vpop.f32.mrb[6].mxu1  ;;  %v1396_v0 = vpop.f32.mrb[7].mxu0 }
 0x102   :  { %v1397_v1 = vadd.f32 %v1396_v0, %v1395_v61  ;;  %v1460_v2 = vpop.f32.mrb[7].mxu1 }
 0x103   :  { %v2088_v3 = vadd.f32 %v1458_v62, %v1394_v59  ;;  %v1461_v4 = vadd.f32 %v1460_v2, %v1459_v63 }
 0x105   :  { %v2090_v5 = vadd.f32 %v1461_v4, %v1397_v1 }
 0x106   :  { %v1398_v6 = vpop.f32.mrb[8].mxu0 }
 0x107   :  { %v1462_v7 = vpop.f32.mrb[8].mxu1  ;;  %v1399_v8 = vpop.f32.mrb[9].mxu0 }
 0x108   :  { %v1400_v9 = vadd.f32 %v1399_v8, %v1398_v6  ;;  %v1463_v10 = vpop.f32.mrb[9].mxu1  ;;  %v1401_v11 = vpop.f32.mrb[10].mxu0 }
 0x109   :  { %v1464_v12 = vadd.f32 %v1463_v10, %v1462_v7  ;;  %v1465_v13 = vpop.f32.mrb[10].mxu1  ;;  %v1402_v14 = vpop.f32.mrb[11].mxu0 }
 0x10a   :  { %v1403_v15 = vadd.f32 %v1402_v14, %v1401_v11  ;;  %v1466_v16 = vpop.f32.mrb[11].mxu1 }
 0x10b   :  { %v2092_v17 = vadd.f32 %v1464_v12, %v1400_v9  ;;  %v1467_v18 = vadd.f32 %v1466_v16, %v1465_v13 }
 0x10d   :  { %v2094_v19 = vadd.f32 %v1467_v18, %v1403_v15 }
 0x10e   :  { %v1404_v20 = vpop.f32.mrb[12].mxu0 }
 0x10f   :  { %v1468_v21 = vpop.f32.mrb[12].mxu1  ;;  %v1405_v22 = vpop.f32.mrb[13].mxu0 }
 0x110   :  { %v1406_v23 = vadd.f32 %v1405_v22, %v1404_v20  ;;  %v1469_v24 = vpop.f32.mrb[13].mxu1  ;;  %v1407_v25 = vpop.f32.mrb[14].mxu0 }
 0x111   :  { %v1470_v26 = vadd.f32 %v1469_v24, %v1468_v21  ;;  %v1471_v27 = vpop.f32.mrb[14].mxu1  ;;  %v1408_v28 = vpop.f32.mrb[15].mxu0 }
 0x112   :  { %v1409_v29 = vadd.f32 %v1408_v28, %v1407_v25  ;;  %v1472_v30 = vpop.f32.mrb[15].mxu1 }
 0x113   :  { %v2096_v31 = vadd.f32 %v1470_v26, %v1406_v23  ;;  %v1473_v32 = vadd.f32 %v1472_v30, %v1471_v27 }
 0x115   :  { %v2098_v33 = vadd.f32 %v1473_v32, %v1409_v29 }
 0x116   :  { %v1410_v34 = vpop.f32.mrb[16].mxu0 }
 0x117   :  { %v1474_v35 = vpop.f32.mrb[16].mxu1  ;;  %v1411_v36 = vpop.f32.mrb[17].mxu0 }
 0x118   :  { %v1412_v37 = vadd.f32 %v1411_v36, %v1410_v34  ;;  %v1475_v38 = vpop.f32.mrb[17].mxu1  ;;  %v1413_v39 = vpop.f32.mrb[18].mxu0 }
 0x119   :  { %v1476_v40 = vadd.f32 %v1475_v38, %v1474_v35  ;;  %v1477_v41 = vpop.f32.mrb[18].mxu1  ;;  %v1414_v42 = vpop.f32.mrb[19].mxu0 }
 0x11a   :  { %v1415_v43 = vadd.f32 %v1414_v42, %v1413_v39  ;;  %v1478_v44 = vpop.f32.mrb[19].mxu1 }
 0x11b   :  { %v2100_v45 = vadd.f32 %v1476_v40, %v1412_v37  ;;  %v1479_v46 = vadd.f32 %v1478_v44, %v1477_v41 }
 0x11d   :  { %v2102_v47 = vadd.f32 %v1479_v46, %v1415_v43 }
 0x11e   :  { %v1416_v48 = vpop.f32.mrb[20].mxu0 }
 0x11f   :  { %v1480_v49 = vpop.f32.mrb[20].mxu1  ;;  %v1417_v50 = vpop.f32.mrb[21].mxu0 }
 0x120   :  { %v1418_v51 = vadd.f32 %v1417_v50, %v1416_v48  ;;  %v1481_v52 = vpop.f32.mrb[21].mxu1  ;;  %v1419_v54 = vpop.f32.mrb[22].mxu0 }
 0x121   :  { %v1482_v56 = vadd.f32 %v1481_v52, %v1480_v49  ;;  %v1483_v57 = vpop.f32.mrb[22].mxu1  ;;  %v1420_v58 = vpop.f32.mrb[23].mxu0 }
 0x122   :  { %v1421_v59 = vadd.f32 %v1420_v58, %v1419_v54  ;;  %v1484_v60 = vpop.f32.mrb[23].mxu1 }
 0x123   :  { %v2104_v61 = vadd.f32 %v1482_v56, %v1418_v51  ;;  %v1485_v62 = vadd.f32 %v1484_v60, %v1483_v57 }
 0x125   :  { %v2106_v63 = vadd.f32 %v1485_v62, %v1421_v59 }
 0x126   :  { %v1422_v0 = vpop.f32.mrb[24].mxu0 }
 0x127   :  { %v1486_v1 = vpop.f32.mrb[24].mxu1  ;;  %v1423_v2 = vpop.f32.mrb[25].mxu0 }
 0x128   :  { %v1424_v4 = vadd.f32 %v1423_v2, %v1422_v0  ;;  %v1487_v6 = vpop.f32.mrb[25].mxu1  ;;  %v1425_v7 = vpop.f32.mrb[26].mxu0 }
 0x129   :  { %v1488_v8 = vadd.f32 %v1487_v6, %v1486_v1  ;;  %v1489_v9 = vpop.f32.mrb[26].mxu1  ;;  %v1426_v10 = vpop.f32.mrb[27].mxu0 }
 0x12a   :  { %v1427_v11 = vadd.f32 %v1426_v10, %v1425_v7  ;;  %v1490_v12 = vpop.f32.mrb[27].mxu1 }
 0x12b   :  { %v963_v13 = vadd.f32 %v1488_v8, %v1424_v4  ;;  %v1491_v14 = vadd.f32 %v1490_v12, %v1489_v9 }
 0x12d   :  { %v966_v15 = vadd.f32 %v1491_v14, %v1427_v11 }
 0x12e   :  { %v1428_v16 = vpop.f32.mrb[28].mxu0 }
 0x12f   :  { %v1492_v18 = vpop.f32.mrb[28].mxu1  ;;  %v1429_v20 = vpop.f32.mrb[29].mxu0 }
 0x130   :  { %v1430_v21 = vadd.f32 %v1429_v20, %v1428_v16  ;;  %v1493_v22 = vpop.f32.mrb[29].mxu1  ;;  %v1431_v23 = vpop.f32.mrb[30].mxu0 }
 0x131   :  { %v1494_v24 = vadd.f32 %v1493_v22, %v1492_v18  ;;  %v1495_v25 = vpop.f32.mrb[30].mxu1  ;;  %v1432_v26 = vpop.f32.mrb[31].mxu0 }
 0x132   :  { %v1433_v27 = vadd.f32 %v1432_v26, %v1431_v23  ;;  %v1496_v28 = vpop.f32.mrb[31].mxu1 }
 0x133   :  { %v971_v29 = vadd.f32 %v1494_v24, %v1430_v21  ;;  %v1497_v30 = vadd.f32 %v1496_v28, %v1495_v25 }
 0x135   :  { %v974_v32 = vadd.f32 %v1497_v30, %v1433_v27 }
 0x136   :  { %v1514_v34 = vpop.f32.mrb[32].mxu0 }
 0x137   :  { %v1550_v35 = vpop.f32.mrb[32].mxu1  ;;  %v1515_v36 = vpop.f32.mrb[33].mxu0 }
 0x138   :  { %v1516_v37 = vadd.f32 %v1515_v36, %v1514_v34  ;;  %v1551_v38 = vpop.f32.mrb[33].mxu1  ;;  %v1517_v39 = vpop.f32.mrb[34].mxu0 }
 0x139   :  { %v1552_v40 = vadd.f32 %v1551_v38, %v1550_v35  ;;  %v1553_v41 = vpop.f32.mrb[34].mxu1  ;;  %v1518_v42 = vpop.f32.mrb[35].mxu0 }
 0x13a   :  { %v1519_v43 = vadd.f32 %v1518_v42, %v1517_v39  ;;  %v1554_v44 = vpop.f32.mrb[35].mxu1  ;;  %v1012_v46 = vadd.f32 %v1516_v37, %v2084_v53 }
 0x13b   :  { %v1555_v48 = vadd.f32 %v1554_v44, %v1553_v41  ;;  %v2109_v49 = vadd.f32 %v1552_v40, %v963_v13 }
 0x13c   :  { %v1015_v50 = vadd.f32 %v1519_v43, %v2086_v55 }
 0x13d   :  { %v2112_v51 = vadd.f32 %v1555_v48, %v966_v15 }
 0x13e   :  { %v1520_v52 = vpop.f32.mrb[36].mxu0 }
 0x13f   :  { %v1556_v54 = vpop.f32.mrb[36].mxu1  ;;  %v1521_v56 = vpop.f32.mrb[37].mxu0 }
 0x140   :  { %v1522_v57 = vadd.f32 %v1521_v56, %v1520_v52  ;;  %v1557_v58 = vpop.f32.mrb[37].mxu1  ;;  %v1523_v59 = vpop.f32.mrb[38].mxu0 }
 0x141   :  { %v1558_v60 = vadd.f32 %v1557_v58, %v1556_v54  ;;  %v1559_v62 = vpop.f32.mrb[38].mxu1  ;;  %v1524_v0 = vpop.f32.mrb[39].mxu0 }
 0x142   :  { %v1525_v1 = vadd.f32 %v1524_v0, %v1523_v59  ;;  %v1560_v2 = vpop.f32.mrb[39].mxu1  ;;  %v1020_v53 = vadd.f32 %v1522_v57, %v2088_v3 }
 0x143   :  { %v1561_v4 = vadd.f32 %v1560_v2, %v1559_v62  ;;  %v2115_v6 = vadd.f32 %v1558_v60, %v971_v29 }
 0x144   :  { %v1023_v55 = vadd.f32 %v1525_v1, %v2090_v5 }
 0x145   :  { %v2118_v7 = vadd.f32 %v1561_v4, %v974_v32 }
 0x146   :  { %v1526_v8 = vpop.f32.mrb[40].mxu0 }
 0x147   :  { %v1578_v9 = vpop.f32.mrb[40].mxu1  ;;  %v1527_v10 = vpop.f32.mrb[41].mxu0 }
 0x148   :  { %v1117_v11 = vadd.f32 %v1578_v9, %v1020_v53  ;;  %v1528_v12 = vadd.f32 %v1527_v10, %v1526_v8  ;;  %v1108_v13 = vpop.f32.mrb[41].mxu1  ;;  %v1529_v14 = vpop.f32.mrb[42].mxu0 }
 0x149   :  { %v1109_v15 = vadd.f32 %v1108_v13, %v1012_v46  ;;  %v1579_v16 = vpop.f32.mrb[42].mxu1  ;;  %v1530_v18 = vpop.f32.mrb[43].mxu0 }
 0x14a   :  { %1173 = vst [vmem:[%s2185_s2 + $0x10] sm:$0xff] %v1117_v11  ;;  %v1120_v3 = vadd.f32 %v1579_v16, %v1023_v55  ;;  %v1531_v20 = vadd.f32 %v1530_v18, %v1529_v14  ;;  %v1111_v21 = vpop.f32.mrb[43].mxu1  ;;  %v1028_v5 = vadd.f32 %v1528_v12, %v2092_v17  ;;  %v1210_v17 = vmul.f32 %v1117_v11, %v1117_v11 }
 0x14b   :  { %1171 = vst [vmem:[%s2185_s2] sm:$0xff] %v1109_v15  ;;  %v1112_v22 = vadd.f32 %v1111_v21, %v1015_v50  ;;  %v1208_v24 = vmul.f32 %v1109_v15, %v1109_v15 }
 0x14c   :  { %1174 = vst [vmem:[%s2185_s2 + $0x18] sm:$0xff] %v1120_v3  ;;  %v1031_v23 = vadd.f32 %v1531_v20, %v2094_v19  ;;  %v1211_v37 = vmul.f32 %v1120_v3, %v1120_v3 }
 0x14d   :  { %1172 = vst [vmem:[%s2185_s2 + $0x8] sm:$0xff] %v1112_v22  ;;  %v1187_v25 = vadd.f32 %v1112_v22, %v1109_v15  ;;  %v1209_v26 = vmul.f32 %v1112_v22, %v1112_v22 }
 0x14e   :  { %v1532_v27 = vpop.f32.mrb[44].mxu0 }
 0x14f   :  { %v1188_v28 = vadd.f32 %v1187_v25, %v1117_v11  ;;  %v1224_v29 = vadd.f32 %v1209_v26, %v1208_v24  ;;  %v1582_v30 = vpop.f32.mrb[44].mxu1  ;;  %v1533_v32 = vpop.f32.mrb[45].mxu0 }
 0x150   :  { %v1534_v34 = vadd.f32 %v1533_v32, %v1532_v27  ;;  %v1124_v35 = vpop.f32.mrb[45].mxu1  ;;  %v1535_v36 = vpop.f32.mrb[46].mxu0 }
 0x151   :  { %v1225_v38 = vadd.f32 %v1224_v29, %v1210_v17  ;;  %v1125_v39 = vadd.f32 %v1124_v35, %v1028_v5  ;;  %v1189_v19 = vadd.f32 %v1188_v28, %v1120_v3  ;;  %v1583_v40 = vpop.f32.mrb[46].mxu1  ;;  %v1536_v41 = vpop.f32.mrb[47].mxu0 }
 0x152   :  { %v1036_v42 = vadd.f32 %v1534_v34, %v2096_v31  ;;  %v1537_v43 = vadd.f32 %v1536_v41, %v1535_v36  ;;  %v1127_v44 = vpop.f32.mrb[47].mxu1 }
 0x153   :  { %1175 = vst [vmem:[%s2185_s2 + $0x20] sm:$0xff] %v1125_v39  ;;  %v1190_v46 = vadd.f32 %v1189_v19, %v1125_v39  ;;  %v1212_v48 = vmul.f32 %v1125_v39, %v1125_v39  ;;  %v1226_v50 = vadd.f32 %v1225_v38, %v1211_v37  ;;  %v1128_v52 = vadd.f32 %v1127_v44, %v1031_v23 }
 0x154   :  { %v1133_v54 = vadd.f32 %v1582_v30, %v1036_v42  ;;  %v1039_v56 = vadd.f32 %v1537_v43, %v2098_v33 }
 0x155   :  { %v1227_v57 = vadd.f32 %v1226_v50, %v1212_v48  ;;  %1176 = vst [vmem:[%s2185_s2 + $0x28] sm:$0xff] %v1128_v52  ;;  %v1191_v58 = vadd.f32 %v1190_v46, %v1128_v52  ;;  %v1213_v31 = vmul.f32 %v1128_v52, %v1128_v52 }
 0x156   :  { %1177 = vst [vmem:[%s2185_s2 + $0x30] sm:$0xff] %v1133_v54  ;;  %v1214_v59 = vmul.f32 %v1133_v54, %v1133_v54  ;;  %v1136_v60 = vadd.f32 %v1583_v40, %v1039_v56  ;;  %v1538_v62 = vpop.f32.mrb[48].mxu0 }
 0x157   :  { %v1192_v0 = vadd.f32 %v1191_v58, %v1133_v54  ;;  %v1228_v1 = vadd.f32 %v1227_v57, %v1213_v31  ;;  %v1539_v2 = vpop.f32.mrb[49].mxu0  ;;  %v1586_v53 = vpop.f32.mrb[48].mxu1 }
 0x158   :  { %1178 = vst [vmem:[%s2185_s2 + $0x38] sm:$0xff] %v1136_v60  ;;  %v1215_v33 = vmul.f32 %v1136_v60, %v1136_v60  ;;  %v1540_v4 = vadd.f32 %v1539_v2, %v1538_v62  ;;  %v1541_v55 = vpop.f32.mrb[50].mxu0  ;;  %v1140_v8 = vpop.f32.mrb[49].mxu1 }
 0x159   :  { %v1229_v9 = vadd.f32 %v1228_v1, %v1214_v59  ;;  %v1542_v10 = vpop.f32.mrb[51].mxu0  ;;  %v1193_v11 = vadd.f32 %v1192_v0, %v1136_v60  ;;  %v1587_v12 = vpop.f32.mrb[50].mxu1 }
 0x15a   :  { %v1543_v13 = vadd.f32 %v1542_v10, %v1541_v55  ;;  %v1044_v14 = vadd.f32 %v1540_v4, %v2100_v45  ;;  %v1143_v15 = vpop.f32.mrb[51].mxu1 }
 0x15b   :  { %v1230_v16 = vadd.f32 %v1229_v9, %v1215_v33 }
 0x15c   :  { %v1141_v18 = vadd.f32 %v1140_v8, %v1044_v14  ;;  %v1047_v3 = vadd.f32 %v1543_v13, %v2102_v47 }
 0x15e   :  { %1179 = vst [vmem:[%s2185_s2 + $0x40] sm:$0xff] %v1141_v18  ;;  %v1194_v20 = vadd.f32 %v1193_v11, %v1141_v18  ;;  %v1216_v21 = vmul.f32 %v1141_v18, %v1141_v18  ;;  %v1144_v5 = vadd.f32 %v1143_v15, %v1047_v3  ;;  %v1544_v22 = vpop.f32.mrb[52].mxu0 }
 0x15f   :  { %v1590_v23 = vpop.f32.mrb[52].mxu1  ;;  %v1545_v24 = vpop.f32.mrb[53].mxu0 }
 0x160   :  { %v1231_v25 = vadd.f32 %v1230_v16, %v1216_v21  ;;  %1180 = vst [vmem:[%s2185_s2 + $0x48] sm:$0xff] %v1144_v5  ;;  %v1195_v45 = vadd.f32 %v1194_v20, %v1144_v5  ;;  %v1217_v26 = vmul.f32 %v1144_v5, %v1144_v5  ;;  %v1165_v27 = vadd.f32 %v1590_v23, %v2115_v6  ;;  %v1156_v47 = vpop.f32.mrb[53].mxu1  ;;  %v1547_v17 = vpop.f32.mrb[54].mxu0 }
 0x161   :  { %v1546_v28 = vadd.f32 %v1545_v24, %v1544_v22  ;;  %v1157_v29 = vadd.f32 %v1156_v47, %v2109_v49  ;;  %v1591_v30 = vpop.f32.mrb[54].mxu1  ;;  %v1548_v32 = vpop.f32.mrb[55].mxu0 }
 0x162   :  { %v1232_v34 = vadd.f32 %v1231_v25, %v1217_v26  ;;  %1185 = vst [vmem:[%s2185_s2 + $0x70] sm:$0xff] %v1165_v27  ;;  %v1168_v35 = vadd.f32 %v1591_v30, %v2118_v7  ;;  %v1549_v36 = vadd.f32 %v1548_v32, %v1547_v17  ;;  %v1159_v37 = vpop.f32.mrb[55].mxu1  ;;  %v1222_v50 = vmul.f32 %v1165_v27, %v1165_v27 }
 0x163   :  { %v1052_v38 = vadd.f32 %v1546_v28, %v2104_v61  ;;  %1183 = vst [vmem:[%s2185_s2 + $0x60] sm:$0xff] %v1157_v29  ;;  %v1160_v6 = vadd.f32 %v1159_v37, %v2112_v51 }
 0x164   :  { %1186 = vst [vmem:[%s2185_s2 + $0x78] sm:$0xff] %v1168_v35  ;;  %v1055_v49 = vadd.f32 %v1549_v36, %v2106_v63  ;;  %v1220_v63 = vmul.f32 %v1157_v29, %v1157_v29  ;;  %v1223_v56 = vmul.f32 %v1168_v35, %v1168_v35 }
 0x165   :  { %v1149_v39 = vadd.f32 %v1586_v53, %v1052_v38  ;;  %1184 = vst [vmem:[%s2185_s2 + $0x68] sm:$0xff] %v1160_v6  ;;  %v1221_v46 = vmul.f32 %v1160_v6, %v1160_v6 }
 0x166   :  { %v1152_v7 = vadd.f32 %v1587_v12, %v1055_v49 }
 0x167   :  { %1181 = vst [vmem:[%s2185_s2 + $0x50] sm:$0xff] %v1149_v39  ;;  %v1196_v61 = vadd.f32 %v1195_v45, %v1149_v39  ;;  %v1218_v19 = vmul.f32 %v1149_v39, %v1149_v39 }
 0x168   :  { %1182 = vst [vmem:[%s2185_s2 + $0x58] sm:$0xff] %v1152_v7  ;;  %v1219_v51 = vmul.f32 %v1152_v7, %v1152_v7 }
 0x169   :  { %v1233_v40 = vadd.f32 %v1232_v34, %v1218_v19  ;;  %v1197_v41 = vadd.f32 %v1196_v61, %v1152_v7 }
 0x16b   :  { %v1198_v42 = vadd.f32 %v1197_v41, %v1157_v29  ;;  %v1234_v43 = vadd.f32 %v1233_v40, %v1219_v51 }
 0x16d   :  { %v1199_v44 = vadd.f32 %v1198_v42, %v1160_v6  ;;  %v1235_v48 = vadd.f32 %v1234_v43, %v1220_v63 }
 0x16f   :  { %v1200_v52 = vadd.f32 %v1199_v44, %v1165_v27  ;;  %v1236_v54 = vadd.f32 %v1235_v48, %v1221_v46 }
 0x171   :  { %v1201_v57 = vadd.f32 %v1200_v52, %v1168_v35  ;;  %v1237_v58 = vadd.f32 %v1236_v54, %v1222_v50 }
 0x173   :  { %v1202_v31 = vrot.slane %v1201_v57, 4  ;;  %v1238_v59 = vadd.f32 %v1237_v58, %v1223_v56 }
 0x175   :  { %v1203_v60 = vadd.f32 %v1202_v31, %v1201_v57  ;;  %v1239_v62 = vrot.slane %v1238_v59, 4 }
 0x177   :  { %v1204_v0 = vrot.slane %v1203_v60, 2  ;;  %v1240_v1 = vadd.f32 %v1239_v62, %v1238_v59 }
 0x179   :  { %v1205_v2 = vadd.f32 %v1204_v0, %v1203_v60  ;;  %v1241_v53 = vrot.slane %v1240_v1, 2 }
 0x17b   :  { %v1206_v33 = vrot.slane %v1205_v2, 1  ;;  %v1242_v4 = vadd.f32 %v1241_v53, %v1240_v1 }
 0x17d   :  { %v1243_v55 = vrot.slane %v1242_v4, 1  ;;  %v1207_v8 = vadd.f32 %v1206_v33, %v1205_v2 }
 0x17f   :  { %v1244_v9 = vadd.f32 %v1243_v55, %v1242_v4 }
 0x181   :  { %v1246_v10 = vsel %vm1245_vm1, %v1207_v8, %v1244_v9 }
 0x182   :  { %1247 = vst [vmem:[%s2186_s3] sm:$0x3] %v1246_v10 }

// kernel: discriminator_forward.14
= control target key start
LH: loop header
LB: loop body
LE: loop exit
PB: predicated region body
PF: predicated region fallthrough
CT: control target
= control target key end

     0   :  { %v24_v0 = vlaneseq  ;;  %s180_s1 = inlined_call_operand.vmem [shape: f32[1,256], index: 1, kind: input, shape index: {}]   ;;  %s181_s2 = inlined_call_operand.vmem [shape: f32[1,256], index: 2, kind: input, shape index: {}]   ;;  %s182_s0 = inlined_call_operand.vmem [shape: f32[32,256], index: 0, kind: input, shape index: {}]   ;;  %s183_s3 = inlined_call_operand.vmem [shape: bf16[32,256], index: 3, kind: output, shape index: {}]  }
   0x1   :  { %v22_v2 = vld [vmem:[%s180_s1] sm:$0x3]  ;;  %v15_v5 = vld [vmem:[%s182_s0 + $0x8] sm:$0xff]  ;;  %v16_v8 = vld [vmem:[%s182_s0 + $0x10] sm:$0xff] }
   0x2   :  { %v25_v1 = vshrl.u32 %v24_v0, 7  ;;  %v42_v3 = vld [vmem:[%s181_s2] sm:$0x3]  ;;  %v17_v9 = vld [vmem:[%s182_s0 + $0x18] sm:$0xff]  ;;  %v19_v15 = vld [vmem:[%s182_s0 + $0x28] sm:$0xff] }
   0x3   :  { %v14_v4 = vld [vmem:[%s182_s0] sm:$0xff]  ;;  %v20_v16 = vld [vmem:[%s182_s0 + $0x30] sm:$0xff]  ;;  %v21_v17 = vld [vmem:[%s182_s0 + $0x38] sm:$0xff] }
   0x4   :  { %v26_v6 = vsub.s32 0, %v25_v1  ;;  %v30_v7 = vsub.s32 1, %v25_v1  ;;  %v18_v10 = vld [vmem:[%s182_s0 + $0x20] sm:$0xff] }
   0x6   :  { %v27_v11 = vrot.slane %v22_v2, %v26_v6  ;;  %v31_v12 = vrot.slane %v22_v2, %v30_v7  ;;  %v47_v13 = vrot.slane %v42_v3, %v26_v6  ;;  %v51_v14 = vrot.slane %v42_v3, %v30_v7 }
   0x8   :  { %v34_v18 = vmul.f32 %v27_v11, %v14_v4  ;;  %v35_v19 = vmul.f32 %v31_v12, %v15_v5  ;;  %v36_v20 = vmul.f32 %v27_v11, %v16_v8  ;;  %v37_v21 = vmul.f32 %v31_v12, %v17_v9 }
   0x9   :  { %v38_v22 = vmul.f32 %v27_v11, %v18_v10  ;;  %v39_v23 = vmul.f32 %v31_v12, %v19_v15  ;;  %v40_v24 = vmul.f32 %v27_v11, %v20_v16  ;;  %v41_v25 = vmul.f32 %v31_v12, %v21_v17 }
   0xa   :  { %v54_v26 = vadd.f32 %v47_v13, %v34_v18  ;;  %v55_v27 = vadd.f32 %v51_v14, %v35_v19  ;;  %v56_v28 = vadd.f32 %v47_v13, %v36_v20  ;;  %v57_v29 = vadd.f32 %v51_v14, %v37_v21 }
   0xb   :  { %v58_v30 = vadd.f32 %v47_v13, %v38_v22  ;;  %v59_v31 = vadd.f32 %v51_v14, %v39_v23  ;;  %v60_v32 = vadd.f32 %v47_v13, %v40_v24  ;;  %v61_v33 = vadd.f32 %v51_v14, %v41_v25 }
   0xc   :  { %v62_v34 = vmul.f32 0.2, %v54_v26  ;;  %v63_v35 = vmul.f32 0.2, %v55_v27  ;;  %v64_v36 = vmul.f32 0.2, %v56_v28 }
   0xd   :  { %v65_v37 = vmul.f32 0.2, %v57_v29  ;;  %v66_v38 = vmul.f32 0.2, %v58_v30  ;;  %v67_v39 = vmul.f32 0.2, %v59_v31 }
   0xe   :  { %v70_v40 = vmax.f32 %v54_v26, %v62_v34  ;;  %v71_v41 = vmax.f32 %v55_v27, %v63_v35  ;;  %v72_v42 = vmax.f32 %v56_v28, %v64_v36  ;;  %v68_v43 = vmul.f32 0.2, %v60_v32 }
   0xf   :  { %v73_v44 = vmax.f32 %v57_v29, %v65_v37  ;;  %v74_v45 = vmax.f32 %v58_v30, %v66_v38  ;;  %v75_v46 = vmax.f32 %v59_v31, %v67_v39  ;;  %v69_v47 = vmul.f32 0.2, %v61_v33 }
  0x10   :  { %v114_v48 = vpack.c.bf16 %v71_v41, %v70_v40  ;;  %v76_v49 = vmax.f32 %v60_v32, %v68_v43 }
  0x11   :  { %v115_v50 = vpack.c.bf16 %v73_v44, %v72_v42  ;;  %v116_v51 = vpack.c.bf16 %v75_v46, %v74_v45  ;;  %v77_v52 = vmax.f32 %v61_v33, %v69_v47 }
  0x12   :  { %102 = vst [vmem:[%s183_s3] sm:$0xff] %v114_v48 }
  0x13   :  { %103 = vst [vmem:[%s183_s3 + $0x8] sm:$0xff] %v115_v50  ;;  %104 = vst [vmem:[%s183_s3 + $0x10] sm:$0xff] %v116_v51  ;;  %v117_v53 = vpack.c.bf16 %v77_v52, %v76_v49 }
  0x15   :  { %105 = vst [vmem:[%s183_s3 + $0x18] sm:$0xff] %v117_v53 }

// kernel: discriminator_forward.13
= control target key start
LH: loop header
LB: loop body
LE: loop exit
PB: predicated region body
PF: predicated region fallthrough
CT: control target
= control target key end

     0   :  { %vm3459_vm0 = vcmask 1040384   ;;  %s6118_s1 = inlined_call_operand.vmem [shape: bf16[3200,256], index: 1, kind: input, shape index: {}]   ;;  %s6119_s0 = inlined_call_operand.vmem [shape: bf16[32,3200], index: 0, kind: input, shape index: {}]   ;;  %s6120_s2 = inlined_call_operand.vmem [shape: f32[32,256], index: 2, kind: output, shape index: {0}]   ;;  %s6121_s3 = inlined_call_operand.vmem [shape: f32[1,2,256], index: 3, kind: output, shape index: {1}]  }
   0x1   :  { %v4046_v0 = vld [vmem:[%s6118_s1 + $0x4] ss:$8 sps:$4 sm:$0xff]   ;;  %v4050_v2 = vld [vmem:[%s6118_s1] ss:$8 sps:$4 sm:$0xff]   ;;  %v4052_v4 = vld [vmem:[%s6118_s1 + $0x14] ss:$8 sps:$4 sm:$0xff]  }
   0x2   :  { %v4048_v1 = vld [vmem:[%s6118_s1 + $0x604] ss:$8 sps:$4 sm:$0xff]   ;;  %2718 = vmatprep.subr.bf16.mxu1 %v4046_v0  ;;  %v4051_v3 = vld [vmem:[%s6118_s1 + $0x600] ss:$8 sps:$4 sm:$0xff]   ;;  %v4054_v5 = vld [vmem:[%s6118_s1 + $0x614] ss:$8 sps:$4 sm:$0xff]  }
   0x3   :  { %3036 = vmatprep.subr.bf16.mxu0 %v4048_v1  ;;  %2719 = vmatpush1.bf16.msra.mxu1 %v4050_v2  ;;  %v4056_v6 = vld [vmem:[%s6118_s1 + $0x10] ss:$8 sps:$4 sm:$0xff]   ;;  %v4058_v8 = vld [vmem:[%s6118_s1 + $0x24] ss:$8 sps:$4 sm:$0xff]   ;;  %v4062_v10 = vld [vmem:[%s6118_s1 + $0x20] ss:$8 sps:$4 sm:$0xff]  }
   0x4   :  { %3037 = vmatpush1.bf16.msra.mxu0 %v4051_v3  ;;  %2720 = vmatprep.subr.bf16.mxu1 %v4052_v4  ;;  %v4057_v7 = vld [vmem:[%s6118_s1 + $0x610] ss:$8 sps:$4 sm:$0xff]   ;;  %v4060_v9 = vld [vmem:[%s6118_s1 + $0x624] ss:$8 sps:$4 sm:$0xff]   ;;  %v4063_v11 = vld [vmem:[%s6118_s1 + $0x620] ss:$8 sps:$4 sm:$0xff]  }
   0x5   :  { %3038 = vmatprep.subr.bf16.mxu0 %v4054_v5  ;;  %v4064_v12 = vld [vmem:[%s6118_s1 + $0x34] ss:$8 sps:$4 sm:$0xff]   ;;  %v4068_v14 = vld [vmem:[%s6118_s1 + $0x30] ss:$8 sps:$4 sm:$0xff]   ;;  %v4070_v16 = vld [vmem:[%s6118_s1 + $0x44] ss:$8 sps:$4 sm:$0xff]  }
   0x6   :  { %v4066_v13 = vld [vmem:[%s6118_s1 + $0x634] ss:$8 sps:$4 sm:$0xff]   ;;  %v4069_v15 = vld [vmem:[%s6118_s1 + $0x630] ss:$8 sps:$4 sm:$0xff]   ;;  %v4072_v17 = vld [vmem:[%s6118_s1 + $0x644] ss:$8 sps:$4 sm:$0xff]  }
   0x7   :  { %2721 = vmatpush1.bf16.msra.mxu1 %v4056_v6  ;;  %v4074_v18 = vld [vmem:[%s6118_s1 + $0x40] ss:$8 sps:$4 sm:$0xff]   ;;  %v4076_v20 = vld [vmem:[%s6118_s1 + $0x54] ss:$8 sps:$4 sm:$0xff]   ;;  %v4080_v22 = vld [vmem:[%s6118_s1 + $0x50] ss:$8 sps:$4 sm:$0xff]  }
   0x8   :  { %3039 = vmatpush1.bf16.msra.mxu0 %v4057_v7  ;;  %2722 = vmatprep.subr.bf16.mxu1 %v4058_v8  ;;  %v4075_v19 = vld [vmem:[%s6118_s1 + $0x640] ss:$8 sps:$4 sm:$0xff]   ;;  %v4078_v21 = vld [vmem:[%s6118_s1 + $0x654] ss:$8 sps:$4 sm:$0xff]   ;;  %v4081_v23 = vld [vmem:[%s6118_s1 + $0x650] ss:$8 sps:$4 sm:$0xff]  }
   0x9   :  { %3040 = vmatprep.subr.bf16.mxu0 %v4060_v9  ;;  %v4082_v24 = vld [vmem:[%s6118_s1 + $0x64] ss:$8 sps:$4 sm:$0xff]   ;;  %v4086_v26 = vld [vmem:[%s6118_s1 + $0x60] ss:$8 sps:$4 sm:$0xff]   ;;  %v4088_v28 = vld [vmem:[%s6118_s1 + $0x74] ss:$8 sps:$4 sm:$0xff]  }
   0xa   :  { %v4084_v25 = vld [vmem:[%s6118_s1 + $0x664] ss:$8 sps:$4 sm:$0xff]   ;;  %v4087_v27 = vld [vmem:[%s6118_s1 + $0x660] ss:$8 sps:$4 sm:$0xff]   ;;  %v4090_v29 = vld [vmem:[%s6118_s1 + $0x674] ss:$8 sps:$4 sm:$0xff]  }
   0xb   :  { %2723 = vmatpush1.bf16.msra.mxu1 %v4062_v10  ;;  %v4092_v30 = vld [vmem:[%s6118_s1 + $0x70] ss:$8 sps:$4 sm:$0xff]   ;;  %v4094_v32 = vld [vmem:[%s6118_s1 + $0x84] ss:$8 sps:$4 sm:$0xff]   ;;  %v4098_v34 = vld [vmem:[%s6118_s1 + $0x80] ss:$8 sps:$4 sm:$0xff]  }
   0xc   :  { %3041 = vmatpush1.bf16.msra.mxu0 %v4063_v11  ;;  %2724 = vmatprep.subr.bf16.mxu1 %v4064_v12  ;;  %v4093_v31 = vld [vmem:[%s6118_s1 + $0x670] ss:$8 sps:$4 sm:$0xff]   ;;  %v4096_v33 = vld [vmem:[%s6118_s1 + $0x684] ss:$8 sps:$4 sm:$0xff]   ;;  %v4099_v35 = vld [vmem:[%s6118_s1 + $0x680] ss:$8 sps:$4 sm:$0xff]  }
   0xd   :  { %3042 = vmatprep.subr.bf16.mxu0 %v4066_v13  ;;  %v4100_v36 = vld [vmem:[%s6118_s1 + $0x94] ss:$8 sps:$4 sm:$0xff]   ;;  %v4104_v38 = vld [vmem:[%s6118_s1 + $0x90] ss:$8 sps:$4 sm:$0xff]   ;;  %v4106_v40 = vld [vmem:[%s6118_s1 + $0xa4] ss:$8 sps:$4 sm:$0xff]  }
   0xe   :  { %v4102_v37 = vld [vmem:[%s6118_s1 + $0x694] ss:$8 sps:$4 sm:$0xff]   ;;  %v4105_v39 = vld [vmem:[%s6118_s1 + $0x690] ss:$8 sps:$4 sm:$0xff]   ;;  %v4108_v41 = vld [vmem:[%s6118_s1 + $0x6a4] ss:$8 sps:$4 sm:$0xff]  }
   0xf   :  { %2725 = vmatpush1.bf16.msra.mxu1 %v4068_v14  ;;  %v4110_v42 = vld [vmem:[%s6118_s1 + $0xa0] ss:$8 sps:$4 sm:$0xff]   ;;  %v4112_v44 = vld [vmem:[%s6118_s1 + $0xb4] ss:$8 sps:$4 sm:$0xff]   ;;  %v4116_v46 = vld [vmem:[%s6118_s1 + $0xb0] ss:$8 sps:$4 sm:$0xff]  }
  0x10   :  { %3043 = vmatpush1.bf16.msra.mxu0 %v4069_v15  ;;  %2726 = vmatprep.subr.bf16.mxu1 %v4070_v16  ;;  %v4111_v43 = vld [vmem:[%s6118_s1 + $0x6a0] ss:$8 sps:$4 sm:$0xff]   ;;  %v4114_v45 = vld [vmem:[%s6118_s1 + $0x6b4] ss:$8 sps:$4 sm:$0xff]   ;;  %v4117_v47 = vld [vmem:[%s6118_s1 + $0x6b0] ss:$8 sps:$4 sm:$0xff]  }
  0x11   :  { %3044 = vmatprep.subr.bf16.mxu0 %v4072_v17  ;;  %v4144_v48 = vld [vmem:[%s6119_s0 + $0x4] ss:$100 sps:$4 sm:$0xff]   ;;  %v4150_v51 = vld [vmem:[%s6119_s0 + $0x34] ss:$100 sps:$4 sm:$0xff]  }
  0x12   :  { %v4118_v49 = vld [vmem:[%s6118_s1 + $0xc4] ss:$8 sps:$4 sm:$0xff]   ;;  %2750 = vmatprep.mubr.bf16.mxu1 %v4144_v48  ;;  %v4122_v52 = vld [vmem:[%s6118_s1 + $0xc0] ss:$8 sps:$4 sm:$0xff]   ;;  %v4124_v54 = vld [vmem:[%s6118_s1 + $0xd4] ss:$8 sps:$4 sm:$0xff]   ;;  %3068 = vmatprep.mubr.bf16.mxu0 %v4150_v51 }
  0x13   :  { %2727 = vmatpush1.bf16.msra.mxu1 %v4074_v18  ;;  %v4120_v50 = vld [vmem:[%s6118_s1 + $0x6c4] ss:$8 sps:$4 sm:$0xff]   ;;  %v4123_v53 = vld [vmem:[%s6118_s1 + $0x6c0] ss:$8 sps:$4 sm:$0xff]   ;;  %v4126_v55 = vld [vmem:[%s6118_s1 + $0x6d4] ss:$8 sps:$4 sm:$0xff]  }
  0x14   :  { %3045 = vmatpush1.bf16.msra.mxu0 %v4075_v19  ;;  %2728 = vmatprep.subr.bf16.mxu1 %v4076_v20  ;;  %v4128_v56 = vld [vmem:[%s6118_s1 + $0xd0] ss:$8 sps:$4 sm:$0xff]   ;;  %v4130_v58 = vld [vmem:[%s6118_s1 + $0xe4] ss:$8 sps:$4 sm:$0xff]   ;;  %v4134_v60 = vld [vmem:[%s6118_s1 + $0xe0] ss:$8 sps:$4 sm:$0xff]  }
  0x15   :  { %3046 = vmatprep.subr.bf16.mxu0 %v4078_v21  ;;  %v4129_v57 = vld [vmem:[%s6118_s1 + $0x6d0] ss:$8 sps:$4 sm:$0xff]   ;;  %v4132_v59 = vld [vmem:[%s6118_s1 + $0x6e4] ss:$8 sps:$4 sm:$0xff]   ;;  %v4135_v61 = vld [vmem:[%s6118_s1 + $0x6e0] ss:$8 sps:$4 sm:$0xff]  }
  0x16   :  { %v4136_v62 = vld [vmem:[%s6118_s1 + $0xf4] ss:$8 sps:$4 sm:$0xff]   ;;  %v4140_v0 = vld [vmem:[%s6118_s1 + $0xf0] ss:$8 sps:$4 sm:$0xff]   ;;  %v4147_v2 = vld [vmem:[%s6118_s1 + $0x104] ss:$8 sps:$4 sm:$0xff]  }
  0x17   :  { %2729 = vmatpush1.bf16.msra.mxu1 %v4080_v22  ;;  %v4138_v63 = vld [vmem:[%s6118_s1 + $0x6f4] ss:$8 sps:$4 sm:$0xff]   ;;  %v4141_v1 = vld [vmem:[%s6118_s1 + $0x6f0] ss:$8 sps:$4 sm:$0xff]   ;;  %v4153_v3 = vld [vmem:[%s6118_s1 + $0x704] ss:$8 sps:$4 sm:$0xff]  }
  0x18   :  { %3047 = vmatpush1.bf16.msra.mxu0 %v4081_v23  ;;  %2730 = vmatprep.subr.bf16.mxu1 %v4082_v24  ;;  %v4142_v4 = vld [vmem:[%s6119_s0] ss:$100 sps:$4 sm:$0xff]   ;;  %v4148_v6 = vld [vmem:[%s6119_s0 + $0x30] ss:$100 sps:$4 sm:$0xff]  }
  0x19   :  { %3048 = vmatprep.subr.bf16.mxu0 %v4084_v25  ;;  %v4145_v5 = vld [vmem:[%s6118_s1 + $0x100] ss:$8 sps:$4 sm:$0xff]   ;;  %v4156_v8 = vld [vmem:[%s6118_s1 + $0x114] ss:$8 sps:$4 sm:$0xff]   ;;  %v4154_v10 = vld [vmem:[%s6118_s1 + $0x110] ss:$8 sps:$4 sm:$0xff]  }
  0x1a   :  { %v4151_v7 = vld [vmem:[%s6118_s1 + $0x700] ss:$8 sps:$4 sm:$0xff]   ;;  %v4159_v9 = vld [vmem:[%s6118_s1 + $0x714] ss:$8 sps:$4 sm:$0xff]   ;;  %v4157_v11 = vld [vmem:[%s6118_s1 + $0x710] ss:$8 sps:$4 sm:$0xff]  }
  0x1b   :  { %2731 = vmatpush1.bf16.msra.mxu1 %v4086_v26  ;;  %v4162_v12 = vld [vmem:[%s6118_s1 + $0x124] ss:$8 sps:$4 sm:$0xff]   ;;  %v4160_v14 = vld [vmem:[%s6118_s1 + $0x120] ss:$8 sps:$4 sm:$0xff]   ;;  %v4168_v16 = vld [vmem:[%s6118_s1 + $0x134] ss:$8 sps:$4 sm:$0xff]  }
  0x1c   :  { %3049 = vmatpush1.bf16.msra.mxu0 %v4087_v27  ;;  %2732 = vmatprep.subr.bf16.mxu1 %v4088_v28  ;;  %v4165_v13 = vld [vmem:[%s6118_s1 + $0x724] ss:$8 sps:$4 sm:$0xff]   ;;  %v4163_v15 = vld [vmem:[%s6118_s1 + $0x720] ss:$8 sps:$4 sm:$0xff]   ;;  %v4171_v17 = vld [vmem:[%s6118_s1 + $0x734] ss:$8 sps:$4 sm:$0xff]  }
  0x1d   :  { %3050 = vmatprep.subr.bf16.mxu0 %v4090_v29  ;;  %v4166_v18 = vld [vmem:[%s6118_s1 + $0x130] ss:$8 sps:$4 sm:$0xff]   ;;  %v4174_v20 = vld [vmem:[%s6118_s1 + $0x144] ss:$8 sps:$4 sm:$0xff]   ;;  %v4172_v22 = vld [vmem:[%s6118_s1 + $0x140] ss:$8 sps:$4 sm:$0xff]  }
  0x1e   :  { %v4169_v19 = vld [vmem:[%s6118_s1 + $0x730] ss:$8 sps:$4 sm:$0xff]   ;;  %v4177_v21 = vld [vmem:[%s6118_s1 + $0x744] ss:$8 sps:$4 sm:$0xff]   ;;  %v4175_v23 = vld [vmem:[%s6118_s1 + $0x740] ss:$8 sps:$4 sm:$0xff]  }
  0x1f   :  { %2733 = vmatpush1.bf16.msra.mxu1 %v4092_v30  ;;  %v4180_v24 = vld [vmem:[%s6118_s1 + $0x154] ss:$8 sps:$4 sm:$0xff]   ;;  %v4178_v26 = vld [vmem:[%s6118_s1 + $0x150] ss:$8 sps:$4 sm:$0xff]   ;;  %v4186_v29 = vld [vmem:[%s6118_s1 + $0x164] ss:$8 sps:$4 sm:$0xff]  }
  0x20   :  { %3051 = vmatpush1.bf16.msra.mxu0 %v4093_v31  ;;  %2734 = vmatprep.subr.bf16.mxu1 %v4094_v32  ;;  %v4183_v25 = vld [vmem:[%s6118_s1 + $0x754] ss:$8 sps:$4 sm:$0xff]   ;;  %v4181_v27 = vld [vmem:[%s6118_s1 + $0x750] ss:$8 sps:$4 sm:$0xff]   ;;  %v4189_v30 = vld [vmem:[%s6118_s1 + $0x764] ss:$8 sps:$4 sm:$0xff]  }
  0x21   :  { %3052 = vmatprep.subr.bf16.mxu0 %v4096_v33  ;;  %v4232_v28 = vld [vmem:[%s6119_s0 + $0xcc] ss:$100 sps:$4 sm:$0xff]   ;;  %v4237_v31 = vld [vmem:[%s6119_s0 + $0xfc] ss:$100 sps:$4 sm:$0xff]  }
  0x22   :  { %v4184_v32 = vld [vmem:[%s6118_s1 + $0x160] ss:$8 sps:$4 sm:$0xff]   ;;  %v4202_v48 = vld [vmem:[%s6118_s1 + $0x190] ss:$8 sps:$4 sm:$0xff]   ;;  %v4213_v51 = vld [vmem:[%s6118_s1 + $0x7a4] ss:$8 sps:$4 sm:$0xff]  }
  0x23   :  { %2735 = vmatpush1.bf16.msra.mxu1 %v4098_v34  ;;  %v4187_v33 = vld [vmem:[%s6118_s1 + $0x760] ss:$8 sps:$4 sm:$0xff]  }
  0x24   :  { %3053 = vmatpush1.bf16.msra.mxu0 %v4099_v35  ;;  %2736 = vmatprep.subr.bf16.mxu1 %v4100_v36  ;;  %v4242_v34 = vld [vmem:[%s6119_s0 + $0xc8] ss:$100 sps:$4 sm:$0xff]   ;;  %v4243_v35 = vld [vmem:[%s6119_s0 + $0xf8] ss:$100 sps:$4 sm:$0xff]  }
  0x25   :  { %3054 = vmatprep.subr.bf16.mxu0 %v4102_v37  ;;  %v4192_v36 = vld [vmem:[%s6118_s1 + $0x174] ss:$8 sps:$4 sm:$0xff]  }
  0x26   :  { %v4195_v37 = vld [vmem:[%s6118_s1 + $0x774] ss:$8 sps:$4 sm:$0xff]  }
  0x27   :  { %2737 = vmatpush1.bf16.msra.mxu1 %v4104_v38  ;;  %v4190_v38 = vld [vmem:[%s6118_s1 + $0x170] ss:$8 sps:$4 sm:$0xff]  }
  0x28   :  { %3055 = vmatpush1.bf16.msra.mxu0 %v4105_v39  ;;  %2738 = vmatprep.subr.bf16.mxu1 %v4106_v40  ;;  %v4193_v39 = vld [vmem:[%s6118_s1 + $0x770] ss:$8 sps:$4 sm:$0xff]  }
  0x29   :  { %3056 = vmatprep.subr.bf16.mxu0 %v4108_v41  ;;  %v4252_v40 = vld [vmem:[%s6119_s0 + $0xc] ss:$100 sps:$4 sm:$0xff]  }
  0x2a   :  { %v4198_v41 = vld [vmem:[%s6118_s1 + $0x184] ss:$8 sps:$4 sm:$0xff]  }
  0x2b   :  { %2739 = vmatpush1.bf16.msra.mxu1 %v4110_v42  ;;  %v4201_v42 = vld [vmem:[%s6118_s1 + $0x784] ss:$8 sps:$4 sm:$0xff]  }
  0x2c   :  { %3057 = vmatpush1.bf16.msra.mxu0 %v4111_v43  ;;  %2740 = vmatprep.subr.bf16.mxu1 %v4112_v44  ;;  %v4258_v43 = vld [vmem:[%s6119_s0 + $0x3c] ss:$100 sps:$4 sm:$0xff]  }
  0x2d   :  { %3058 = vmatprep.subr.bf16.mxu0 %v4114_v45  ;;  %v4196_v44 = vld [vmem:[%s6118_s1 + $0x180] ss:$8 sps:$4 sm:$0xff]  }
  0x2e   :  { %v4199_v45 = vld [vmem:[%s6118_s1 + $0x780] ss:$8 sps:$4 sm:$0xff]  }
  0x2f   :  { %2741 = vmatpush1.bf16.msra.mxu1 %v4116_v46  ;;  %v4204_v46 = vld [vmem:[%s6118_s1 + $0x194] ss:$8 sps:$4 sm:$0xff]  }
  0x30   :  { %3059 = vmatpush1.bf16.msra.mxu0 %v4117_v47  ;;  %2742 = vmatprep.subr.bf16.mxu1 %v4118_v49  ;;  %v4207_v47 = vld [vmem:[%s6118_s1 + $0x794] ss:$8 sps:$4 sm:$0xff]   ;;  %v4205_v49 = vld [vmem:[%s6118_s1 + $0x790] ss:$8 sps:$4 sm:$0xff]  }
  0x31   :  { %3060 = vmatprep.subr.bf16.mxu0 %v4120_v50  ;;  %v4210_v50 = vld [vmem:[%s6118_s1 + $0x1a4] ss:$8 sps:$4 sm:$0xff]  }
  0x33   :  { %2743 = vmatpush1.bf16.msra.mxu1 %v4122_v52  ;;  %v4208_v52 = vld [vmem:[%s6118_s1 + $0x1a0] ss:$8 sps:$4 sm:$0xff]  }
  0x34   :  { %3061 = vmatpush1.bf16.msra.mxu0 %v4123_v53  ;;  %2744 = vmatprep.subr.bf16.mxu1 %v4124_v54  ;;  %v4211_v53 = vld [vmem:[%s6118_s1 + $0x7a0] ss:$8 sps:$4 sm:$0xff]   ;;  %v4216_v54 = vld [vmem:[%s6118_s1 + $0x1b4] ss:$8 sps:$4 sm:$0xff]  }
  0x35   :  { %3062 = vmatprep.subr.bf16.mxu0 %v4126_v55  ;;  %v4219_v55 = vld [vmem:[%s6118_s1 + $0x7b4] ss:$8 sps:$4 sm:$0xff]  }
  0x37   :  { %2745 = vmatpush1.bf16.msra.mxu1 %v4128_v56  ;;  %v4214_v56 = vld [vmem:[%s6118_s1 + $0x1b0] ss:$8 sps:$4 sm:$0xff]  }
  0x38   :  { %3063 = vmatpush1.bf16.msra.mxu0 %v4129_v57  ;;  %2746 = vmatprep.subr.bf16.mxu1 %v4130_v58  ;;  %v4217_v57 = vld [vmem:[%s6118_s1 + $0x7b0] ss:$8 sps:$4 sm:$0xff]   ;;  %v4222_v58 = vld [vmem:[%s6118_s1 + $0x1c4] ss:$8 sps:$4 sm:$0xff]  }
  0x39   :  { %3064 = vmatprep.subr.bf16.mxu0 %v4132_v59  ;;  %v4225_v59 = vld [vmem:[%s6118_s1 + $0x7c4] ss:$8 sps:$4 sm:$0xff]  }
  0x3b   :  { %2747 = vmatpush1.bf16.msra.mxu1 %v4134_v60  ;;  %v4220_v60 = vld [vmem:[%s6118_s1 + $0x1c0] ss:$8 sps:$4 sm:$0xff]  }
  0x3c   :  { %3065 = vmatpush1.bf16.msra.mxu0 %v4135_v61  ;;  %2748 = vmatprep.subr.bf16.mxu1 %v4136_v62  ;;  %v4223_v61 = vld [vmem:[%s6118_s1 + $0x7c0] ss:$8 sps:$4 sm:$0xff]   ;;  %v4228_v62 = vld [vmem:[%s6118_s1 + $0x1d4] ss:$8 sps:$4 sm:$0xff]  }
  0x3d   :  { %3066 = vmatprep.subr.bf16.mxu0 %v4138_v63  ;;  %v4231_v63 = vld [vmem:[%s6118_s1 + $0x7d4] ss:$8 sps:$4 sm:$0xff]  }
  0x3f   :  { %2749 = vmatpush1.bf16.msra.mxu1 %v4140_v0  ;;  %v4226_v0 = vld [vmem:[%s6118_s1 + $0x1d0] ss:$8 sps:$4 sm:$0xff]  }
  0x40   :  { %3067 = vmatpush1.bf16.msra.mxu0 %v4141_v1  ;;  %2771 = vmatprep.subr.bf16.mxu1 %v4147_v2  ;;  %v4229_v1 = vld [vmem:[%s6118_s1 + $0x7d0] ss:$8 sps:$4 sm:$0xff]   ;;  %v4236_v2 = vld [vmem:[%s6118_s1 + $0x1e4] ss:$8 sps:$4 sm:$0xff]  }
  0x41   :  { %3089 = vmatprep.subr.bf16.mxu0 %v4153_v3  ;;  %v4241_v3 = vld [vmem:[%s6118_s1 + $0x7e4] ss:$8 sps:$4 sm:$0xff]  }
  0x42   :  { %2751 = vmatmul.mubr.bf16.vlgmr.msra.gmra.mrb[0].mxu1 %v4142_v4  ;;  %v4234_v4 = vld [vmem:[%s6118_s1 + $0x1e0] ss:$8 sps:$4 sm:$0xff]  }
  0x43   :  { %3069 = vmatmul.mubr.bf16.vlgmr.msra.gmra.mrb[0].mxu0 %v4148_v6  ;;  %2772 = vmatpush1.bf16.msra.mxu1 %v4145_v5  ;;  %v4239_v5 = vld [vmem:[%s6118_s1 + $0x7e0] ss:$8 sps:$4 sm:$0xff]   ;;  %v4246_v6 = vld [vmem:[%s6118_s1 + $0x1f4] ss:$8 sps:$4 sm:$0xff]  }
  0x44   :  { %3090 = vmatpush1.bf16.msra.mxu0 %v4151_v7  ;;  %2773 = vmatprep.subr.bf16.mxu1 %v4156_v8  ;;  %v4249_v7 = vld [vmem:[%s6118_s1 + $0x7f4] ss:$8 sps:$4 sm:$0xff]   ;;  %v4244_v8 = vld [vmem:[%s6118_s1 + $0x1f0] ss:$8 sps:$4 sm:$0xff]  }
  0x45   :  { %3091 = vmatprep.subr.bf16.mxu0 %v4159_v9  ;;  %2760 = vmatprep.mubr.bf16.mxu1 %v4232_v28  ;;  %v4247_v9 = vld [vmem:[%s6118_s1 + $0x7f0] ss:$8 sps:$4 sm:$0xff]   ;;  %v4276_v28 = vld [vmem:[%s6118_s1 + $0x234] ss:$8 sps:$4 sm:$0xff]  }
  0x46   :  { %3078 = vmatprep.mubr.bf16.mxu0 %v4237_v31  ;;  %v4277_v31 = vld [vmem:[%s6118_s1 + $0x830] ss:$8 sps:$4 sm:$0xff]  }
  0x47   :  { %2774 = vmatpush1.bf16.msra.mxu1 %v4154_v10  ;;  %v4255_v10 = vld [vmem:[%s6118_s1 + $0x204] ss:$8 sps:$4 sm:$0xff]  }
  0x48   :  { %3092 = vmatpush1.bf16.msra.mxu0 %v4157_v11  ;;  %2775 = vmatprep.subr.bf16.mxu1 %v4162_v12  ;;  %v4261_v11 = vld [vmem:[%s6118_s1 + $0x804] ss:$8 sps:$4 sm:$0xff]  }
  0x49   :  { %3093 = vmatprep.subr.bf16.mxu0 %v4165_v13  ;;  %v4250_v12 = vld [vmem:[%s6119_s0 + $0x8] ss:$100 sps:$4 sm:$0xff]  }
  0x4a   :  { %2761 = vmatmul.mubr.bf16.gmra.mrb[4].mxu1 %v4242_v34  ;;  %v4253_v13 = vld [vmem:[%s6118_s1 + $0x200] ss:$8 sps:$4 sm:$0xff]   ;;  %v4285_v34 = vld [vmem:[%s6118_s1 + $0x844] ss:$8 sps:$4 sm:$0xff]  }
  0x4b   :  { %2776 = vmatpush1.bf16.msra.mxu1 %v4160_v14  ;;  %3079 = vmatmul.mubr.bf16.gmra.mrb[4].mxu0 %v4243_v35  ;;  %v4256_v14 = vld [vmem:[%s6119_s0 + $0x38] ss:$100 sps:$4 sm:$0xff]   ;;  %v4366_v35 = vld [vmem:[%s6119_s0 + $0x44] ss:$100 sps:$4 sm:$0xff]  }
  0x4c   :  { %3094 = vmatpush1.bf16.msra.mxu0 %v4163_v15  ;;  %2777 = vmatprep.subr.bf16.mxu1 %v4168_v16  ;;  %v4259_v15 = vld [vmem:[%s6118_s1 + $0x800] ss:$8 sps:$4 sm:$0xff]   ;;  %v4264_v16 = vld [vmem:[%s6118_s1 + $0x214] ss:$8 sps:$4 sm:$0xff]  }
  0x4d   :  { %3095 = vmatprep.subr.bf16.mxu0 %v4171_v17  ;;  %2803 = vmatprep.mubr.bf16.mxu1 %v4252_v40  ;;  %v4267_v17 = vld [vmem:[%s6118_s1 + $0x814] ss:$8 sps:$4 sm:$0xff]   ;;  %v4286_v40 = vld [vmem:[%s6118_s1 + $0x250] ss:$8 sps:$4 sm:$0xff]  }
  0x4e   :  { %3121 = vmatprep.mubr.bf16.mxu0 %v4258_v43  ;;  %v4297_v43 = vld [vmem:[%s6118_s1 + $0x864] ss:$8 sps:$4 sm:$0xff]  }
  0x4f   :  { %2778 = vmatpush1.bf16.msra.mxu1 %v4166_v18  ;;  %v4262_v18 = vld [vmem:[%s6118_s1 + $0x210] ss:$8 sps:$4 sm:$0xff]  }
  0x50   :  { %3096 = vmatpush1.bf16.msra.mxu0 %v4169_v19  ;;  %2779 = vmatprep.subr.bf16.mxu1 %v4174_v20  ;;  %v4265_v19 = vld [vmem:[%s6118_s1 + $0x810] ss:$8 sps:$4 sm:$0xff]  }
  0x51   :  { %3097 = vmatprep.subr.bf16.mxu0 %v4177_v21  ;;  %v4340_v20 = vld [vmem:[%s6119_s0 + $0xd4] ss:$100 sps:$4 sm:$0xff]   ;;  %v4270_v21 = vld [vmem:[%s6118_s1 + $0x224] ss:$8 sps:$4 sm:$0xff]  }
  0x53   :  { %2780 = vmatpush1.bf16.msra.mxu1 %v4172_v22  ;;  %v4273_v22 = vld [vmem:[%s6118_s1 + $0x824] ss:$8 sps:$4 sm:$0xff]  }
  0x54   :  { %3098 = vmatpush1.bf16.msra.mxu0 %v4175_v23  ;;  %2781 = vmatprep.subr.bf16.mxu1 %v4180_v24  ;;  %v4345_v23 = vld [vmem:[%s6119_s0 + $0x104] ss:$100 sps:$4 sm:$0xff]  }
  0x55   :  { %3099 = vmatprep.subr.bf16.mxu0 %v4183_v25  ;;  %v4268_v24 = vld [vmem:[%s6118_s1 + $0x220] ss:$8 sps:$4 sm:$0xff]  }
  0x56   :  { %v4271_v25 = vld [vmem:[%s6118_s1 + $0x820] ss:$8 sps:$4 sm:$0xff]  }
  0x57   :  { %2782 = vmatpush1.bf16.msra.mxu1 %v4178_v26  ;;  %v4350_v26 = vld [vmem:[%s6119_s0 + $0xd0] ss:$100 sps:$4 sm:$0xff]  }
  0x58   :  { %3100 = vmatpush1.bf16.msra.mxu0 %v4181_v27  ;;  %2783 = vmatprep.subr.bf16.mxu1 %v4186_v29  ;;  %v4351_v27 = vld [vmem:[%s6119_s0 + $0x100] ss:$100 sps:$4 sm:$0xff]   ;;  %v4279_v29 = vld [vmem:[%s6118_s1 + $0x834] ss:$8 sps:$4 sm:$0xff]  }
  0x59   :  { %3101 = vmatprep.subr.bf16.mxu0 %v4189_v30  ;;  %v4274_v30 = vld [vmem:[%s6118_s1 + $0x230] ss:$8 sps:$4 sm:$0xff]  }
  0x5b   :  { %2784 = vmatpush1.bf16.msra.mxu1 %v4184_v32  ;;  %v4360_v32 = vld [vmem:[%s6119_s0 + $0x14] ss:$100 sps:$4 sm:$0xff]  }
  0x5c   :  { %3102 = vmatpush1.bf16.msra.mxu0 %v4187_v33  ;;  %2785 = vmatprep.subr.bf16.mxu1 %v4192_v36  ;;  %v4282_v33 = vld [vmem:[%s6118_s1 + $0x244] ss:$8 sps:$4 sm:$0xff]   ;;  %v4280_v36 = vld [vmem:[%s6118_s1 + $0x240] ss:$8 sps:$4 sm:$0xff]  }
  0x5d   :  { %3103 = vmatprep.subr.bf16.mxu0 %v4195_v37  ;;  %v4283_v37 = vld [vmem:[%s6118_s1 + $0x840] ss:$8 sps:$4 sm:$0xff]  }
  0x5f   :  { %2786 = vmatpush1.bf16.msra.mxu1 %v4190_v38  ;;  %v4288_v38 = vld [vmem:[%s6118_s1 + $0x254] ss:$8 sps:$4 sm:$0xff]  }
  0x60   :  { %3104 = vmatpush1.bf16.msra.mxu0 %v4193_v39  ;;  %2787 = vmatprep.subr.bf16.mxu1 %v4198_v41  ;;  %v4291_v39 = vld [vmem:[%s6118_s1 + $0x854] ss:$8 sps:$4 sm:$0xff]   ;;  %v4289_v41 = vld [vmem:[%s6118_s1 + $0x850] ss:$8 sps:$4 sm:$0xff]  }
  0x61   :  { %3105 = vmatprep.subr.bf16.mxu0 %v4201_v42  ;;  %v4294_v42 = vld [vmem:[%s6118_s1 + $0x264] ss:$8 sps:$4 sm:$0xff]  }
  0x63   :  { %2788 = vmatpush1.bf16.msra.mxu1 %v4196_v44  ;;  %v4292_v44 = vld [vmem:[%s6118_s1 + $0x260] ss:$8 sps:$4 sm:$0xff]  }
  0x64   :  { %3106 = vmatpush1.bf16.msra.mxu0 %v4199_v45  ;;  %2789 = vmatprep.subr.bf16.mxu1 %v4204_v46  ;;  %v4295_v45 = vld [vmem:[%s6118_s1 + $0x860] ss:$8 sps:$4 sm:$0xff]   ;;  %v4300_v46 = vld [vmem:[%s6118_s1 + $0x274] ss:$8 sps:$4 sm:$0xff]  }
  0x65   :  { %3107 = vmatprep.subr.bf16.mxu0 %v4207_v47  ;;  %v4303_v47 = vld [vmem:[%s6118_s1 + $0x874] ss:$8 sps:$4 sm:$0xff]  }
  0x67   :  { %2790 = vmatpush1.bf16.msra.mxu1 %v4202_v48  ;;  %v4298_v48 = vld [vmem:[%s6118_s1 + $0x270] ss:$8 sps:$4 sm:$0xff]  }
  0x68   :  { %3108 = vmatpush1.bf16.msra.mxu0 %v4205_v49  ;;  %2791 = vmatprep.subr.bf16.mxu1 %v4210_v50  ;;  %v4301_v49 = vld [vmem:[%s6118_s1 + $0x870] ss:$8 sps:$4 sm:$0xff]   ;;  %v4306_v50 = vld [vmem:[%s6118_s1 + $0x284] ss:$8 sps:$4 sm:$0xff]  }
  0x69   :  { %3109 = vmatprep.subr.bf16.mxu0 %v4213_v51  ;;  %v4309_v51 = vld [vmem:[%s6118_s1 + $0x884] ss:$8 sps:$4 sm:$0xff]  }
  0x6b   :  { %2792 = vmatpush1.bf16.msra.mxu1 %v4208_v52  ;;  %v4304_v52 = vld [vmem:[%s6118_s1 + $0x280] ss:$8 sps:$4 sm:$0xff]  }
  0x6c   :  { %3110 = vmatpush1.bf16.msra.mxu0 %v4211_v53  ;;  %2793 = vmatprep.subr.bf16.mxu1 %v4216_v54  ;;  %v4307_v53 = vld [vmem:[%s6118_s1 + $0x880] ss:$8 sps:$4 sm:$0xff]   ;;  %v4312_v54 = vld [vmem:[%s6118_s1 + $0x294] ss:$8 sps:$4 sm:$0xff]  }
  0x6d   :  { %3111 = vmatprep.subr.bf16.mxu0 %v4219_v55  ;;  %v4315_v55 = vld [vmem:[%s6118_s1 + $0x894] ss:$8 sps:$4 sm:$0xff]  }
  0x6f   :  { %2794 = vmatpush1.bf16.msra.mxu1 %v4214_v56  ;;  %v4310_v56 = vld [vmem:[%s6118_s1 + $0x290] ss:$8 sps:$4 sm:$0xff]  }
  0x70   :  { %3112 = vmatpush1.bf16.msra.mxu0 %v4217_v57  ;;  %2795 = vmatprep.subr.bf16.mxu1 %v4222_v58  ;;  %v4313_v57 = vld [vmem:[%s6118_s1 + $0x890] ss:$8 sps:$4 sm:$0xff]   ;;  %v4318_v58 = vld [vmem:[%s6118_s1 + $0x2a4] ss:$8 sps:$4 sm:$0xff]  }
  0x71   :  { %3113 = vmatprep.subr.bf16.mxu0 %v4225_v59  ;;  %v4321_v59 = vld [vmem:[%s6118_s1 + $0x8a4] ss:$8 sps:$4 sm:$0xff]  }
  0x73   :  { %2796 = vmatpush1.bf16.msra.mxu1 %v4220_v60  ;;  %v4316_v60 = vld [vmem:[%s6118_s1 + $0x2a0] ss:$8 sps:$4 sm:$0xff]  }
  0x74   :  { %3114 = vmatpush1.bf16.msra.mxu0 %v4223_v61  ;;  %2797 = vmatprep.subr.bf16.mxu1 %v4228_v62  ;;  %v4319_v61 = vld [vmem:[%s6118_s1 + $0x8a0] ss:$8 sps:$4 sm:$0xff]   ;;  %v4324_v62 = vld [vmem:[%s6118_s1 + $0x2b4] ss:$8 sps:$4 sm:$0xff]  }
  0x75   :  { %3115 = vmatprep.subr.bf16.mxu0 %v4231_v63  ;;  %v4327_v63 = vld [vmem:[%s6118_s1 + $0x8b4] ss:$8 sps:$4 sm:$0xff]  }
  0x77   :  { %2798 = vmatpush1.bf16.msra.mxu1 %v4226_v0  ;;  %v4322_v0 = vld [vmem:[%s6118_s1 + $0x2b0] ss:$8 sps:$4 sm:$0xff]  }
  0x78   :  { %3116 = vmatpush1.bf16.msra.mxu0 %v4229_v1  ;;  %2799 = vmatprep.subr.bf16.mxu1 %v4236_v2  ;;  %v4325_v1 = vld [vmem:[%s6118_s1 + $0x8b0] ss:$8 sps:$4 sm:$0xff]   ;;  %v4330_v2 = vld [vmem:[%s6118_s1 + $0x2c4] ss:$8 sps:$4 sm:$0xff]  }
  0x79   :  { %3117 = vmatprep.subr.bf16.mxu0 %v4241_v3  ;;  %v4333_v3 = vld [vmem:[%s6118_s1 + $0x8c4] ss:$8 sps:$4 sm:$0xff]  }
  0x7b   :  { %2800 = vmatpush1.bf16.msra.mxu1 %v4234_v4  ;;  %v4328_v4 = vld [vmem:[%s6118_s1 + $0x2c0] ss:$8 sps:$4 sm:$0xff]  }
  0x7c   :  { %3118 = vmatpush1.bf16.msra.mxu0 %v4239_v5  ;;  %2801 = vmatprep.subr.bf16.mxu1 %v4246_v6  ;;  %v4331_v5 = vld [vmem:[%s6118_s1 + $0x8c0] ss:$8 sps:$4 sm:$0xff]   ;;  %v4336_v6 = vld [vmem:[%s6118_s1 + $0x2d4] ss:$8 sps:$4 sm:$0xff]  }
  0x7d   :  { %3119 = vmatprep.subr.bf16.mxu0 %v4249_v7  ;;  %v4339_v7 = vld [vmem:[%s6118_s1 + $0x8d4] ss:$8 sps:$4 sm:$0xff]  }
  0x7f   :  { %2802 = vmatpush1.bf16.msra.mxu1 %v4244_v8  ;;  %v4334_v8 = vld [vmem:[%s6118_s1 + $0x2d0] ss:$8 sps:$4 sm:$0xff]  }
  0x80   :  { %3120 = vmatpush1.bf16.msra.mxu0 %v4247_v9  ;;  %2824 = vmatprep.subr.bf16.mxu1 %v4255_v10  ;;  %v4337_v9 = vld [vmem:[%s6118_s1 + $0x8d0] ss:$8 sps:$4 sm:$0xff]   ;;  %v4344_v10 = vld [vmem:[%s6118_s1 + $0x2e4] ss:$8 sps:$4 sm:$0xff]  }
  0x81   :  { %3142 = vmatprep.subr.bf16.mxu0 %v4261_v11  ;;  %v4349_v11 = vld [vmem:[%s6118_s1 + $0x8e4] ss:$8 sps:$4 sm:$0xff]  }
  0x82   :  { %2804 = vmatmul.mubr.bf16.vlgmr.msra.gmra.mrb[0].mxu1 %v4250_v12  ;;  %v4342_v12 = vld [vmem:[%s6118_s1 + $0x2e0] ss:$8 sps:$4 sm:$0xff]  }
  0x83   :  { %3122 = vmatmul.mubr.bf16.vlgmr.msra.gmra.mrb[0].mxu0 %v4256_v14  ;;  %2825 = vmatpush1.bf16.msra.mxu1 %v4253_v13  ;;  %v4347_v13 = vld [vmem:[%s6118_s1 + $0x8e0] ss:$8 sps:$4 sm:$0xff]   ;;  %v4354_v14 = vld [vmem:[%s6118_s1 + $0x2f4] ss:$8 sps:$4 sm:$0xff]  }
  0x84   :  { %3143 = vmatpush1.bf16.msra.mxu0 %v4259_v15  ;;  %2826 = vmatprep.subr.bf16.mxu1 %v4264_v16  ;;  %v4357_v15 = vld [vmem:[%s6118_s1 + $0x8f4] ss:$8 sps:$4 sm:$0xff]   ;;  %v4352_v16 = vld [vmem:[%s6118_s1 + $0x2f0] ss:$8 sps:$4 sm:$0xff]  }
  0x85   :  { %3144 = vmatprep.subr.bf16.mxu0 %v4267_v17  ;;  %2813 = vmatprep.mubr.bf16.mxu1 %v4340_v20  ;;  %v4355_v17 = vld [vmem:[%s6118_s1 + $0x8f0] ss:$8 sps:$4 sm:$0xff]  }
  0x86   :  { %3131 = vmatprep.mubr.bf16.mxu0 %v4345_v23  ;;  %v4358_v20 = vld [vmem:[%s6119_s0 + $0x10] ss:$100 sps:$4 sm:$0xff]   ;;  %v4367_v23 = vld [vmem:[%s6118_s1 + $0x900] ss:$8 sps:$4 sm:$0xff]  }
  0x87   :  { %2827 = vmatpush1.bf16.msra.mxu1 %v4262_v18  ;;  %v4363_v18 = vld [vmem:[%s6118_s1 + $0x304] ss:$8 sps:$4 sm:$0xff]  }
  0x88   :  { %3145 = vmatpush1.bf16.msra.mxu0 %v4265_v19  ;;  %2828 = vmatprep.subr.bf16.mxu1 %v4270_v21  ;;  %v4369_v19 = vld [vmem:[%s6118_s1 + $0x904] ss:$8 sps:$4 sm:$0xff]   ;;  %v4361_v21 = vld [vmem:[%s6118_s1 + $0x300] ss:$8 sps:$4 sm:$0xff]  }
  0x89   :  { %3146 = vmatprep.subr.bf16.mxu0 %v4273_v22  ;;  %v4364_v22 = vld [vmem:[%s6119_s0 + $0x40] ss:$100 sps:$4 sm:$0xff]  }
  0x8a   :  { %2814 = vmatmul.mubr.bf16.gmra.mrb[4].mxu1 %v4350_v26  ;;  %v4448_v26 = vld [vmem:[%s6119_s0 + $0xdc] ss:$100 sps:$4 sm:$0xff]  }
  0x8b   :  { %3132 = vmatmul.mubr.bf16.gmra.mrb[4].mxu0 %v4351_v27  ;;  %2829 = vmatpush1.bf16.msra.mxu1 %v4268_v24  ;;  %v4372_v24 = vld [vmem:[%s6118_s1 + $0x314] ss:$8 sps:$4 sm:$0xff]   ;;  %v4453_v27 = vld [vmem:[%s6119_s0 + $0x10c] ss:$100 sps:$4 sm:$0xff]  }
  0x8c   :  { %3147 = vmatpush1.bf16.msra.mxu0 %v4271_v25  ;;  %2830 = vmatprep.subr.bf16.mxu1 %v4276_v28  ;;  %v4375_v25 = vld [vmem:[%s6118_s1 + $0x914] ss:$8 sps:$4 sm:$0xff]   ;;  %v4370_v28 = vld [vmem:[%s6118_s1 + $0x310] ss:$8 sps:$4 sm:$0xff]  }
  0x8d   :  { %3148 = vmatprep.subr.bf16.mxu0 %v4279_v29  ;;  %2856 = vmatprep.mubr.bf16.mxu1 %v4360_v32  ;;  %v4373_v29 = vld [vmem:[%s6118_s1 + $0x910] ss:$8 sps:$4 sm:$0xff]   ;;  %v4376_v32 = vld [vmem:[%s6118_s1 + $0x320] ss:$8 sps:$4 sm:$0xff]  }
  0x8e   :  { %3174 = vmatprep.mubr.bf16.mxu0 %v4366_v35  ;;  %v4459_v35 = vld [vmem:[%s6119_s0 + $0x108] ss:$100 sps:$4 sm:$0xff]  }
  0x8f   :  { %2831 = vmatpush1.bf16.msra.mxu1 %v4274_v30  ;;  %v4378_v30 = vld [vmem:[%s6118_s1 + $0x324] ss:$8 sps:$4 sm:$0xff]  }
  0x90   :  { %3149 = vmatpush1.bf16.msra.mxu0 %v4277_v31  ;;  %2832 = vmatprep.subr.bf16.mxu1 %v4282_v33  ;;  %v4381_v31 = vld [vmem:[%s6118_s1 + $0x924] ss:$8 sps:$4 sm:$0xff]   ;;  %v4379_v33 = vld [vmem:[%s6118_s1 + $0x920] ss:$8 sps:$4 sm:$0xff]  }
  0x91   :  { %3150 = vmatprep.subr.bf16.mxu0 %v4285_v34  ;;  %v4458_v34 = vld [vmem:[%s6119_s0 + $0xd8] ss:$100 sps:$4 sm:$0xff]  }
  0x93   :  { %2833 = vmatpush1.bf16.msra.mxu1 %v4280_v36  ;;  %v4384_v36 = vld [vmem:[%s6118_s1 + $0x334] ss:$8 sps:$4 sm:$0xff]  }
  0x94   :  { %3151 = vmatpush1.bf16.msra.mxu0 %v4283_v37  ;;  %2834 = vmatprep.subr.bf16.mxu1 %v4288_v38  ;;  %v4387_v37 = vld [vmem:[%s6118_s1 + $0x934] ss:$8 sps:$4 sm:$0xff]  }
  0x95   :  { %3152 = vmatprep.subr.bf16.mxu0 %v4291_v39  ;;  %v4468_v38 = vld [vmem:[%s6119_s0 + $0x1c] ss:$100 sps:$4 sm:$0xff]   ;;  %v4474_v39 = vld [vmem:[%s6119_s0 + $0x4c] ss:$100 sps:$4 sm:$0xff]  }
  0x97   :  { %2835 = vmatpush1.bf16.msra.mxu1 %v4286_v40  ;;  %v4382_v40 = vld [vmem:[%s6118_s1 + $0x330] ss:$8 sps:$4 sm:$0xff]  }
  0x98   :  { %3153 = vmatpush1.bf16.msra.mxu0 %v4289_v41  ;;  %2836 = vmatprep.subr.bf16.mxu1 %v4294_v42  ;;  %v4385_v41 = vld [vmem:[%s6118_s1 + $0x930] ss:$8 sps:$4 sm:$0xff]   ;;  %v4390_v42 = vld [vmem:[%s6118_s1 + $0x344] ss:$8 sps:$4 sm:$0xff]  }
  0x99   :  { %3154 = vmatprep.subr.bf16.mxu0 %v4297_v43  ;;  %v4393_v43 = vld [vmem:[%s6118_s1 + $0x944] ss:$8 sps:$4 sm:$0xff]  }
  0x9b   :  { %2837 = vmatpush1.bf16.msra.mxu1 %v4292_v44  ;;  %v4388_v44 = vld [vmem:[%s6118_s1 + $0x340] ss:$8 sps:$4 sm:$0xff]  }
  0x9c   :  { %3155 = vmatpush1.bf16.msra.mxu0 %v4295_v45  ;;  %2838 = vmatprep.subr.bf16.mxu1 %v4300_v46  ;;  %v4391_v45 = vld [vmem:[%s6118_s1 + $0x940] ss:$8 sps:$4 sm:$0xff]   ;;  %v4396_v46 = vld [vmem:[%s6118_s1 + $0x354] ss:$8 sps:$4 sm:$0xff]  }
  0x9d   :  { %3156 = vmatprep.subr.bf16.mxu0 %v4303_v47  ;;  %v4399_v47 = vld [vmem:[%s6118_s1 + $0x954] ss:$8 sps:$4 sm:$0xff]  }
  0x9f   :  { %2839 = vmatpush1.bf16.msra.mxu1 %v4298_v48  ;;  %v4394_v48 = vld [vmem:[%s6118_s1 + $0x350] ss:$8 sps:$4 sm:$0xff]  }
  0xa0   :  { %3157 = vmatpush1.bf16.msra.mxu0 %v4301_v49  ;;  %2840 = vmatprep.subr.bf16.mxu1 %v4306_v50  ;;  %v4397_v49 = vld [vmem:[%s6118_s1 + $0x950] ss:$8 sps:$4 sm:$0xff]   ;;  %v4402_v50 = vld [vmem:[%s6118_s1 + $0x364] ss:$8 sps:$4 sm:$0xff]  }
  0xa1   :  { %3158 = vmatprep.subr.bf16.mxu0 %v4309_v51  ;;  %v4405_v51 = vld [vmem:[%s6118_s1 + $0x964] ss:$8 sps:$4 sm:$0xff]  }
  0xa3   :  { %2841 = vmatpush1.bf16.msra.mxu1 %v4304_v52  ;;  %v4400_v52 = vld [vmem:[%s6118_s1 + $0x360] ss:$8 sps:$4 sm:$0xff]  }
  0xa4   :  { %3159 = vmatpush1.bf16.msra.mxu0 %v4307_v53  ;;  %2842 = vmatprep.subr.bf16.mxu1 %v4312_v54  ;;  %v4403_v53 = vld [vmem:[%s6118_s1 + $0x960] ss:$8 sps:$4 sm:$0xff]   ;;  %v4408_v54 = vld [vmem:[%s6118_s1 + $0x374] ss:$8 sps:$4 sm:$0xff]  }
  0xa5   :  { %3160 = vmatprep.subr.bf16.mxu0 %v4315_v55  ;;  %v4411_v55 = vld [vmem:[%s6118_s1 + $0x974] ss:$8 sps:$4 sm:$0xff]  }
  0xa7   :  { %2843 = vmatpush1.bf16.msra.mxu1 %v4310_v56  ;;  %v4406_v56 = vld [vmem:[%s6118_s1 + $0x370] ss:$8 sps:$4 sm:$0xff]  }
  0xa8   :  { %3161 = vmatpush1.bf16.msra.mxu0 %v4313_v57  ;;  %2844 = vmatprep.subr.bf16.mxu1 %v4318_v58  ;;  %v4409_v57 = vld [vmem:[%s6118_s1 + $0x970] ss:$8 sps:$4 sm:$0xff]   ;;  %v4414_v58 = vld [vmem:[%s6118_s1 + $0x384] ss:$8 sps:$4 sm:$0xff]  }
  0xa9   :  { %3162 = vmatprep.subr.bf16.mxu0 %v4321_v59  ;;  %v4417_v59 = vld [vmem:[%s6118_s1 + $0x984] ss:$8 sps:$4 sm:$0xff]  }
  0xab   :  { %2845 = vmatpush1.bf16.msra.mxu1 %v4316_v60  ;;  %v4412_v60 = vld [vmem:[%s6118_s1 + $0x380] ss:$8 sps:$4 sm:$0xff]  }
  0xac   :  { %3163 = vmatpush1.bf16.msra.mxu0 %v4319_v61  ;;  %2846 = vmatprep.subr.bf16.mxu1 %v4324_v62  ;;  %v4415_v61 = vld [vmem:[%s6118_s1 + $0x980] ss:$8 sps:$4 sm:$0xff]   ;;  %v4420_v62 = vld [vmem:[%s6118_s1 + $0x394] ss:$8 sps:$4 sm:$0xff]  }
  0xad   :  { %3164 = vmatprep.subr.bf16.mxu0 %v4327_v63  ;;  %v4423_v63 = vld [vmem:[%s6118_s1 + $0x994] ss:$8 sps:$4 sm:$0xff]  }
  0xaf   :  { %2847 = vmatpush1.bf16.msra.mxu1 %v4322_v0  ;;  %v4418_v0 = vld [vmem:[%s6118_s1 + $0x390] ss:$8 sps:$4 sm:$0xff]  }
  0xb0   :  { %3165 = vmatpush1.bf16.msra.mxu0 %v4325_v1  ;;  %2848 = vmatprep.subr.bf16.mxu1 %v4330_v2  ;;  %v4421_v1 = vld [vmem:[%s6118_s1 + $0x990] ss:$8 sps:$4 sm:$0xff]   ;;  %v4426_v2 = vld [vmem:[%s6118_s1 + $0x3a4] ss:$8 sps:$4 sm:$0xff]  }
  0xb1   :  { %3166 = vmatprep.subr.bf16.mxu0 %v4333_v3  ;;  %v4429_v3 = vld [vmem:[%s6118_s1 + $0x9a4] ss:$8 sps:$4 sm:$0xff]  }
  0xb3   :  { %2849 = vmatpush1.bf16.msra.mxu1 %v4328_v4  ;;  %v4424_v4 = vld [vmem:[%s6118_s1 + $0x3a0] ss:$8 sps:$4 sm:$0xff]  }
  0xb4   :  { %3167 = vmatpush1.bf16.msra.mxu0 %v4331_v5  ;;  %2850 = vmatprep.subr.bf16.mxu1 %v4336_v6  ;;  %v4427_v5 = vld [vmem:[%s6118_s1 + $0x9a0] ss:$8 sps:$4 sm:$0xff]   ;;  %v4432_v6 = vld [vmem:[%s6118_s1 + $0x3b4] ss:$8 sps:$4 sm:$0xff]  }
  0xb5   :  { %3168 = vmatprep.subr.bf16.mxu0 %v4339_v7  ;;  %v4435_v7 = vld [vmem:[%s6118_s1 + $0x9b4] ss:$8 sps:$4 sm:$0xff]  }
  0xb7   :  { %2851 = vmatpush1.bf16.msra.mxu1 %v4334_v8  ;;  %v4430_v8 = vld [vmem:[%s6118_s1 + $0x3b0] ss:$8 sps:$4 sm:$0xff]  }
  0xb8   :  { %3169 = vmatpush1.bf16.msra.mxu0 %v4337_v9  ;;  %2852 = vmatprep.subr.bf16.mxu1 %v4344_v10  ;;  %v4433_v9 = vld [vmem:[%s6118_s1 + $0x9b0] ss:$8 sps:$4 sm:$0xff]   ;;  %v4438_v10 = vld [vmem:[%s6118_s1 + $0x3c4] ss:$8 sps:$4 sm:$0xff]  }
  0xb9   :  { %3170 = vmatprep.subr.bf16.mxu0 %v4349_v11  ;;  %v4441_v11 = vld [vmem:[%s6118_s1 + $0x9c4] ss:$8 sps:$4 sm:$0xff]  }
  0xbb   :  { %2853 = vmatpush1.bf16.msra.mxu1 %v4342_v12  ;;  %v4436_v12 = vld [vmem:[%s6118_s1 + $0x3c0] ss:$8 sps:$4 sm:$0xff]  }
  0xbc   :  { %3171 = vmatpush1.bf16.msra.mxu0 %v4347_v13  ;;  %2854 = vmatprep.subr.bf16.mxu1 %v4354_v14  ;;  %v4439_v13 = vld [vmem:[%s6118_s1 + $0x9c0] ss:$8 sps:$4 sm:$0xff]   ;;  %v4444_v14 = vld [vmem:[%s6118_s1 + $0x3d4] ss:$8 sps:$4 sm:$0xff]  }
  0xbd   :  { %3172 = vmatprep.subr.bf16.mxu0 %v4357_v15  ;;  %v4447_v15 = vld [vmem:[%s6118_s1 + $0x9d4] ss:$8 sps:$4 sm:$0xff]  }
  0xbf   :  { %2855 = vmatpush1.bf16.msra.mxu1 %v4352_v16  ;;  %v4442_v16 = vld [vmem:[%s6118_s1 + $0x3d0] ss:$8 sps:$4 sm:$0xff]  }
  0xc0   :  { %3173 = vmatpush1.bf16.msra.mxu0 %v4355_v17  ;;  %2877 = vmatprep.subr.bf16.mxu1 %v4363_v18  ;;  %v4445_v17 = vld [vmem:[%s6118_s1 + $0x9d0] ss:$8 sps:$4 sm:$0xff]   ;;  %v4452_v18 = vld [vmem:[%s6118_s1 + $0x3e4] ss:$8 sps:$4 sm:$0xff]  }
  0xc1   :  { %3195 = vmatprep.subr.bf16.mxu0 %v4369_v19  ;;  %v4457_v19 = vld [vmem:[%s6118_s1 + $0x9e4] ss:$8 sps:$4 sm:$0xff]  }
  0xc2   :  { %2857 = vmatmul.mubr.bf16.vlgmr.msra.gmra.mrb[0].mxu1 %v4358_v20  ;;  %v4450_v20 = vld [vmem:[%s6118_s1 + $0x3e0] ss:$8 sps:$4 sm:$0xff]  }
  0xc3   :  { %3175 = vmatmul.mubr.bf16.vlgmr.msra.gmra.mrb[0].mxu0 %v4364_v22  ;;  %2878 = vmatpush1.bf16.msra.mxu1 %v4361_v21  ;;  %v4455_v21 = vld [vmem:[%s6118_s1 + $0x9e0] ss:$8 sps:$4 sm:$0xff]   ;;  %v4462_v22 = vld [vmem:[%s6118_s1 + $0x3f4] ss:$8 sps:$4 sm:$0xff]  }
  0xc4   :  { %3196 = vmatpush1.bf16.msra.mxu0 %v4367_v23  ;;  %2879 = vmatprep.subr.bf16.mxu1 %v4372_v24  ;;  %v4465_v23 = vld [vmem:[%s6118_s1 + $0x9f4] ss:$8 sps:$4 sm:$0xff]   ;;  %v4460_v24 = vld [vmem:[%s6118_s1 + $0x3f0] ss:$8 sps:$4 sm:$0xff]  }
  0xc5   :  { %3197 = vmatprep.subr.bf16.mxu0 %v4375_v25  ;;  %2866 = vmatprep.mubr.bf16.mxu1 %v4448_v26  ;;  %v4463_v25 = vld [vmem:[%s6118_s1 + $0x9f0] ss:$8 sps:$4 sm:$0xff]   ;;  %v4471_v26 = vld [vmem:[%s6118_s1 + $0x404] ss:$8 sps:$4 sm:$0xff]  }
  0xc6   :  { %3184 = vmatprep.mubr.bf16.mxu0 %v4453_v27  ;;  %v4477_v27 = vld [vmem:[%s6118_s1 + $0xa04] ss:$8 sps:$4 sm:$0xff]  }
  0xc7   :  { %2880 = vmatpush1.bf16.msra.mxu1 %v4370_v28  ;;  %v4466_v28 = vld [vmem:[%s6119_s0 + $0x18] ss:$100 sps:$4 sm:$0xff]  }
  0xc8   :  { %3198 = vmatpush1.bf16.msra.mxu0 %v4373_v29  ;;  %2881 = vmatprep.subr.bf16.mxu1 %v4378_v30  ;;  %v4469_v29 = vld [vmem:[%s6118_s1 + $0x400] ss:$8 sps:$4 sm:$0xff]  }
  0xc9   :  { %3199 = vmatprep.subr.bf16.mxu0 %v4381_v31  ;;  %v4472_v30 = vld [vmem:[%s6119_s0 + $0x48] ss:$100 sps:$4 sm:$0xff]  }
  0xca   :  { %2867 = vmatmul.mubr.bf16.gmra.mrb[4].mxu1 %v4458_v34  ;;  %v4475_v31 = vld [vmem:[%s6118_s1 + $0xa00] ss:$8 sps:$4 sm:$0xff]  }
  0xcb   :  { %3185 = vmatmul.mubr.bf16.gmra.mrb[4].mxu0 %v4459_v35  ;;  %2882 = vmatpush1.bf16.msra.mxu1 %v4376_v32  ;;  %v4480_v32 = vld [vmem:[%s6118_s1 + $0x414] ss:$8 sps:$4 sm:$0xff]   ;;  %v4556_v34 = vld [vmem:[%s6119_s0 + $0xe4] ss:$100 sps:$4 sm:$0xff]  }
  0xcc   :  { %3200 = vmatpush1.bf16.msra.mxu0 %v4379_v33  ;;  %2883 = vmatprep.subr.bf16.mxu1 %v4384_v36  ;;  %v4483_v33 = vld [vmem:[%s6118_s1 + $0xa14] ss:$8 sps:$4 sm:$0xff]   ;;  %v4478_v36 = vld [vmem:[%s6118_s1 + $0x410] ss:$8 sps:$4 sm:$0xff]  }
  0xcd   :  { %3201 = vmatprep.subr.bf16.mxu0 %v4387_v37  ;;  %2909 = vmatprep.mubr.bf16.mxu1 %v4468_v38  ;;  %v4561_v35 = vld [vmem:[%s6119_s0 + $0x114] ss:$100 sps:$4 sm:$0xff]   ;;  %v4486_v38 = vld [vmem:[%s6118_s1 + $0x424] ss:$8 sps:$4 sm:$0xff]  }
  0xce   :  { %3227 = vmatprep.mubr.bf16.mxu0 %v4474_v39  ;;  %v4481_v37 = vld [vmem:[%s6118_s1 + $0xa10] ss:$8 sps:$4 sm:$0xff]   ;;  %v4489_v39 = vld [vmem:[%s6118_s1 + $0xa24] ss:$8 sps:$4 sm:$0xff]  }
  0xcf   :  { %2884 = vmatpush1.bf16.msra.mxu1 %v4382_v40  ;;  %v4484_v40 = vld [vmem:[%s6118_s1 + $0x420] ss:$8 sps:$4 sm:$0xff]  }
  0xd0   :  { %3202 = vmatpush1.bf16.msra.mxu0 %v4385_v41  ;;  %2885 = vmatprep.subr.bf16.mxu1 %v4390_v42  ;;  %v4487_v41 = vld [vmem:[%s6118_s1 + $0xa20] ss:$8 sps:$4 sm:$0xff]  }
  0xd1   :  { %3203 = vmatprep.subr.bf16.mxu0 %v4393_v43  ;;  %v4566_v42 = vld [vmem:[%s6119_s0 + $0xe0] ss:$100 sps:$4 sm:$0xff]   ;;  %v4567_v43 = vld [vmem:[%s6119_s0 + $0x110] ss:$100 sps:$4 sm:$0xff]  }
  0xd3   :  { %2886 = vmatpush1.bf16.msra.mxu1 %v4388_v44  ;;  %v4492_v44 = vld [vmem:[%s6118_s1 + $0x434] ss:$8 sps:$4 sm:$0xff]  }
  0xd4   :  { %3204 = vmatpush1.bf16.msra.mxu0 %v4391_v45  ;;  %2887 = vmatprep.subr.bf16.mxu1 %v4396_v46  ;;  %v4495_v45 = vld [vmem:[%s6118_s1 + $0xa34] ss:$8 sps:$4 sm:$0xff]   ;;  %v4576_v46 = vld [vmem:[%s6119_s0 + $0x24] ss:$100 sps:$4 sm:$0xff]  }
  0xd5   :  { %3205 = vmatprep.subr.bf16.mxu0 %v4399_v47  ;;  %v4582_v47 = vld [vmem:[%s6119_s0 + $0x54] ss:$100 sps:$4 sm:$0xff]  }
  0xd7   :  { %2888 = vmatpush1.bf16.msra.mxu1 %v4394_v48  ;;  %v4490_v48 = vld [vmem:[%s6118_s1 + $0x430] ss:$8 sps:$4 sm:$0xff]  }
  0xd8   :  { %3206 = vmatpush1.bf16.msra.mxu0 %v4397_v49  ;;  %2889 = vmatprep.subr.bf16.mxu1 %v4402_v50  ;;  %v4493_v49 = vld [vmem:[%s6118_s1 + $0xa30] ss:$8 sps:$4 sm:$0xff]   ;;  %v4498_v50 = vld [vmem:[%s6118_s1 + $0x444] ss:$8 sps:$4 sm:$0xff]  }
  0xd9   :  { %3207 = vmatprep.subr.bf16.mxu0 %v4405_v51  ;;  %v4501_v51 = vld [vmem:[%s6118_s1 + $0xa44] ss:$8 sps:$4 sm:$0xff]  }
  0xdb   :  { %2890 = vmatpush1.bf16.msra.mxu1 %v4400_v52  ;;  %v4496_v52 = vld [vmem:[%s6118_s1 + $0x440] ss:$8 sps:$4 sm:$0xff]  }
  0xdc   :  { %3208 = vmatpush1.bf16.msra.mxu0 %v4403_v53  ;;  %2891 = vmatprep.subr.bf16.mxu1 %v4408_v54  ;;  %v4499_v53 = vld [vmem:[%s6118_s1 + $0xa40] ss:$8 sps:$4 sm:$0xff]   ;;  %v4504_v54 = vld [vmem:[%s6118_s1 + $0x454] ss:$8 sps:$4 sm:$0xff]  }
  0xdd   :  { %3209 = vmatprep.subr.bf16.mxu0 %v4411_v55  ;;  %v4507_v55 = vld [vmem:[%s6118_s1 + $0xa54] ss:$8 sps:$4 sm:$0xff]  }
  0xdf   :  { %2892 = vmatpush1.bf16.msra.mxu1 %v4406_v56  ;;  %v4502_v56 = vld [vmem:[%s6118_s1 + $0x450] ss:$8 sps:$4 sm:$0xff]  }
  0xe0   :  { %3210 = vmatpush1.bf16.msra.mxu0 %v4409_v57  ;;  %2893 = vmatprep.subr.bf16.mxu1 %v4414_v58  ;;  %v4505_v57 = vld [vmem:[%s6118_s1 + $0xa50] ss:$8 sps:$4 sm:$0xff]   ;;  %v4510_v58 = vld [vmem:[%s6118_s1 + $0x464] ss:$8 sps:$4 sm:$0xff]  }
  0xe1   :  { %3211 = vmatprep.subr.bf16.mxu0 %v4417_v59  ;;  %v4513_v59 = vld [vmem:[%s6118_s1 + $0xa64] ss:$8 sps:$4 sm:$0xff]  }
  0xe3   :  { %2894 = vmatpush1.bf16.msra.mxu1 %v4412_v60  ;;  %v4508_v60 = vld [vmem:[%s6118_s1 + $0x460] ss:$8 sps:$4 sm:$0xff]  }
  0xe4   :  { %3212 = vmatpush1.bf16.msra.mxu0 %v4415_v61  ;;  %2895 = vmatprep.subr.bf16.mxu1 %v4420_v62  ;;  %v4511_v61 = vld [vmem:[%s6118_s1 + $0xa60] ss:$8 sps:$4 sm:$0xff]   ;;  %v4516_v62 = vld [vmem:[%s6118_s1 + $0x474] ss:$8 sps:$4 sm:$0xff]  }
  0xe5   :  { %3213 = vmatprep.subr.bf16.mxu0 %v4423_v63  ;;  %v4519_v63 = vld [vmem:[%s6118_s1 + $0xa74] ss:$8 sps:$4 sm:$0xff]  }
  0xe7   :  { %2896 = vmatpush1.bf16.msra.mxu1 %v4418_v0  ;;  %v4514_v0 = vld [vmem:[%s6118_s1 + $0x470] ss:$8 sps:$4 sm:$0xff]  }
  0xe8   :  { %3214 = vmatpush1.bf16.msra.mxu0 %v4421_v1  ;;  %2897 = vmatprep.subr.bf16.mxu1 %v4426_v2  ;;  %v4517_v1 = vld [vmem:[%s6118_s1 + $0xa70] ss:$8 sps:$4 sm:$0xff]   ;;  %v4522_v2 = vld [vmem:[%s6118_s1 + $0x484] ss:$8 sps:$4 sm:$0xff]  }
  0xe9   :  { %3215 = vmatprep.subr.bf16.mxu0 %v4429_v3  ;;  %v4525_v3 = vld [vmem:[%s6118_s1 + $0xa84] ss:$8 sps:$4 sm:$0xff]  }
  0xeb   :  { %2898 = vmatpush1.bf16.msra.mxu1 %v4424_v4  ;;  %v4520_v4 = vld [vmem:[%s6118_s1 + $0x480] ss:$8 sps:$4 sm:$0xff]  }
  0xec   :  { %3216 = vmatpush1.bf16.msra.mxu0 %v4427_v5  ;;  %2899 = vmatprep.subr.bf16.mxu1 %v4432_v6  ;;  %v4523_v5 = vld [vmem:[%s6118_s1 + $0xa80] ss:$8 sps:$4 sm:$0xff]   ;;  %v4528_v6 = vld [vmem:[%s6118_s1 + $0x494] ss:$8 sps:$4 sm:$0xff]  }
  0xed   :  { %3217 = vmatprep.subr.bf16.mxu0 %v4435_v7  ;;  %v4531_v7 = vld [vmem:[%s6118_s1 + $0xa94] ss:$8 sps:$4 sm:$0xff]  }
  0xef   :  { %2900 = vmatpush1.bf16.msra.mxu1 %v4430_v8  ;;  %v4526_v8 = vld [vmem:[%s6118_s1 + $0x490] ss:$8 sps:$4 sm:$0xff]  }
  0xf0   :  { %3218 = vmatpush1.bf16.msra.mxu0 %v4433_v9  ;;  %2901 = vmatprep.subr.bf16.mxu1 %v4438_v10  ;;  %v4529_v9 = vld [vmem:[%s6118_s1 + $0xa90] ss:$8 sps:$4 sm:$0xff]   ;;  %v4534_v10 = vld [vmem:[%s6118_s1 + $0x4a4] ss:$8 sps:$4 sm:$0xff]  }
  0xf1   :  { %3219 = vmatprep.subr.bf16.mxu0 %v4441_v11  ;;  %v4537_v11 = vld [vmem:[%s6118_s1 + $0xaa4] ss:$8 sps:$4 sm:$0xff]  }
  0xf3   :  { %2902 = vmatpush1.bf16.msra.mxu1 %v4436_v12  ;;  %v4532_v12 = vld [vmem:[%s6118_s1 + $0x4a0] ss:$8 sps:$4 sm:$0xff]  }
  0xf4   :  { %3220 = vmatpush1.bf16.msra.mxu0 %v4439_v13  ;;  %2903 = vmatprep.subr.bf16.mxu1 %v4444_v14  ;;  %v4535_v13 = vld [vmem:[%s6118_s1 + $0xaa0] ss:$8 sps:$4 sm:$0xff]   ;;  %v4540_v14 = vld [vmem:[%s6118_s1 + $0x4b4] ss:$8 sps:$4 sm:$0xff]  }
  0xf5   :  { %3221 = vmatprep.subr.bf16.mxu0 %v4447_v15  ;;  %v4543_v15 = vld [vmem:[%s6118_s1 + $0xab4] ss:$8 sps:$4 sm:$0xff]  }
  0xf7   :  { %2904 = vmatpush1.bf16.msra.mxu1 %v4442_v16  ;;  %v4538_v16 = vld [vmem:[%s6118_s1 + $0x4b0] ss:$8 sps:$4 sm:$0xff]  }
  0xf8   :  { %3222 = vmatpush1.bf16.msra.mxu0 %v4445_v17  ;;  %2905 = vmatprep.subr.bf16.mxu1 %v4452_v18  ;;  %v4541_v17 = vld [vmem:[%s6118_s1 + $0xab0] ss:$8 sps:$4 sm:$0xff]   ;;  %v4546_v18 = vld [vmem:[%s6118_s1 + $0x4c4] ss:$8 sps:$4 sm:$0xff]  }
  0xf9   :  { %3223 = vmatprep.subr.bf16.mxu0 %v4457_v19  ;;  %v4549_v19 = vld [vmem:[%s6118_s1 + $0xac4] ss:$8 sps:$4 sm:$0xff]  }
  0xfb   :  { %2906 = vmatpush1.bf16.msra.mxu1 %v4450_v20  ;;  %v4544_v20 = vld [vmem:[%s6118_s1 + $0x4c0] ss:$8 sps:$4 sm:$0xff]  }
  0xfc   :  { %3224 = vmatpush1.bf16.msra.mxu0 %v4455_v21  ;;  %2907 = vmatprep.subr.bf16.mxu1 %v4462_v22  ;;  %v4547_v21 = vld [vmem:[%s6118_s1 + $0xac0] ss:$8 sps:$4 sm:$0xff]   ;;  %v4552_v22 = vld [vmem:[%s6118_s1 + $0x4d4] ss:$8 sps:$4 sm:$0xff]  }
  0xfd   :  { %3225 = vmatprep.subr.bf16.mxu0 %v4465_v23  ;;  %v4555_v23 = vld [vmem:[%s6118_s1 + $0xad4] ss:$8 sps:$4 sm:$0xff]  }
  0xff   :  { %2908 = vmatpush1.bf16.msra.mxu1 %v4460_v24  ;;  %v4550_v24 = vld [vmem:[%s6118_s1 + $0x4d0] ss:$8 sps:$4 sm:$0xff]  }
 0x100   :  { %3226 = vmatpush1.bf16.msra.mxu0 %v4463_v25  ;;  %2930 = vmatprep.subr.bf16.mxu1 %v4471_v26  ;;  %v4553_v25 = vld [vmem:[%s6118_s1 + $0xad0] ss:$8 sps:$4 sm:$0xff]   ;;  %v4560_v26 = vld [vmem:[%s6118_s1 + $0x4e4] ss:$8 sps:$4 sm:$0xff]  }
 0x101   :  { %3248 = vmatprep.subr.bf16.mxu0 %v4477_v27  ;;  %v4565_v27 = vld [vmem:[%s6118_s1 + $0xae4] ss:$8 sps:$4 sm:$0xff]  }
 0x102   :  { %2910 = vmatmul.mubr.bf16.vlgmr.msra.gmra.mrb[0].mxu1 %v4466_v28  ;;  %v4558_v28 = vld [vmem:[%s6118_s1 + $0x4e0] ss:$8 sps:$4 sm:$0xff]  }
 0x103   :  { %3228 = vmatmul.mubr.bf16.vlgmr.msra.gmra.mrb[0].mxu0 %v4472_v30  ;;  %2931 = vmatpush1.bf16.msra.mxu1 %v4469_v29  ;;  %v4563_v29 = vld [vmem:[%s6118_s1 + $0xae0] ss:$8 sps:$4 sm:$0xff]   ;;  %v4570_v30 = vld [vmem:[%s6118_s1 + $0x4f4] ss:$8 sps:$4 sm:$0xff]  }
 0x104   :  { %3249 = vmatpush1.bf16.msra.mxu0 %v4475_v31  ;;  %2932 = vmatprep.subr.bf16.mxu1 %v4480_v32  ;;  %v4573_v31 = vld [vmem:[%s6118_s1 + $0xaf4] ss:$8 sps:$4 sm:$0xff]   ;;  %v4568_v32 = vld [vmem:[%s6118_s1 + $0x4f0] ss:$8 sps:$4 sm:$0xff]  }
 0x105   :  { %3250 = vmatprep.subr.bf16.mxu0 %v4483_v33  ;;  %2919 = vmatprep.mubr.bf16.mxu1 %v4556_v34  ;;  %v4571_v33 = vld [vmem:[%s6118_s1 + $0xaf0] ss:$8 sps:$4 sm:$0xff]   ;;  %v4579_v34 = vld [vmem:[%s6118_s1 + $0x504] ss:$8 sps:$4 sm:$0xff]  }
 0x106   :  { %3237 = vmatprep.mubr.bf16.mxu0 %v4561_v35  ;;  %v4585_v35 = vld [vmem:[%s6118_s1 + $0xb04] ss:$8 sps:$4 sm:$0xff]  }
 0x107   :  { %2933 = vmatpush1.bf16.msra.mxu1 %v4478_v36  ;;  %v4574_v36 = vld [vmem:[%s6119_s0 + $0x20] ss:$100 sps:$4 sm:$0xff]  }
 0x108   :  { %3251 = vmatpush1.bf16.msra.mxu0 %v4481_v37  ;;  %2934 = vmatprep.subr.bf16.mxu1 %v4486_v38  ;;  %v4580_v37 = vld [vmem:[%s6119_s0 + $0x50] ss:$100 sps:$4 sm:$0xff]   ;;  %v4577_v38 = vld [vmem:[%s6118_s1 + $0x500] ss:$8 sps:$4 sm:$0xff]  }
 0x109   :  { %3252 = vmatprep.subr.bf16.mxu0 %v4489_v39  ;;  %v4583_v39 = vld [vmem:[%s6118_s1 + $0xb00] ss:$8 sps:$4 sm:$0xff]  }
 0x10a   :  { %2920 = vmatmul.mubr.bf16.gmra.mrb[4].mxu1 %v4566_v42  ;;  %v4664_v42 = vld [vmem:[%s6119_s0 + $0xec] ss:$100 sps:$4 sm:$0xff]  }
 0x10b   :  { %3238 = vmatmul.mubr.bf16.gmra.mrb[4].mxu0 %v4567_v43  ;;  %2935 = vmatpush1.bf16.msra.mxu1 %v4484_v40  ;;  %v4588_v40 = vld [vmem:[%s6118_s1 + $0x514] ss:$8 sps:$4 sm:$0xff]  }
 0x10c   :  { %3253 = vmatpush1.bf16.msra.mxu0 %v4487_v41  ;;  %2936 = vmatprep.subr.bf16.mxu1 %v4492_v44  ;;  %v4591_v41 = vld [vmem:[%s6118_s1 + $0xb14] ss:$8 sps:$4 sm:$0xff]   ;;  %v4586_v44 = vld [vmem:[%s6118_s1 + $0x510] ss:$8 sps:$4 sm:$0xff]  }
 0x10d   :  { %3254 = vmatprep.subr.bf16.mxu0 %v4495_v45  ;;  %2962 = vmatprep.mubr.bf16.mxu1 %v4576_v46  ;;  %v4666_v43 = vld [vmem:[%s6119_s0 + $0x11c] ss:$100 sps:$4 sm:$0xff]   ;;  %v4589_v45 = vld [vmem:[%s6118_s1 + $0xb10] ss:$8 sps:$4 sm:$0xff]   ;;  %v4594_v46 = vld [vmem:[%s6118_s1 + $0x524] ss:$8 sps:$4 sm:$0xff]  }
 0x10e   :  { %3280 = vmatprep.mubr.bf16.mxu0 %v4582_v47  ;;  %v4597_v47 = vld [vmem:[%s6118_s1 + $0xb24] ss:$8 sps:$4 sm:$0xff]  }
 0x10f   :  { %2937 = vmatpush1.bf16.msra.mxu1 %v4490_v48  ;;  %v4668_v48 = vld [vmem:[%s6119_s0 + $0xe8] ss:$100 sps:$4 sm:$0xff]  }
 0x110   :  { %3255 = vmatpush1.bf16.msra.mxu0 %v4493_v49  ;;  %2938 = vmatprep.subr.bf16.mxu1 %v4498_v50  ;;  %v4672_v49 = vld [vmem:[%s6119_s0 + $0x118] ss:$100 sps:$4 sm:$0xff]   ;;  %v4592_v50 = vld [vmem:[%s6118_s1 + $0x520] ss:$8 sps:$4 sm:$0xff]  }
 0x111   :  { %3256 = vmatprep.subr.bf16.mxu0 %v4501_v51  ;;  %v4595_v51 = vld [vmem:[%s6118_s1 + $0xb20] ss:$8 sps:$4 sm:$0xff]  }
 0x113   :  { %2939 = vmatpush1.bf16.msra.mxu1 %v4496_v52  ;;  %v4600_v52 = vld [vmem:[%s6118_s1 + $0x534] ss:$8 sps:$4 sm:$0xff]  }
 0x114   :  { %3257 = vmatpush1.bf16.msra.mxu0 %v4499_v53  ;;  %2940 = vmatprep.subr.bf16.mxu1 %v4504_v54  ;;  %v4603_v53 = vld [vmem:[%s6118_s1 + $0xb34] ss:$8 sps:$4 sm:$0xff]   ;;  %v4684_v54 = vld [vmem:[%s6119_s0 + $0x2c] ss:$100 sps:$4 sm:$0xff]  }
 0x115   :  { %3258 = vmatprep.subr.bf16.mxu0 %v4507_v55  ;;  %v4687_v55 = vld [vmem:[%s6119_s0 + $0x5c] ss:$100 sps:$4 sm:$0xff]  }
 0x117   :  { %2941 = vmatpush1.bf16.msra.mxu1 %v4502_v56  ;;  %v4598_v56 = vld [vmem:[%s6118_s1 + $0x530] ss:$8 sps:$4 sm:$0xff]  }
 0x118   :  { %3259 = vmatpush1.bf16.msra.mxu0 %v4505_v57  ;;  %2942 = vmatprep.subr.bf16.mxu1 %v4510_v58  ;;  %v4601_v57 = vld [vmem:[%s6118_s1 + $0xb30] ss:$8 sps:$4 sm:$0xff]   ;;  %v4606_v58 = vld [vmem:[%s6118_s1 + $0x544] ss:$8 sps:$4 sm:$0xff]  }
 0x119   :  { %3260 = vmatprep.subr.bf16.mxu0 %v4513_v59  ;;  %v4609_v59 = vld [vmem:[%s6118_s1 + $0xb44] ss:$8 sps:$4 sm:$0xff]  }
 0x11b   :  { %2943 = vmatpush1.bf16.msra.mxu1 %v4508_v60  ;;  %v4604_v60 = vld [vmem:[%s6118_s1 + $0x540] ss:$8 sps:$4 sm:$0xff]  }
 0x11c   :  { %3261 = vmatpush1.bf16.msra.mxu0 %v4511_v61  ;;  %2944 = vmatprep.subr.bf16.mxu1 %v4516_v62  ;;  %v4607_v61 = vld [vmem:[%s6118_s1 + $0xb40] ss:$8 sps:$4 sm:$0xff]   ;;  %v4612_v62 = vld [vmem:[%s6118_s1 + $0x554] ss:$8 sps:$4 sm:$0xff]  }
 0x11d   :  { %3262 = vmatprep.subr.bf16.mxu0 %v4519_v63  ;;  %v4615_v63 = vld [vmem:[%s6118_s1 + $0xb54] ss:$8 sps:$4 sm:$0xff]  }
 0x11f   :  { %2945 = vmatpush1.bf16.msra.mxu1 %v4514_v0  ;;  %v4610_v0 = vld [vmem:[%s6118_s1 + $0x550] ss:$8 sps:$4 sm:$0xff]  }
 0x120   :  { %3263 = vmatpush1.bf16.msra.mxu0 %v4517_v1  ;;  %2946 = vmatprep.subr.bf16.mxu1 %v4522_v2  ;;  %v4613_v1 = vld [vmem:[%s6118_s1 + $0xb50] ss:$8 sps:$4 sm:$0xff]   ;;  %v4618_v2 = vld [vmem:[%s6118_s1 + $0x564] ss:$8 sps:$4 sm:$0xff]  }
 0x121   :  { %3264 = vmatprep.subr.bf16.mxu0 %v4525_v3  ;;  %v4621_v3 = vld [vmem:[%s6118_s1 + $0xb64] ss:$8 sps:$4 sm:$0xff]  }
 0x123   :  { %2947 = vmatpush1.bf16.msra.mxu1 %v4520_v4  ;;  %v4616_v4 = vld [vmem:[%s6118_s1 + $0x560] ss:$8 sps:$4 sm:$0xff]  }
 0x124   :  { %3265 = vmatpush1.bf16.msra.mxu0 %v4523_v5  ;;  %2948 = vmatprep.subr.bf16.mxu1 %v4528_v6  ;;  %v4619_v5 = vld [vmem:[%s6118_s1 + $0xb60] ss:$8 sps:$4 sm:$0xff]   ;;  %v4624_v6 = vld [vmem:[%s6118_s1 + $0x574] ss:$8 sps:$4 sm:$0xff]  }
 0x125   :  { %3266 = vmatprep.subr.bf16.mxu0 %v4531_v7  ;;  %v4627_v7 = vld [vmem:[%s6118_s1 + $0xb74] ss:$8 sps:$4 sm:$0xff]  }
 0x127   :  { %2949 = vmatpush1.bf16.msra.mxu1 %v4526_v8  ;;  %v4622_v8 = vld [vmem:[%s6118_s1 + $0x570] ss:$8 sps:$4 sm:$0xff]  }
 0x128   :  { %3267 = vmatpush1.bf16.msra.mxu0 %v4529_v9  ;;  %2950 = vmatprep.subr.bf16.mxu1 %v4534_v10  ;;  %v4625_v9 = vld [vmem:[%s6118_s1 + $0xb70] ss:$8 sps:$4 sm:$0xff]   ;;  %v4630_v10 = vld [vmem:[%s6118_s1 + $0x584] ss:$8 sps:$4 sm:$0xff]  }
 0x129   :  { %3268 = vmatprep.subr.bf16.mxu0 %v4537_v11  ;;  %v4633_v11 = vld [vmem:[%s6118_s1 + $0xb84] ss:$8 sps:$4 sm:$0xff]  }
 0x12b   :  { %2951 = vmatpush1.bf16.msra.mxu1 %v4532_v12  ;;  %v4628_v12 = vld [vmem:[%s6118_s1 + $0x580] ss:$8 sps:$4 sm:$0xff]  }
 0x12c   :  { %3269 = vmatpush1.bf16.msra.mxu0 %v4535_v13  ;;  %2952 = vmatprep.subr.bf16.mxu1 %v4540_v14  ;;  %v4631_v13 = vld [vmem:[%s6118_s1 + $0xb80] ss:$8 sps:$4 sm:$0xff]   ;;  %v4636_v14 = vld [vmem:[%s6118_s1 + $0x594] ss:$8 sps:$4 sm:$0xff]  }
 0x12d   :  { %3270 = vmatprep.subr.bf16.mxu0 %v4543_v15  ;;  %v4639_v15 = vld [vmem:[%s6118_s1 + $0xb94] ss:$8 sps:$4 sm:$0xff]  }
 0x12f   :  { %2953 = vmatpush1.bf16.msra.mxu1 %v4538_v16  ;;  %v4634_v16 = vld [vmem:[%s6118_s1 + $0x590] ss:$8 sps:$4 sm:$0xff]  }
 0x130   :  { %3271 = vmatpush1.bf16.msra.mxu0 %v4541_v17  ;;  %2954 = vmatprep.subr.bf16.mxu1 %v4546_v18  ;;  %v4637_v17 = vld [vmem:[%s6118_s1 + $0xb90] ss:$8 sps:$4 sm:$0xff]   ;;  %v4642_v18 = vld [vmem:[%s6118_s1 + $0x5a4] ss:$8 sps:$4 sm:$0xff]  }
 0x131   :  { %3272 = vmatprep.subr.bf16.mxu0 %v4549_v19  ;;  %v4645_v19 = vld [vmem:[%s6118_s1 + $0xba4] ss:$8 sps:$4 sm:$0xff]  }
 0x133   :  { %2955 = vmatpush1.bf16.msra.mxu1 %v4544_v20  ;;  %v4640_v20 = vld [vmem:[%s6118_s1 + $0x5a0] ss:$8 sps:$4 sm:$0xff]  }
 0x134   :  { %3273 = vmatpush1.bf16.msra.mxu0 %v4547_v21  ;;  %2956 = vmatprep.subr.bf16.mxu1 %v4552_v22  ;;  %v4643_v21 = vld [vmem:[%s6118_s1 + $0xba0] ss:$8 sps:$4 sm:$0xff]   ;;  %v4648_v22 = vld [vmem:[%s6118_s1 + $0x5b4] ss:$8 sps:$4 sm:$0xff]  }
 0x135   :  { %3274 = vmatprep.subr.bf16.mxu0 %v4555_v23  ;;  %v4651_v23 = vld [vmem:[%s6118_s1 + $0xbb4] ss:$8 sps:$4 sm:$0xff]  }
 0x137   :  { %2957 = vmatpush1.bf16.msra.mxu1 %v4550_v24  ;;  %v4646_v24 = vld [vmem:[%s6118_s1 + $0x5b0] ss:$8 sps:$4 sm:$0xff]  }
 0x138   :  { %3275 = vmatpush1.bf16.msra.mxu0 %v4553_v25  ;;  %2958 = vmatprep.subr.bf16.mxu1 %v4560_v26  ;;  %v4649_v25 = vld [vmem:[%s6118_s1 + $0xbb0] ss:$8 sps:$4 sm:$0xff]   ;;  %v4654_v26 = vld [vmem:[%s6118_s1 + $0x5c4] ss:$8 sps:$4 sm:$0xff]  }
 0x139   :  { %3276 = vmatprep.subr.bf16.mxu0 %v4565_v27  ;;  %v4657_v27 = vld [vmem:[%s6118_s1 + $0xbc4] ss:$8 sps:$4 sm:$0xff]  }
 0x13b   :  { %2959 = vmatpush1.bf16.msra.mxu1 %v4558_v28  ;;  %v4652_v28 = vld [vmem:[%s6118_s1 + $0x5c0] ss:$8 sps:$4 sm:$0xff]  }
 0x13c   :  { %3277 = vmatpush1.bf16.msra.mxu0 %v4563_v29  ;;  %2960 = vmatprep.subr.bf16.mxu1 %v4570_v30  ;;  %v4655_v29 = vld [vmem:[%s6118_s1 + $0xbc0] ss:$8 sps:$4 sm:$0xff]   ;;  %v4660_v30 = vld [vmem:[%s6118_s1 + $0x5d4] ss:$8 sps:$4 sm:$0xff]  }
 0x13d   :  { %3278 = vmatprep.subr.bf16.mxu0 %v4573_v31  ;;  %v4663_v31 = vld [vmem:[%s6118_s1 + $0xbd4] ss:$8 sps:$4 sm:$0xff]  }
 0x13f   :  { %2961 = vmatpush1.bf16.msra.mxu1 %v4568_v32  ;;  %v4658_v32 = vld [vmem:[%s6118_s1 + $0x5d0] ss:$8 sps:$4 sm:$0xff]  }
 0x140   :  { %3279 = vmatpush1.bf16.msra.mxu0 %v4571_v33  ;;  %2983 = vmatprep.subr.bf16.mxu1 %v4579_v34  ;;  %v4661_v33 = vld [vmem:[%s6118_s1 + $0xbd0] ss:$8 sps:$4 sm:$0xff]   ;;  %v4671_v34 = vld [vmem:[%s6118_s1 + $0x5e4] ss:$8 sps:$4 sm:$0xff]  }
 0x141   :  { %3301 = vmatprep.subr.bf16.mxu0 %v4585_v35  ;;  %v4675_v35 = vld [vmem:[%s6118_s1 + $0xbe4] ss:$8 sps:$4 sm:$0xff]  }
 0x142   :  { %2963 = vmatmul.mubr.bf16.vlgmr.msra.gmra.mrb[0].mxu1 %v4574_v36  ;;  %v4669_v36 = vld [vmem:[%s6118_s1 + $0x5e0] ss:$8 sps:$4 sm:$0xff]  }
 0x143   :  { %3281 = vmatmul.mubr.bf16.vlgmr.msra.gmra.mrb[0].mxu0 %v4580_v37  ;;  %2984 = vmatpush1.bf16.msra.mxu1 %v4577_v38  ;;  %v4673_v37 = vld [vmem:[%s6118_s1 + $0xbe0] ss:$8 sps:$4 sm:$0xff]   ;;  %v4678_v38 = vld [vmem:[%s6118_s1 + $0x5f4] ss:$8 sps:$4 sm:$0xff]  }
 0x144   :  { %3302 = vmatpush1.bf16.msra.mxu0 %v4583_v39  ;;  %2985 = vmatprep.subr.bf16.mxu1 %v4588_v40  ;;  %v4681_v39 = vld [vmem:[%s6118_s1 + $0xbf4] ss:$8 sps:$4 sm:$0xff]   ;;  %v4676_v40 = vld [vmem:[%s6118_s1 + $0x5f0] ss:$8 sps:$4 sm:$0xff]  }
 0x145   :  { %3303 = vmatprep.subr.bf16.mxu0 %v4591_v41  ;;  %2972 = vmatprep.mubr.bf16.mxu1 %v4664_v42  ;;  %v4679_v41 = vld [vmem:[%s6118_s1 + $0xbf0] ss:$8 sps:$4 sm:$0xff]   ;;  %v4690_v42 = vld [vmem:[%s6118_s1 + $0xc04] ss:$8 sps:$4 sm:$0xff]  }
 0x146   :  { %3290 = vmatprep.mubr.bf16.mxu0 %v4666_v43  ;;  %v4682_v43 = vld [vmem:[%s6119_s0 + $0x28] ss:$100 sps:$4 sm:$0xff]  }
 0x147   :  { %2986 = vmatpush1.bf16.msra.mxu1 %v4586_v44  ;;  %v4685_v44 = vld [vmem:[%s6119_s0 + $0x58] ss:$100 sps:$4 sm:$0xff]  }
 0x148   :  { %3304 = vmatpush1.bf16.msra.mxu0 %v4589_v45  ;;  %2987 = vmatprep.subr.bf16.mxu1 %v4594_v46  ;;  %v4688_v45 = vld [vmem:[%s6118_s1 + $0xc00] ss:$8 sps:$4 sm:$0xff]   ;;  %v4693_v46 = vld [vmem:[%s6118_s1 + $0xc14] ss:$8 sps:$4 sm:$0xff]  }
 0x149   :  { %3305 = vmatprep.subr.bf16.mxu0 %v4597_v47  ;;  %v4694_v47 = vld [vmem:[%s6119_s0 + $0xf4] ss:$100 sps:$4 sm:$0xff]  }
 0x14a   :  { %2973 = vmatmul.mubr.bf16.gmra.mrb[4].mxu1 %v4668_v48  ;;  %v4696_v48 = vld [vmem:[%s6119_s0 + $0x124] ss:$100 sps:$4 sm:$0xff]  }
 0x14b   :  { %3291 = vmatmul.mubr.bf16.gmra.mrb[4].mxu0 %v4672_v49  ;;  %2988 = vmatpush1.bf16.msra.mxu1 %v4592_v50  ;;  %v4691_v49 = vld [vmem:[%s6118_s1 + $0xc10] ss:$8 sps:$4 sm:$0xff]   ;;  %v4702_v50 = vld [vmem:[%s6118_s1 + $0xc24] ss:$8 sps:$4 sm:$0xff]  }
 0x14c   :  { %3306 = vmatpush1.bf16.msra.mxu0 %v4595_v51  ;;  %2989 = vmatprep.subr.bf16.mxu1 %v4600_v52  ;;  %v4698_v51 = vld [vmem:[%s6119_s0 + $0xf0] ss:$100 sps:$4 sm:$0xff]   ;;  %v4699_v52 = vld [vmem:[%s6119_s0 + $0x120] ss:$100 sps:$4 sm:$0xff]  }
 0x14d   :  { %3307 = vmatprep.subr.bf16.mxu0 %v4603_v53  ;;  %3015 = vmatprep.mubr.bf16.mxu1 %v4684_v54  ;;  %v4700_v53 = vld [vmem:[%s6118_s1 + $0xc20] ss:$8 sps:$4 sm:$0xff]   ;;  %v4705_v54 = vld [vmem:[%s6118_s1 + $0xc34] ss:$8 sps:$4 sm:$0xff]  }
 0x14e   :  { %3333 = vmatprep.mubr.bf16.mxu0 %v4687_v55  ;;  %v4703_v55 = vld [vmem:[%s6118_s1 + $0xc30] ss:$8 sps:$4 sm:$0xff]  }
 0x14f   :  { %2990 = vmatpush1.bf16.msra.mxu1 %v4598_v56  ;;  %v4708_v56 = vld [vmem:[%s6118_s1 + $0xc44] ss:$8 sps:$4 sm:$0xff]  }
 0x150   :  { %3308 = vmatpush1.bf16.msra.mxu0 %v4601_v57  ;;  %2991 = vmatprep.subr.bf16.mxu1 %v4606_v58  ;;  %v4720_v57 = vmov 0   ;;  %v4706_v58 = vld [vmem:[%s6118_s1 + $0xc40] ss:$8 sps:$4 sm:$0xff]  }
 0x151   :  { %3309 = vmatprep.subr.bf16.mxu0 %v4609_v59  ;;  %v4711_v59 = vld [vmem:[%s6118_s1 + $0xc54] ss:$8 sps:$4 sm:$0xff]  }
 0x153   :  { %2992 = vmatpush1.bf16.msra.mxu1 %v4604_v60  ;;  %v4709_v60 = vld [vmem:[%s6118_s1 + $0xc50] ss:$8 sps:$4 sm:$0xff]  }
 0x154   :  { %3310 = vmatpush1.bf16.msra.mxu0 %v4607_v61  ;;  %2993 = vmatprep.subr.bf16.mxu1 %v4612_v62  ;;  %v4714_v61 = vld [vmem:[%s6118_s1 + $0xc64] ss:$8 sps:$4 sm:$0xff]   ;;  %v4712_v62 = vld [vmem:[%s6118_s1 + $0xc60] ss:$8 sps:$4 sm:$0xff]  }
 0x155   :  { %3311 = vmatprep.subr.bf16.mxu0 %v4615_v63  ;;  %v4717_v63 = vld [vmem:[%s6118_s1 + $0xc74] ss:$8 sps:$4 sm:$0xff]  }
 0x157   :  { %2994 = vmatpush1.bf16.msra.mxu1 %v4610_v0  ;;  %v4715_v0 = vld [vmem:[%s6118_s1 + $0xc70] ss:$8 sps:$4 sm:$0xff]  }
 0x158   :  { %3312 = vmatpush1.bf16.msra.mxu0 %v4613_v1  ;;  %2995 = vmatprep.subr.bf16.mxu1 %v4618_v2  ;;  %v4718_v1 = vld [vmem:[%s6119_s0 + $0x60] ss:$100 sps:$4 sm:$0xff]   ;;  %v4719_v2 = vld [vmem:[%s6119_s0 + $0x128] ss:$100 sps:$4 sm:$0xff]  }
 0x159   :  { %3313 = vmatprep.subr.bf16.mxu0 %v4621_v3 }
 0x15b   :  { %2996 = vmatpush1.bf16.msra.mxu1 %v4616_v4 }
 0x15c   :  { %3314 = vmatpush1.bf16.msra.mxu0 %v4619_v5  ;;  %2997 = vmatprep.subr.bf16.mxu1 %v4624_v6 }
 0x15d   :  { %3315 = vmatprep.subr.bf16.mxu0 %v4627_v7 }
 0x15f   :  { %2998 = vmatpush1.bf16.msra.mxu1 %v4622_v8 }
 0x160   :  { %3316 = vmatpush1.bf16.msra.mxu0 %v4625_v9  ;;  %2999 = vmatprep.subr.bf16.mxu1 %v4630_v10 }
 0x161   :  { %3317 = vmatprep.subr.bf16.mxu0 %v4633_v11 }
 0x163   :  { %3000 = vmatpush1.bf16.msra.mxu1 %v4628_v12 }
 0x164   :  { %3318 = vmatpush1.bf16.msra.mxu0 %v4631_v13  ;;  %3001 = vmatprep.subr.bf16.mxu1 %v4636_v14 }
 0x165   :  { %3319 = vmatprep.subr.bf16.mxu0 %v4639_v15 }
 0x167   :  { %3002 = vmatpush1.bf16.msra.mxu1 %v4634_v16 }
 0x168   :  { %3320 = vmatpush1.bf16.msra.mxu0 %v4637_v17  ;;  %3003 = vmatprep.subr.bf16.mxu1 %v4642_v18 }
 0x169   :  { %3321 = vmatprep.subr.bf16.mxu0 %v4645_v19 }
 0x16b   :  { %3004 = vmatpush1.bf16.msra.mxu1 %v4640_v20 }
 0x16c   :  { %3322 = vmatpush1.bf16.msra.mxu0 %v4643_v21  ;;  %3005 = vmatprep.subr.bf16.mxu1 %v4648_v22 }
 0x16d   :  { %3323 = vmatprep.subr.bf16.mxu0 %v4651_v23 }
 0x16f   :  { %3006 = vmatpush1.bf16.msra.mxu1 %v4646_v24 }
 0x170   :  { %3324 = vmatpush1.bf16.msra.mxu0 %v4649_v25  ;;  %3007 = vmatprep.subr.bf16.mxu1 %v4654_v26 }
 0x171   :  { %3325 = vmatprep.subr.bf16.mxu0 %v4657_v27 }
 0x173   :  { %3008 = vmatpush1.bf16.msra.mxu1 %v4652_v28 }
 0x174   :  { %3326 = vmatpush1.bf16.msra.mxu0 %v4655_v29  ;;  %3009 = vmatprep.subr.bf16.mxu1 %v4660_v30 }
 0x175   :  { %3327 = vmatprep.subr.bf16.mxu0 %v4663_v31 }
 0x177   :  { %3010 = vmatpush1.bf16.msra.mxu1 %v4658_v32 }
 0x178   :  { %3328 = vmatpush1.bf16.msra.mxu0 %v4661_v33  ;;  %3011 = vmatprep.subr.bf16.mxu1 %v4671_v34 }
 0x179   :  { %3329 = vmatprep.subr.bf16.mxu0 %v4675_v35 }
 0x17b   :  { %3012 = vmatpush1.bf16.msra.mxu1 %v4669_v36 }
 0x17c   :  { %3330 = vmatpush1.bf16.msra.mxu0 %v4673_v37  ;;  %3013 = vmatprep.subr.bf16.mxu1 %v4678_v38 }
 0x17d   :  { %3331 = vmatprep.subr.bf16.mxu0 %v4681_v39 }
 0x17f   :  { %3014 = vmatpush1.bf16.msra.mxu1 %v4676_v40 }
 0x180   :  { %3332 = vmatpush1.bf16.msra.mxu0 %v4679_v41  ;;  %3933 = vmatprep.subr.bf16.mxu1 %v4690_v42 }
 0x181   :  { %3354 = vmatprep.subr.bf16.mxu0 %v4690_v42 }
 0x182   :  { %3016 = vmatmul.mubr.bf16.vlgmr.msra.gmra.mrb[0].mxu1 %v4682_v43 }
 0x183   :  { %3334 = vmatmul.mubr.bf16.vlgmr.msra.gmra.mrb[0].mxu0 %v4685_v44  ;;  %3941 = vmatpush1.bf16.msra.mxu1 %v4688_v45 }
 0x184   :  { %3355 = vmatpush1.bf16.msra.mxu0 %v4688_v45  ;;  %3934 = vmatprep.subr.bf16.mxu1 %v4693_v46 }
 0x185   :  { %3356 = vmatprep.subr.bf16.mxu0 %v4693_v46  ;;  %3025 = vmatprep.mubr.bf16.mxu1 %v4694_v47 }
 0x186   :  { %3343 = vmatprep.mubr.bf16.mxu0 %v4696_v48 }
 0x187   :  { %3942 = vmatpush1.bf16.msra.mxu1 %v4691_v49 }
 0x188   :  { %3357 = vmatpush1.bf16.msra.mxu0 %v4691_v49  ;;  %3935 = vmatprep.subr.bf16.mxu1 %v4702_v50 }
 0x189   :  { %3358 = vmatprep.subr.bf16.mxu0 %v4702_v50 }
 0x18a   :  { %3026 = vmatmul.mubr.bf16.gmra.mrb[4].mxu1 %v4698_v51 }
 0x18b   :  { %3344 = vmatmul.mubr.bf16.gmra.mrb[4].mxu0 %v4699_v52  ;;  %3943 = vmatpush1.bf16.msra.mxu1 %v4700_v53 }
 0x18c   :  { %3359 = vmatpush1.bf16.msra.mxu0 %v4700_v53  ;;  %3936 = vmatprep.subr.bf16.mxu1 %v4705_v54 }
 0x18d   :  { %3360 = vmatprep.subr.bf16.mxu0 %v4705_v54  ;;  %3386 = vmatprep.mubr.bf16.mxu0 %v4720_v57 }
 0x18e   :  { %3396 = vmatprep.mubr.bf16.mxu1 %v4720_v57 }
 0x18f   :  { %3944 = vmatpush1.bf16.msra.mxu1 %v4703_v55 }
 0x190   :  { %3361 = vmatpush1.bf16.msra.mxu0 %v4703_v55  ;;  %3937 = vmatprep.subr.bf16.mxu1 %v4708_v56 }
 0x191   :  { %3362 = vmatprep.subr.bf16.mxu0 %v4708_v56 }
 0x193   :  { %3945 = vmatpush1.bf16.msra.mxu1 %v4706_v58 }
 0x194   :  { %3363 = vmatpush1.bf16.msra.mxu0 %v4706_v58  ;;  %3938 = vmatprep.subr.bf16.mxu1 %v4711_v59 }
 0x195   :  { %3364 = vmatprep.subr.bf16.mxu0 %v4711_v59 }
 0x197   :  { %3946 = vmatpush1.bf16.msra.mxu1 %v4709_v60 }
 0x198   :  { %3365 = vmatpush1.bf16.msra.mxu0 %v4709_v60  ;;  %3939 = vmatprep.subr.bf16.mxu1 %v4714_v61 }
 0x199   :  { %3366 = vmatprep.subr.bf16.mxu0 %v4714_v61 }
 0x19b   :  { %3947 = vmatpush1.bf16.msra.mxu1 %v4712_v62 }
 0x19c   :  { %3367 = vmatpush1.bf16.msra.mxu0 %v4712_v62  ;;  %3940 = vmatprep.subr.bf16.mxu1 %v4717_v63 }
 0x19d   :  { %3368 = vmatprep.subr.bf16.mxu0 %v4717_v63 }
 0x19f   :  { %3948 = vmatpush1.bf16.msra.mxu1 %v4715_v0 }
 0x1a0   :  { %3369 = vmatpush1.bf16.msra.mxu0 %v4715_v0 }
 0x1a2   :  { %3397 = vmatmul.mubr.bf16.vlgmr.msra.gmra.mrb[8].mxu1 %v4719_v2 }
 0x1a3   :  { %3387 = vmatmul.mubr.bf16.vlgmr.msra.gmra.mrb[0].mxu0 %v4718_v1 }
 0x255   :  { %v3017_v3 = vpop.f32.mrb[0].mxu1 }
 0x256   :  { %v3019_v4 = vpop.f32.mrb[1].mxu1 }
 0x257   :  { %v3021_v5 = vpop.f32.mrb[2].mxu1 }
 0x258   :  { %v3023_v6 = vpop.f32.mrb[3].mxu1 }
 0x25d   :  { %v3027_v7 = vpop.f32.mrb[4].mxu1 }
 0x25e   :  { %v3345_v8 = vpop.f32.mrb[4].mxu0  ;;  %v3029_v10 = vpop.f32.mrb[5].mxu1 }
 0x25f   :  { %v3953_v9 = vadd.f32 %v3345_v8, %v3027_v7  ;;  %v3347_v11 = vpop.f32.mrb[5].mxu0  ;;  %v3031_v13 = vpop.f32.mrb[6].mxu1 }
 0x260   :  { %v3955_v12 = vadd.f32 %v3347_v11, %v3029_v10  ;;  %v3349_v14 = vpop.f32.mrb[6].mxu0  ;;  %v3033_v16 = vpop.f32.mrb[7].mxu1 }
 0x261   :  { %v3957_v15 = vadd.f32 %v3349_v14, %v3031_v13  ;;  %v3351_v17 = vpop.f32.mrb[7].mxu0 }
 0x262   :  { %v3959_v18 = vadd.f32 %v3351_v17, %v3033_v16 }
 0x275   :  { %v3398_v20 = vpop.f32.mrb[8].mxu1 }
 0x276   :  { %v3388_v19 = vpop.f32.mrb[0].mxu0  ;;  %v3954_v22 = vadd.f32 %v3953_v9, %v3398_v20  ;;  %v3400_v24 = vpop.f32.mrb[9].mxu1 }
 0x277   :  { %v3949_v21 = vadd.f32 %v3388_v19, %v3017_v3  ;;  %v3390_v23 = vpop.f32.mrb[1].mxu0  ;;  %v3956_v26 = vadd.f32 %v3955_v12, %v3400_v24  ;;  %v3402_v28 = vpop.f32.mrb[10].mxu1 }
 0x278   :  { %v3950_v25 = vadd.f32 %v3390_v23, %v3019_v4  ;;  %v3392_v27 = vpop.f32.mrb[2].mxu0  ;;  %3411 = vst [vmem:[%s6120_s2 + $0x20] sm:$0xff] %v3954_v22  ;;  %v3958_v30 = vadd.f32 %v3957_v15, %v3402_v28  ;;  %v3404_v32 = vpop.f32.mrb[11].mxu1  ;;  %v3437_v41 = vmul.f32 %v3954_v22, %v3954_v22 }
 0x279   :  { %3407 = vst [vmem:[%s6120_s2] sm:$0xff] %v3949_v21  ;;  %v3951_v29 = vadd.f32 %v3392_v27, %v3021_v5  ;;  %v3394_v31 = vpop.f32.mrb[3].mxu0  ;;  %3412 = vst [vmem:[%s6120_s2 + $0x28] sm:$0xff] %v3956_v26  ;;  %v3960_v34 = vadd.f32 %v3959_v18, %v3404_v32  ;;  %v3433_v35 = vmul.f32 %v3949_v21, %v3949_v21 }
 0x27a   :  { %3408 = vst [vmem:[%s6120_s2 + $0x8] sm:$0xff] %v3950_v25  ;;  %v3952_v33 = vadd.f32 %v3394_v31, %v3023_v6  ;;  %3413 = vst [vmem:[%s6120_s2 + $0x30] sm:$0xff] %v3958_v30  ;;  %v3434_v38 = vmul.f32 %v3950_v25, %v3950_v25  ;;  %v3438_v44 = vmul.f32 %v3956_v26, %v3956_v26 }
 0x27b   :  { %3409 = vst [vmem:[%s6120_s2 + $0x10] sm:$0xff] %v3951_v29  ;;  %v3415_v36 = vadd.f32 %v3951_v29, %v3949_v21  ;;  %v3435_v37 = vmul.f32 %v3951_v29, %v3951_v29  ;;  %3414 = vst [vmem:[%s6120_s2 + $0x38] sm:$0xff] %v3960_v34  ;;  %v3439_v48 = vmul.f32 %v3958_v30, %v3958_v30 }
 0x27c   :  { %3410 = vst [vmem:[%s6120_s2 + $0x18] sm:$0xff] %v3952_v33  ;;  %v3424_v39 = vadd.f32 %v3952_v33, %v3950_v25  ;;  %v3436_v40 = vmul.f32 %v3952_v33, %v3952_v33  ;;  %v3440_v51 = vmul.f32 %v3960_v34, %v3960_v34 }
 0x27d   :  { %v3441_v42 = vadd.f32 %v3435_v37, %v3433_v35  ;;  %v3416_v43 = vadd.f32 %v3954_v22, %v3415_v36 }
 0x27e   :  { %v3450_v45 = vadd.f32 %v3436_v40, %v3434_v38  ;;  %v3425_v46 = vadd.f32 %v3956_v26, %v3424_v39 }
 0x27f   :  { %v3417_v47 = vadd.f32 %v3958_v30, %v3416_v43  ;;  %v3442_v49 = vadd.f32 %v3441_v42, %v3437_v41 }
 0x280   :  { %v3426_v50 = vadd.f32 %v3960_v34, %v3425_v46  ;;  %v3451_v52 = vadd.f32 %v3450_v45, %v3438_v44 }
 0x281   :  { %v3418_v53 = vrot.slane %v3417_v47, 4  ;;  %v3443_v54 = vadd.f32 %v3442_v49, %v3439_v48 }
 0x282   :  { %v3427_v55 = vrot.slane %v3426_v50, 4  ;;  %v3452_v56 = vadd.f32 %v3451_v52, %v3440_v51 }
 0x283   :  { %v3419_v57 = vadd.f32 %v3418_v53, %v3417_v47  ;;  %v3444_v58 = vrot.slane %v3443_v54, 4 }
 0x284   :  { %v3428_v59 = vadd.f32 %v3427_v55, %v3426_v50  ;;  %v3453_v60 = vrot.slane %v3452_v56, 4 }
 0x285   :  { %v3420_v61 = vrot.slane %v3419_v57, 2  ;;  %v3445_v62 = vadd.f32 %v3444_v58, %v3443_v54 }
 0x286   :  { %v3429_v63 = vrot.slane %v3428_v59, 2  ;;  %v3454_v0 = vadd.f32 %v3453_v60, %v3452_v56 }
 0x287   :  { %v3421_v1 = vadd.f32 %v3420_v61, %v3419_v57  ;;  %v3446_v2 = vrot.slane %v3445_v62, 2 }
 0x288   :  { %v3430_v3 = vadd.f32 %v3429_v63, %v3428_v59  ;;  %v3455_v4 = vrot.slane %v3454_v0, 2 }
 0x289   :  { %v3422_v5 = vrot.slane %v3421_v1, 1  ;;  %v3447_v6 = vadd.f32 %v3446_v2, %v3445_v62 }
 0x28a   :  { %v3431_v7 = vrot.slane %v3430_v3, 1  ;;  %v3456_v8 = vadd.f32 %v3455_v4, %v3454_v0 }
 0x28b   :  { %v3448_v9 = vrot.slane %v3447_v6, 1  ;;  %v3423_v11 = vadd.f32 %v3422_v5, %v3421_v1 }
 0x28c   :  { %v3457_v10 = vrot.slane %v3456_v8, 1  ;;  %v3432_v13 = vadd.f32 %v3431_v7, %v3430_v3 }
 0x28d   :  { %v3449_v12 = vadd.f32 %v3448_v9, %v3447_v6 }
 0x28e   :  { %v3458_v14 = vadd.f32 %v3457_v10, %v3456_v8 }
 0x28f   :  { %v3460_v15 = vsel %vm3459_vm0, %v3423_v11, %v3449_v12 }
 0x290   :  { %v3461_v16 = vsel %vm3459_vm0, %v3432_v13, %v3458_v14 }
 0x291   :  { %v3464_v17 = vcombine.low %v3460_v15, %v3461_v16 }
 0x293   :  { %3932 = vst.sshfl [vmem:[%s6121_s3] sm:$0x33 pattern:$0x76325410] %v3464_v17 }

// kernel: discriminator_forward.16
= control target key start
LH: loop header
LB: loop body
LE: loop exit
PB: predicated region body
PF: predicated region fallthrough
CT: control target
= control target key end

     0   :  { %v18_v0 = vlaneseq  ;;  %s98_s1 = inlined_call_operand.vmem [shape: f32[1,256], index: 1, kind: input, shape index: {}]   ;;  %s99_s2 = inlined_call_operand.vmem [shape: f32[1,256], index: 2, kind: input, shape index: {}]   ;;  %s100_s0 = inlined_call_operand.vmem [shape: f32[8,256], index: 0, kind: input, shape index: {}]   ;;  %s101_s3 = inlined_call_operand.vmem [shape: bf16[8,256], index: 3, kind: output, shape index: {}]  }
   0x1   :  { %v16_v2 = vld [vmem:[%s98_s1] sm:$0x3]  ;;  %v15_v7 = vld [vmem:[%s100_s0 + $0x8] sm:$0xff] }
   0x2   :  { %v19_v1 = vshrl.u32 %v18_v0, 7  ;;  %v30_v3 = vld [vmem:[%s99_s2] sm:$0x3] }
   0x3   :  { %v14_v6 = vld [vmem:[%s100_s0] sm:$0xff] }
   0x4   :  { %v20_v4 = vsub.s32 0, %v19_v1  ;;  %v24_v5 = vsub.s32 1, %v19_v1 }
   0x6   :  { %v21_v8 = vrot.slane %v16_v2, %v20_v4  ;;  %v25_v9 = vrot.slane %v16_v2, %v24_v5  ;;  %v35_v10 = vrot.slane %v30_v3, %v20_v4  ;;  %v39_v11 = vrot.slane %v30_v3, %v24_v5 }
   0x8   :  { %v28_v12 = vmul.f32 %v21_v8, %v14_v6  ;;  %v29_v13 = vmul.f32 %v25_v9, %v15_v7 }
   0xa   :  { %v42_v14 = vadd.f32 %v35_v10, %v28_v12  ;;  %v43_v15 = vadd.f32 %v39_v11, %v29_v13 }
   0xc   :  { %v44_v16 = vmul.f32 0.2, %v42_v14  ;;  %v45_v17 = vmul.f32 0.2, %v43_v15 }
   0xe   :  { %v46_v18 = vmax.f32 %v42_v14, %v44_v16  ;;  %v47_v19 = vmax.f32 %v43_v15, %v45_v17 }
  0x10   :  { %v62_v20 = vpack.c.bf16 %v47_v19, %v46_v18 }
  0x12   :  { %56 = vst [vmem:[%s101_s3] sm:$0xff] %v62_v20 }

// kernel: discriminator_forward.15
= control target key start
LH: loop header
LB: loop body
LE: loop exit
PB: predicated region body
PF: predicated region fallthrough
CT: control target
= control target key end

     0   :  { %vm6066_vm0 = vcmask 1040384   ;;  %s10926_s1 = inlined_call_operand.vmem [shape: bf16[6400,256], index: 1, kind: input, shape index: {}]   ;;  %s10927_s0 = inlined_call_operand.vmem [shape: bf16[8,6400], index: 0, kind: input, shape index: {}]   ;;  %s10928_s2 = inlined_call_operand.vmem [shape: f32[8,256], index: 2, kind: output, shape index: {0}]   ;;  %s10929_s3 = inlined_call_operand.vmem [shape: f32[1,2,256], index: 3, kind: output, shape index: {1}]  }
   0x1   :  { %v7034_v0 = vld [vmem:[%s10926_s1 + $0x4] ss:$8 sps:$4 sm:$0xff]   ;;  %v7038_v2 = vld [vmem:[%s10926_s1] ss:$8 sps:$4 sm:$0xff]   ;;  %v7040_v4 = vld [vmem:[%s10926_s1 + $0x14] ss:$8 sps:$4 sm:$0xff]  }
   0x2   :  { %v7036_v1 = vld [vmem:[%s10926_s1 + $0xc04] ss:$8 sps:$4 sm:$0xff]   ;;  %5013 = vmatprep.subr.bf16.mxu1 %v7034_v0  ;;  %v7039_v3 = vld [vmem:[%s10926_s1 + $0xc00] ss:$8 sps:$4 sm:$0xff]   ;;  %v7042_v5 = vld [vmem:[%s10926_s1 + $0xc14] ss:$8 sps:$4 sm:$0xff]  }
   0x3   :  { %5505 = vmatprep.subr.bf16.mxu0 %v7036_v1  ;;  %5014 = vmatpush1.bf16.msra.mxu1 %v7038_v2  ;;  %v7044_v6 = vld [vmem:[%s10926_s1 + $0x10] ss:$8 sps:$4 sm:$0xff]   ;;  %v7046_v8 = vld [vmem:[%s10926_s1 + $0x24] ss:$8 sps:$4 sm:$0xff]   ;;  %v7050_v10 = vld [vmem:[%s10926_s1 + $0x20] ss:$8 sps:$4 sm:$0xff]  }
   0x4   :  { %5506 = vmatpush1.bf16.msra.mxu0 %v7039_v3  ;;  %5015 = vmatprep.subr.bf16.mxu1 %v7040_v4  ;;  %v7045_v7 = vld [vmem:[%s10926_s1 + $0xc10] ss:$8 sps:$4 sm:$0xff]   ;;  %v7048_v9 = vld [vmem:[%s10926_s1 + $0xc24] ss:$8 sps:$4 sm:$0xff]   ;;  %v7051_v11 = vld [vmem:[%s10926_s1 + $0xc20] ss:$8 sps:$4 sm:$0xff]  }
   0x5   :  { %5507 = vmatprep.subr.bf16.mxu0 %v7042_v5  ;;  %v7052_v12 = vld [vmem:[%s10926_s1 + $0x34] ss:$8 sps:$4 sm:$0xff]   ;;  %v7056_v14 = vld [vmem:[%s10926_s1 + $0x30] ss:$8 sps:$4 sm:$0xff]   ;;  %v7058_v16 = vld [vmem:[%s10926_s1 + $0x44] ss:$8 sps:$4 sm:$0xff]  }
   0x6   :  { %v7054_v13 = vld [vmem:[%s10926_s1 + $0xc34] ss:$8 sps:$4 sm:$0xff]   ;;  %v7057_v15 = vld [vmem:[%s10926_s1 + $0xc30] ss:$8 sps:$4 sm:$0xff]   ;;  %v7060_v17 = vld [vmem:[%s10926_s1 + $0xc44] ss:$8 sps:$4 sm:$0xff]  }
   0x7   :  { %5016 = vmatpush1.bf16.msra.mxu1 %v7044_v6  ;;  %v7062_v18 = vld [vmem:[%s10926_s1 + $0x40] ss:$8 sps:$4 sm:$0xff]   ;;  %v7064_v20 = vld [vmem:[%s10926_s1 + $0x54] ss:$8 sps:$4 sm:$0xff]   ;;  %v7068_v22 = vld [vmem:[%s10926_s1 + $0x50] ss:$8 sps:$4 sm:$0xff]  }
   0x8   :  { %5508 = vmatpush1.bf16.msra.mxu0 %v7045_v7  ;;  %5017 = vmatprep.subr.bf16.mxu1 %v7046_v8  ;;  %v7063_v19 = vld [vmem:[%s10926_s1 + $0xc40] ss:$8 sps:$4 sm:$0xff]   ;;  %v7066_v21 = vld [vmem:[%s10926_s1 + $0xc54] ss:$8 sps:$4 sm:$0xff]   ;;  %v7069_v23 = vld [vmem:[%s10926_s1 + $0xc50] ss:$8 sps:$4 sm:$0xff]  }
   0x9   :  { %5509 = vmatprep.subr.bf16.mxu0 %v7048_v9  ;;  %v7070_v24 = vld [vmem:[%s10926_s1 + $0x64] ss:$8 sps:$4 sm:$0xff]   ;;  %v7074_v26 = vld [vmem:[%s10926_s1 + $0x60] ss:$8 sps:$4 sm:$0xff]   ;;  %v7076_v28 = vld [vmem:[%s10926_s1 + $0x74] ss:$8 sps:$4 sm:$0xff]  }
   0xa   :  { %v7072_v25 = vld [vmem:[%s10926_s1 + $0xc64] ss:$8 sps:$4 sm:$0xff]   ;;  %v7075_v27 = vld [vmem:[%s10926_s1 + $0xc60] ss:$8 sps:$4 sm:$0xff]   ;;  %v7078_v29 = vld [vmem:[%s10926_s1 + $0xc74] ss:$8 sps:$4 sm:$0xff]  }
   0xb   :  { %5018 = vmatpush1.bf16.msra.mxu1 %v7050_v10  ;;  %v7080_v30 = vld [vmem:[%s10926_s1 + $0x70] ss:$8 sps:$4 sm:$0xff]   ;;  %v7082_v32 = vld [vmem:[%s10926_s1 + $0x84] ss:$8 sps:$4 sm:$0xff]   ;;  %v7086_v34 = vld [vmem:[%s10926_s1 + $0x80] ss:$8 sps:$4 sm:$0xff]  }
   0xc   :  { %5510 = vmatpush1.bf16.msra.mxu0 %v7051_v11  ;;  %5019 = vmatprep.subr.bf16.mxu1 %v7052_v12  ;;  %v7081_v31 = vld [vmem:[%s10926_s1 + $0xc70] ss:$8 sps:$4 sm:$0xff]   ;;  %v7084_v33 = vld [vmem:[%s10926_s1 + $0xc84] ss:$8 sps:$4 sm:$0xff]   ;;  %v7087_v35 = vld [vmem:[%s10926_s1 + $0xc80] ss:$8 sps:$4 sm:$0xff]  }
   0xd   :  { %5511 = vmatprep.subr.bf16.mxu0 %v7054_v13  ;;  %v7088_v36 = vld [vmem:[%s10926_s1 + $0x94] ss:$8 sps:$4 sm:$0xff]   ;;  %v7092_v38 = vld [vmem:[%s10926_s1 + $0x90] ss:$8 sps:$4 sm:$0xff]   ;;  %v7094_v40 = vld [vmem:[%s10926_s1 + $0xa4] ss:$8 sps:$4 sm:$0xff]  }
   0xe   :  { %v7090_v37 = vld [vmem:[%s10926_s1 + $0xc94] ss:$8 sps:$4 sm:$0xff]   ;;  %v7093_v39 = vld [vmem:[%s10926_s1 + $0xc90] ss:$8 sps:$4 sm:$0xff]   ;;  %v7096_v41 = vld [vmem:[%s10926_s1 + $0xca4] ss:$8 sps:$4 sm:$0xff]  }
   0xf   :  { %5020 = vmatpush1.bf16.msra.mxu1 %v7056_v14  ;;  %v7098_v42 = vld [vmem:[%s10926_s1 + $0xa0] ss:$8 sps:$4 sm:$0xff]   ;;  %v7100_v44 = vld [vmem:[%s10926_s1 + $0xb4] ss:$8 sps:$4 sm:$0xff]   ;;  %v7104_v47 = vld [vmem:[%s10926_s1 + $0xb0] ss:$8 sps:$4 sm:$0xff]  }
  0x10   :  { %5512 = vmatpush1.bf16.msra.mxu0 %v7057_v15  ;;  %5021 = vmatprep.subr.bf16.mxu1 %v7058_v16  ;;  %v7099_v43 = vld [vmem:[%s10926_s1 + $0xca0] ss:$8 sps:$4 sm:$0xff]   ;;  %v7102_v45 = vld [vmem:[%s10926_s1 + $0xcb4] ss:$8 sps:$4 sm:$0xff]   ;;  %v7105_v49 = vld [vmem:[%s10926_s1 + $0xcb0] ss:$8 sps:$4 sm:$0xff]  }
  0x11   :  { %5513 = vmatprep.subr.bf16.mxu0 %v7060_v17  ;;  %v13_v46 = vld [vmem:[%s10927_s0] sm:$0xff]  ;;  %v7112_v56 = vld [vmem:[%s10926_s1 + $0xd4] ss:$8 sps:$4 sm:$0xff]   ;;  %v7116_v58 = vld [vmem:[%s10926_s1 + $0xd0] ss:$8 sps:$4 sm:$0xff]  }
  0x12   :  { %v6090_v48 = vcombine.high %v13_v46, %v13_v46  ;;  %v25_v50 = vld [vmem:[%s10927_s0 + $0x60] sm:$0xff]  ;;  %v7114_v57 = vld [vmem:[%s10926_s1 + $0xcd4] ss:$8 sps:$4 sm:$0xff]   ;;  %v7117_v59 = vld [vmem:[%s10926_s1 + $0xcd0] ss:$8 sps:$4 sm:$0xff]   ;;  %v6089_v6 = vcombine.low %v13_v46, %v13_v46 }
  0x13   :  { %5022 = vmatpush1.bf16.msra.mxu1 %v7062_v18  ;;  %v7106_v51 = vld [vmem:[%s10926_s1 + $0xc4] ss:$8 sps:$4 sm:$0xff]   ;;  %v6114_v53 = vcombine.high %v25_v50, %v25_v50  ;;  %v7110_v54 = vld [vmem:[%s10926_s1 + $0xc0] ss:$8 sps:$4 sm:$0xff]   ;;  %v7124_v0 = vld [vmem:[%s10926_s1 + $0xf4] ss:$8 sps:$4 sm:$0xff]   ;;  %v6113_v7 = vcombine.low %v25_v50, %v25_v50 }
  0x14   :  { %5514 = vmatpush1.bf16.msra.mxu0 %v7063_v19  ;;  %5023 = vmatprep.subr.bf16.mxu1 %v7064_v20  ;;  %v7108_v52 = vld [vmem:[%s10926_s1 + $0xcc4] ss:$8 sps:$4 sm:$0xff]   ;;  %v7111_v55 = vld [vmem:[%s10926_s1 + $0xcc0] ss:$8 sps:$4 sm:$0xff]   ;;  %v7126_v1 = vld [vmem:[%s10926_s1 + $0xcf4] ss:$8 sps:$4 sm:$0xff]  }
  0x15   :  { %5515 = vmatprep.subr.bf16.mxu0 %v7066_v21  ;;  %5045 = vmatprep.mubr.bf16.mxu1 %v6090_v48  ;;  %v7118_v60 = vld [vmem:[%s10926_s1 + $0xe4] ss:$8 sps:$4 sm:$0xff]   ;;  %v7122_v62 = vld [vmem:[%s10926_s1 + $0xe0] ss:$8 sps:$4 sm:$0xff]   ;;  %v7128_v2 = vld [vmem:[%s10926_s1 + $0xf0] ss:$8 sps:$4 sm:$0xff]  }
  0x16   :  { %5537 = vmatprep.mubr.bf16.mxu0 %v6114_v53  ;;  %v7120_v61 = vld [vmem:[%s10926_s1 + $0xce4] ss:$8 sps:$4 sm:$0xff]   ;;  %v7123_v63 = vld [vmem:[%s10926_s1 + $0xce0] ss:$8 sps:$4 sm:$0xff]   ;;  %v7129_v3 = vld [vmem:[%s10926_s1 + $0xcf0] ss:$8 sps:$4 sm:$0xff]  }
  0x17   :  { %5024 = vmatpush1.bf16.msra.mxu1 %v7068_v22  ;;  %v7134_v4 = vld [vmem:[%s10926_s1 + $0x104] ss:$8 sps:$4 sm:$0xff]   ;;  %v7132_v8 = vld [vmem:[%s10926_s1 + $0x100] ss:$8 sps:$4 sm:$0xff]   ;;  %v7142_v10 = vld [vmem:[%s10926_s1 + $0x114] ss:$8 sps:$4 sm:$0xff]  }
  0x18   :  { %5516 = vmatpush1.bf16.msra.mxu0 %v7069_v23  ;;  %5025 = vmatprep.subr.bf16.mxu1 %v7070_v24  ;;  %v7139_v5 = vld [vmem:[%s10926_s1 + $0xd04] ss:$8 sps:$4 sm:$0xff]   ;;  %v7137_v9 = vld [vmem:[%s10926_s1 + $0xd00] ss:$8 sps:$4 sm:$0xff]   ;;  %v7145_v11 = vld [vmem:[%s10926_s1 + $0xd14] ss:$8 sps:$4 sm:$0xff]  }
  0x19   :  { %5517 = vmatprep.subr.bf16.mxu0 %v7072_v25  ;;  %v7140_v12 = vld [vmem:[%s10926_s1 + $0x110] ss:$8 sps:$4 sm:$0xff]   ;;  %v7148_v14 = vld [vmem:[%s10926_s1 + $0x124] ss:$8 sps:$4 sm:$0xff]   ;;  %v7146_v16 = vld [vmem:[%s10926_s1 + $0x120] ss:$8 sps:$4 sm:$0xff]  }
  0x1a   :  { %v7143_v13 = vld [vmem:[%s10926_s1 + $0xd10] ss:$8 sps:$4 sm:$0xff]   ;;  %v7151_v15 = vld [vmem:[%s10926_s1 + $0xd24] ss:$8 sps:$4 sm:$0xff]   ;;  %v7149_v17 = vld [vmem:[%s10926_s1 + $0xd20] ss:$8 sps:$4 sm:$0xff]  }
  0x1b   :  { %5026 = vmatpush1.bf16.msra.mxu1 %v7074_v26  ;;  %v7154_v18 = vld [vmem:[%s10926_s1 + $0x134] ss:$8 sps:$4 sm:$0xff]   ;;  %v7152_v20 = vld [vmem:[%s10926_s1 + $0x130] ss:$8 sps:$4 sm:$0xff]   ;;  %v7160_v22 = vld [vmem:[%s10926_s1 + $0x144] ss:$8 sps:$4 sm:$0xff]  }
  0x1c   :  { %5518 = vmatpush1.bf16.msra.mxu0 %v7075_v27  ;;  %5027 = vmatprep.subr.bf16.mxu1 %v7076_v28  ;;  %v7157_v19 = vld [vmem:[%s10926_s1 + $0xd34] ss:$8 sps:$4 sm:$0xff]   ;;  %v7155_v21 = vld [vmem:[%s10926_s1 + $0xd30] ss:$8 sps:$4 sm:$0xff]   ;;  %v7163_v23 = vld [vmem:[%s10926_s1 + $0xd44] ss:$8 sps:$4 sm:$0xff]  }
  0x1d   :  { %5519 = vmatprep.subr.bf16.mxu0 %v7078_v29  ;;  %v7158_v24 = vld [vmem:[%s10926_s1 + $0x140] ss:$8 sps:$4 sm:$0xff]   ;;  %v7166_v26 = vld [vmem:[%s10926_s1 + $0x154] ss:$8 sps:$4 sm:$0xff]   ;;  %v7164_v28 = vld [vmem:[%s10926_s1 + $0x150] ss:$8 sps:$4 sm:$0xff]  }
  0x1e   :  { %v7161_v25 = vld [vmem:[%s10926_s1 + $0xd40] ss:$8 sps:$4 sm:$0xff]   ;;  %v7169_v27 = vld [vmem:[%s10926_s1 + $0xd54] ss:$8 sps:$4 sm:$0xff]   ;;  %v7167_v29 = vld [vmem:[%s10926_s1 + $0xd50] ss:$8 sps:$4 sm:$0xff]  }
  0x1f   :  { %5028 = vmatpush1.bf16.msra.mxu1 %v7080_v30  ;;  %v7172_v30 = vld [vmem:[%s10926_s1 + $0x164] ss:$8 sps:$4 sm:$0xff]   ;;  %v7190_v46 = vld [vmem:[%s10926_s1 + $0x194] ss:$8 sps:$4 sm:$0xff]   ;;  %v7188_v48 = vld [vmem:[%s10926_s1 + $0x190] ss:$8 sps:$4 sm:$0xff]  }
  0x20   :  { %5520 = vmatpush1.bf16.msra.mxu0 %v7081_v31  ;;  %5029 = vmatprep.subr.bf16.mxu1 %v7082_v32  ;;  %v7175_v31 = vld [vmem:[%s10926_s1 + $0xd64] ss:$8 sps:$4 sm:$0xff]   ;;  %v7197_v53 = vld [vmem:[%s10926_s1 + $0xda0] ss:$8 sps:$4 sm:$0xff]  }
  0x21   :  { %5521 = vmatprep.subr.bf16.mxu0 %v7084_v33  ;;  %v8583_v32 = vld [vmem:[%s10927_s0 + $0x8] sm:$0xff] }
  0x22   :  { %v7170_v33 = vld [vmem:[%s10926_s1 + $0x160] ss:$8 sps:$4 sm:$0xff]   ;;  %v7196_v50 = vld [vmem:[%s10926_s1 + $0x1a4] ss:$8 sps:$4 sm:$0xff]  }
  0x23   :  { %5030 = vmatpush1.bf16.msra.mxu1 %v7086_v34  ;;  %v7173_v34 = vld [vmem:[%s10926_s1 + $0xd60] ss:$8 sps:$4 sm:$0xff]  }
  0x24   :  { %5522 = vmatpush1.bf16.msra.mxu0 %v7087_v35  ;;  %5031 = vmatprep.subr.bf16.mxu1 %v7088_v36  ;;  %v6092_v35 = vcombine.high %v8583_v32, %v8583_v32  ;;  %v8596_v36 = vld [vmem:[%s10927_s0 + $0x68] sm:$0xff] }
  0x25   :  { %5523 = vmatprep.subr.bf16.mxu0 %v7090_v37  ;;  %v7178_v37 = vld [vmem:[%s10926_s1 + $0x174] ss:$8 sps:$4 sm:$0xff]  }
  0x27   :  { %5032 = vmatpush1.bf16.msra.mxu1 %v7092_v38  ;;  %v6116_v38 = vcombine.high %v8596_v36, %v8596_v36 }
  0x28   :  { %5524 = vmatpush1.bf16.msra.mxu0 %v7093_v39  ;;  %5033 = vmatprep.subr.bf16.mxu1 %v7094_v40  ;;  %v7181_v39 = vld [vmem:[%s10926_s1 + $0xd74] ss:$8 sps:$4 sm:$0xff]   ;;  %v7176_v40 = vld [vmem:[%s10926_s1 + $0x170] ss:$8 sps:$4 sm:$0xff]  }
  0x29   :  { %5525 = vmatprep.subr.bf16.mxu0 %v7096_v41  ;;  %v7179_v41 = vld [vmem:[%s10926_s1 + $0xd70] ss:$8 sps:$4 sm:$0xff]  }
  0x2b   :  { %5034 = vmatpush1.bf16.msra.mxu1 %v7098_v42  ;;  %v7184_v42 = vld [vmem:[%s10926_s1 + $0x184] ss:$8 sps:$4 sm:$0xff]  }
  0x2c   :  { %5526 = vmatpush1.bf16.msra.mxu0 %v7099_v43  ;;  %5035 = vmatprep.subr.bf16.mxu1 %v7100_v44  ;;  %v7187_v43 = vld [vmem:[%s10926_s1 + $0xd84] ss:$8 sps:$4 sm:$0xff]   ;;  %v7182_v44 = vld [vmem:[%s10926_s1 + $0x180] ss:$8 sps:$4 sm:$0xff]  }
  0x2d   :  { %5527 = vmatprep.subr.bf16.mxu0 %v7102_v45  ;;  %v7185_v45 = vld [vmem:[%s10926_s1 + $0xd80] ss:$8 sps:$4 sm:$0xff]  }
  0x2f   :  { %5036 = vmatpush1.bf16.msra.mxu1 %v7104_v47  ;;  %v7193_v47 = vld [vmem:[%s10926_s1 + $0xd94] ss:$8 sps:$4 sm:$0xff]  }
  0x30   :  { %5528 = vmatpush1.bf16.msra.mxu0 %v7105_v49  ;;  %5037 = vmatprep.subr.bf16.mxu1 %v7106_v51  ;;  %v7191_v49 = vld [vmem:[%s10926_s1 + $0xd90] ss:$8 sps:$4 sm:$0xff]   ;;  %v7199_v51 = vld [vmem:[%s10926_s1 + $0xda4] ss:$8 sps:$4 sm:$0xff]  }
  0x31   :  { %5529 = vmatprep.subr.bf16.mxu0 %v7108_v52  ;;  %v7194_v52 = vld [vmem:[%s10926_s1 + $0x1a0] ss:$8 sps:$4 sm:$0xff]  }
  0x33   :  { %5038 = vmatpush1.bf16.msra.mxu1 %v7110_v54  ;;  %v7202_v54 = vld [vmem:[%s10926_s1 + $0x1b4] ss:$8 sps:$4 sm:$0xff]  }
  0x34   :  { %5530 = vmatpush1.bf16.msra.mxu0 %v7111_v55  ;;  %5039 = vmatprep.subr.bf16.mxu1 %v7112_v56  ;;  %v7205_v55 = vld [vmem:[%s10926_s1 + $0xdb4] ss:$8 sps:$4 sm:$0xff]   ;;  %v7200_v56 = vld [vmem:[%s10926_s1 + $0x1b0] ss:$8 sps:$4 sm:$0xff]  }
  0x35   :  { %5531 = vmatprep.subr.bf16.mxu0 %v7114_v57  ;;  %v7203_v57 = vld [vmem:[%s10926_s1 + $0xdb0] ss:$8 sps:$4 sm:$0xff]  }
  0x37   :  { %5040 = vmatpush1.bf16.msra.mxu1 %v7116_v58  ;;  %v7208_v58 = vld [vmem:[%s10926_s1 + $0x1c4] ss:$8 sps:$4 sm:$0xff]  }
  0x38   :  { %5532 = vmatpush1.bf16.msra.mxu0 %v7117_v59  ;;  %5041 = vmatprep.subr.bf16.mxu1 %v7118_v60  ;;  %v7211_v59 = vld [vmem:[%s10926_s1 + $0xdc4] ss:$8 sps:$4 sm:$0xff]   ;;  %v7206_v60 = vld [vmem:[%s10926_s1 + $0x1c0] ss:$8 sps:$4 sm:$0xff]  }
  0x39   :  { %5533 = vmatprep.subr.bf16.mxu0 %v7120_v61  ;;  %v7209_v61 = vld [vmem:[%s10926_s1 + $0xdc0] ss:$8 sps:$4 sm:$0xff]  }
  0x3b   :  { %5042 = vmatpush1.bf16.msra.mxu1 %v7122_v62  ;;  %v7214_v62 = vld [vmem:[%s10926_s1 + $0x1d4] ss:$8 sps:$4 sm:$0xff]  }
  0x3c   :  { %5534 = vmatpush1.bf16.msra.mxu0 %v7123_v63  ;;  %5043 = vmatprep.subr.bf16.mxu1 %v7124_v0  ;;  %v7217_v63 = vld [vmem:[%s10926_s1 + $0xdd4] ss:$8 sps:$4 sm:$0xff]   ;;  %v7212_v0 = vld [vmem:[%s10926_s1 + $0x1d0] ss:$8 sps:$4 sm:$0xff]  }
  0x3d   :  { %5535 = vmatprep.subr.bf16.mxu0 %v7126_v1  ;;  %v7215_v1 = vld [vmem:[%s10926_s1 + $0xdd0] ss:$8 sps:$4 sm:$0xff]  }
  0x3f   :  { %5044 = vmatpush1.bf16.msra.mxu1 %v7128_v2  ;;  %v7220_v2 = vld [vmem:[%s10926_s1 + $0x1e4] ss:$8 sps:$4 sm:$0xff]  }
  0x40   :  { %5536 = vmatpush1.bf16.msra.mxu0 %v7129_v3  ;;  %5054 = vmatprep.subr.bf16.mxu1 %v7134_v4  ;;  %v7223_v3 = vld [vmem:[%s10926_s1 + $0xde4] ss:$8 sps:$4 sm:$0xff]   ;;  %v7218_v4 = vld [vmem:[%s10926_s1 + $0x1e0] ss:$8 sps:$4 sm:$0xff]  }
  0x41   :  { %5546 = vmatprep.subr.bf16.mxu0 %v7139_v5  ;;  %v7221_v5 = vld [vmem:[%s10926_s1 + $0xde0] ss:$8 sps:$4 sm:$0xff]  }
  0x42   :  { %5046 = vmatmul.mubr.bf16.vlgmr.msra.gmra.mrb[0].mxu1 %v6089_v6  ;;  %v7226_v6 = vld [vmem:[%s10926_s1 + $0x1f4] ss:$8 sps:$4 sm:$0xff]  }
  0x43   :  { %5538 = vmatmul.mubr.bf16.vlgmr.msra.gmra.mrb[0].mxu0 %v6113_v7  ;;  %5055 = vmatpush1.bf16.msra.mxu1 %v7132_v8  ;;  %v7229_v7 = vld [vmem:[%s10926_s1 + $0xdf4] ss:$8 sps:$4 sm:$0xff]   ;;  %v7224_v8 = vld [vmem:[%s10926_s1 + $0x1f0] ss:$8 sps:$4 sm:$0xff]  }
  0x44   :  { %5547 = vmatpush1.bf16.msra.mxu0 %v7137_v9  ;;  %5056 = vmatprep.subr.bf16.mxu1 %v7142_v10  ;;  %v7227_v9 = vld [vmem:[%s10926_s1 + $0xdf0] ss:$8 sps:$4 sm:$0xff]   ;;  %v7234_v10 = vld [vmem:[%s10926_s1 + $0x204] ss:$8 sps:$4 sm:$0xff]  }
  0x45   :  { %5548 = vmatprep.subr.bf16.mxu0 %v7145_v11  ;;  %5086 = vmatprep.mubr.bf16.mxu1 %v6092_v35  ;;  %v7239_v11 = vld [vmem:[%s10926_s1 + $0xe04] ss:$8 sps:$4 sm:$0xff]   ;;  %v7261_v35 = vld [vmem:[%s10926_s1 + $0xe40] ss:$8 sps:$4 sm:$0xff]  }
  0x46   :  { %5578 = vmatprep.mubr.bf16.mxu0 %v6116_v38  ;;  %v7264_v38 = vld [vmem:[%s10926_s1 + $0x250] ss:$8 sps:$4 sm:$0xff]  }
  0x47   :  { %5057 = vmatpush1.bf16.msra.mxu1 %v7140_v12  ;;  %v6091_v12 = vcombine.low %v8583_v32, %v8583_v32  ;;  %v7260_v32 = vld [vmem:[%s10926_s1 + $0x244] ss:$8 sps:$4 sm:$0xff]  }
  0x48   :  { %5549 = vmatpush1.bf16.msra.mxu0 %v7143_v13  ;;  %5058 = vmatprep.subr.bf16.mxu1 %v7148_v14  ;;  %v7232_v13 = vld [vmem:[%s10926_s1 + $0x200] ss:$8 sps:$4 sm:$0xff]   ;;  %v6115_v14 = vcombine.low %v8596_v36, %v8596_v36  ;;  %v7266_v36 = vld [vmem:[%s10926_s1 + $0x254] ss:$8 sps:$4 sm:$0xff]  }
  0x49   :  { %5550 = vmatprep.subr.bf16.mxu0 %v7151_v15  ;;  %v7237_v15 = vld [vmem:[%s10926_s1 + $0xe00] ss:$8 sps:$4 sm:$0xff]  }
  0x4b   :  { %5059 = vmatpush1.bf16.msra.mxu1 %v7146_v16  ;;  %v7242_v16 = vld [vmem:[%s10926_s1 + $0x214] ss:$8 sps:$4 sm:$0xff]  }
  0x4c   :  { %5551 = vmatpush1.bf16.msra.mxu0 %v7149_v17  ;;  %5060 = vmatprep.subr.bf16.mxu1 %v7154_v18  ;;  %v7245_v17 = vld [vmem:[%s10926_s1 + $0xe14] ss:$8 sps:$4 sm:$0xff]  }
  0x4d   :  { %5552 = vmatprep.subr.bf16.mxu0 %v7157_v19  ;;  %v8733_v18 = vld [vmem:[%s10927_s0 + $0x10] sm:$0xff] }
  0x4e   :  { %v6094_v19 = vcombine.high %v8733_v18, %v8733_v18 }
  0x4f   :  { %5061 = vmatpush1.bf16.msra.mxu1 %v7152_v20  ;;  %v8740_v20 = vld [vmem:[%s10927_s0 + $0x70] sm:$0xff] }
  0x50   :  { %5553 = vmatpush1.bf16.msra.mxu0 %v7155_v21  ;;  %5062 = vmatprep.subr.bf16.mxu1 %v7160_v22  ;;  %v7240_v21 = vld [vmem:[%s10926_s1 + $0x210] ss:$8 sps:$4 sm:$0xff]  }
  0x51   :  { %5554 = vmatprep.subr.bf16.mxu0 %v7163_v23  ;;  %v7243_v22 = vld [vmem:[%s10926_s1 + $0xe10] ss:$8 sps:$4 sm:$0xff]   ;;  %v6118_v23 = vcombine.high %v8740_v20, %v8740_v20 }
  0x53   :  { %5063 = vmatpush1.bf16.msra.mxu1 %v7158_v24  ;;  %v7248_v24 = vld [vmem:[%s10926_s1 + $0x224] ss:$8 sps:$4 sm:$0xff]  }
  0x54   :  { %5555 = vmatpush1.bf16.msra.mxu0 %v7161_v25  ;;  %5064 = vmatprep.subr.bf16.mxu1 %v7166_v26  ;;  %v7251_v25 = vld [vmem:[%s10926_s1 + $0xe24] ss:$8 sps:$4 sm:$0xff]   ;;  %v7246_v26 = vld [vmem:[%s10926_s1 + $0x220] ss:$8 sps:$4 sm:$0xff]  }
  0x55   :  { %5556 = vmatprep.subr.bf16.mxu0 %v7169_v27  ;;  %v7249_v27 = vld [vmem:[%s10926_s1 + $0xe20] ss:$8 sps:$4 sm:$0xff]  }
  0x57   :  { %5065 = vmatpush1.bf16.msra.mxu1 %v7164_v28  ;;  %v7254_v28 = vld [vmem:[%s10926_s1 + $0x234] ss:$8 sps:$4 sm:$0xff]  }
  0x58   :  { %5557 = vmatpush1.bf16.msra.mxu0 %v7167_v29  ;;  %5066 = vmatprep.subr.bf16.mxu1 %v7172_v30  ;;  %v7257_v29 = vld [vmem:[%s10926_s1 + $0xe34] ss:$8 sps:$4 sm:$0xff]   ;;  %v7252_v30 = vld [vmem:[%s10926_s1 + $0x230] ss:$8 sps:$4 sm:$0xff]  }
  0x59   :  { %5558 = vmatprep.subr.bf16.mxu0 %v7175_v31  ;;  %v7255_v31 = vld [vmem:[%s10926_s1 + $0xe30] ss:$8 sps:$4 sm:$0xff]  }
  0x5b   :  { %5067 = vmatpush1.bf16.msra.mxu1 %v7170_v33  ;;  %v7263_v33 = vld [vmem:[%s10926_s1 + $0xe44] ss:$8 sps:$4 sm:$0xff]  }
  0x5c   :  { %5559 = vmatpush1.bf16.msra.mxu0 %v7173_v34  ;;  %5068 = vmatprep.subr.bf16.mxu1 %v7178_v37  ;;  %v7258_v34 = vld [vmem:[%s10926_s1 + $0x240] ss:$8 sps:$4 sm:$0xff]   ;;  %v7269_v37 = vld [vmem:[%s10926_s1 + $0xe54] ss:$8 sps:$4 sm:$0xff]  }
  0x5d   :  { %5560 = vmatprep.subr.bf16.mxu0 %v7181_v39  ;;  %v7267_v39 = vld [vmem:[%s10926_s1 + $0xe50] ss:$8 sps:$4 sm:$0xff]  }
  0x5f   :  { %5069 = vmatpush1.bf16.msra.mxu1 %v7176_v40  ;;  %v7272_v40 = vld [vmem:[%s10926_s1 + $0x264] ss:$8 sps:$4 sm:$0xff]  }
  0x60   :  { %5561 = vmatpush1.bf16.msra.mxu0 %v7179_v41  ;;  %5070 = vmatprep.subr.bf16.mxu1 %v7184_v42  ;;  %v7275_v41 = vld [vmem:[%s10926_s1 + $0xe64] ss:$8 sps:$4 sm:$0xff]   ;;  %v7270_v42 = vld [vmem:[%s10926_s1 + $0x260] ss:$8 sps:$4 sm:$0xff]  }
  0x61   :  { %5562 = vmatprep.subr.bf16.mxu0 %v7187_v43  ;;  %v7273_v43 = vld [vmem:[%s10926_s1 + $0xe60] ss:$8 sps:$4 sm:$0xff]  }
  0x63   :  { %5071 = vmatpush1.bf16.msra.mxu1 %v7182_v44  ;;  %v7278_v44 = vld [vmem:[%s10926_s1 + $0x274] ss:$8 sps:$4 sm:$0xff]  }
  0x64   :  { %5563 = vmatpush1.bf16.msra.mxu0 %v7185_v45  ;;  %5072 = vmatprep.subr.bf16.mxu1 %v7190_v46  ;;  %v7281_v45 = vld [vmem:[%s10926_s1 + $0xe74] ss:$8 sps:$4 sm:$0xff]   ;;  %v7276_v46 = vld [vmem:[%s10926_s1 + $0x270] ss:$8 sps:$4 sm:$0xff]  }
  0x65   :  { %5564 = vmatprep.subr.bf16.mxu0 %v7193_v47  ;;  %v7279_v47 = vld [vmem:[%s10926_s1 + $0xe70] ss:$8 sps:$4 sm:$0xff]  }
  0x67   :  { %5073 = vmatpush1.bf16.msra.mxu1 %v7188_v48  ;;  %v7284_v48 = vld [vmem:[%s10926_s1 + $0x284] ss:$8 sps:$4 sm:$0xff]  }
  0x68   :  { %5565 = vmatpush1.bf16.msra.mxu0 %v7191_v49  ;;  %5074 = vmatprep.subr.bf16.mxu1 %v7196_v50  ;;  %v7287_v49 = vld [vmem:[%s10926_s1 + $0xe84] ss:$8 sps:$4 sm:$0xff]   ;;  %v7282_v50 = vld [vmem:[%s10926_s1 + $0x280] ss:$8 sps:$4 sm:$0xff]  }
  0x69   :  { %5566 = vmatprep.subr.bf16.mxu0 %v7199_v51  ;;  %v7285_v51 = vld [vmem:[%s10926_s1 + $0xe80] ss:$8 sps:$4 sm:$0xff]  }
  0x6b   :  { %5075 = vmatpush1.bf16.msra.mxu1 %v7194_v52  ;;  %v7290_v52 = vld [vmem:[%s10926_s1 + $0x294] ss:$8 sps:$4 sm:$0xff]  }
  0x6c   :  { %5567 = vmatpush1.bf16.msra.mxu0 %v7197_v53  ;;  %5076 = vmatprep.subr.bf16.mxu1 %v7202_v54  ;;  %v7293_v53 = vld [vmem:[%s10926_s1 + $0xe94] ss:$8 sps:$4 sm:$0xff]   ;;  %v7288_v54 = vld [vmem:[%s10926_s1 + $0x290] ss:$8 sps:$4 sm:$0xff]  }
  0x6d   :  { %5568 = vmatprep.subr.bf16.mxu0 %v7205_v55  ;;  %v7291_v55 = vld [vmem:[%s10926_s1 + $0xe90] ss:$8 sps:$4 sm:$0xff]  }
  0x6f   :  { %5077 = vmatpush1.bf16.msra.mxu1 %v7200_v56  ;;  %v7296_v56 = vld [vmem:[%s10926_s1 + $0x2a4] ss:$8 sps:$4 sm:$0xff]  }
  0x70   :  { %5569 = vmatpush1.bf16.msra.mxu0 %v7203_v57  ;;  %5078 = vmatprep.subr.bf16.mxu1 %v7208_v58  ;;  %v7299_v57 = vld [vmem:[%s10926_s1 + $0xea4] ss:$8 sps:$4 sm:$0xff]   ;;  %v7294_v58 = vld [vmem:[%s10926_s1 + $0x2a0] ss:$8 sps:$4 sm:$0xff]  }
  0x71   :  { %5570 = vmatprep.subr.bf16.mxu0 %v7211_v59  ;;  %v7297_v59 = vld [vmem:[%s10926_s1 + $0xea0] ss:$8 sps:$4 sm:$0xff]  }
  0x73   :  { %5079 = vmatpush1.bf16.msra.mxu1 %v7206_v60  ;;  %v7302_v60 = vld [vmem:[%s10926_s1 + $0x2b4] ss:$8 sps:$4 sm:$0xff]  }
  0x74   :  { %5571 = vmatpush1.bf16.msra.mxu0 %v7209_v61  ;;  %5080 = vmatprep.subr.bf16.mxu1 %v7214_v62  ;;  %v7305_v61 = vld [vmem:[%s10926_s1 + $0xeb4] ss:$8 sps:$4 sm:$0xff]   ;;  %v7300_v62 = vld [vmem:[%s10926_s1 + $0x2b0] ss:$8 sps:$4 sm:$0xff]  }
  0x75   :  { %5572 = vmatprep.subr.bf16.mxu0 %v7217_v63  ;;  %v7303_v63 = vld [vmem:[%s10926_s1 + $0xeb0] ss:$8 sps:$4 sm:$0xff]  }
  0x77   :  { %5081 = vmatpush1.bf16.msra.mxu1 %v7212_v0  ;;  %v7308_v0 = vld [vmem:[%s10926_s1 + $0x2c4] ss:$8 sps:$4 sm:$0xff]  }
  0x78   :  { %5573 = vmatpush1.bf16.msra.mxu0 %v7215_v1  ;;  %5082 = vmatprep.subr.bf16.mxu1 %v7220_v2  ;;  %v7311_v1 = vld [vmem:[%s10926_s1 + $0xec4] ss:$8 sps:$4 sm:$0xff]   ;;  %v7306_v2 = vld [vmem:[%s10926_s1 + $0x2c0] ss:$8 sps:$4 sm:$0xff]  }
  0x79   :  { %5574 = vmatprep.subr.bf16.mxu0 %v7223_v3  ;;  %v7309_v3 = vld [vmem:[%s10926_s1 + $0xec0] ss:$8 sps:$4 sm:$0xff]  }
  0x7b   :  { %5083 = vmatpush1.bf16.msra.mxu1 %v7218_v4  ;;  %v7314_v4 = vld [vmem:[%s10926_s1 + $0x2d4] ss:$8 sps:$4 sm:$0xff]  }
  0x7c   :  { %5575 = vmatpush1.bf16.msra.mxu0 %v7221_v5  ;;  %5084 = vmatprep.subr.bf16.mxu1 %v7226_v6  ;;  %v7317_v5 = vld [vmem:[%s10926_s1 + $0xed4] ss:$8 sps:$4 sm:$0xff]   ;;  %v7312_v6 = vld [vmem:[%s10926_s1 + $0x2d0] ss:$8 sps:$4 sm:$0xff]  }
  0x7d   :  { %5576 = vmatprep.subr.bf16.mxu0 %v7229_v7  ;;  %v7315_v7 = vld [vmem:[%s10926_s1 + $0xed0] ss:$8 sps:$4 sm:$0xff]  }
  0x7f   :  { %5085 = vmatpush1.bf16.msra.mxu1 %v7224_v8  ;;  %v7320_v8 = vld [vmem:[%s10926_s1 + $0x2e4] ss:$8 sps:$4 sm:$0xff]  }
  0x80   :  { %5577 = vmatpush1.bf16.msra.mxu0 %v7227_v9  ;;  %5095 = vmatprep.subr.bf16.mxu1 %v7234_v10  ;;  %v7323_v9 = vld [vmem:[%s10926_s1 + $0xee4] ss:$8 sps:$4 sm:$0xff]   ;;  %v7318_v10 = vld [vmem:[%s10926_s1 + $0x2e0] ss:$8 sps:$4 sm:$0xff]  }
  0x81   :  { %5587 = vmatprep.subr.bf16.mxu0 %v7239_v11  ;;  %v7321_v11 = vld [vmem:[%s10926_s1 + $0xee0] ss:$8 sps:$4 sm:$0xff]  }
  0x82   :  { %5087 = vmatmul.mubr.bf16.vlgmr.msra.gmra.mrb[0].mxu1 %v6091_v12  ;;  %v7326_v12 = vld [vmem:[%s10926_s1 + $0x2f4] ss:$8 sps:$4 sm:$0xff]  }
  0x83   :  { %5579 = vmatmul.mubr.bf16.vlgmr.msra.gmra.mrb[0].mxu0 %v6115_v14  ;;  %5096 = vmatpush1.bf16.msra.mxu1 %v7232_v13  ;;  %v7329_v13 = vld [vmem:[%s10926_s1 + $0xef4] ss:$8 sps:$4 sm:$0xff]   ;;  %v7324_v14 = vld [vmem:[%s10926_s1 + $0x2f0] ss:$8 sps:$4 sm:$0xff]  }
  0x84   :  { %5588 = vmatpush1.bf16.msra.mxu0 %v7237_v15  ;;  %5097 = vmatprep.subr.bf16.mxu1 %v7242_v16  ;;  %v7327_v15 = vld [vmem:[%s10926_s1 + $0xef0] ss:$8 sps:$4 sm:$0xff]   ;;  %v7334_v16 = vld [vmem:[%s10926_s1 + $0x304] ss:$8 sps:$4 sm:$0xff]  }
  0x85   :  { %5589 = vmatprep.subr.bf16.mxu0 %v7245_v17  ;;  %5127 = vmatprep.mubr.bf16.mxu1 %v6094_v19  ;;  %v7339_v17 = vld [vmem:[%s10926_s1 + $0xf04] ss:$8 sps:$4 sm:$0xff]   ;;  %v7332_v19 = vld [vmem:[%s10926_s1 + $0x300] ss:$8 sps:$4 sm:$0xff]  }
  0x86   :  { %5619 = vmatprep.mubr.bf16.mxu0 %v6118_v23  ;;  %v6117_v23 = vcombine.low %v8740_v20, %v8740_v20 }
  0x87   :  { %5098 = vmatpush1.bf16.msra.mxu1 %v7240_v21  ;;  %v7337_v21 = vld [vmem:[%s10926_s1 + $0xf00] ss:$8 sps:$4 sm:$0xff]  }
  0x88   :  { %5590 = vmatpush1.bf16.msra.mxu0 %v7243_v22  ;;  %5099 = vmatprep.subr.bf16.mxu1 %v7248_v24  ;;  %v6093_v22 = vcombine.low %v8733_v18, %v8733_v18  ;;  %v8937_v24 = vld [vmem:[%s10927_s0 + $0x18] sm:$0xff] }
  0x89   :  { %5591 = vmatprep.subr.bf16.mxu0 %v7251_v25  ;;  %v8942_v25 = vld [vmem:[%s10927_s0 + $0x78] sm:$0xff]  ;;  %v6096_v20 = vcombine.high %v8937_v24, %v8937_v24 }
  0x8a   :  { %v7345_v18 = vld [vmem:[%s10926_s1 + $0xf14] ss:$8 sps:$4 sm:$0xff]  }
  0x8b   :  { %5100 = vmatpush1.bf16.msra.mxu1 %v7246_v26  ;;  %v7342_v26 = vld [vmem:[%s10926_s1 + $0x314] ss:$8 sps:$4 sm:$0xff]  }
  0x8c   :  { %5592 = vmatpush1.bf16.msra.mxu0 %v7249_v27  ;;  %5101 = vmatprep.subr.bf16.mxu1 %v7254_v28  ;;  %v6120_v27 = vcombine.high %v8942_v25, %v8942_v25  ;;  %v7340_v28 = vld [vmem:[%s10926_s1 + $0x310] ss:$8 sps:$4 sm:$0xff]  }
  0x8d   :  { %5593 = vmatprep.subr.bf16.mxu0 %v7257_v29  ;;  %v7343_v29 = vld [vmem:[%s10926_s1 + $0xf10] ss:$8 sps:$4 sm:$0xff]  }
  0x8f   :  { %5102 = vmatpush1.bf16.msra.mxu1 %v7252_v30  ;;  %v7348_v30 = vld [vmem:[%s10926_s1 + $0x324] ss:$8 sps:$4 sm:$0xff]  }
  0x90   :  { %5594 = vmatpush1.bf16.msra.mxu0 %v7255_v31  ;;  %5103 = vmatprep.subr.bf16.mxu1 %v7260_v32  ;;  %v7351_v31 = vld [vmem:[%s10926_s1 + $0xf24] ss:$8 sps:$4 sm:$0xff]   ;;  %v7346_v32 = vld [vmem:[%s10926_s1 + $0x320] ss:$8 sps:$4 sm:$0xff]  }
  0x91   :  { %5595 = vmatprep.subr.bf16.mxu0 %v7263_v33  ;;  %v7349_v33 = vld [vmem:[%s10926_s1 + $0xf20] ss:$8 sps:$4 sm:$0xff]  }
  0x93   :  { %5104 = vmatpush1.bf16.msra.mxu1 %v7258_v34  ;;  %v7354_v34 = vld [vmem:[%s10926_s1 + $0x334] ss:$8 sps:$4 sm:$0xff]  }
  0x94   :  { %5596 = vmatpush1.bf16.msra.mxu0 %v7261_v35  ;;  %5105 = vmatprep.subr.bf16.mxu1 %v7266_v36  ;;  %v7357_v35 = vld [vmem:[%s10926_s1 + $0xf34] ss:$8 sps:$4 sm:$0xff]   ;;  %v7352_v36 = vld [vmem:[%s10926_s1 + $0x330] ss:$8 sps:$4 sm:$0xff]  }
  0x95   :  { %5597 = vmatprep.subr.bf16.mxu0 %v7269_v37  ;;  %v7355_v37 = vld [vmem:[%s10926_s1 + $0xf30] ss:$8 sps:$4 sm:$0xff]  }
  0x97   :  { %5106 = vmatpush1.bf16.msra.mxu1 %v7264_v38  ;;  %v7360_v38 = vld [vmem:[%s10926_s1 + $0x344] ss:$8 sps:$4 sm:$0xff]  }
  0x98   :  { %5598 = vmatpush1.bf16.msra.mxu0 %v7267_v39  ;;  %5107 = vmatprep.subr.bf16.mxu1 %v7272_v40  ;;  %v7363_v39 = vld [vmem:[%s10926_s1 + $0xf44] ss:$8 sps:$4 sm:$0xff]   ;;  %v7358_v40 = vld [vmem:[%s10926_s1 + $0x340] ss:$8 sps:$4 sm:$0xff]  }
  0x99   :  { %5599 = vmatprep.subr.bf16.mxu0 %v7275_v41  ;;  %v7361_v41 = vld [vmem:[%s10926_s1 + $0xf40] ss:$8 sps:$4 sm:$0xff]  }
  0x9b   :  { %5108 = vmatpush1.bf16.msra.mxu1 %v7270_v42  ;;  %v7366_v42 = vld [vmem:[%s10926_s1 + $0x354] ss:$8 sps:$4 sm:$0xff]  }
  0x9c   :  { %5600 = vmatpush1.bf16.msra.mxu0 %v7273_v43  ;;  %5109 = vmatprep.subr.bf16.mxu1 %v7278_v44  ;;  %v7369_v43 = vld [vmem:[%s10926_s1 + $0xf54] ss:$8 sps:$4 sm:$0xff]   ;;  %v7364_v44 = vld [vmem:[%s10926_s1 + $0x350] ss:$8 sps:$4 sm:$0xff]  }
  0x9d   :  { %5601 = vmatprep.subr.bf16.mxu0 %v7281_v45  ;;  %v7367_v45 = vld [vmem:[%s10926_s1 + $0xf50] ss:$8 sps:$4 sm:$0xff]  }
  0x9f   :  { %5110 = vmatpush1.bf16.msra.mxu1 %v7276_v46  ;;  %v7372_v46 = vld [vmem:[%s10926_s1 + $0x364] ss:$8 sps:$4 sm:$0xff]  }
  0xa0   :  { %5602 = vmatpush1.bf16.msra.mxu0 %v7279_v47  ;;  %5111 = vmatprep.subr.bf16.mxu1 %v7284_v48  ;;  %v7375_v47 = vld [vmem:[%s10926_s1 + $0xf64] ss:$8 sps:$4 sm:$0xff]   ;;  %v7370_v48 = vld [vmem:[%s10926_s1 + $0x360] ss:$8 sps:$4 sm:$0xff]  }
  0xa1   :  { %5603 = vmatprep.subr.bf16.mxu0 %v7287_v49  ;;  %v7373_v49 = vld [vmem:[%s10926_s1 + $0xf60] ss:$8 sps:$4 sm:$0xff]  }
  0xa3   :  { %5112 = vmatpush1.bf16.msra.mxu1 %v7282_v50  ;;  %v7378_v50 = vld [vmem:[%s10926_s1 + $0x374] ss:$8 sps:$4 sm:$0xff]  }
  0xa4   :  { %5604 = vmatpush1.bf16.msra.mxu0 %v7285_v51  ;;  %5113 = vmatprep.subr.bf16.mxu1 %v7290_v52  ;;  %v7381_v51 = vld [vmem:[%s10926_s1 + $0xf74] ss:$8 sps:$4 sm:$0xff]   ;;  %v7376_v52 = vld [vmem:[%s10926_s1 + $0x370] ss:$8 sps:$4 sm:$0xff]  }
  0xa5   :  { %5605 = vmatprep.subr.bf16.mxu0 %v7293_v53  ;;  %v7379_v53 = vld [vmem:[%s10926_s1 + $0xf70] ss:$8 sps:$4 sm:$0xff]  }
  0xa7   :  { %5114 = vmatpush1.bf16.msra.mxu1 %v7288_v54  ;;  %v7384_v54 = vld [vmem:[%s10926_s1 + $0x384] ss:$8 sps:$4 sm:$0xff]  }
  0xa8   :  { %5606 = vmatpush1.bf16.msra.mxu0 %v7291_v55  ;;  %5115 = vmatprep.subr.bf16.mxu1 %v7296_v56  ;;  %v7387_v55 = vld [vmem:[%s10926_s1 + $0xf84] ss:$8 sps:$4 sm:$0xff]   ;;  %v7382_v56 = vld [vmem:[%s10926_s1 + $0x380] ss:$8 sps:$4 sm:$0xff]  }
  0xa9   :  { %5607 = vmatprep.subr.bf16.mxu0 %v7299_v57  ;;  %v7385_v57 = vld [vmem:[%s10926_s1 + $0xf80] ss:$8 sps:$4 sm:$0xff]  }
  0xab   :  { %5116 = vmatpush1.bf16.msra.mxu1 %v7294_v58  ;;  %v7390_v58 = vld [vmem:[%s10926_s1 + $0x394] ss:$8 sps:$4 sm:$0xff]  }
  0xac   :  { %5608 = vmatpush1.bf16.msra.mxu0 %v7297_v59  ;;  %5117 = vmatprep.subr.bf16.mxu1 %v7302_v60  ;;  %v7393_v59 = vld [vmem:[%s10926_s1 + $0xf94] ss:$8 sps:$4 sm:$0xff]   ;;  %v7388_v60 = vld [vmem:[%s10926_s1 + $0x390] ss:$8 sps:$4 sm:$0xff]  }
  0xad   :  { %5609 = vmatprep.subr.bf16.mxu0 %v7305_v61  ;;  %v7391_v61 = vld [vmem:[%s10926_s1 + $0xf90] ss:$8 sps:$4 sm:$0xff]  }
  0xaf   :  { %5118 = vmatpush1.bf16.msra.mxu1 %v7300_v62  ;;  %v7396_v62 = vld [vmem:[%s10926_s1 + $0x3a4] ss:$8 sps:$4 sm:$0xff]  }
  0xb0   :  { %5610 = vmatpush1.bf16.msra.mxu0 %v7303_v63  ;;  %5119 = vmatprep.subr.bf16.mxu1 %v7308_v0  ;;  %v7399_v63 = vld [vmem:[%s10926_s1 + $0xfa4] ss:$8 sps:$4 sm:$0xff]   ;;  %v7394_v0 = vld [vmem:[%s10926_s1 + $0x3a0] ss:$8 sps:$4 sm:$0xff]  }
  0xb1   :  { %5611 = vmatprep.subr.bf16.mxu0 %v7311_v1  ;;  %v7397_v1 = vld [vmem:[%s10926_s1 + $0xfa0] ss:$8 sps:$4 sm:$0xff]  }
  0xb3   :  { %5120 = vmatpush1.bf16.msra.mxu1 %v7306_v2  ;;  %v7402_v2 = vld [vmem:[%s10926_s1 + $0x3b4] ss:$8 sps:$4 sm:$0xff]  }
  0xb4   :  { %5612 = vmatpush1.bf16.msra.mxu0 %v7309_v3  ;;  %5121 = vmatprep.subr.bf16.mxu1 %v7314_v4  ;;  %v7405_v3 = vld [vmem:[%s10926_s1 + $0xfb4] ss:$8 sps:$4 sm:$0xff]   ;;  %v7400_v4 = vld [vmem:[%s10926_s1 + $0x3b0] ss:$8 sps:$4 sm:$0xff]  }
  0xb5   :  { %5613 = vmatprep.subr.bf16.mxu0 %v7317_v5  ;;  %v7403_v5 = vld [vmem:[%s10926_s1 + $0xfb0] ss:$8 sps:$4 sm:$0xff]  }
  0xb7   :  { %5122 = vmatpush1.bf16.msra.mxu1 %v7312_v6  ;;  %v7408_v6 = vld [vmem:[%s10926_s1 + $0x3c4] ss:$8 sps:$4 sm:$0xff]  }
  0xb8   :  { %5614 = vmatpush1.bf16.msra.mxu0 %v7315_v7  ;;  %5123 = vmatprep.subr.bf16.mxu1 %v7320_v8  ;;  %v7411_v7 = vld [vmem:[%s10926_s1 + $0xfc4] ss:$8 sps:$4 sm:$0xff]   ;;  %v7406_v8 = vld [vmem:[%s10926_s1 + $0x3c0] ss:$8 sps:$4 sm:$0xff]  }
  0xb9   :  { %5615 = vmatprep.subr.bf16.mxu0 %v7323_v9  ;;  %v7409_v9 = vld [vmem:[%s10926_s1 + $0xfc0] ss:$8 sps:$4 sm:$0xff]  }
  0xbb   :  { %5124 = vmatpush1.bf16.msra.mxu1 %v7318_v10  ;;  %v7414_v10 = vld [vmem:[%s10926_s1 + $0x3d4] ss:$8 sps:$4 sm:$0xff]  }
  0xbc   :  { %5616 = vmatpush1.bf16.msra.mxu0 %v7321_v11  ;;  %5125 = vmatprep.subr.bf16.mxu1 %v7326_v12  ;;  %v7417_v11 = vld [vmem:[%s10926_s1 + $0xfd4] ss:$8 sps:$4 sm:$0xff]   ;;  %v7412_v12 = vld [vmem:[%s10926_s1 + $0x3d0] ss:$8 sps:$4 sm:$0xff]  }
  0xbd   :  { %5617 = vmatprep.subr.bf16.mxu0 %v7329_v13  ;;  %v7415_v13 = vld [vmem:[%s10926_s1 + $0xfd0] ss:$8 sps:$4 sm:$0xff]  }
  0xbf   :  { %5126 = vmatpush1.bf16.msra.mxu1 %v7324_v14  ;;  %v7420_v14 = vld [vmem:[%s10926_s1 + $0x3e4] ss:$8 sps:$4 sm:$0xff]  }
  0xc0   :  { %5618 = vmatpush1.bf16.msra.mxu0 %v7327_v15  ;;  %5136 = vmatprep.subr.bf16.mxu1 %v7334_v16  ;;  %v7423_v15 = vld [vmem:[%s10926_s1 + $0xfe4] ss:$8 sps:$4 sm:$0xff]   ;;  %v7418_v16 = vld [vmem:[%s10926_s1 + $0x3e0] ss:$8 sps:$4 sm:$0xff]  }
  0xc1   :  { %5628 = vmatprep.subr.bf16.mxu0 %v7339_v17  ;;  %v7421_v17 = vld [vmem:[%s10926_s1 + $0xfe0] ss:$8 sps:$4 sm:$0xff]  }
  0xc2   :  { %5128 = vmatmul.mubr.bf16.vlgmr.msra.gmra.mrb[0].mxu1 %v6093_v22  ;;  %v7424_v22 = vld [vmem:[%s10926_s1 + $0x3f0] ss:$8 sps:$4 sm:$0xff]  }
  0xc3   :  { %5620 = vmatmul.mubr.bf16.vlgmr.msra.gmra.mrb[0].mxu0 %v6117_v23  ;;  %5137 = vmatpush1.bf16.msra.mxu1 %v7332_v19  ;;  %v7426_v19 = vld [vmem:[%s10926_s1 + $0x3f4] ss:$8 sps:$4 sm:$0xff]   ;;  %v7427_v23 = vld [vmem:[%s10926_s1 + $0xff0] ss:$8 sps:$4 sm:$0xff]  }
  0xc4   :  { %5629 = vmatpush1.bf16.msra.mxu0 %v7337_v21  ;;  %5138 = vmatprep.subr.bf16.mxu1 %v7342_v26  ;;  %v7429_v21 = vld [vmem:[%s10926_s1 + $0xff4] ss:$8 sps:$4 sm:$0xff]   ;;  %v7434_v26 = vld [vmem:[%s10926_s1 + $0x404] ss:$8 sps:$4 sm:$0xff]  }
  0xc5   :  { %5630 = vmatprep.subr.bf16.mxu0 %v7345_v18  ;;  %5168 = vmatprep.mubr.bf16.mxu1 %v6096_v20  ;;  %v7439_v18 = vld [vmem:[%s10926_s1 + $0x1004] ss:$8 sps:$4 sm:$0xff]  }
  0xc6   :  { %5660 = vmatprep.mubr.bf16.mxu0 %v6120_v27  ;;  %v9137_v20 = vld [vmem:[%s10927_s0 + $0x20] sm:$0xff]  ;;  %v6095_v27 = vcombine.low %v8937_v24, %v8937_v24  ;;  %v7442_v24 = vld [vmem:[%s10926_s1 + $0x414] ss:$8 sps:$4 sm:$0xff]  }
  0xc7   :  { %5139 = vmatpush1.bf16.msra.mxu1 %v7340_v28  ;;  %v6119_v28 = vcombine.low %v8942_v25, %v8942_v25  ;;  %v7445_v25 = vld [vmem:[%s10926_s1 + $0x1014] ss:$8 sps:$4 sm:$0xff]  }
  0xc8   :  { %5631 = vmatpush1.bf16.msra.mxu0 %v7343_v29  ;;  %5140 = vmatprep.subr.bf16.mxu1 %v7348_v30  ;;  %v9146_v29 = vld [vmem:[%s10927_s0 + $0x80] sm:$0xff] }
  0xc9   :  { %5632 = vmatprep.subr.bf16.mxu0 %v7351_v31  ;;  %v7432_v30 = vld [vmem:[%s10926_s1 + $0x400] ss:$8 sps:$4 sm:$0xff]  }
  0xca   :  { %v7437_v31 = vld [vmem:[%s10926_s1 + $0x1000] ss:$8 sps:$4 sm:$0xff]  }
  0xcb   :  { %5141 = vmatpush1.bf16.msra.mxu1 %v7346_v32  ;;  %v6098_v32 = vcombine.high %v9137_v20, %v9137_v20 }
  0xcc   :  { %5633 = vmatpush1.bf16.msra.mxu0 %v7349_v33  ;;  %5142 = vmatprep.subr.bf16.mxu1 %v7354_v34  ;;  %v6122_v33 = vcombine.high %v9146_v29, %v9146_v29  ;;  %v7440_v34 = vld [vmem:[%s10926_s1 + $0x410] ss:$8 sps:$4 sm:$0xff]  }
  0xcd   :  { %5634 = vmatprep.subr.bf16.mxu0 %v7357_v35  ;;  %v7443_v35 = vld [vmem:[%s10926_s1 + $0x1010] ss:$8 sps:$4 sm:$0xff]  }
  0xcf   :  { %5143 = vmatpush1.bf16.msra.mxu1 %v7352_v36  ;;  %v7448_v36 = vld [vmem:[%s10926_s1 + $0x424] ss:$8 sps:$4 sm:$0xff]  }
  0xd0   :  { %5635 = vmatpush1.bf16.msra.mxu0 %v7355_v37  ;;  %5144 = vmatprep.subr.bf16.mxu1 %v7360_v38  ;;  %v7451_v37 = vld [vmem:[%s10926_s1 + $0x1024] ss:$8 sps:$4 sm:$0xff]   ;;  %v7446_v38 = vld [vmem:[%s10926_s1 + $0x420] ss:$8 sps:$4 sm:$0xff]  }
  0xd1   :  { %5636 = vmatprep.subr.bf16.mxu0 %v7363_v39  ;;  %v7449_v39 = vld [vmem:[%s10926_s1 + $0x1020] ss:$8 sps:$4 sm:$0xff]  }
  0xd3   :  { %5145 = vmatpush1.bf16.msra.mxu1 %v7358_v40  ;;  %v7454_v40 = vld [vmem:[%s10926_s1 + $0x434] ss:$8 sps:$4 sm:$0xff]  }
  0xd4   :  { %5637 = vmatpush1.bf16.msra.mxu0 %v7361_v41  ;;  %5146 = vmatprep.subr.bf16.mxu1 %v7366_v42  ;;  %v7457_v41 = vld [vmem:[%s10926_s1 + $0x1034] ss:$8 sps:$4 sm:$0xff]   ;;  %v7452_v42 = vld [vmem:[%s10926_s1 + $0x430] ss:$8 sps:$4 sm:$0xff]  }
  0xd5   :  { %5638 = vmatprep.subr.bf16.mxu0 %v7369_v43  ;;  %v7455_v43 = vld [vmem:[%s10926_s1 + $0x1030] ss:$8 sps:$4 sm:$0xff]  }
  0xd7   :  { %5147 = vmatpush1.bf16.msra.mxu1 %v7364_v44  ;;  %v7460_v44 = vld [vmem:[%s10926_s1 + $0x444] ss:$8 sps:$4 sm:$0xff]  }
  0xd8   :  { %5639 = vmatpush1.bf16.msra.mxu0 %v7367_v45  ;;  %5148 = vmatprep.subr.bf16.mxu1 %v7372_v46  ;;  %v7463_v45 = vld [vmem:[%s10926_s1 + $0x1044] ss:$8 sps:$4 sm:$0xff]   ;;  %v7458_v46 = vld [vmem:[%s10926_s1 + $0x440] ss:$8 sps:$4 sm:$0xff]  }
  0xd9   :  { %5640 = vmatprep.subr.bf16.mxu0 %v7375_v47  ;;  %v7461_v47 = vld [vmem:[%s10926_s1 + $0x1040] ss:$8 sps:$4 sm:$0xff]  }
  0xdb   :  { %5149 = vmatpush1.bf16.msra.mxu1 %v7370_v48  ;;  %v7466_v48 = vld [vmem:[%s10926_s1 + $0x454] ss:$8 sps:$4 sm:$0xff]  }
  0xdc   :  { %5641 = vmatpush1.bf16.msra.mxu0 %v7373_v49  ;;  %5150 = vmatprep.subr.bf16.mxu1 %v7378_v50  ;;  %v7469_v49 = vld [vmem:[%s10926_s1 + $0x1054] ss:$8 sps:$4 sm:$0xff]   ;;  %v7464_v50 = vld [vmem:[%s10926_s1 + $0x450] ss:$8 sps:$4 sm:$0xff]  }
  0xdd   :  { %5642 = vmatprep.subr.bf16.mxu0 %v7381_v51  ;;  %v7467_v51 = vld [vmem:[%s10926_s1 + $0x1050] ss:$8 sps:$4 sm:$0xff]  }
  0xdf   :  { %5151 = vmatpush1.bf16.msra.mxu1 %v7376_v52  ;;  %v7472_v52 = vld [vmem:[%s10926_s1 + $0x464] ss:$8 sps:$4 sm:$0xff]  }
  0xe0   :  { %5643 = vmatpush1.bf16.msra.mxu0 %v7379_v53  ;;  %5152 = vmatprep.subr.bf16.mxu1 %v7384_v54  ;;  %v7475_v53 = vld [vmem:[%s10926_s1 + $0x1064] ss:$8 sps:$4 sm:$0xff]   ;;  %v7470_v54 = vld [vmem:[%s10926_s1 + $0x460] ss:$8 sps:$4 sm:$0xff]  }
  0xe1   :  { %5644 = vmatprep.subr.bf16.mxu0 %v7387_v55  ;;  %v7473_v55 = vld [vmem:[%s10926_s1 + $0x1060] ss:$8 sps:$4 sm:$0xff]  }
  0xe3   :  { %5153 = vmatpush1.bf16.msra.mxu1 %v7382_v56  ;;  %v7478_v56 = vld [vmem:[%s10926_s1 + $0x474] ss:$8 sps:$4 sm:$0xff]  }
  0xe4   :  { %5645 = vmatpush1.bf16.msra.mxu0 %v7385_v57  ;;  %5154 = vmatprep.subr.bf16.mxu1 %v7390_v58  ;;  %v7481_v57 = vld [vmem:[%s10926_s1 + $0x1074] ss:$8 sps:$4 sm:$0xff]   ;;  %v7476_v58 = vld [vmem:[%s10926_s1 + $0x470] ss:$8 sps:$4 sm:$0xff]  }
  0xe5   :  { %5646 = vmatprep.subr.bf16.mxu0 %v7393_v59  ;;  %v7479_v59 = vld [vmem:[%s10926_s1 + $0x1070] ss:$8 sps:$4 sm:$0xff]  }
  0xe7   :  { %5155 = vmatpush1.bf16.msra.mxu1 %v7388_v60  ;;  %v7484_v60 = vld [vmem:[%s10926_s1 + $0x484] ss:$8 sps:$4 sm:$0xff]  }
  0xe8   :  { %5647 = vmatpush1.bf16.msra.mxu0 %v7391_v61  ;;  %5156 = vmatprep.subr.bf16.mxu1 %v7396_v62  ;;  %v7487_v61 = vld [vmem:[%s10926_s1 + $0x1084] ss:$8 sps:$4 sm:$0xff]   ;;  %v7482_v62 = vld [vmem:[%s10926_s1 + $0x480] ss:$8 sps:$4 sm:$0xff]  }
  0xe9   :  { %5648 = vmatprep.subr.bf16.mxu0 %v7399_v63  ;;  %v7485_v63 = vld [vmem:[%s10926_s1 + $0x1080] ss:$8 sps:$4 sm:$0xff]  }
  0xeb   :  { %5157 = vmatpush1.bf16.msra.mxu1 %v7394_v0  ;;  %v7490_v0 = vld [vmem:[%s10926_s1 + $0x494] ss:$8 sps:$4 sm:$0xff]  }
  0xec   :  { %5649 = vmatpush1.bf16.msra.mxu0 %v7397_v1  ;;  %5158 = vmatprep.subr.bf16.mxu1 %v7402_v2  ;;  %v7493_v1 = vld [vmem:[%s10926_s1 + $0x1094] ss:$8 sps:$4 sm:$0xff]   ;;  %v7488_v2 = vld [vmem:[%s10926_s1 + $0x490] ss:$8 sps:$4 sm:$0xff]  }
  0xed   :  { %5650 = vmatprep.subr.bf16.mxu0 %v7405_v3  ;;  %v7491_v3 = vld [vmem:[%s10926_s1 + $0x1090] ss:$8 sps:$4 sm:$0xff]  }
  0xef   :  { %5159 = vmatpush1.bf16.msra.mxu1 %v7400_v4  ;;  %v7496_v4 = vld [vmem:[%s10926_s1 + $0x4a4] ss:$8 sps:$4 sm:$0xff]  }
  0xf0   :  { %5651 = vmatpush1.bf16.msra.mxu0 %v7403_v5  ;;  %5160 = vmatprep.subr.bf16.mxu1 %v7408_v6  ;;  %v7499_v5 = vld [vmem:[%s10926_s1 + $0x10a4] ss:$8 sps:$4 sm:$0xff]   ;;  %v7494_v6 = vld [vmem:[%s10926_s1 + $0x4a0] ss:$8 sps:$4 sm:$0xff]  }
  0xf1   :  { %5652 = vmatprep.subr.bf16.mxu0 %v7411_v7  ;;  %v7497_v7 = vld [vmem:[%s10926_s1 + $0x10a0] ss:$8 sps:$4 sm:$0xff]  }
  0xf3   :  { %5161 = vmatpush1.bf16.msra.mxu1 %v7406_v8  ;;  %v7502_v8 = vld [vmem:[%s10926_s1 + $0x4b4] ss:$8 sps:$4 sm:$0xff]  }
  0xf4   :  { %5653 = vmatpush1.bf16.msra.mxu0 %v7409_v9  ;;  %5162 = vmatprep.subr.bf16.mxu1 %v7414_v10  ;;  %v7505_v9 = vld [vmem:[%s10926_s1 + $0x10b4] ss:$8 sps:$4 sm:$0xff]   ;;  %v7500_v10 = vld [vmem:[%s10926_s1 + $0x4b0] ss:$8 sps:$4 sm:$0xff]  }
  0xf5   :  { %5654 = vmatprep.subr.bf16.mxu0 %v7417_v11  ;;  %v7503_v11 = vld [vmem:[%s10926_s1 + $0x10b0] ss:$8 sps:$4 sm:$0xff]  }
  0xf7   :  { %5163 = vmatpush1.bf16.msra.mxu1 %v7412_v12  ;;  %v7508_v12 = vld [vmem:[%s10926_s1 + $0x4c4] ss:$8 sps:$4 sm:$0xff]  }
  0xf8   :  { %5655 = vmatpush1.bf16.msra.mxu0 %v7415_v13  ;;  %5164 = vmatprep.subr.bf16.mxu1 %v7420_v14  ;;  %v7511_v13 = vld [vmem:[%s10926_s1 + $0x10c4] ss:$8 sps:$4 sm:$0xff]   ;;  %v7506_v14 = vld [vmem:[%s10926_s1 + $0x4c0] ss:$8 sps:$4 sm:$0xff]  }
  0xf9   :  { %5656 = vmatprep.subr.bf16.mxu0 %v7423_v15  ;;  %v7509_v15 = vld [vmem:[%s10926_s1 + $0x10c0] ss:$8 sps:$4 sm:$0xff]  }
  0xfb   :  { %5165 = vmatpush1.bf16.msra.mxu1 %v7418_v16  ;;  %v7514_v16 = vld [vmem:[%s10926_s1 + $0x4d4] ss:$8 sps:$4 sm:$0xff]  }
  0xfc   :  { %5657 = vmatpush1.bf16.msra.mxu0 %v7421_v17  ;;  %5166 = vmatprep.subr.bf16.mxu1 %v7426_v19  ;;  %v7517_v17 = vld [vmem:[%s10926_s1 + $0x10d4] ss:$8 sps:$4 sm:$0xff]   ;;  %v7512_v19 = vld [vmem:[%s10926_s1 + $0x4d0] ss:$8 sps:$4 sm:$0xff]  }
  0xfd   :  { %5658 = vmatprep.subr.bf16.mxu0 %v7429_v21  ;;  %v7515_v21 = vld [vmem:[%s10926_s1 + $0x10d0] ss:$8 sps:$4 sm:$0xff]  }
  0xff   :  { %5167 = vmatpush1.bf16.msra.mxu1 %v7424_v22  ;;  %v7520_v22 = vld [vmem:[%s10926_s1 + $0x4e4] ss:$8 sps:$4 sm:$0xff]  }
 0x100   :  { %5659 = vmatpush1.bf16.msra.mxu0 %v7427_v23  ;;  %5177 = vmatprep.subr.bf16.mxu1 %v7434_v26  ;;  %v7523_v23 = vld [vmem:[%s10926_s1 + $0x10e4] ss:$8 sps:$4 sm:$0xff]   ;;  %v7518_v26 = vld [vmem:[%s10926_s1 + $0x4e0] ss:$8 sps:$4 sm:$0xff]  }
 0x101   :  { %5669 = vmatprep.subr.bf16.mxu0 %v7439_v18  ;;  %v7521_v18 = vld [vmem:[%s10926_s1 + $0x10e0] ss:$8 sps:$4 sm:$0xff]  }
 0x102   :  { %5169 = vmatmul.mubr.bf16.vlgmr.msra.gmra.mrb[0].mxu1 %v6095_v27  ;;  %v7526_v27 = vld [vmem:[%s10926_s1 + $0x4f4] ss:$8 sps:$4 sm:$0xff]  }
 0x103   :  { %5661 = vmatmul.mubr.bf16.vlgmr.msra.gmra.mrb[0].mxu0 %v6119_v28  ;;  %5178 = vmatpush1.bf16.msra.mxu1 %v7432_v30  ;;  %v7529_v28 = vld [vmem:[%s10926_s1 + $0x10f4] ss:$8 sps:$4 sm:$0xff]   ;;  %v7524_v30 = vld [vmem:[%s10926_s1 + $0x4f0] ss:$8 sps:$4 sm:$0xff]  }
 0x104   :  { %5670 = vmatpush1.bf16.msra.mxu0 %v7437_v31  ;;  %5179 = vmatprep.subr.bf16.mxu1 %v7442_v24  ;;  %v7527_v31 = vld [vmem:[%s10926_s1 + $0x10f0] ss:$8 sps:$4 sm:$0xff]   ;;  %v7534_v24 = vld [vmem:[%s10926_s1 + $0x504] ss:$8 sps:$4 sm:$0xff]  }
 0x105   :  { %5671 = vmatprep.subr.bf16.mxu0 %v7445_v25  ;;  %5209 = vmatprep.mubr.bf16.mxu1 %v6098_v32  ;;  %v7539_v25 = vld [vmem:[%s10926_s1 + $0x1104] ss:$8 sps:$4 sm:$0xff]  }
 0x106   :  { %5701 = vmatprep.mubr.bf16.mxu0 %v6122_v33  ;;  %v9347_v32 = vld [vmem:[%s10927_s0 + $0x28] sm:$0xff] }
 0x107   :  { %5180 = vmatpush1.bf16.msra.mxu1 %v7440_v34  ;;  %v9352_v33 = vld [vmem:[%s10927_s0 + $0x88] sm:$0xff]  ;;  %v6097_v34 = vcombine.low %v9137_v20, %v9137_v20  ;;  %v7545_v20 = vld [vmem:[%s10926_s1 + $0x1114] ss:$8 sps:$4 sm:$0xff]  }
 0x108   :  { %5672 = vmatpush1.bf16.msra.mxu0 %v7443_v35  ;;  %5181 = vmatprep.subr.bf16.mxu1 %v7448_v36  ;;  %v6121_v35 = vcombine.low %v9146_v29, %v9146_v29  ;;  %v7532_v36 = vld [vmem:[%s10926_s1 + $0x500] ss:$8 sps:$4 sm:$0xff]   ;;  %v6100_v29 = vcombine.high %v9347_v32, %v9347_v32 }
 0x109   :  { %5673 = vmatprep.subr.bf16.mxu0 %v7451_v37  ;;  %v7537_v37 = vld [vmem:[%s10926_s1 + $0x1100] ss:$8 sps:$4 sm:$0xff]  }
 0x10b   :  { %5182 = vmatpush1.bf16.msra.mxu1 %v7446_v38  ;;  %v7542_v38 = vld [vmem:[%s10926_s1 + $0x514] ss:$8 sps:$4 sm:$0xff]  }
 0x10c   :  { %5674 = vmatpush1.bf16.msra.mxu0 %v7449_v39  ;;  %5183 = vmatprep.subr.bf16.mxu1 %v7454_v40  ;;  %v6124_v39 = vcombine.high %v9352_v33, %v9352_v33  ;;  %v7540_v40 = vld [vmem:[%s10926_s1 + $0x510] ss:$8 sps:$4 sm:$0xff]  }
 0x10d   :  { %5675 = vmatprep.subr.bf16.mxu0 %v7457_v41  ;;  %v7543_v41 = vld [vmem:[%s10926_s1 + $0x1110] ss:$8 sps:$4 sm:$0xff]  }
 0x10f   :  { %5184 = vmatpush1.bf16.msra.mxu1 %v7452_v42  ;;  %v7548_v42 = vld [vmem:[%s10926_s1 + $0x524] ss:$8 sps:$4 sm:$0xff]  }
 0x110   :  { %5676 = vmatpush1.bf16.msra.mxu0 %v7455_v43  ;;  %5185 = vmatprep.subr.bf16.mxu1 %v7460_v44  ;;  %v7551_v43 = vld [vmem:[%s10926_s1 + $0x1124] ss:$8 sps:$4 sm:$0xff]   ;;  %v7546_v44 = vld [vmem:[%s10926_s1 + $0x520] ss:$8 sps:$4 sm:$0xff]  }
 0x111   :  { %5677 = vmatprep.subr.bf16.mxu0 %v7463_v45  ;;  %v7549_v45 = vld [vmem:[%s10926_s1 + $0x1120] ss:$8 sps:$4 sm:$0xff]  }
 0x113   :  { %5186 = vmatpush1.bf16.msra.mxu1 %v7458_v46  ;;  %v7554_v46 = vld [vmem:[%s10926_s1 + $0x534] ss:$8 sps:$4 sm:$0xff]  }
 0x114   :  { %5678 = vmatpush1.bf16.msra.mxu0 %v7461_v47  ;;  %5187 = vmatprep.subr.bf16.mxu1 %v7466_v48  ;;  %v7557_v47 = vld [vmem:[%s10926_s1 + $0x1134] ss:$8 sps:$4 sm:$0xff]   ;;  %v7552_v48 = vld [vmem:[%s10926_s1 + $0x530] ss:$8 sps:$4 sm:$0xff]  }
 0x115   :  { %5679 = vmatprep.subr.bf16.mxu0 %v7469_v49  ;;  %v7555_v49 = vld [vmem:[%s10926_s1 + $0x1130] ss:$8 sps:$4 sm:$0xff]  }
 0x117   :  { %5188 = vmatpush1.bf16.msra.mxu1 %v7464_v50  ;;  %v7560_v50 = vld [vmem:[%s10926_s1 + $0x544] ss:$8 sps:$4 sm:$0xff]  }
 0x118   :  { %5680 = vmatpush1.bf16.msra.mxu0 %v7467_v51  ;;  %5189 = vmatprep.subr.bf16.mxu1 %v7472_v52  ;;  %v7563_v51 = vld [vmem:[%s10926_s1 + $0x1144] ss:$8 sps:$4 sm:$0xff]   ;;  %v7558_v52 = vld [vmem:[%s10926_s1 + $0x540] ss:$8 sps:$4 sm:$0xff]  }
 0x119   :  { %5681 = vmatprep.subr.bf16.mxu0 %v7475_v53  ;;  %v7561_v53 = vld [vmem:[%s10926_s1 + $0x1140] ss:$8 sps:$4 sm:$0xff]  }
 0x11b   :  { %5190 = vmatpush1.bf16.msra.mxu1 %v7470_v54  ;;  %v7566_v54 = vld [vmem:[%s10926_s1 + $0x554] ss:$8 sps:$4 sm:$0xff]  }
 0x11c   :  { %5682 = vmatpush1.bf16.msra.mxu0 %v7473_v55  ;;  %5191 = vmatprep.subr.bf16.mxu1 %v7478_v56  ;;  %v7569_v55 = vld [vmem:[%s10926_s1 + $0x1154] ss:$8 sps:$4 sm:$0xff]   ;;  %v7564_v56 = vld [vmem:[%s10926_s1 + $0x550] ss:$8 sps:$4 sm:$0xff]  }
 0x11d   :  { %5683 = vmatprep.subr.bf16.mxu0 %v7481_v57  ;;  %v7567_v57 = vld [vmem:[%s10926_s1 + $0x1150] ss:$8 sps:$4 sm:$0xff]  }
 0x11f   :  { %5192 = vmatpush1.bf16.msra.mxu1 %v7476_v58  ;;  %v7572_v58 = vld [vmem:[%s10926_s1 + $0x564] ss:$8 sps:$4 sm:$0xff]  }
 0x120   :  { %5684 = vmatpush1.bf16.msra.mxu0 %v7479_v59  ;;  %5193 = vmatprep.subr.bf16.mxu1 %v7484_v60  ;;  %v7575_v59 = vld [vmem:[%s10926_s1 + $0x1164] ss:$8 sps:$4 sm:$0xff]   ;;  %v7570_v60 = vld [vmem:[%s10926_s1 + $0x560] ss:$8 sps:$4 sm:$0xff]  }
 0x121   :  { %5685 = vmatprep.subr.bf16.mxu0 %v7487_v61  ;;  %v7573_v61 = vld [vmem:[%s10926_s1 + $0x1160] ss:$8 sps:$4 sm:$0xff]  }
 0x123   :  { %5194 = vmatpush1.bf16.msra.mxu1 %v7482_v62  ;;  %v7578_v62 = vld [vmem:[%s10926_s1 + $0x574] ss:$8 sps:$4 sm:$0xff]  }
 0x124   :  { %5686 = vmatpush1.bf16.msra.mxu0 %v7485_v63  ;;  %5195 = vmatprep.subr.bf16.mxu1 %v7490_v0  ;;  %v7581_v63 = vld [vmem:[%s10926_s1 + $0x1174] ss:$8 sps:$4 sm:$0xff]   ;;  %v7576_v0 = vld [vmem:[%s10926_s1 + $0x570] ss:$8 sps:$4 sm:$0xff]  }
 0x125   :  { %5687 = vmatprep.subr.bf16.mxu0 %v7493_v1  ;;  %v7579_v1 = vld [vmem:[%s10926_s1 + $0x1170] ss:$8 sps:$4 sm:$0xff]  }
 0x127   :  { %5196 = vmatpush1.bf16.msra.mxu1 %v7488_v2  ;;  %v7584_v2 = vld [vmem:[%s10926_s1 + $0x584] ss:$8 sps:$4 sm:$0xff]  }
 0x128   :  { %5688 = vmatpush1.bf16.msra.mxu0 %v7491_v3  ;;  %5197 = vmatprep.subr.bf16.mxu1 %v7496_v4  ;;  %v7587_v3 = vld [vmem:[%s10926_s1 + $0x1184] ss:$8 sps:$4 sm:$0xff]   ;;  %v7582_v4 = vld [vmem:[%s10926_s1 + $0x580] ss:$8 sps:$4 sm:$0xff]  }
 0x129   :  { %5689 = vmatprep.subr.bf16.mxu0 %v7499_v5  ;;  %v7585_v5 = vld [vmem:[%s10926_s1 + $0x1180] ss:$8 sps:$4 sm:$0xff]  }
 0x12b   :  { %5198 = vmatpush1.bf16.msra.mxu1 %v7494_v6  ;;  %v7590_v6 = vld [vmem:[%s10926_s1 + $0x594] ss:$8 sps:$4 sm:$0xff]  }
 0x12c   :  { %5690 = vmatpush1.bf16.msra.mxu0 %v7497_v7  ;;  %5199 = vmatprep.subr.bf16.mxu1 %v7502_v8  ;;  %v7593_v7 = vld [vmem:[%s10926_s1 + $0x1194] ss:$8 sps:$4 sm:$0xff]   ;;  %v7588_v8 = vld [vmem:[%s10926_s1 + $0x590] ss:$8 sps:$4 sm:$0xff]  }
 0x12d   :  { %5691 = vmatprep.subr.bf16.mxu0 %v7505_v9  ;;  %v7591_v9 = vld [vmem:[%s10926_s1 + $0x1190] ss:$8 sps:$4 sm:$0xff]  }
 0x12f   :  { %5200 = vmatpush1.bf16.msra.mxu1 %v7500_v10  ;;  %v7596_v10 = vld [vmem:[%s10926_s1 + $0x5a4] ss:$8 sps:$4 sm:$0xff]  }
 0x130   :  { %5692 = vmatpush1.bf16.msra.mxu0 %v7503_v11  ;;  %5201 = vmatprep.subr.bf16.mxu1 %v7508_v12  ;;  %v7599_v11 = vld [vmem:[%s10926_s1 + $0x11a4] ss:$8 sps:$4 sm:$0xff]   ;;  %v7594_v12 = vld [vmem:[%s10926_s1 + $0x5a0] ss:$8 sps:$4 sm:$0xff]  }
 0x131   :  { %5693 = vmatprep.subr.bf16.mxu0 %v7511_v13  ;;  %v7597_v13 = vld [vmem:[%s10926_s1 + $0x11a0] ss:$8 sps:$4 sm:$0xff]  }
 0x133   :  { %5202 = vmatpush1.bf16.msra.mxu1 %v7506_v14  ;;  %v7602_v14 = vld [vmem:[%s10926_s1 + $0x5b4] ss:$8 sps:$4 sm:$0xff]  }
 0x134   :  { %5694 = vmatpush1.bf16.msra.mxu0 %v7509_v15  ;;  %5203 = vmatprep.subr.bf16.mxu1 %v7514_v16  ;;  %v7605_v15 = vld [vmem:[%s10926_s1 + $0x11b4] ss:$8 sps:$4 sm:$0xff]   ;;  %v7600_v16 = vld [vmem:[%s10926_s1 + $0x5b0] ss:$8 sps:$4 sm:$0xff]  }
 0x135   :  { %5695 = vmatprep.subr.bf16.mxu0 %v7517_v17  ;;  %v7603_v17 = vld [vmem:[%s10926_s1 + $0x11b0] ss:$8 sps:$4 sm:$0xff]  }
 0x137   :  { %5204 = vmatpush1.bf16.msra.mxu1 %v7512_v19  ;;  %v7608_v19 = vld [vmem:[%s10926_s1 + $0x5c4] ss:$8 sps:$4 sm:$0xff]  }
 0x138   :  { %5696 = vmatpush1.bf16.msra.mxu0 %v7515_v21  ;;  %5205 = vmatprep.subr.bf16.mxu1 %v7520_v22  ;;  %v7611_v21 = vld [vmem:[%s10926_s1 + $0x11c4] ss:$8 sps:$4 sm:$0xff]   ;;  %v7606_v22 = vld [vmem:[%s10926_s1 + $0x5c0] ss:$8 sps:$4 sm:$0xff]  }
 0x139   :  { %5697 = vmatprep.subr.bf16.mxu0 %v7523_v23  ;;  %v7609_v23 = vld [vmem:[%s10926_s1 + $0x11c0] ss:$8 sps:$4 sm:$0xff]  }
 0x13b   :  { %5206 = vmatpush1.bf16.msra.mxu1 %v7518_v26  ;;  %v7614_v26 = vld [vmem:[%s10926_s1 + $0x5d4] ss:$8 sps:$4 sm:$0xff]  }
 0x13c   :  { %5698 = vmatpush1.bf16.msra.mxu0 %v7521_v18  ;;  %5207 = vmatprep.subr.bf16.mxu1 %v7526_v27  ;;  %v7617_v18 = vld [vmem:[%s10926_s1 + $0x11d4] ss:$8 sps:$4 sm:$0xff]   ;;  %v7612_v27 = vld [vmem:[%s10926_s1 + $0x5d0] ss:$8 sps:$4 sm:$0xff]  }
 0x13d   :  { %5699 = vmatprep.subr.bf16.mxu0 %v7529_v28  ;;  %v7615_v28 = vld [vmem:[%s10926_s1 + $0x11d0] ss:$8 sps:$4 sm:$0xff]  }
 0x13f   :  { %5208 = vmatpush1.bf16.msra.mxu1 %v7524_v30  ;;  %v7620_v30 = vld [vmem:[%s10926_s1 + $0x5e4] ss:$8 sps:$4 sm:$0xff]  }
 0x140   :  { %5700 = vmatpush1.bf16.msra.mxu0 %v7527_v31  ;;  %5218 = vmatprep.subr.bf16.mxu1 %v7534_v24  ;;  %v7623_v31 = vld [vmem:[%s10926_s1 + $0x11e4] ss:$8 sps:$4 sm:$0xff]   ;;  %v7618_v24 = vld [vmem:[%s10926_s1 + $0x5e0] ss:$8 sps:$4 sm:$0xff]  }
 0x141   :  { %5710 = vmatprep.subr.bf16.mxu0 %v7539_v25  ;;  %v7621_v25 = vld [vmem:[%s10926_s1 + $0x11e0] ss:$8 sps:$4 sm:$0xff]  }
 0x142   :  { %5210 = vmatmul.mubr.bf16.vlgmr.msra.gmra.mrb[0].mxu1 %v6097_v34  ;;  %v7626_v34 = vld [vmem:[%s10926_s1 + $0x5f4] ss:$8 sps:$4 sm:$0xff]  }
 0x143   :  { %5702 = vmatmul.mubr.bf16.vlgmr.msra.gmra.mrb[0].mxu0 %v6121_v35  ;;  %5219 = vmatpush1.bf16.msra.mxu1 %v7532_v36  ;;  %v7629_v35 = vld [vmem:[%s10926_s1 + $0x11f4] ss:$8 sps:$4 sm:$0xff]   ;;  %v7624_v36 = vld [vmem:[%s10926_s1 + $0x5f0] ss:$8 sps:$4 sm:$0xff]  }
 0x144   :  { %5711 = vmatpush1.bf16.msra.mxu0 %v7537_v37  ;;  %5220 = vmatprep.subr.bf16.mxu1 %v7542_v38  ;;  %v7627_v37 = vld [vmem:[%s10926_s1 + $0x11f0] ss:$8 sps:$4 sm:$0xff]   ;;  %v7634_v38 = vld [vmem:[%s10926_s1 + $0x604] ss:$8 sps:$4 sm:$0xff]  }
 0x145   :  { %5712 = vmatprep.subr.bf16.mxu0 %v7545_v20  ;;  %5250 = vmatprep.mubr.bf16.mxu1 %v6100_v29  ;;  %v7639_v20 = vld [vmem:[%s10926_s1 + $0x1204] ss:$8 sps:$4 sm:$0xff]   ;;  %v9557_v29 = vld [vmem:[%s10927_s0 + $0x30] sm:$0xff] }
 0x146   :  { %5742 = vmatprep.mubr.bf16.mxu0 %v6124_v39  ;;  %v9562_v39 = vld [vmem:[%s10927_s0 + $0x90] sm:$0xff] }
 0x147   :  { %5221 = vmatpush1.bf16.msra.mxu1 %v7540_v40  ;;  %v6099_v40 = vcombine.low %v9347_v32, %v9347_v32  ;;  %v7645_v32 = vld [vmem:[%s10926_s1 + $0x1214] ss:$8 sps:$4 sm:$0xff]  }
 0x148   :  { %5713 = vmatpush1.bf16.msra.mxu0 %v7543_v41  ;;  %5222 = vmatprep.subr.bf16.mxu1 %v7548_v42  ;;  %v6123_v41 = vcombine.low %v9352_v33, %v9352_v33  ;;  %v7632_v42 = vld [vmem:[%s10926_s1 + $0x600] ss:$8 sps:$4 sm:$0xff]   ;;  %v6102_v33 = vcombine.high %v9557_v29, %v9557_v29 }
 0x149   :  { %5714 = vmatprep.subr.bf16.mxu0 %v7551_v43  ;;  %v7637_v43 = vld [vmem:[%s10926_s1 + $0x1200] ss:$8 sps:$4 sm:$0xff]  }
 0x14b   :  { %5223 = vmatpush1.bf16.msra.mxu1 %v7546_v44  ;;  %v7642_v44 = vld [vmem:[%s10926_s1 + $0x614] ss:$8 sps:$4 sm:$0xff]  }
 0x14c   :  { %5715 = vmatpush1.bf16.msra.mxu0 %v7549_v45  ;;  %5224 = vmatprep.subr.bf16.mxu1 %v7554_v46  ;;  %v6126_v45 = vcombine.high %v9562_v39, %v9562_v39  ;;  %v7640_v46 = vld [vmem:[%s10926_s1 + $0x610] ss:$8 sps:$4 sm:$0xff]  }
 0x14d   :  { %5716 = vmatprep.subr.bf16.mxu0 %v7557_v47  ;;  %v7643_v47 = vld [vmem:[%s10926_s1 + $0x1210] ss:$8 sps:$4 sm:$0xff]  }
 0x14f   :  { %5225 = vmatpush1.bf16.msra.mxu1 %v7552_v48  ;;  %v7648_v48 = vld [vmem:[%s10926_s1 + $0x624] ss:$8 sps:$4 sm:$0xff]  }
 0x150   :  { %5717 = vmatpush1.bf16.msra.mxu0 %v7555_v49  ;;  %5226 = vmatprep.subr.bf16.mxu1 %v7560_v50  ;;  %v7651_v49 = vld [vmem:[%s10926_s1 + $0x1224] ss:$8 sps:$4 sm:$0xff]   ;;  %v7646_v50 = vld [vmem:[%s10926_s1 + $0x620] ss:$8 sps:$4 sm:$0xff]  }
 0x151   :  { %5718 = vmatprep.subr.bf16.mxu0 %v7563_v51  ;;  %v7649_v51 = vld [vmem:[%s10926_s1 + $0x1220] ss:$8 sps:$4 sm:$0xff]  }
 0x153   :  { %5227 = vmatpush1.bf16.msra.mxu1 %v7558_v52  ;;  %v7654_v52 = vld [vmem:[%s10926_s1 + $0x634] ss:$8 sps:$4 sm:$0xff]  }
 0x154   :  { %5719 = vmatpush1.bf16.msra.mxu0 %v7561_v53  ;;  %5228 = vmatprep.subr.bf16.mxu1 %v7566_v54  ;;  %v7657_v53 = vld [vmem:[%s10926_s1 + $0x1234] ss:$8 sps:$4 sm:$0xff]   ;;  %v7652_v54 = vld [vmem:[%s10926_s1 + $0x630] ss:$8 sps:$4 sm:$0xff]  }
 0x155   :  { %5720 = vmatprep.subr.bf16.mxu0 %v7569_v55  ;;  %v7655_v55 = vld [vmem:[%s10926_s1 + $0x1230] ss:$8 sps:$4 sm:$0xff]  }
 0x157   :  { %5229 = vmatpush1.bf16.msra.mxu1 %v7564_v56  ;;  %v7660_v56 = vld [vmem:[%s10926_s1 + $0x644] ss:$8 sps:$4 sm:$0xff]  }
 0x158   :  { %5721 = vmatpush1.bf16.msra.mxu0 %v7567_v57  ;;  %5230 = vmatprep.subr.bf16.mxu1 %v7572_v58  ;;  %v7663_v57 = vld [vmem:[%s10926_s1 + $0x1244] ss:$8 sps:$4 sm:$0xff]   ;;  %v7658_v58 = vld [vmem:[%s10926_s1 + $0x640] ss:$8 sps:$4 sm:$0xff]  }
 0x159   :  { %5722 = vmatprep.subr.bf16.mxu0 %v7575_v59  ;;  %v7661_v59 = vld [vmem:[%s10926_s1 + $0x1240] ss:$8 sps:$4 sm:$0xff]  }
 0x15b   :  { %5231 = vmatpush1.bf16.msra.mxu1 %v7570_v60  ;;  %v7666_v60 = vld [vmem:[%s10926_s1 + $0x654] ss:$8 sps:$4 sm:$0xff]  }
 0x15c   :  { %5723 = vmatpush1.bf16.msra.mxu0 %v7573_v61  ;;  %5232 = vmatprep.subr.bf16.mxu1 %v7578_v62  ;;  %v7669_v61 = vld [vmem:[%s10926_s1 + $0x1254] ss:$8 sps:$4 sm:$0xff]   ;;  %v7664_v62 = vld [vmem:[%s10926_s1 + $0x650] ss:$8 sps:$4 sm:$0xff]  }
 0x15d   :  { %5724 = vmatprep.subr.bf16.mxu0 %v7581_v63  ;;  %v7667_v63 = vld [vmem:[%s10926_s1 + $0x1250] ss:$8 sps:$4 sm:$0xff]  }
 0x15f   :  { %5233 = vmatpush1.bf16.msra.mxu1 %v7576_v0  ;;  %v7672_v0 = vld [vmem:[%s10926_s1 + $0x664] ss:$8 sps:$4 sm:$0xff]  }
 0x160   :  { %5725 = vmatpush1.bf16.msra.mxu0 %v7579_v1  ;;  %5234 = vmatprep.subr.bf16.mxu1 %v7584_v2  ;;  %v7675_v1 = vld [vmem:[%s10926_s1 + $0x1264] ss:$8 sps:$4 sm:$0xff]   ;;  %v7670_v2 = vld [vmem:[%s10926_s1 + $0x660] ss:$8 sps:$4 sm:$0xff]  }
 0x161   :  { %5726 = vmatprep.subr.bf16.mxu0 %v7587_v3  ;;  %v7673_v3 = vld [vmem:[%s10926_s1 + $0x1260] ss:$8 sps:$4 sm:$0xff]  }
 0x163   :  { %5235 = vmatpush1.bf16.msra.mxu1 %v7582_v4  ;;  %v7678_v4 = vld [vmem:[%s10926_s1 + $0x674] ss:$8 sps:$4 sm:$0xff]  }
 0x164   :  { %5727 = vmatpush1.bf16.msra.mxu0 %v7585_v5  ;;  %5236 = vmatprep.subr.bf16.mxu1 %v7590_v6  ;;  %v7681_v5 = vld [vmem:[%s10926_s1 + $0x1274] ss:$8 sps:$4 sm:$0xff]   ;;  %v7676_v6 = vld [vmem:[%s10926_s1 + $0x670] ss:$8 sps:$4 sm:$0xff]  }
 0x165   :  { %5728 = vmatprep.subr.bf16.mxu0 %v7593_v7  ;;  %v7679_v7 = vld [vmem:[%s10926_s1 + $0x1270] ss:$8 sps:$4 sm:$0xff]  }
 0x167   :  { %5237 = vmatpush1.bf16.msra.mxu1 %v7588_v8  ;;  %v7684_v8 = vld [vmem:[%s10926_s1 + $0x684] ss:$8 sps:$4 sm:$0xff]  }
 0x168   :  { %5729 = vmatpush1.bf16.msra.mxu0 %v7591_v9  ;;  %5238 = vmatprep.subr.bf16.mxu1 %v7596_v10  ;;  %v7687_v9 = vld [vmem:[%s10926_s1 + $0x1284] ss:$8 sps:$4 sm:$0xff]   ;;  %v7682_v10 = vld [vmem:[%s10926_s1 + $0x680] ss:$8 sps:$4 sm:$0xff]  }
 0x169   :  { %5730 = vmatprep.subr.bf16.mxu0 %v7599_v11  ;;  %v7685_v11 = vld [vmem:[%s10926_s1 + $0x1280] ss:$8 sps:$4 sm:$0xff]  }
 0x16b   :  { %5239 = vmatpush1.bf16.msra.mxu1 %v7594_v12  ;;  %v7690_v12 = vld [vmem:[%s10926_s1 + $0x694] ss:$8 sps:$4 sm:$0xff]  }
 0x16c   :  { %5731 = vmatpush1.bf16.msra.mxu0 %v7597_v13  ;;  %5240 = vmatprep.subr.bf16.mxu1 %v7602_v14  ;;  %v7693_v13 = vld [vmem:[%s10926_s1 + $0x1294] ss:$8 sps:$4 sm:$0xff]   ;;  %v7688_v14 = vld [vmem:[%s10926_s1 + $0x690] ss:$8 sps:$4 sm:$0xff]  }
 0x16d   :  { %5732 = vmatprep.subr.bf16.mxu0 %v7605_v15  ;;  %v7691_v15 = vld [vmem:[%s10926_s1 + $0x1290] ss:$8 sps:$4 sm:$0xff]  }
 0x16f   :  { %5241 = vmatpush1.bf16.msra.mxu1 %v7600_v16  ;;  %v7696_v16 = vld [vmem:[%s10926_s1 + $0x6a4] ss:$8 sps:$4 sm:$0xff]  }
 0x170   :  { %5733 = vmatpush1.bf16.msra.mxu0 %v7603_v17  ;;  %5242 = vmatprep.subr.bf16.mxu1 %v7608_v19  ;;  %v7699_v17 = vld [vmem:[%s10926_s1 + $0x12a4] ss:$8 sps:$4 sm:$0xff]   ;;  %v7694_v19 = vld [vmem:[%s10926_s1 + $0x6a0] ss:$8 sps:$4 sm:$0xff]  }
 0x171   :  { %5734 = vmatprep.subr.bf16.mxu0 %v7611_v21  ;;  %v7697_v21 = vld [vmem:[%s10926_s1 + $0x12a0] ss:$8 sps:$4 sm:$0xff]  }
 0x173   :  { %5243 = vmatpush1.bf16.msra.mxu1 %v7606_v22  ;;  %v7702_v22 = vld [vmem:[%s10926_s1 + $0x6b4] ss:$8 sps:$4 sm:$0xff]  }
 0x174   :  { %5735 = vmatpush1.bf16.msra.mxu0 %v7609_v23  ;;  %5244 = vmatprep.subr.bf16.mxu1 %v7614_v26  ;;  %v7705_v23 = vld [vmem:[%s10926_s1 + $0x12b4] ss:$8 sps:$4 sm:$0xff]   ;;  %v7700_v26 = vld [vmem:[%s10926_s1 + $0x6b0] ss:$8 sps:$4 sm:$0xff]  }
 0x175   :  { %5736 = vmatprep.subr.bf16.mxu0 %v7617_v18  ;;  %v7703_v18 = vld [vmem:[%s10926_s1 + $0x12b0] ss:$8 sps:$4 sm:$0xff]  }
 0x177   :  { %5245 = vmatpush1.bf16.msra.mxu1 %v7612_v27  ;;  %v7708_v27 = vld [vmem:[%s10926_s1 + $0x6c4] ss:$8 sps:$4 sm:$0xff]  }
 0x178   :  { %5737 = vmatpush1.bf16.msra.mxu0 %v7615_v28  ;;  %5246 = vmatprep.subr.bf16.mxu1 %v7620_v30  ;;  %v7711_v28 = vld [vmem:[%s10926_s1 + $0x12c4] ss:$8 sps:$4 sm:$0xff]   ;;  %v7706_v30 = vld [vmem:[%s10926_s1 + $0x6c0] ss:$8 sps:$4 sm:$0xff]  }
 0x179   :  { %5738 = vmatprep.subr.bf16.mxu0 %v7623_v31  ;;  %v7709_v31 = vld [vmem:[%s10926_s1 + $0x12c0] ss:$8 sps:$4 sm:$0xff]  }
 0x17b   :  { %5247 = vmatpush1.bf16.msra.mxu1 %v7618_v24  ;;  %v7714_v24 = vld [vmem:[%s10926_s1 + $0x6d4] ss:$8 sps:$4 sm:$0xff]  }
 0x17c   :  { %5739 = vmatpush1.bf16.msra.mxu0 %v7621_v25  ;;  %5248 = vmatprep.subr.bf16.mxu1 %v7626_v34  ;;  %v7717_v25 = vld [vmem:[%s10926_s1 + $0x12d4] ss:$8 sps:$4 sm:$0xff]   ;;  %v7712_v34 = vld [vmem:[%s10926_s1 + $0x6d0] ss:$8 sps:$4 sm:$0xff]  }
 0x17d   :  { %5740 = vmatprep.subr.bf16.mxu0 %v7629_v35  ;;  %v7715_v35 = vld [vmem:[%s10926_s1 + $0x12d0] ss:$8 sps:$4 sm:$0xff]  }
 0x17f   :  { %5249 = vmatpush1.bf16.msra.mxu1 %v7624_v36  ;;  %v7720_v36 = vld [vmem:[%s10926_s1 + $0x6e4] ss:$8 sps:$4 sm:$0xff]  }
 0x180   :  { %5741 = vmatpush1.bf16.msra.mxu0 %v7627_v37  ;;  %5259 = vmatprep.subr.bf16.mxu1 %v7634_v38  ;;  %v7723_v37 = vld [vmem:[%s10926_s1 + $0x12e4] ss:$8 sps:$4 sm:$0xff]   ;;  %v7718_v38 = vld [vmem:[%s10926_s1 + $0x6e0] ss:$8 sps:$4 sm:$0xff]  }
 0x181   :  { %5751 = vmatprep.subr.bf16.mxu0 %v7639_v20  ;;  %v7721_v20 = vld [vmem:[%s10926_s1 + $0x12e0] ss:$8 sps:$4 sm:$0xff]  }
 0x182   :  { %5251 = vmatmul.mubr.bf16.vlgmr.msra.gmra.mrb[0].mxu1 %v6099_v40  ;;  %v7726_v40 = vld [vmem:[%s10926_s1 + $0x6f4] ss:$8 sps:$4 sm:$0xff]  }
 0x183   :  { %5743 = vmatmul.mubr.bf16.vlgmr.msra.gmra.mrb[0].mxu0 %v6123_v41  ;;  %5260 = vmatpush1.bf16.msra.mxu1 %v7632_v42  ;;  %v7729_v41 = vld [vmem:[%s10926_s1 + $0x12f4] ss:$8 sps:$4 sm:$0xff]   ;;  %v7724_v42 = vld [vmem:[%s10926_s1 + $0x6f0] ss:$8 sps:$4 sm:$0xff]  }
 0x184   :  { %5752 = vmatpush1.bf16.msra.mxu0 %v7637_v43  ;;  %5261 = vmatprep.subr.bf16.mxu1 %v7642_v44  ;;  %v7727_v43 = vld [vmem:[%s10926_s1 + $0x12f0] ss:$8 sps:$4 sm:$0xff]   ;;  %v7734_v44 = vld [vmem:[%s10926_s1 + $0x704] ss:$8 sps:$4 sm:$0xff]  }
 0x185   :  { %5753 = vmatprep.subr.bf16.mxu0 %v7645_v32  ;;  %5291 = vmatprep.mubr.bf16.mxu1 %v6102_v33  ;;  %v7739_v32 = vld [vmem:[%s10926_s1 + $0x1304] ss:$8 sps:$4 sm:$0xff]   ;;  %v9767_v33 = vld [vmem:[%s10927_s0 + $0x38] sm:$0xff] }
 0x186   :  { %5783 = vmatprep.mubr.bf16.mxu0 %v6126_v45  ;;  %v9772_v45 = vld [vmem:[%s10927_s0 + $0x98] sm:$0xff] }
 0x187   :  { %5262 = vmatpush1.bf16.msra.mxu1 %v7640_v46  ;;  %v6101_v46 = vcombine.low %v9557_v29, %v9557_v29  ;;  %v7745_v29 = vld [vmem:[%s10926_s1 + $0x1314] ss:$8 sps:$4 sm:$0xff]  }
 0x188   :  { %5754 = vmatpush1.bf16.msra.mxu0 %v7643_v47  ;;  %5263 = vmatprep.subr.bf16.mxu1 %v7648_v48  ;;  %v6125_v47 = vcombine.low %v9562_v39, %v9562_v39  ;;  %v7732_v48 = vld [vmem:[%s10926_s1 + $0x700] ss:$8 sps:$4 sm:$0xff]   ;;  %v6104_v39 = vcombine.high %v9767_v33, %v9767_v33 }
 0x189   :  { %5755 = vmatprep.subr.bf16.mxu0 %v7651_v49  ;;  %v7737_v49 = vld [vmem:[%s10926_s1 + $0x1300] ss:$8 sps:$4 sm:$0xff]  }
 0x18b   :  { %5264 = vmatpush1.bf16.msra.mxu1 %v7646_v50  ;;  %v7742_v50 = vld [vmem:[%s10926_s1 + $0x714] ss:$8 sps:$4 sm:$0xff]  }
 0x18c   :  { %5756 = vmatpush1.bf16.msra.mxu0 %v7649_v51  ;;  %5265 = vmatprep.subr.bf16.mxu1 %v7654_v52  ;;  %v6128_v51 = vcombine.high %v9772_v45, %v9772_v45  ;;  %v7740_v52 = vld [vmem:[%s10926_s1 + $0x710] ss:$8 sps:$4 sm:$0xff]  }
 0x18d   :  { %5757 = vmatprep.subr.bf16.mxu0 %v7657_v53  ;;  %v7743_v53 = vld [vmem:[%s10926_s1 + $0x1310] ss:$8 sps:$4 sm:$0xff]  }
 0x18f   :  { %5266 = vmatpush1.bf16.msra.mxu1 %v7652_v54  ;;  %v7748_v54 = vld [vmem:[%s10926_s1 + $0x724] ss:$8 sps:$4 sm:$0xff]  }
 0x190   :  { %5758 = vmatpush1.bf16.msra.mxu0 %v7655_v55  ;;  %5267 = vmatprep.subr.bf16.mxu1 %v7660_v56  ;;  %v7751_v55 = vld [vmem:[%s10926_s1 + $0x1324] ss:$8 sps:$4 sm:$0xff]   ;;  %v7746_v56 = vld [vmem:[%s10926_s1 + $0x720] ss:$8 sps:$4 sm:$0xff]  }
 0x191   :  { %5759 = vmatprep.subr.bf16.mxu0 %v7663_v57  ;;  %v7749_v57 = vld [vmem:[%s10926_s1 + $0x1320] ss:$8 sps:$4 sm:$0xff]  }
 0x193   :  { %5268 = vmatpush1.bf16.msra.mxu1 %v7658_v58  ;;  %v7754_v58 = vld [vmem:[%s10926_s1 + $0x734] ss:$8 sps:$4 sm:$0xff]  }
 0x194   :  { %5760 = vmatpush1.bf16.msra.mxu0 %v7661_v59  ;;  %5269 = vmatprep.subr.bf16.mxu1 %v7666_v60  ;;  %v7757_v59 = vld [vmem:[%s10926_s1 + $0x1334] ss:$8 sps:$4 sm:$0xff]   ;;  %v7752_v60 = vld [vmem:[%s10926_s1 + $0x730] ss:$8 sps:$4 sm:$0xff]  }
 0x195   :  { %5761 = vmatprep.subr.bf16.mxu0 %v7669_v61  ;;  %v7755_v61 = vld [vmem:[%s10926_s1 + $0x1330] ss:$8 sps:$4 sm:$0xff]  }
 0x197   :  { %5270 = vmatpush1.bf16.msra.mxu1 %v7664_v62  ;;  %v7760_v62 = vld [vmem:[%s10926_s1 + $0x744] ss:$8 sps:$4 sm:$0xff]  }
 0x198   :  { %5762 = vmatpush1.bf16.msra.mxu0 %v7667_v63  ;;  %5271 = vmatprep.subr.bf16.mxu1 %v7672_v0  ;;  %v7763_v63 = vld [vmem:[%s10926_s1 + $0x1344] ss:$8 sps:$4 sm:$0xff]   ;;  %v7758_v0 = vld [vmem:[%s10926_s1 + $0x740] ss:$8 sps:$4 sm:$0xff]  }
 0x199   :  { %5763 = vmatprep.subr.bf16.mxu0 %v7675_v1  ;;  %v7761_v1 = vld [vmem:[%s10926_s1 + $0x1340] ss:$8 sps:$4 sm:$0xff]  }
 0x19b   :  { %5272 = vmatpush1.bf16.msra.mxu1 %v7670_v2  ;;  %v7766_v2 = vld [vmem:[%s10926_s1 + $0x754] ss:$8 sps:$4 sm:$0xff]  }
 0x19c   :  { %5764 = vmatpush1.bf16.msra.mxu0 %v7673_v3  ;;  %5273 = vmatprep.subr.bf16.mxu1 %v7678_v4  ;;  %v7769_v3 = vld [vmem:[%s10926_s1 + $0x1354] ss:$8 sps:$4 sm:$0xff]   ;;  %v7764_v4 = vld [vmem:[%s10926_s1 + $0x750] ss:$8 sps:$4 sm:$0xff]  }
 0x19d   :  { %5765 = vmatprep.subr.bf16.mxu0 %v7681_v5  ;;  %v7767_v5 = vld [vmem:[%s10926_s1 + $0x1350] ss:$8 sps:$4 sm:$0xff]  }
 0x19f   :  { %5274 = vmatpush1.bf16.msra.mxu1 %v7676_v6  ;;  %v7772_v6 = vld [vmem:[%s10926_s1 + $0x764] ss:$8 sps:$4 sm:$0xff]  }
 0x1a0   :  { %5766 = vmatpush1.bf16.msra.mxu0 %v7679_v7  ;;  %5275 = vmatprep.subr.bf16.mxu1 %v7684_v8  ;;  %v7775_v7 = vld [vmem:[%s10926_s1 + $0x1364] ss:$8 sps:$4 sm:$0xff]   ;;  %v7770_v8 = vld [vmem:[%s10926_s1 + $0x760] ss:$8 sps:$4 sm:$0xff]  }
 0x1a1   :  { %5767 = vmatprep.subr.bf16.mxu0 %v7687_v9  ;;  %v7773_v9 = vld [vmem:[%s10926_s1 + $0x1360] ss:$8 sps:$4 sm:$0xff]  }
 0x1a3   :  { %5276 = vmatpush1.bf16.msra.mxu1 %v7682_v10  ;;  %v7778_v10 = vld [vmem:[%s10926_s1 + $0x774] ss:$8 sps:$4 sm:$0xff]  }
 0x1a4   :  { %5768 = vmatpush1.bf16.msra.mxu0 %v7685_v11  ;;  %5277 = vmatprep.subr.bf16.mxu1 %v7690_v12  ;;  %v7781_v11 = vld [vmem:[%s10926_s1 + $0x1374] ss:$8 sps:$4 sm:$0xff]   ;;  %v7776_v12 = vld [vmem:[%s10926_s1 + $0x770] ss:$8 sps:$4 sm:$0xff]  }
 0x1a5   :  { %5769 = vmatprep.subr.bf16.mxu0 %v7693_v13  ;;  %v7779_v13 = vld [vmem:[%s10926_s1 + $0x1370] ss:$8 sps:$4 sm:$0xff]  }
 0x1a7   :  { %5278 = vmatpush1.bf16.msra.mxu1 %v7688_v14  ;;  %v7784_v14 = vld [vmem:[%s10926_s1 + $0x784] ss:$8 sps:$4 sm:$0xff]  }
 0x1a8   :  { %5770 = vmatpush1.bf16.msra.mxu0 %v7691_v15  ;;  %5279 = vmatprep.subr.bf16.mxu1 %v7696_v16  ;;  %v7787_v15 = vld [vmem:[%s10926_s1 + $0x1384] ss:$8 sps:$4 sm:$0xff]   ;;  %v7782_v16 = vld [vmem:[%s10926_s1 + $0x780] ss:$8 sps:$4 sm:$0xff]  }
 0x1a9   :  { %5771 = vmatprep.subr.bf16.mxu0 %v7699_v17  ;;  %v7785_v17 = vld [vmem:[%s10926_s1 + $0x1380] ss:$8 sps:$4 sm:$0xff]  }
 0x1ab   :  { %5280 = vmatpush1.bf16.msra.mxu1 %v7694_v19  ;;  %v7790_v19 = vld [vmem:[%s10926_s1 + $0x794] ss:$8 sps:$4 sm:$0xff]  }
 0x1ac   :  { %5772 = vmatpush1.bf16.msra.mxu0 %v7697_v21  ;;  %5281 = vmatprep.subr.bf16.mxu1 %v7702_v22  ;;  %v7793_v21 = vld [vmem:[%s10926_s1 + $0x1394] ss:$8 sps:$4 sm:$0xff]   ;;  %v7788_v22 = vld [vmem:[%s10926_s1 + $0x790] ss:$8 sps:$4 sm:$0xff]  }
 0x1ad   :  { %5773 = vmatprep.subr.bf16.mxu0 %v7705_v23  ;;  %v7791_v23 = vld [vmem:[%s10926_s1 + $0x1390] ss:$8 sps:$4 sm:$0xff]  }
 0x1af   :  { %5282 = vmatpush1.bf16.msra.mxu1 %v7700_v26  ;;  %v7796_v26 = vld [vmem:[%s10926_s1 + $0x7a4] ss:$8 sps:$4 sm:$0xff]  }
 0x1b0   :  { %5774 = vmatpush1.bf16.msra.mxu0 %v7703_v18  ;;  %5283 = vmatprep.subr.bf16.mxu1 %v7708_v27  ;;  %v7799_v18 = vld [vmem:[%s10926_s1 + $0x13a4] ss:$8 sps:$4 sm:$0xff]   ;;  %v7794_v27 = vld [vmem:[%s10926_s1 + $0x7a0] ss:$8 sps:$4 sm:$0xff]  }
 0x1b1   :  { %5775 = vmatprep.subr.bf16.mxu0 %v7711_v28  ;;  %v7797_v28 = vld [vmem:[%s10926_s1 + $0x13a0] ss:$8 sps:$4 sm:$0xff]  }
 0x1b3   :  { %5284 = vmatpush1.bf16.msra.mxu1 %v7706_v30  ;;  %v7802_v30 = vld [vmem:[%s10926_s1 + $0x7b4] ss:$8 sps:$4 sm:$0xff]  }
 0x1b4   :  { %5776 = vmatpush1.bf16.msra.mxu0 %v7709_v31  ;;  %5285 = vmatprep.subr.bf16.mxu1 %v7714_v24  ;;  %v7805_v31 = vld [vmem:[%s10926_s1 + $0x13b4] ss:$8 sps:$4 sm:$0xff]   ;;  %v7800_v24 = vld [vmem:[%s10926_s1 + $0x7b0] ss:$8 sps:$4 sm:$0xff]  }
 0x1b5   :  { %5777 = vmatprep.subr.bf16.mxu0 %v7717_v25  ;;  %v7803_v25 = vld [vmem:[%s10926_s1 + $0x13b0] ss:$8 sps:$4 sm:$0xff]  }
 0x1b7   :  { %5286 = vmatpush1.bf16.msra.mxu1 %v7712_v34  ;;  %v7808_v34 = vld [vmem:[%s10926_s1 + $0x7c4] ss:$8 sps:$4 sm:$0xff]  }
 0x1b8   :  { %5778 = vmatpush1.bf16.msra.mxu0 %v7715_v35  ;;  %5287 = vmatprep.subr.bf16.mxu1 %v7720_v36  ;;  %v7811_v35 = vld [vmem:[%s10926_s1 + $0x13c4] ss:$8 sps:$4 sm:$0xff]   ;;  %v7806_v36 = vld [vmem:[%s10926_s1 + $0x7c0] ss:$8 sps:$4 sm:$0xff]  }
 0x1b9   :  { %5779 = vmatprep.subr.bf16.mxu0 %v7723_v37  ;;  %v7809_v37 = vld [vmem:[%s10926_s1 + $0x13c0] ss:$8 sps:$4 sm:$0xff]  }
 0x1bb   :  { %5288 = vmatpush1.bf16.msra.mxu1 %v7718_v38  ;;  %v7814_v38 = vld [vmem:[%s10926_s1 + $0x7d4] ss:$8 sps:$4 sm:$0xff]  }
 0x1bc   :  { %5780 = vmatpush1.bf16.msra.mxu0 %v7721_v20  ;;  %5289 = vmatprep.subr.bf16.mxu1 %v7726_v40  ;;  %v7817_v20 = vld [vmem:[%s10926_s1 + $0x13d4] ss:$8 sps:$4 sm:$0xff]   ;;  %v7812_v40 = vld [vmem:[%s10926_s1 + $0x7d0] ss:$8 sps:$4 sm:$0xff]  }
 0x1bd   :  { %5781 = vmatprep.subr.bf16.mxu0 %v7729_v41  ;;  %v7815_v41 = vld [vmem:[%s10926_s1 + $0x13d0] ss:$8 sps:$4 sm:$0xff]  }
 0x1bf   :  { %5290 = vmatpush1.bf16.msra.mxu1 %v7724_v42  ;;  %v7820_v42 = vld [vmem:[%s10926_s1 + $0x7e4] ss:$8 sps:$4 sm:$0xff]  }
 0x1c0   :  { %5782 = vmatpush1.bf16.msra.mxu0 %v7727_v43  ;;  %5300 = vmatprep.subr.bf16.mxu1 %v7734_v44  ;;  %v7823_v43 = vld [vmem:[%s10926_s1 + $0x13e4] ss:$8 sps:$4 sm:$0xff]   ;;  %v7818_v44 = vld [vmem:[%s10926_s1 + $0x7e0] ss:$8 sps:$4 sm:$0xff]  }
 0x1c1   :  { %5792 = vmatprep.subr.bf16.mxu0 %v7739_v32  ;;  %v7821_v32 = vld [vmem:[%s10926_s1 + $0x13e0] ss:$8 sps:$4 sm:$0xff]  }
 0x1c2   :  { %5292 = vmatmul.mubr.bf16.vlgmr.msra.gmra.mrb[0].mxu1 %v6101_v46  ;;  %v7826_v46 = vld [vmem:[%s10926_s1 + $0x7f4] ss:$8 sps:$4 sm:$0xff]  }
 0x1c3   :  { %5784 = vmatmul.mubr.bf16.vlgmr.msra.gmra.mrb[0].mxu0 %v6125_v47  ;;  %5301 = vmatpush1.bf16.msra.mxu1 %v7732_v48  ;;  %v7829_v47 = vld [vmem:[%s10926_s1 + $0x13f4] ss:$8 sps:$4 sm:$0xff]   ;;  %v7824_v48 = vld [vmem:[%s10926_s1 + $0x7f0] ss:$8 sps:$4 sm:$0xff]  }
 0x1c4   :  { %5793 = vmatpush1.bf16.msra.mxu0 %v7737_v49  ;;  %5302 = vmatprep.subr.bf16.mxu1 %v7742_v50  ;;  %v7827_v49 = vld [vmem:[%s10926_s1 + $0x13f0] ss:$8 sps:$4 sm:$0xff]   ;;  %v7834_v50 = vld [vmem:[%s10926_s1 + $0x804] ss:$8 sps:$4 sm:$0xff]  }
 0x1c5   :  { %5794 = vmatprep.subr.bf16.mxu0 %v7745_v29  ;;  %5332 = vmatprep.mubr.bf16.mxu1 %v6104_v39  ;;  %v7839_v29 = vld [vmem:[%s10926_s1 + $0x1404] ss:$8 sps:$4 sm:$0xff]   ;;  %v6103_v39 = vcombine.low %v9767_v33, %v9767_v33  ;;  %v7837_v33 = vld [vmem:[%s10926_s1 + $0x1400] ss:$8 sps:$4 sm:$0xff]  }
 0x1c6   :  { %5824 = vmatprep.mubr.bf16.mxu0 %v6128_v51  ;;  %v6127_v51 = vcombine.low %v9772_v45, %v9772_v45  ;;  %v7842_v45 = vld [vmem:[%s10926_s1 + $0x814] ss:$8 sps:$4 sm:$0xff]  }
 0x1c7   :  { %5303 = vmatpush1.bf16.msra.mxu1 %v7740_v52  ;;  %v9981_v52 = vld [vmem:[%s10927_s0 + $0x40] sm:$0xff] }
 0x1c8   :  { %5795 = vmatpush1.bf16.msra.mxu0 %v7743_v53  ;;  %5304 = vmatprep.subr.bf16.mxu1 %v7748_v54  ;;  %v9986_v53 = vld [vmem:[%s10927_s0 + $0xa0] sm:$0xff] }
 0x1c9   :  { %5796 = vmatprep.subr.bf16.mxu0 %v7751_v55  ;;  %v7832_v54 = vld [vmem:[%s10926_s1 + $0x800] ss:$8 sps:$4 sm:$0xff]   ;;  %v7845_v55 = vld [vmem:[%s10926_s1 + $0x1414] ss:$8 sps:$4 sm:$0xff]  }
 0x1cb   :  { %5305 = vmatpush1.bf16.msra.mxu1 %v7746_v56  ;;  %v6106_v56 = vcombine.high %v9981_v52, %v9981_v52 }
 0x1cc   :  { %5797 = vmatpush1.bf16.msra.mxu0 %v7749_v57  ;;  %5306 = vmatprep.subr.bf16.mxu1 %v7754_v58  ;;  %v6130_v57 = vcombine.high %v9986_v53, %v9986_v53  ;;  %v7840_v58 = vld [vmem:[%s10926_s1 + $0x810] ss:$8 sps:$4 sm:$0xff]  }
 0x1cd   :  { %5798 = vmatprep.subr.bf16.mxu0 %v7757_v59  ;;  %v7843_v59 = vld [vmem:[%s10926_s1 + $0x1410] ss:$8 sps:$4 sm:$0xff]  }
 0x1cf   :  { %5307 = vmatpush1.bf16.msra.mxu1 %v7752_v60  ;;  %v7848_v60 = vld [vmem:[%s10926_s1 + $0x824] ss:$8 sps:$4 sm:$0xff]  }
 0x1d0   :  { %5799 = vmatpush1.bf16.msra.mxu0 %v7755_v61  ;;  %5308 = vmatprep.subr.bf16.mxu1 %v7760_v62  ;;  %v7851_v61 = vld [vmem:[%s10926_s1 + $0x1424] ss:$8 sps:$4 sm:$0xff]   ;;  %v7846_v62 = vld [vmem:[%s10926_s1 + $0x820] ss:$8 sps:$4 sm:$0xff]  }
 0x1d1   :  { %5800 = vmatprep.subr.bf16.mxu0 %v7763_v63  ;;  %v7849_v63 = vld [vmem:[%s10926_s1 + $0x1420] ss:$8 sps:$4 sm:$0xff]  }
 0x1d3   :  { %5309 = vmatpush1.bf16.msra.mxu1 %v7758_v0  ;;  %v7854_v0 = vld [vmem:[%s10926_s1 + $0x834] ss:$8 sps:$4 sm:$0xff]  }
 0x1d4   :  { %5801 = vmatpush1.bf16.msra.mxu0 %v7761_v1  ;;  %5310 = vmatprep.subr.bf16.mxu1 %v7766_v2  ;;  %v7857_v1 = vld [vmem:[%s10926_s1 + $0x1434] ss:$8 sps:$4 sm:$0xff]   ;;  %v7852_v2 = vld [vmem:[%s10926_s1 + $0x830] ss:$8 sps:$4 sm:$0xff]  }
 0x1d5   :  { %5802 = vmatprep.subr.bf16.mxu0 %v7769_v3  ;;  %v7855_v3 = vld [vmem:[%s10926_s1 + $0x1430] ss:$8 sps:$4 sm:$0xff]  }
 0x1d7   :  { %5311 = vmatpush1.bf16.msra.mxu1 %v7764_v4  ;;  %v7860_v4 = vld [vmem:[%s10926_s1 + $0x844] ss:$8 sps:$4 sm:$0xff]  }
 0x1d8   :  { %5803 = vmatpush1.bf16.msra.mxu0 %v7767_v5  ;;  %5312 = vmatprep.subr.bf16.mxu1 %v7772_v6  ;;  %v7863_v5 = vld [vmem:[%s10926_s1 + $0x1444] ss:$8 sps:$4 sm:$0xff]   ;;  %v7858_v6 = vld [vmem:[%s10926_s1 + $0x840] ss:$8 sps:$4 sm:$0xff]  }
 0x1d9   :  { %5804 = vmatprep.subr.bf16.mxu0 %v7775_v7  ;;  %v7861_v7 = vld [vmem:[%s10926_s1 + $0x1440] ss:$8 sps:$4 sm:$0xff]  }
 0x1db   :  { %5313 = vmatpush1.bf16.msra.mxu1 %v7770_v8  ;;  %v7866_v8 = vld [vmem:[%s10926_s1 + $0x854] ss:$8 sps:$4 sm:$0xff]  }
 0x1dc   :  { %5805 = vmatpush1.bf16.msra.mxu0 %v7773_v9  ;;  %5314 = vmatprep.subr.bf16.mxu1 %v7778_v10  ;;  %v7869_v9 = vld [vmem:[%s10926_s1 + $0x1454] ss:$8 sps:$4 sm:$0xff]   ;;  %v7864_v10 = vld [vmem:[%s10926_s1 + $0x850] ss:$8 sps:$4 sm:$0xff]  }
 0x1dd   :  { %5806 = vmatprep.subr.bf16.mxu0 %v7781_v11  ;;  %v7867_v11 = vld [vmem:[%s10926_s1 + $0x1450] ss:$8 sps:$4 sm:$0xff]  }
 0x1df   :  { %5315 = vmatpush1.bf16.msra.mxu1 %v7776_v12  ;;  %v7872_v12 = vld [vmem:[%s10926_s1 + $0x864] ss:$8 sps:$4 sm:$0xff]  }
 0x1e0   :  { %5807 = vmatpush1.bf16.msra.mxu0 %v7779_v13  ;;  %5316 = vmatprep.subr.bf16.mxu1 %v7784_v14  ;;  %v7875_v13 = vld [vmem:[%s10926_s1 + $0x1464] ss:$8 sps:$4 sm:$0xff]   ;;  %v7870_v14 = vld [vmem:[%s10926_s1 + $0x860] ss:$8 sps:$4 sm:$0xff]  }
 0x1e1   :  { %5808 = vmatprep.subr.bf16.mxu0 %v7787_v15  ;;  %v7873_v15 = vld [vmem:[%s10926_s1 + $0x1460] ss:$8 sps:$4 sm:$0xff]  }
 0x1e3   :  { %5317 = vmatpush1.bf16.msra.mxu1 %v7782_v16  ;;  %v7878_v16 = vld [vmem:[%s10926_s1 + $0x874] ss:$8 sps:$4 sm:$0xff]  }
 0x1e4   :  { %5809 = vmatpush1.bf16.msra.mxu0 %v7785_v17  ;;  %5318 = vmatprep.subr.bf16.mxu1 %v7790_v19  ;;  %v7881_v17 = vld [vmem:[%s10926_s1 + $0x1474] ss:$8 sps:$4 sm:$0xff]   ;;  %v7876_v19 = vld [vmem:[%s10926_s1 + $0x870] ss:$8 sps:$4 sm:$0xff]  }
 0x1e5   :  { %5810 = vmatprep.subr.bf16.mxu0 %v7793_v21  ;;  %v7879_v21 = vld [vmem:[%s10926_s1 + $0x1470] ss:$8 sps:$4 sm:$0xff]  }
 0x1e7   :  { %5319 = vmatpush1.bf16.msra.mxu1 %v7788_v22  ;;  %v7884_v22 = vld [vmem:[%s10926_s1 + $0x884] ss:$8 sps:$4 sm:$0xff]  }
 0x1e8   :  { %5811 = vmatpush1.bf16.msra.mxu0 %v7791_v23  ;;  %5320 = vmatprep.subr.bf16.mxu1 %v7796_v26  ;;  %v7887_v23 = vld [vmem:[%s10926_s1 + $0x1484] ss:$8 sps:$4 sm:$0xff]   ;;  %v7882_v26 = vld [vmem:[%s10926_s1 + $0x880] ss:$8 sps:$4 sm:$0xff]  }
 0x1e9   :  { %5812 = vmatprep.subr.bf16.mxu0 %v7799_v18  ;;  %v7885_v18 = vld [vmem:[%s10926_s1 + $0x1480] ss:$8 sps:$4 sm:$0xff]  }
 0x1eb   :  { %5321 = vmatpush1.bf16.msra.mxu1 %v7794_v27  ;;  %v7890_v27 = vld [vmem:[%s10926_s1 + $0x894] ss:$8 sps:$4 sm:$0xff]  }
 0x1ec   :  { %5813 = vmatpush1.bf16.msra.mxu0 %v7797_v28  ;;  %5322 = vmatprep.subr.bf16.mxu1 %v7802_v30  ;;  %v7893_v28 = vld [vmem:[%s10926_s1 + $0x1494] ss:$8 sps:$4 sm:$0xff]   ;;  %v7888_v30 = vld [vmem:[%s10926_s1 + $0x890] ss:$8 sps:$4 sm:$0xff]  }
 0x1ed   :  { %5814 = vmatprep.subr.bf16.mxu0 %v7805_v31  ;;  %v7891_v31 = vld [vmem:[%s10926_s1 + $0x1490] ss:$8 sps:$4 sm:$0xff]  }
 0x1ef   :  { %5323 = vmatpush1.bf16.msra.mxu1 %v7800_v24  ;;  %v7896_v24 = vld [vmem:[%s10926_s1 + $0x8a4] ss:$8 sps:$4 sm:$0xff]  }
 0x1f0   :  { %5815 = vmatpush1.bf16.msra.mxu0 %v7803_v25  ;;  %5324 = vmatprep.subr.bf16.mxu1 %v7808_v34  ;;  %v7899_v25 = vld [vmem:[%s10926_s1 + $0x14a4] ss:$8 sps:$4 sm:$0xff]   ;;  %v7894_v34 = vld [vmem:[%s10926_s1 + $0x8a0] ss:$8 sps:$4 sm:$0xff]  }
 0x1f1   :  { %5816 = vmatprep.subr.bf16.mxu0 %v7811_v35  ;;  %v7897_v35 = vld [vmem:[%s10926_s1 + $0x14a0] ss:$8 sps:$4 sm:$0xff]  }
 0x1f3   :  { %5325 = vmatpush1.bf16.msra.mxu1 %v7806_v36  ;;  %v7902_v36 = vld [vmem:[%s10926_s1 + $0x8b4] ss:$8 sps:$4 sm:$0xff]  }
 0x1f4   :  { %5817 = vmatpush1.bf16.msra.mxu0 %v7809_v37  ;;  %5326 = vmatprep.subr.bf16.mxu1 %v7814_v38  ;;  %v7905_v37 = vld [vmem:[%s10926_s1 + $0x14b4] ss:$8 sps:$4 sm:$0xff]   ;;  %v7900_v38 = vld [vmem:[%s10926_s1 + $0x8b0] ss:$8 sps:$4 sm:$0xff]  }
 0x1f5   :  { %5818 = vmatprep.subr.bf16.mxu0 %v7817_v20  ;;  %v7903_v20 = vld [vmem:[%s10926_s1 + $0x14b0] ss:$8 sps:$4 sm:$0xff]  }
 0x1f7   :  { %5327 = vmatpush1.bf16.msra.mxu1 %v7812_v40  ;;  %v7908_v40 = vld [vmem:[%s10926_s1 + $0x8c4] ss:$8 sps:$4 sm:$0xff]  }
 0x1f8   :  { %5819 = vmatpush1.bf16.msra.mxu0 %v7815_v41  ;;  %5328 = vmatprep.subr.bf16.mxu1 %v7820_v42  ;;  %v7911_v41 = vld [vmem:[%s10926_s1 + $0x14c4] ss:$8 sps:$4 sm:$0xff]   ;;  %v7906_v42 = vld [vmem:[%s10926_s1 + $0x8c0] ss:$8 sps:$4 sm:$0xff]  }
 0x1f9   :  { %5820 = vmatprep.subr.bf16.mxu0 %v7823_v43  ;;  %v7909_v43 = vld [vmem:[%s10926_s1 + $0x14c0] ss:$8 sps:$4 sm:$0xff]  }
 0x1fb   :  { %5329 = vmatpush1.bf16.msra.mxu1 %v7818_v44  ;;  %v7914_v44 = vld [vmem:[%s10926_s1 + $0x8d4] ss:$8 sps:$4 sm:$0xff]  }
 0x1fc   :  { %5821 = vmatpush1.bf16.msra.mxu0 %v7821_v32  ;;  %5330 = vmatprep.subr.bf16.mxu1 %v7826_v46  ;;  %v7917_v32 = vld [vmem:[%s10926_s1 + $0x14d4] ss:$8 sps:$4 sm:$0xff]   ;;  %v7912_v46 = vld [vmem:[%s10926_s1 + $0x8d0] ss:$8 sps:$4 sm:$0xff]  }
 0x1fd   :  { %5822 = vmatprep.subr.bf16.mxu0 %v7829_v47  ;;  %v7915_v47 = vld [vmem:[%s10926_s1 + $0x14d0] ss:$8 sps:$4 sm:$0xff]  }
 0x1ff   :  { %5331 = vmatpush1.bf16.msra.mxu1 %v7824_v48  ;;  %v7920_v48 = vld [vmem:[%s10926_s1 + $0x8e4] ss:$8 sps:$4 sm:$0xff]  }
 0x200   :  { %5823 = vmatpush1.bf16.msra.mxu0 %v7827_v49  ;;  %5341 = vmatprep.subr.bf16.mxu1 %v7834_v50  ;;  %v7923_v49 = vld [vmem:[%s10926_s1 + $0x14e4] ss:$8 sps:$4 sm:$0xff]   ;;  %v7918_v50 = vld [vmem:[%s10926_s1 + $0x8e0] ss:$8 sps:$4 sm:$0xff]  }
 0x201   :  { %5833 = vmatprep.subr.bf16.mxu0 %v7839_v29  ;;  %v7921_v29 = vld [vmem:[%s10926_s1 + $0x14e0] ss:$8 sps:$4 sm:$0xff]  }
 0x202   :  { %5333 = vmatmul.mubr.bf16.vlgmr.msra.gmra.mrb[0].mxu1 %v6103_v39  ;;  %v7926_v39 = vld [vmem:[%s10926_s1 + $0x8f4] ss:$8 sps:$4 sm:$0xff]  }
 0x203   :  { %5825 = vmatmul.mubr.bf16.vlgmr.msra.gmra.mrb[0].mxu0 %v6127_v51  ;;  %5342 = vmatpush1.bf16.msra.mxu1 %v7832_v54  ;;  %v7929_v51 = vld [vmem:[%s10926_s1 + $0x14f4] ss:$8 sps:$4 sm:$0xff]   ;;  %v7924_v54 = vld [vmem:[%s10926_s1 + $0x8f0] ss:$8 sps:$4 sm:$0xff]  }
 0x204   :  { %5834 = vmatpush1.bf16.msra.mxu0 %v7837_v33  ;;  %5343 = vmatprep.subr.bf16.mxu1 %v7842_v45  ;;  %v7927_v33 = vld [vmem:[%s10926_s1 + $0x14f0] ss:$8 sps:$4 sm:$0xff]   ;;  %v7934_v45 = vld [vmem:[%s10926_s1 + $0x904] ss:$8 sps:$4 sm:$0xff]  }
 0x205   :  { %5835 = vmatprep.subr.bf16.mxu0 %v7845_v55  ;;  %5373 = vmatprep.mubr.bf16.mxu1 %v6106_v56  ;;  %v7939_v55 = vld [vmem:[%s10926_s1 + $0x1504] ss:$8 sps:$4 sm:$0xff]   ;;  %v6105_v56 = vcombine.low %v9981_v52, %v9981_v52  ;;  %v7937_v52 = vld [vmem:[%s10926_s1 + $0x1500] ss:$8 sps:$4 sm:$0xff]  }
 0x206   :  { %5865 = vmatprep.mubr.bf16.mxu0 %v6130_v57  ;;  %v6129_v57 = vcombine.low %v9986_v53, %v9986_v53  ;;  %v7942_v53 = vld [vmem:[%s10926_s1 + $0x914] ss:$8 sps:$4 sm:$0xff]  }
 0x207   :  { %5344 = vmatpush1.bf16.msra.mxu1 %v7840_v58  ;;  %v10191_v58 = vld [vmem:[%s10927_s0 + $0x48] sm:$0xff] }
 0x208   :  { %5836 = vmatpush1.bf16.msra.mxu0 %v7843_v59  ;;  %5345 = vmatprep.subr.bf16.mxu1 %v7848_v60  ;;  %v10196_v59 = vld [vmem:[%s10927_s0 + $0xa8] sm:$0xff] }
 0x209   :  { %5837 = vmatprep.subr.bf16.mxu0 %v7851_v61  ;;  %v7932_v60 = vld [vmem:[%s10926_s1 + $0x900] ss:$8 sps:$4 sm:$0xff]   ;;  %v7945_v61 = vld [vmem:[%s10926_s1 + $0x1514] ss:$8 sps:$4 sm:$0xff]  }
 0x20b   :  { %5346 = vmatpush1.bf16.msra.mxu1 %v7846_v62  ;;  %v6108_v62 = vcombine.high %v10191_v58, %v10191_v58 }
 0x20c   :  { %5838 = vmatpush1.bf16.msra.mxu0 %v7849_v63  ;;  %5347 = vmatprep.subr.bf16.mxu1 %v7854_v0  ;;  %v6132_v63 = vcombine.high %v10196_v59, %v10196_v59  ;;  %v7940_v0 = vld [vmem:[%s10926_s1 + $0x910] ss:$8 sps:$4 sm:$0xff]  }
 0x20d   :  { %5839 = vmatprep.subr.bf16.mxu0 %v7857_v1  ;;  %v7943_v1 = vld [vmem:[%s10926_s1 + $0x1510] ss:$8 sps:$4 sm:$0xff]  }
 0x20f   :  { %5348 = vmatpush1.bf16.msra.mxu1 %v7852_v2  ;;  %v7948_v2 = vld [vmem:[%s10926_s1 + $0x924] ss:$8 sps:$4 sm:$0xff]  }
 0x210   :  { %5840 = vmatpush1.bf16.msra.mxu0 %v7855_v3  ;;  %5349 = vmatprep.subr.bf16.mxu1 %v7860_v4  ;;  %v7951_v3 = vld [vmem:[%s10926_s1 + $0x1524] ss:$8 sps:$4 sm:$0xff]   ;;  %v7946_v4 = vld [vmem:[%s10926_s1 + $0x920] ss:$8 sps:$4 sm:$0xff]  }
 0x211   :  { %5841 = vmatprep.subr.bf16.mxu0 %v7863_v5  ;;  %v7949_v5 = vld [vmem:[%s10926_s1 + $0x1520] ss:$8 sps:$4 sm:$0xff]  }
 0x213   :  { %5350 = vmatpush1.bf16.msra.mxu1 %v7858_v6  ;;  %v7954_v6 = vld [vmem:[%s10926_s1 + $0x934] ss:$8 sps:$4 sm:$0xff]  }
 0x214   :  { %5842 = vmatpush1.bf16.msra.mxu0 %v7861_v7  ;;  %5351 = vmatprep.subr.bf16.mxu1 %v7866_v8  ;;  %v7957_v7 = vld [vmem:[%s10926_s1 + $0x1534] ss:$8 sps:$4 sm:$0xff]   ;;  %v7952_v8 = vld [vmem:[%s10926_s1 + $0x930] ss:$8 sps:$4 sm:$0xff]  }
 0x215   :  { %5843 = vmatprep.subr.bf16.mxu0 %v7869_v9  ;;  %v7955_v9 = vld [vmem:[%s10926_s1 + $0x1530] ss:$8 sps:$4 sm:$0xff]  }
 0x217   :  { %5352 = vmatpush1.bf16.msra.mxu1 %v7864_v10  ;;  %v7960_v10 = vld [vmem:[%s10926_s1 + $0x944] ss:$8 sps:$4 sm:$0xff]  }
 0x218   :  { %5844 = vmatpush1.bf16.msra.mxu0 %v7867_v11  ;;  %5353 = vmatprep.subr.bf16.mxu1 %v7872_v12  ;;  %v7963_v11 = vld [vmem:[%s10926_s1 + $0x1544] ss:$8 sps:$4 sm:$0xff]   ;;  %v7958_v12 = vld [vmem:[%s10926_s1 + $0x940] ss:$8 sps:$4 sm:$0xff]  }
 0x219   :  { %5845 = vmatprep.subr.bf16.mxu0 %v7875_v13  ;;  %v7961_v13 = vld [vmem:[%s10926_s1 + $0x1540] ss:$8 sps:$4 sm:$0xff]  }
 0x21b   :  { %5354 = vmatpush1.bf16.msra.mxu1 %v7870_v14  ;;  %v7966_v14 = vld [vmem:[%s10926_s1 + $0x954] ss:$8 sps:$4 sm:$0xff]  }
 0x21c   :  { %5846 = vmatpush1.bf16.msra.mxu0 %v7873_v15  ;;  %5355 = vmatprep.subr.bf16.mxu1 %v7878_v16  ;;  %v7969_v15 = vld [vmem:[%s10926_s1 + $0x1554] ss:$8 sps:$4 sm:$0xff]   ;;  %v7964_v16 = vld [vmem:[%s10926_s1 + $0x950] ss:$8 sps:$4 sm:$0xff]  }
 0x21d   :  { %5847 = vmatprep.subr.bf16.mxu0 %v7881_v17  ;;  %v7967_v17 = vld [vmem:[%s10926_s1 + $0x1550] ss:$8 sps:$4 sm:$0xff]  }
 0x21f   :  { %5356 = vmatpush1.bf16.msra.mxu1 %v7876_v19  ;;  %v7972_v19 = vld [vmem:[%s10926_s1 + $0x964] ss:$8 sps:$4 sm:$0xff]  }
 0x220   :  { %5848 = vmatpush1.bf16.msra.mxu0 %v7879_v21  ;;  %5357 = vmatprep.subr.bf16.mxu1 %v7884_v22  ;;  %v7975_v21 = vld [vmem:[%s10926_s1 + $0x1564] ss:$8 sps:$4 sm:$0xff]   ;;  %v7970_v22 = vld [vmem:[%s10926_s1 + $0x960] ss:$8 sps:$4 sm:$0xff]  }
 0x221   :  { %5849 = vmatprep.subr.bf16.mxu0 %v7887_v23  ;;  %v7973_v23 = vld [vmem:[%s10926_s1 + $0x1560] ss:$8 sps:$4 sm:$0xff]  }
 0x223   :  { %5358 = vmatpush1.bf16.msra.mxu1 %v7882_v26  ;;  %v7978_v26 = vld [vmem:[%s10926_s1 + $0x974] ss:$8 sps:$4 sm:$0xff]  }
 0x224   :  { %5850 = vmatpush1.bf16.msra.mxu0 %v7885_v18  ;;  %5359 = vmatprep.subr.bf16.mxu1 %v7890_v27  ;;  %v7981_v18 = vld [vmem:[%s10926_s1 + $0x1574] ss:$8 sps:$4 sm:$0xff]   ;;  %v7976_v27 = vld [vmem:[%s10926_s1 + $0x970] ss:$8 sps:$4 sm:$0xff]  }
 0x225   :  { %5851 = vmatprep.subr.bf16.mxu0 %v7893_v28  ;;  %v7979_v28 = vld [vmem:[%s10926_s1 + $0x1570] ss:$8 sps:$4 sm:$0xff]  }
 0x227   :  { %5360 = vmatpush1.bf16.msra.mxu1 %v7888_v30  ;;  %v7984_v30 = vld [vmem:[%s10926_s1 + $0x984] ss:$8 sps:$4 sm:$0xff]  }
 0x228   :  { %5852 = vmatpush1.bf16.msra.mxu0 %v7891_v31  ;;  %5361 = vmatprep.subr.bf16.mxu1 %v7896_v24  ;;  %v7987_v31 = vld [vmem:[%s10926_s1 + $0x1584] ss:$8 sps:$4 sm:$0xff]   ;;  %v7982_v24 = vld [vmem:[%s10926_s1 + $0x980] ss:$8 sps:$4 sm:$0xff]  }
 0x229   :  { %5853 = vmatprep.subr.bf16.mxu0 %v7899_v25  ;;  %v7985_v25 = vld [vmem:[%s10926_s1 + $0x1580] ss:$8 sps:$4 sm:$0xff]  }
 0x22b   :  { %5362 = vmatpush1.bf16.msra.mxu1 %v7894_v34  ;;  %v7990_v34 = vld [vmem:[%s10926_s1 + $0x994] ss:$8 sps:$4 sm:$0xff]  }
 0x22c   :  { %5854 = vmatpush1.bf16.msra.mxu0 %v7897_v35  ;;  %5363 = vmatprep.subr.bf16.mxu1 %v7902_v36  ;;  %v7993_v35 = vld [vmem:[%s10926_s1 + $0x1594] ss:$8 sps:$4 sm:$0xff]   ;;  %v7988_v36 = vld [vmem:[%s10926_s1 + $0x990] ss:$8 sps:$4 sm:$0xff]  }
 0x22d   :  { %5855 = vmatprep.subr.bf16.mxu0 %v7905_v37  ;;  %v7991_v37 = vld [vmem:[%s10926_s1 + $0x1590] ss:$8 sps:$4 sm:$0xff]  }
 0x22f   :  { %5364 = vmatpush1.bf16.msra.mxu1 %v7900_v38  ;;  %v7996_v38 = vld [vmem:[%s10926_s1 + $0x9a4] ss:$8 sps:$4 sm:$0xff]  }
 0x230   :  { %5856 = vmatpush1.bf16.msra.mxu0 %v7903_v20  ;;  %5365 = vmatprep.subr.bf16.mxu1 %v7908_v40  ;;  %v7999_v20 = vld [vmem:[%s10926_s1 + $0x15a4] ss:$8 sps:$4 sm:$0xff]   ;;  %v7994_v40 = vld [vmem:[%s10926_s1 + $0x9a0] ss:$8 sps:$4 sm:$0xff]  }
 0x231   :  { %5857 = vmatprep.subr.bf16.mxu0 %v7911_v41  ;;  %v7997_v41 = vld [vmem:[%s10926_s1 + $0x15a0] ss:$8 sps:$4 sm:$0xff]  }
 0x233   :  { %5366 = vmatpush1.bf16.msra.mxu1 %v7906_v42  ;;  %v8002_v42 = vld [vmem:[%s10926_s1 + $0x9b4] ss:$8 sps:$4 sm:$0xff]  }
 0x234   :  { %5858 = vmatpush1.bf16.msra.mxu0 %v7909_v43  ;;  %5367 = vmatprep.subr.bf16.mxu1 %v7914_v44  ;;  %v8005_v43 = vld [vmem:[%s10926_s1 + $0x15b4] ss:$8 sps:$4 sm:$0xff]   ;;  %v8000_v44 = vld [vmem:[%s10926_s1 + $0x9b0] ss:$8 sps:$4 sm:$0xff]  }
 0x235   :  { %5859 = vmatprep.subr.bf16.mxu0 %v7917_v32  ;;  %v8003_v32 = vld [vmem:[%s10926_s1 + $0x15b0] ss:$8 sps:$4 sm:$0xff]  }
 0x237   :  { %5368 = vmatpush1.bf16.msra.mxu1 %v7912_v46  ;;  %v8008_v46 = vld [vmem:[%s10926_s1 + $0x9c4] ss:$8 sps:$4 sm:$0xff]  }
 0x238   :  { %5860 = vmatpush1.bf16.msra.mxu0 %v7915_v47  ;;  %5369 = vmatprep.subr.bf16.mxu1 %v7920_v48  ;;  %v8011_v47 = vld [vmem:[%s10926_s1 + $0x15c4] ss:$8 sps:$4 sm:$0xff]   ;;  %v8006_v48 = vld [vmem:[%s10926_s1 + $0x9c0] ss:$8 sps:$4 sm:$0xff]  }
 0x239   :  { %5861 = vmatprep.subr.bf16.mxu0 %v7923_v49  ;;  %v8009_v49 = vld [vmem:[%s10926_s1 + $0x15c0] ss:$8 sps:$4 sm:$0xff]  }
 0x23b   :  { %5370 = vmatpush1.bf16.msra.mxu1 %v7918_v50  ;;  %v8014_v50 = vld [vmem:[%s10926_s1 + $0x9d4] ss:$8 sps:$4 sm:$0xff]  }
 0x23c   :  { %5862 = vmatpush1.bf16.msra.mxu0 %v7921_v29  ;;  %5371 = vmatprep.subr.bf16.mxu1 %v7926_v39  ;;  %v8017_v29 = vld [vmem:[%s10926_s1 + $0x15d4] ss:$8 sps:$4 sm:$0xff]   ;;  %v8012_v39 = vld [vmem:[%s10926_s1 + $0x9d0] ss:$8 sps:$4 sm:$0xff]  }
 0x23d   :  { %5863 = vmatprep.subr.bf16.mxu0 %v7929_v51  ;;  %v8015_v51 = vld [vmem:[%s10926_s1 + $0x15d0] ss:$8 sps:$4 sm:$0xff]  }
 0x23f   :  { %5372 = vmatpush1.bf16.msra.mxu1 %v7924_v54  ;;  %v8020_v54 = vld [vmem:[%s10926_s1 + $0x9e4] ss:$8 sps:$4 sm:$0xff]  }
 0x240   :  { %5864 = vmatpush1.bf16.msra.mxu0 %v7927_v33  ;;  %5382 = vmatprep.subr.bf16.mxu1 %v7934_v45  ;;  %v8023_v33 = vld [vmem:[%s10926_s1 + $0x15e4] ss:$8 sps:$4 sm:$0xff]   ;;  %v8018_v45 = vld [vmem:[%s10926_s1 + $0x9e0] ss:$8 sps:$4 sm:$0xff]  }
 0x241   :  { %5874 = vmatprep.subr.bf16.mxu0 %v7939_v55  ;;  %v8021_v55 = vld [vmem:[%s10926_s1 + $0x15e0] ss:$8 sps:$4 sm:$0xff]  }
 0x242   :  { %5374 = vmatmul.mubr.bf16.vlgmr.msra.gmra.mrb[0].mxu1 %v6105_v56  ;;  %v8026_v56 = vld [vmem:[%s10926_s1 + $0x9f4] ss:$8 sps:$4 sm:$0xff]  }
 0x243   :  { %5866 = vmatmul.mubr.bf16.vlgmr.msra.gmra.mrb[0].mxu0 %v6129_v57  ;;  %5383 = vmatpush1.bf16.msra.mxu1 %v7932_v60  ;;  %v8029_v57 = vld [vmem:[%s10926_s1 + $0x15f4] ss:$8 sps:$4 sm:$0xff]   ;;  %v8024_v60 = vld [vmem:[%s10926_s1 + $0x9f0] ss:$8 sps:$4 sm:$0xff]  }
 0x244   :  { %5875 = vmatpush1.bf16.msra.mxu0 %v7937_v52  ;;  %5384 = vmatprep.subr.bf16.mxu1 %v7942_v53  ;;  %v8027_v52 = vld [vmem:[%s10926_s1 + $0x15f0] ss:$8 sps:$4 sm:$0xff]   ;;  %v8034_v53 = vld [vmem:[%s10926_s1 + $0xa04] ss:$8 sps:$4 sm:$0xff]  }
 0x245   :  { %5876 = vmatprep.subr.bf16.mxu0 %v7945_v61  ;;  %5414 = vmatprep.mubr.bf16.mxu1 %v6108_v62  ;;  %v8039_v61 = vld [vmem:[%s10926_s1 + $0x1604] ss:$8 sps:$4 sm:$0xff]   ;;  %v6107_v62 = vcombine.low %v10191_v58, %v10191_v58  ;;  %v8037_v58 = vld [vmem:[%s10926_s1 + $0x1600] ss:$8 sps:$4 sm:$0xff]  }
 0x246   :  { %5906 = vmatprep.mubr.bf16.mxu0 %v6132_v63  ;;  %v6131_v63 = vcombine.low %v10196_v59, %v10196_v59  ;;  %v8042_v59 = vld [vmem:[%s10926_s1 + $0xa14] ss:$8 sps:$4 sm:$0xff]  }
 0x247   :  { %5385 = vmatpush1.bf16.msra.mxu1 %v7940_v0  ;;  %v10401_v0 = vld [vmem:[%s10927_s0 + $0x50] sm:$0xff] }
 0x248   :  { %5877 = vmatpush1.bf16.msra.mxu0 %v7943_v1  ;;  %5386 = vmatprep.subr.bf16.mxu1 %v7948_v2  ;;  %v10406_v1 = vld [vmem:[%s10927_s0 + $0xb0] sm:$0xff]  ;;  %v8032_v2 = vld [vmem:[%s10926_s1 + $0xa00] ss:$8 sps:$4 sm:$0xff]  }
 0x249   :  { %5878 = vmatprep.subr.bf16.mxu0 %v7951_v3  ;;  %v8045_v3 = vld [vmem:[%s10926_s1 + $0x1614] ss:$8 sps:$4 sm:$0xff]  }
 0x24b   :  { %5387 = vmatpush1.bf16.msra.mxu1 %v7946_v4  ;;  %v6110_v4 = vcombine.high %v10401_v0, %v10401_v0 }
 0x24c   :  { %5879 = vmatpush1.bf16.msra.mxu0 %v7949_v5  ;;  %5388 = vmatprep.subr.bf16.mxu1 %v7954_v6  ;;  %v6134_v5 = vcombine.high %v10406_v1, %v10406_v1  ;;  %v8040_v6 = vld [vmem:[%s10926_s1 + $0xa10] ss:$8 sps:$4 sm:$0xff]  }
 0x24d   :  { %5880 = vmatprep.subr.bf16.mxu0 %v7957_v7  ;;  %v8043_v7 = vld [vmem:[%s10926_s1 + $0x1610] ss:$8 sps:$4 sm:$0xff]  }
 0x24f   :  { %5389 = vmatpush1.bf16.msra.mxu1 %v7952_v8  ;;  %v8048_v8 = vld [vmem:[%s10926_s1 + $0xa24] ss:$8 sps:$4 sm:$0xff]  }
 0x250   :  { %5881 = vmatpush1.bf16.msra.mxu0 %v7955_v9  ;;  %5390 = vmatprep.subr.bf16.mxu1 %v7960_v10  ;;  %v8051_v9 = vld [vmem:[%s10926_s1 + $0x1624] ss:$8 sps:$4 sm:$0xff]   ;;  %v8046_v10 = vld [vmem:[%s10926_s1 + $0xa20] ss:$8 sps:$4 sm:$0xff]  }
 0x251   :  { %5882 = vmatprep.subr.bf16.mxu0 %v7963_v11  ;;  %v8049_v11 = vld [vmem:[%s10926_s1 + $0x1620] ss:$8 sps:$4 sm:$0xff]  }
 0x253   :  { %5391 = vmatpush1.bf16.msra.mxu1 %v7958_v12  ;;  %v8054_v12 = vld [vmem:[%s10926_s1 + $0xa34] ss:$8 sps:$4 sm:$0xff]  }
 0x254   :  { %5883 = vmatpush1.bf16.msra.mxu0 %v7961_v13  ;;  %5392 = vmatprep.subr.bf16.mxu1 %v7966_v14  ;;  %v8057_v13 = vld [vmem:[%s10926_s1 + $0x1634] ss:$8 sps:$4 sm:$0xff]   ;;  %v8052_v14 = vld [vmem:[%s10926_s1 + $0xa30] ss:$8 sps:$4 sm:$0xff]  }
 0x255   :  { %5884 = vmatprep.subr.bf16.mxu0 %v7969_v15  ;;  %v8055_v15 = vld [vmem:[%s10926_s1 + $0x1630] ss:$8 sps:$4 sm:$0xff]  }
 0x257   :  { %5393 = vmatpush1.bf16.msra.mxu1 %v7964_v16  ;;  %v8060_v16 = vld [vmem:[%s10926_s1 + $0xa44] ss:$8 sps:$4 sm:$0xff]  }
 0x258   :  { %5885 = vmatpush1.bf16.msra.mxu0 %v7967_v17  ;;  %5394 = vmatprep.subr.bf16.mxu1 %v7972_v19  ;;  %v8063_v17 = vld [vmem:[%s10926_s1 + $0x1644] ss:$8 sps:$4 sm:$0xff]   ;;  %v8058_v19 = vld [vmem:[%s10926_s1 + $0xa40] ss:$8 sps:$4 sm:$0xff]  }
 0x259   :  { %5886 = vmatprep.subr.bf16.mxu0 %v7975_v21  ;;  %v8061_v21 = vld [vmem:[%s10926_s1 + $0x1640] ss:$8 sps:$4 sm:$0xff]  }
 0x25b   :  { %5395 = vmatpush1.bf16.msra.mxu1 %v7970_v22  ;;  %v8066_v22 = vld [vmem:[%s10926_s1 + $0xa54] ss:$8 sps:$4 sm:$0xff]  }
 0x25c   :  { %5887 = vmatpush1.bf16.msra.mxu0 %v7973_v23  ;;  %5396 = vmatprep.subr.bf16.mxu1 %v7978_v26  ;;  %v8069_v23 = vld [vmem:[%s10926_s1 + $0x1654] ss:$8 sps:$4 sm:$0xff]   ;;  %v8064_v26 = vld [vmem:[%s10926_s1 + $0xa50] ss:$8 sps:$4 sm:$0xff]  }
 0x25d   :  { %5888 = vmatprep.subr.bf16.mxu0 %v7981_v18  ;;  %v8067_v18 = vld [vmem:[%s10926_s1 + $0x1650] ss:$8 sps:$4 sm:$0xff]  }
 0x25f   :  { %5397 = vmatpush1.bf16.msra.mxu1 %v7976_v27  ;;  %v8072_v27 = vld [vmem:[%s10926_s1 + $0xa64] ss:$8 sps:$4 sm:$0xff]  }
 0x260   :  { %5889 = vmatpush1.bf16.msra.mxu0 %v7979_v28  ;;  %5398 = vmatprep.subr.bf16.mxu1 %v7984_v30  ;;  %v8075_v28 = vld [vmem:[%s10926_s1 + $0x1664] ss:$8 sps:$4 sm:$0xff]   ;;  %v8070_v30 = vld [vmem:[%s10926_s1 + $0xa60] ss:$8 sps:$4 sm:$0xff]  }
 0x261   :  { %5890 = vmatprep.subr.bf16.mxu0 %v7987_v31  ;;  %v8073_v31 = vld [vmem:[%s10926_s1 + $0x1660] ss:$8 sps:$4 sm:$0xff]  }
 0x263   :  { %5399 = vmatpush1.bf16.msra.mxu1 %v7982_v24  ;;  %v8078_v24 = vld [vmem:[%s10926_s1 + $0xa74] ss:$8 sps:$4 sm:$0xff]  }
 0x264   :  { %5891 = vmatpush1.bf16.msra.mxu0 %v7985_v25  ;;  %5400 = vmatprep.subr.bf16.mxu1 %v7990_v34  ;;  %v8081_v25 = vld [vmem:[%s10926_s1 + $0x1674] ss:$8 sps:$4 sm:$0xff]   ;;  %v8076_v34 = vld [vmem:[%s10926_s1 + $0xa70] ss:$8 sps:$4 sm:$0xff]  }
 0x265   :  { %5892 = vmatprep.subr.bf16.mxu0 %v7993_v35  ;;  %v8079_v35 = vld [vmem:[%s10926_s1 + $0x1670] ss:$8 sps:$4 sm:$0xff]  }
 0x267   :  { %5401 = vmatpush1.bf16.msra.mxu1 %v7988_v36  ;;  %v8084_v36 = vld [vmem:[%s10926_s1 + $0xa84] ss:$8 sps:$4 sm:$0xff]  }
 0x268   :  { %5893 = vmatpush1.bf16.msra.mxu0 %v7991_v37  ;;  %5402 = vmatprep.subr.bf16.mxu1 %v7996_v38  ;;  %v8087_v37 = vld [vmem:[%s10926_s1 + $0x1684] ss:$8 sps:$4 sm:$0xff]   ;;  %v8082_v38 = vld [vmem:[%s10926_s1 + $0xa80] ss:$8 sps:$4 sm:$0xff]  }
 0x269   :  { %5894 = vmatprep.subr.bf16.mxu0 %v7999_v20  ;;  %v8085_v20 = vld [vmem:[%s10926_s1 + $0x1680] ss:$8 sps:$4 sm:$0xff]  }
 0x26b   :  { %5403 = vmatpush1.bf16.msra.mxu1 %v7994_v40  ;;  %v8090_v40 = vld [vmem:[%s10926_s1 + $0xa94] ss:$8 sps:$4 sm:$0xff]  }
 0x26c   :  { %5895 = vmatpush1.bf16.msra.mxu0 %v7997_v41  ;;  %5404 = vmatprep.subr.bf16.mxu1 %v8002_v42  ;;  %v8093_v41 = vld [vmem:[%s10926_s1 + $0x1694] ss:$8 sps:$4 sm:$0xff]   ;;  %v8088_v42 = vld [vmem:[%s10926_s1 + $0xa90] ss:$8 sps:$4 sm:$0xff]  }
 0x26d   :  { %5896 = vmatprep.subr.bf16.mxu0 %v8005_v43  ;;  %v8091_v43 = vld [vmem:[%s10926_s1 + $0x1690] ss:$8 sps:$4 sm:$0xff]  }
 0x26f   :  { %5405 = vmatpush1.bf16.msra.mxu1 %v8000_v44  ;;  %v8096_v44 = vld [vmem:[%s10926_s1 + $0xaa4] ss:$8 sps:$4 sm:$0xff]  }
 0x270   :  { %5897 = vmatpush1.bf16.msra.mxu0 %v8003_v32  ;;  %5406 = vmatprep.subr.bf16.mxu1 %v8008_v46  ;;  %v8099_v32 = vld [vmem:[%s10926_s1 + $0x16a4] ss:$8 sps:$4 sm:$0xff]   ;;  %v8094_v46 = vld [vmem:[%s10926_s1 + $0xaa0] ss:$8 sps:$4 sm:$0xff]  }
 0x271   :  { %5898 = vmatprep.subr.bf16.mxu0 %v8011_v47  ;;  %v8097_v47 = vld [vmem:[%s10926_s1 + $0x16a0] ss:$8 sps:$4 sm:$0xff]  }
 0x273   :  { %5407 = vmatpush1.bf16.msra.mxu1 %v8006_v48  ;;  %v8102_v48 = vld [vmem:[%s10926_s1 + $0xab4] ss:$8 sps:$4 sm:$0xff]  }
 0x274   :  { %5899 = vmatpush1.bf16.msra.mxu0 %v8009_v49  ;;  %5408 = vmatprep.subr.bf16.mxu1 %v8014_v50  ;;  %v8105_v49 = vld [vmem:[%s10926_s1 + $0x16b4] ss:$8 sps:$4 sm:$0xff]   ;;  %v8100_v50 = vld [vmem:[%s10926_s1 + $0xab0] ss:$8 sps:$4 sm:$0xff]  }
 0x275   :  { %5900 = vmatprep.subr.bf16.mxu0 %v8017_v29  ;;  %v8103_v29 = vld [vmem:[%s10926_s1 + $0x16b0] ss:$8 sps:$4 sm:$0xff]  }
 0x277   :  { %5409 = vmatpush1.bf16.msra.mxu1 %v8012_v39  ;;  %v8108_v39 = vld [vmem:[%s10926_s1 + $0xac4] ss:$8 sps:$4 sm:$0xff]  }
 0x278   :  { %5901 = vmatpush1.bf16.msra.mxu0 %v8015_v51  ;;  %5410 = vmatprep.subr.bf16.mxu1 %v8020_v54  ;;  %v8111_v51 = vld [vmem:[%s10926_s1 + $0x16c4] ss:$8 sps:$4 sm:$0xff]   ;;  %v8106_v54 = vld [vmem:[%s10926_s1 + $0xac0] ss:$8 sps:$4 sm:$0xff]  }
 0x279   :  { %5902 = vmatprep.subr.bf16.mxu0 %v8023_v33  ;;  %v8109_v33 = vld [vmem:[%s10926_s1 + $0x16c0] ss:$8 sps:$4 sm:$0xff]  }
 0x27b   :  { %5411 = vmatpush1.bf16.msra.mxu1 %v8018_v45  ;;  %v8114_v45 = vld [vmem:[%s10926_s1 + $0xad4] ss:$8 sps:$4 sm:$0xff]  }
 0x27c   :  { %5903 = vmatpush1.bf16.msra.mxu0 %v8021_v55  ;;  %5412 = vmatprep.subr.bf16.mxu1 %v8026_v56  ;;  %v8117_v55 = vld [vmem:[%s10926_s1 + $0x16d4] ss:$8 sps:$4 sm:$0xff]   ;;  %v8112_v56 = vld [vmem:[%s10926_s1 + $0xad0] ss:$8 sps:$4 sm:$0xff]  }
 0x27d   :  { %5904 = vmatprep.subr.bf16.mxu0 %v8029_v57  ;;  %v8115_v57 = vld [vmem:[%s10926_s1 + $0x16d0] ss:$8 sps:$4 sm:$0xff]  }
 0x27f   :  { %5413 = vmatpush1.bf16.msra.mxu1 %v8024_v60  ;;  %v8120_v60 = vld [vmem:[%s10926_s1 + $0xae4] ss:$8 sps:$4 sm:$0xff]  }
 0x280   :  { %5905 = vmatpush1.bf16.msra.mxu0 %v8027_v52  ;;  %5423 = vmatprep.subr.bf16.mxu1 %v8034_v53  ;;  %v8123_v52 = vld [vmem:[%s10926_s1 + $0x16e4] ss:$8 sps:$4 sm:$0xff]   ;;  %v8118_v53 = vld [vmem:[%s10926_s1 + $0xae0] ss:$8 sps:$4 sm:$0xff]  }
 0x281   :  { %5915 = vmatprep.subr.bf16.mxu0 %v8039_v61  ;;  %v8121_v61 = vld [vmem:[%s10926_s1 + $0x16e0] ss:$8 sps:$4 sm:$0xff]  }
 0x282   :  { %5415 = vmatmul.mubr.bf16.vlgmr.msra.gmra.mrb[0].mxu1 %v6107_v62  ;;  %v8126_v62 = vld [vmem:[%s10926_s1 + $0xaf4] ss:$8 sps:$4 sm:$0xff]  }
 0x283   :  { %5907 = vmatmul.mubr.bf16.vlgmr.msra.gmra.mrb[0].mxu0 %v6131_v63  ;;  %5424 = vmatpush1.bf16.msra.mxu1 %v8032_v2  ;;  %v8129_v63 = vld [vmem:[%s10926_s1 + $0x16f4] ss:$8 sps:$4 sm:$0xff]   ;;  %v8124_v2 = vld [vmem:[%s10926_s1 + $0xaf0] ss:$8 sps:$4 sm:$0xff]  }
 0x284   :  { %5916 = vmatpush1.bf16.msra.mxu0 %v8037_v58  ;;  %5425 = vmatprep.subr.bf16.mxu1 %v8042_v59  ;;  %v8127_v58 = vld [vmem:[%s10926_s1 + $0x16f0] ss:$8 sps:$4 sm:$0xff]   ;;  %v8134_v59 = vld [vmem:[%s10926_s1 + $0xb04] ss:$8 sps:$4 sm:$0xff]  }
 0x285   :  { %5917 = vmatprep.subr.bf16.mxu0 %v8045_v3  ;;  %5455 = vmatprep.mubr.bf16.mxu1 %v6110_v4  ;;  %v8139_v3 = vld [vmem:[%s10926_s1 + $0x1704] ss:$8 sps:$4 sm:$0xff]   ;;  %v6109_v4 = vcombine.low %v10401_v0, %v10401_v0  ;;  %v8137_v0 = vld [vmem:[%s10926_s1 + $0x1700] ss:$8 sps:$4 sm:$0xff]  }
 0x286   :  { %5947 = vmatprep.mubr.bf16.mxu0 %v6134_v5  ;;  %v6133_v5 = vcombine.low %v10406_v1, %v10406_v1  ;;  %v8142_v1 = vld [vmem:[%s10926_s1 + $0xb14] ss:$8 sps:$4 sm:$0xff]  }
 0x287   :  { %5426 = vmatpush1.bf16.msra.mxu1 %v8040_v6  ;;  %v10611_v6 = vld [vmem:[%s10927_s0 + $0x58] sm:$0xff] }
 0x288   :  { %5918 = vmatpush1.bf16.msra.mxu0 %v8043_v7  ;;  %5427 = vmatprep.subr.bf16.mxu1 %v8048_v8  ;;  %v10616_v7 = vld [vmem:[%s10927_s0 + $0xb8] sm:$0xff]  ;;  %v8132_v8 = vld [vmem:[%s10926_s1 + $0xb00] ss:$8 sps:$4 sm:$0xff]  }
 0x289   :  { %5919 = vmatprep.subr.bf16.mxu0 %v8051_v9  ;;  %v8145_v9 = vld [vmem:[%s10926_s1 + $0x1714] ss:$8 sps:$4 sm:$0xff]  }
 0x28b   :  { %5428 = vmatpush1.bf16.msra.mxu1 %v8046_v10  ;;  %v6112_v10 = vcombine.high %v10611_v6, %v10611_v6 }
 0x28c   :  { %5920 = vmatpush1.bf16.msra.mxu0 %v8049_v11  ;;  %5429 = vmatprep.subr.bf16.mxu1 %v8054_v12  ;;  %v6136_v11 = vcombine.high %v10616_v7, %v10616_v7  ;;  %v8140_v12 = vld [vmem:[%s10926_s1 + $0xb10] ss:$8 sps:$4 sm:$0xff]  }
 0x28d   :  { %5921 = vmatprep.subr.bf16.mxu0 %v8057_v13  ;;  %v8143_v13 = vld [vmem:[%s10926_s1 + $0x1710] ss:$8 sps:$4 sm:$0xff]  }
 0x28f   :  { %5430 = vmatpush1.bf16.msra.mxu1 %v8052_v14  ;;  %v8148_v14 = vld [vmem:[%s10926_s1 + $0xb24] ss:$8 sps:$4 sm:$0xff]  }
 0x290   :  { %5922 = vmatpush1.bf16.msra.mxu0 %v8055_v15  ;;  %5431 = vmatprep.subr.bf16.mxu1 %v8060_v16  ;;  %v8151_v15 = vld [vmem:[%s10926_s1 + $0x1724] ss:$8 sps:$4 sm:$0xff]   ;;  %v8146_v16 = vld [vmem:[%s10926_s1 + $0xb20] ss:$8 sps:$4 sm:$0xff]  }
 0x291   :  { %5923 = vmatprep.subr.bf16.mxu0 %v8063_v17  ;;  %v8149_v17 = vld [vmem:[%s10926_s1 + $0x1720] ss:$8 sps:$4 sm:$0xff]  }
 0x293   :  { %5432 = vmatpush1.bf16.msra.mxu1 %v8058_v19  ;;  %v8154_v19 = vld [vmem:[%s10926_s1 + $0xb34] ss:$8 sps:$4 sm:$0xff]  }
 0x294   :  { %5924 = vmatpush1.bf16.msra.mxu0 %v8061_v21  ;;  %5433 = vmatprep.subr.bf16.mxu1 %v8066_v22  ;;  %v8157_v21 = vld [vmem:[%s10926_s1 + $0x1734] ss:$8 sps:$4 sm:$0xff]   ;;  %v8152_v22 = vld [vmem:[%s10926_s1 + $0xb30] ss:$8 sps:$4 sm:$0xff]  }
 0x295   :  { %5925 = vmatprep.subr.bf16.mxu0 %v8069_v23  ;;  %v8155_v23 = vld [vmem:[%s10926_s1 + $0x1730] ss:$8 sps:$4 sm:$0xff]  }
 0x297   :  { %5434 = vmatpush1.bf16.msra.mxu1 %v8064_v26  ;;  %v8160_v26 = vld [vmem:[%s10926_s1 + $0xb44] ss:$8 sps:$4 sm:$0xff]  }
 0x298   :  { %5926 = vmatpush1.bf16.msra.mxu0 %v8067_v18  ;;  %5435 = vmatprep.subr.bf16.mxu1 %v8072_v27  ;;  %v8163_v18 = vld [vmem:[%s10926_s1 + $0x1744] ss:$8 sps:$4 sm:$0xff]   ;;  %v8158_v27 = vld [vmem:[%s10926_s1 + $0xb40] ss:$8 sps:$4 sm:$0xff]  }
 0x299   :  { %5927 = vmatprep.subr.bf16.mxu0 %v8075_v28  ;;  %v8161_v28 = vld [vmem:[%s10926_s1 + $0x1740] ss:$8 sps:$4 sm:$0xff]  }
 0x29b   :  { %5436 = vmatpush1.bf16.msra.mxu1 %v8070_v30  ;;  %v8166_v30 = vld [vmem:[%s10926_s1 + $0xb54] ss:$8 sps:$4 sm:$0xff]  }
 0x29c   :  { %5928 = vmatpush1.bf16.msra.mxu0 %v8073_v31  ;;  %5437 = vmatprep.subr.bf16.mxu1 %v8078_v24  ;;  %v8169_v31 = vld [vmem:[%s10926_s1 + $0x1754] ss:$8 sps:$4 sm:$0xff]   ;;  %v8164_v24 = vld [vmem:[%s10926_s1 + $0xb50] ss:$8 sps:$4 sm:$0xff]  }
 0x29d   :  { %5929 = vmatprep.subr.bf16.mxu0 %v8081_v25  ;;  %v8167_v25 = vld [vmem:[%s10926_s1 + $0x1750] ss:$8 sps:$4 sm:$0xff]  }
 0x29f   :  { %5438 = vmatpush1.bf16.msra.mxu1 %v8076_v34  ;;  %v8172_v34 = vld [vmem:[%s10926_s1 + $0xb64] ss:$8 sps:$4 sm:$0xff]  }
 0x2a0   :  { %5930 = vmatpush1.bf16.msra.mxu0 %v8079_v35  ;;  %5439 = vmatprep.subr.bf16.mxu1 %v8084_v36  ;;  %v8175_v35 = vld [vmem:[%s10926_s1 + $0x1764] ss:$8 sps:$4 sm:$0xff]   ;;  %v8170_v36 = vld [vmem:[%s10926_s1 + $0xb60] ss:$8 sps:$4 sm:$0xff]  }
 0x2a1   :  { %5931 = vmatprep.subr.bf16.mxu0 %v8087_v37  ;;  %v8173_v37 = vld [vmem:[%s10926_s1 + $0x1760] ss:$8 sps:$4 sm:$0xff]  }
 0x2a3   :  { %5440 = vmatpush1.bf16.msra.mxu1 %v8082_v38  ;;  %v8178_v38 = vld [vmem:[%s10926_s1 + $0xb74] ss:$8 sps:$4 sm:$0xff]  }
 0x2a4   :  { %5932 = vmatpush1.bf16.msra.mxu0 %v8085_v20  ;;  %5441 = vmatprep.subr.bf16.mxu1 %v8090_v40  ;;  %v8181_v20 = vld [vmem:[%s10926_s1 + $0x1774] ss:$8 sps:$4 sm:$0xff]   ;;  %v8176_v40 = vld [vmem:[%s10926_s1 + $0xb70] ss:$8 sps:$4 sm:$0xff]  }
 0x2a5   :  { %5933 = vmatprep.subr.bf16.mxu0 %v8093_v41  ;;  %v8179_v41 = vld [vmem:[%s10926_s1 + $0x1770] ss:$8 sps:$4 sm:$0xff]  }
 0x2a7   :  { %5442 = vmatpush1.bf16.msra.mxu1 %v8088_v42  ;;  %v8184_v42 = vld [vmem:[%s10926_s1 + $0xb84] ss:$8 sps:$4 sm:$0xff]  }
 0x2a8   :  { %5934 = vmatpush1.bf16.msra.mxu0 %v8091_v43  ;;  %5443 = vmatprep.subr.bf16.mxu1 %v8096_v44  ;;  %v8187_v43 = vld [vmem:[%s10926_s1 + $0x1784] ss:$8 sps:$4 sm:$0xff]   ;;  %v8182_v44 = vld [vmem:[%s10926_s1 + $0xb80] ss:$8 sps:$4 sm:$0xff]  }
 0x2a9   :  { %5935 = vmatprep.subr.bf16.mxu0 %v8099_v32  ;;  %v8185_v32 = vld [vmem:[%s10926_s1 + $0x1780] ss:$8 sps:$4 sm:$0xff]  }
 0x2ab   :  { %5444 = vmatpush1.bf16.msra.mxu1 %v8094_v46  ;;  %v8190_v46 = vld [vmem:[%s10926_s1 + $0xb94] ss:$8 sps:$4 sm:$0xff]  }
 0x2ac   :  { %5936 = vmatpush1.bf16.msra.mxu0 %v8097_v47  ;;  %5445 = vmatprep.subr.bf16.mxu1 %v8102_v48  ;;  %v8193_v47 = vld [vmem:[%s10926_s1 + $0x1794] ss:$8 sps:$4 sm:$0xff]   ;;  %v8188_v48 = vld [vmem:[%s10926_s1 + $0xb90] ss:$8 sps:$4 sm:$0xff]  }
 0x2ad   :  { %5937 = vmatprep.subr.bf16.mxu0 %v8105_v49  ;;  %v8191_v49 = vld [vmem:[%s10926_s1 + $0x1790] ss:$8 sps:$4 sm:$0xff]  }
 0x2af   :  { %5446 = vmatpush1.bf16.msra.mxu1 %v8100_v50  ;;  %v8196_v50 = vld [vmem:[%s10926_s1 + $0xba4] ss:$8 sps:$4 sm:$0xff]  }
 0x2b0   :  { %5938 = vmatpush1.bf16.msra.mxu0 %v8103_v29  ;;  %5447 = vmatprep.subr.bf16.mxu1 %v8108_v39  ;;  %v8199_v29 = vld [vmem:[%s10926_s1 + $0x17a4] ss:$8 sps:$4 sm:$0xff]   ;;  %v8194_v39 = vld [vmem:[%s10926_s1 + $0xba0] ss:$8 sps:$4 sm:$0xff]  }
 0x2b1   :  { %5939 = vmatprep.subr.bf16.mxu0 %v8111_v51  ;;  %v8197_v51 = vld [vmem:[%s10926_s1 + $0x17a0] ss:$8 sps:$4 sm:$0xff]  }
 0x2b3   :  { %5448 = vmatpush1.bf16.msra.mxu1 %v8106_v54  ;;  %v8202_v54 = vld [vmem:[%s10926_s1 + $0xbb4] ss:$8 sps:$4 sm:$0xff]  }
 0x2b4   :  { %5940 = vmatpush1.bf16.msra.mxu0 %v8109_v33  ;;  %5449 = vmatprep.subr.bf16.mxu1 %v8114_v45  ;;  %v8205_v33 = vld [vmem:[%s10926_s1 + $0x17b4] ss:$8 sps:$4 sm:$0xff]   ;;  %v8200_v45 = vld [vmem:[%s10926_s1 + $0xbb0] ss:$8 sps:$4 sm:$0xff]  }
 0x2b5   :  { %5941 = vmatprep.subr.bf16.mxu0 %v8117_v55  ;;  %v8203_v55 = vld [vmem:[%s10926_s1 + $0x17b0] ss:$8 sps:$4 sm:$0xff]  }
 0x2b7   :  { %5450 = vmatpush1.bf16.msra.mxu1 %v8112_v56  ;;  %v8208_v56 = vld [vmem:[%s10926_s1 + $0xbc4] ss:$8 sps:$4 sm:$0xff]  }
 0x2b8   :  { %5942 = vmatpush1.bf16.msra.mxu0 %v8115_v57  ;;  %5451 = vmatprep.subr.bf16.mxu1 %v8120_v60  ;;  %v8211_v57 = vld [vmem:[%s10926_s1 + $0x17c4] ss:$8 sps:$4 sm:$0xff]   ;;  %v8206_v60 = vld [vmem:[%s10926_s1 + $0xbc0] ss:$8 sps:$4 sm:$0xff]  }
 0x2b9   :  { %5943 = vmatprep.subr.bf16.mxu0 %v8123_v52  ;;  %v8209_v52 = vld [vmem:[%s10926_s1 + $0x17c0] ss:$8 sps:$4 sm:$0xff]  }
 0x2bb   :  { %5452 = vmatpush1.bf16.msra.mxu1 %v8118_v53  ;;  %v8214_v53 = vld [vmem:[%s10926_s1 + $0xbd4] ss:$8 sps:$4 sm:$0xff]  }
 0x2bc   :  { %5944 = vmatpush1.bf16.msra.mxu0 %v8121_v61  ;;  %5453 = vmatprep.subr.bf16.mxu1 %v8126_v62  ;;  %v8217_v61 = vld [vmem:[%s10926_s1 + $0x17d4] ss:$8 sps:$4 sm:$0xff]   ;;  %v8212_v62 = vld [vmem:[%s10926_s1 + $0xbd0] ss:$8 sps:$4 sm:$0xff]  }
 0x2bd   :  { %5945 = vmatprep.subr.bf16.mxu0 %v8129_v63  ;;  %v8215_v63 = vld [vmem:[%s10926_s1 + $0x17d0] ss:$8 sps:$4 sm:$0xff]  }
 0x2bf   :  { %5454 = vmatpush1.bf16.msra.mxu1 %v8124_v2  ;;  %v8220_v2 = vld [vmem:[%s10926_s1 + $0xbe4] ss:$8 sps:$4 sm:$0xff]  }
 0x2c0   :  { %5946 = vmatpush1.bf16.msra.mxu0 %v8127_v58  ;;  %5464 = vmatprep.subr.bf16.mxu1 %v8134_v59  ;;  %v8223_v58 = vld [vmem:[%s10926_s1 + $0x17e4] ss:$8 sps:$4 sm:$0xff]   ;;  %v8218_v59 = vld [vmem:[%s10926_s1 + $0xbe0] ss:$8 sps:$4 sm:$0xff]  }
 0x2c1   :  { %5956 = vmatprep.subr.bf16.mxu0 %v8139_v3  ;;  %v8221_v3 = vld [vmem:[%s10926_s1 + $0x17e0] ss:$8 sps:$4 sm:$0xff]  }
 0x2c2   :  { %5456 = vmatmul.mubr.bf16.vlgmr.msra.gmra.mrb[0].mxu1 %v6109_v4  ;;  %v8226_v4 = vld [vmem:[%s10926_s1 + $0xbf4] ss:$8 sps:$4 sm:$0xff]  }
 0x2c3   :  { %5948 = vmatmul.mubr.bf16.vlgmr.msra.gmra.mrb[0].mxu0 %v6133_v5  ;;  %5465 = vmatpush1.bf16.msra.mxu1 %v8132_v8  ;;  %v8229_v5 = vld [vmem:[%s10926_s1 + $0x17f4] ss:$8 sps:$4 sm:$0xff]   ;;  %v8224_v8 = vld [vmem:[%s10926_s1 + $0xbf0] ss:$8 sps:$4 sm:$0xff]  }
 0x2c4   :  { %5957 = vmatpush1.bf16.msra.mxu0 %v8137_v0  ;;  %5466 = vmatprep.subr.bf16.mxu1 %v8142_v1  ;;  %v8227_v0 = vld [vmem:[%s10926_s1 + $0x17f0] ss:$8 sps:$4 sm:$0xff]   ;;  %v8236_v1 = vld [vmem:[%s10926_s1 + $0x1804] ss:$8 sps:$4 sm:$0xff]  }
 0x2c5   :  { %5958 = vmatprep.subr.bf16.mxu0 %v8145_v9  ;;  %5496 = vmatprep.mubr.bf16.mxu1 %v6112_v10  ;;  %v10814_v9 = vld [vmem:[%s10927_s0 + $0xc0] sm:$0xff]  ;;  %v6111_v10 = vcombine.low %v10611_v6, %v10611_v6  ;;  %v8237_v6 = vld [vmem:[%s10926_s1 + $0x1810] ss:$8 sps:$4 sm:$0xff]  }
 0x2c6   :  { %5988 = vmatprep.mubr.bf16.mxu0 %v6136_v11  ;;  %v6135_v11 = vcombine.low %v10616_v7, %v10616_v7  ;;  %v8242_v7 = vld [vmem:[%s10926_s1 + $0x1824] ss:$8 sps:$4 sm:$0xff]  }
 0x2c7   :  { %5467 = vmatpush1.bf16.msra.mxu1 %v8140_v12  ;;  %v8234_v12 = vld [vmem:[%s10926_s1 + $0x1800] ss:$8 sps:$4 sm:$0xff]  }
 0x2c8   :  { %5959 = vmatpush1.bf16.msra.mxu0 %v8143_v13  ;;  %5468 = vmatprep.subr.bf16.mxu1 %v8148_v14  ;;  %v6138_v13 = vcombine.high %v10814_v9, %v10814_v9  ;;  %v8239_v14 = vld [vmem:[%s10926_s1 + $0x1814] ss:$8 sps:$4 sm:$0xff]  }
 0x2c9   :  { %5960 = vmatprep.subr.bf16.mxu0 %v8151_v15  ;;  %v8240_v15 = vld [vmem:[%s10926_s1 + $0x1820] ss:$8 sps:$4 sm:$0xff]  }
 0x2cb   :  { %5469 = vmatpush1.bf16.msra.mxu1 %v8146_v16  ;;  %v8245_v16 = vld [vmem:[%s10926_s1 + $0x1834] ss:$8 sps:$4 sm:$0xff]  }
 0x2cc   :  { %5961 = vmatpush1.bf16.msra.mxu0 %v8149_v17  ;;  %5470 = vmatprep.subr.bf16.mxu1 %v8154_v19  ;;  %v8243_v17 = vld [vmem:[%s10926_s1 + $0x1830] ss:$8 sps:$4 sm:$0xff]   ;;  %v8248_v19 = vld [vmem:[%s10926_s1 + $0x1844] ss:$8 sps:$4 sm:$0xff]  }
 0x2cd   :  { %5962 = vmatprep.subr.bf16.mxu0 %v8157_v21  ;;  %v8246_v21 = vld [vmem:[%s10926_s1 + $0x1840] ss:$8 sps:$4 sm:$0xff]  }
 0x2cf   :  { %5471 = vmatpush1.bf16.msra.mxu1 %v8152_v22  ;;  %v8251_v22 = vld [vmem:[%s10926_s1 + $0x1854] ss:$8 sps:$4 sm:$0xff]  }
 0x2d0   :  { %5963 = vmatpush1.bf16.msra.mxu0 %v8155_v23  ;;  %5472 = vmatprep.subr.bf16.mxu1 %v8160_v26  ;;  %v8249_v23 = vld [vmem:[%s10926_s1 + $0x1850] ss:$8 sps:$4 sm:$0xff]   ;;  %v8254_v26 = vld [vmem:[%s10926_s1 + $0x1864] ss:$8 sps:$4 sm:$0xff]  }
 0x2d1   :  { %5964 = vmatprep.subr.bf16.mxu0 %v8163_v18  ;;  %v8252_v18 = vld [vmem:[%s10926_s1 + $0x1860] ss:$8 sps:$4 sm:$0xff]  }
 0x2d3   :  { %5473 = vmatpush1.bf16.msra.mxu1 %v8158_v27  ;;  %v8257_v27 = vld [vmem:[%s10926_s1 + $0x1874] ss:$8 sps:$4 sm:$0xff]  }
 0x2d4   :  { %5965 = vmatpush1.bf16.msra.mxu0 %v8161_v28  ;;  %5474 = vmatprep.subr.bf16.mxu1 %v8166_v30  ;;  %v8255_v28 = vld [vmem:[%s10926_s1 + $0x1870] ss:$8 sps:$4 sm:$0xff]   ;;  %v8260_v30 = vld [vmem:[%s10926_s1 + $0x1884] ss:$8 sps:$4 sm:$0xff]  }
 0x2d5   :  { %5966 = vmatprep.subr.bf16.mxu0 %v8169_v31  ;;  %v8258_v31 = vld [vmem:[%s10926_s1 + $0x1880] ss:$8 sps:$4 sm:$0xff]  }
 0x2d7   :  { %5475 = vmatpush1.bf16.msra.mxu1 %v8164_v24  ;;  %v8263_v24 = vld [vmem:[%s10926_s1 + $0x1894] ss:$8 sps:$4 sm:$0xff]  }
 0x2d8   :  { %5967 = vmatpush1.bf16.msra.mxu0 %v8167_v25  ;;  %5476 = vmatprep.subr.bf16.mxu1 %v8172_v34  ;;  %v8261_v25 = vld [vmem:[%s10926_s1 + $0x1890] ss:$8 sps:$4 sm:$0xff]   ;;  %v8266_v34 = vld [vmem:[%s10926_s1 + $0x18a4] ss:$8 sps:$4 sm:$0xff]  }
 0x2d9   :  { %5968 = vmatprep.subr.bf16.mxu0 %v8175_v35  ;;  %v8264_v35 = vld [vmem:[%s10926_s1 + $0x18a0] ss:$8 sps:$4 sm:$0xff]  }
 0x2db   :  { %5477 = vmatpush1.bf16.msra.mxu1 %v8170_v36  ;;  %v8269_v36 = vld [vmem:[%s10926_s1 + $0x18b4] ss:$8 sps:$4 sm:$0xff]  }
 0x2dc   :  { %5969 = vmatpush1.bf16.msra.mxu0 %v8173_v37  ;;  %5478 = vmatprep.subr.bf16.mxu1 %v8178_v38  ;;  %v8267_v37 = vld [vmem:[%s10926_s1 + $0x18b0] ss:$8 sps:$4 sm:$0xff]   ;;  %v8272_v38 = vld [vmem:[%s10926_s1 + $0x18c4] ss:$8 sps:$4 sm:$0xff]  }
 0x2dd   :  { %5970 = vmatprep.subr.bf16.mxu0 %v8181_v20  ;;  %v8270_v20 = vld [vmem:[%s10926_s1 + $0x18c0] ss:$8 sps:$4 sm:$0xff]  }
 0x2df   :  { %5479 = vmatpush1.bf16.msra.mxu1 %v8176_v40  ;;  %v8275_v40 = vld [vmem:[%s10926_s1 + $0x18d4] ss:$8 sps:$4 sm:$0xff]  }
 0x2e0   :  { %5971 = vmatpush1.bf16.msra.mxu0 %v8179_v41  ;;  %5480 = vmatprep.subr.bf16.mxu1 %v8184_v42  ;;  %v8273_v41 = vld [vmem:[%s10926_s1 + $0x18d0] ss:$8 sps:$4 sm:$0xff]   ;;  %v8278_v42 = vld [vmem:[%s10926_s1 + $0x18e4] ss:$8 sps:$4 sm:$0xff]  }
 0x2e1   :  { %5972 = vmatprep.subr.bf16.mxu0 %v8187_v43  ;;  %v8276_v43 = vld [vmem:[%s10926_s1 + $0x18e0] ss:$8 sps:$4 sm:$0xff]  }
 0x2e3   :  { %5481 = vmatpush1.bf16.msra.mxu1 %v8182_v44  ;;  %v8281_v44 = vld [vmem:[%s10926_s1 + $0x18f4] ss:$8 sps:$4 sm:$0xff]  }
 0x2e4   :  { %5973 = vmatpush1.bf16.msra.mxu0 %v8185_v32  ;;  %5482 = vmatprep.subr.bf16.mxu1 %v8190_v46  ;;  %v8279_v32 = vld [vmem:[%s10926_s1 + $0x18f0] ss:$8 sps:$4 sm:$0xff]   ;;  %v6137_v46 = vcombine.low %v10814_v9, %v10814_v9 }
 0x2e5   :  { %5974 = vmatprep.subr.bf16.mxu0 %v8193_v47 }
 0x2e7   :  { %5483 = vmatpush1.bf16.msra.mxu1 %v8188_v48 }
 0x2e8   :  { %5975 = vmatpush1.bf16.msra.mxu0 %v8191_v49  ;;  %5484 = vmatprep.subr.bf16.mxu1 %v8196_v50 }
 0x2e9   :  { %5976 = vmatprep.subr.bf16.mxu0 %v8199_v29 }
 0x2eb   :  { %5485 = vmatpush1.bf16.msra.mxu1 %v8194_v39 }
 0x2ec   :  { %5977 = vmatpush1.bf16.msra.mxu0 %v8197_v51  ;;  %5486 = vmatprep.subr.bf16.mxu1 %v8202_v54 }
 0x2ed   :  { %5978 = vmatprep.subr.bf16.mxu0 %v8205_v33 }
 0x2ef   :  { %5487 = vmatpush1.bf16.msra.mxu1 %v8200_v45 }
 0x2f0   :  { %5979 = vmatpush1.bf16.msra.mxu0 %v8203_v55  ;;  %5488 = vmatprep.subr.bf16.mxu1 %v8208_v56 }
 0x2f1   :  { %5980 = vmatprep.subr.bf16.mxu0 %v8211_v57 }
 0x2f3   :  { %5489 = vmatpush1.bf16.msra.mxu1 %v8206_v60 }
 0x2f4   :  { %5981 = vmatpush1.bf16.msra.mxu0 %v8209_v52  ;;  %5490 = vmatprep.subr.bf16.mxu1 %v8214_v53 }
 0x2f5   :  { %5982 = vmatprep.subr.bf16.mxu0 %v8217_v61 }
 0x2f7   :  { %5491 = vmatpush1.bf16.msra.mxu1 %v8212_v62 }
 0x2f8   :  { %5983 = vmatpush1.bf16.msra.mxu0 %v8215_v63  ;;  %5492 = vmatprep.subr.bf16.mxu1 %v8220_v2 }
 0x2f9   :  { %5984 = vmatprep.subr.bf16.mxu0 %v8223_v58 }
 0x2fb   :  { %5493 = vmatpush1.bf16.msra.mxu1 %v8218_v59 }
 0x2fc   :  { %5985 = vmatpush1.bf16.msra.mxu0 %v8221_v3  ;;  %5494 = vmatprep.subr.bf16.mxu1 %v8226_v4 }
 0x2fd   :  { %5986 = vmatprep.subr.bf16.mxu0 %v8229_v5 }
 0x2ff   :  { %5495 = vmatpush1.bf16.msra.mxu1 %v8224_v8 }
 0x300   :  { %5987 = vmatpush1.bf16.msra.mxu0 %v8227_v0 }
 0x301   :  { %5997 = vmatprep.subr.bf16.mxu0 %v8236_v1 }
 0x302   :  { %5497 = vmatmul.mubr.bf16.vlgmr.msra.gmra.mrb[0].mxu1 %v6111_v10 }
 0x303   :  { %5989 = vmatmul.mubr.bf16.vlgmr.msra.gmra.mrb[0].mxu0 %v6135_v11 }
 0x304   :  { %5998 = vmatpush1.bf16.msra.mxu0 %v8234_v12  ;;  %6029 = vmatprep.mubr.bf16.mxu0 %v6138_v13 }
 0x305   :  { %5999 = vmatprep.subr.bf16.mxu0 %v8239_v14 }
 0x308   :  { %6000 = vmatpush1.bf16.msra.mxu0 %v8237_v6 }
 0x309   :  { %6001 = vmatprep.subr.bf16.mxu0 %v8242_v7 }
 0x30c   :  { %6002 = vmatpush1.bf16.msra.mxu0 %v8240_v15 }
 0x30d   :  { %6003 = vmatprep.subr.bf16.mxu0 %v8245_v16 }
 0x310   :  { %6004 = vmatpush1.bf16.msra.mxu0 %v8243_v17 }
 0x311   :  { %6005 = vmatprep.subr.bf16.mxu0 %v8248_v19 }
 0x314   :  { %6006 = vmatpush1.bf16.msra.mxu0 %v8246_v21 }
 0x315   :  { %6007 = vmatprep.subr.bf16.mxu0 %v8251_v22 }
 0x318   :  { %6008 = vmatpush1.bf16.msra.mxu0 %v8249_v23 }
 0x319   :  { %6009 = vmatprep.subr.bf16.mxu0 %v8254_v26 }
 0x31c   :  { %6010 = vmatpush1.bf16.msra.mxu0 %v8252_v18 }
 0x31d   :  { %6011 = vmatprep.subr.bf16.mxu0 %v8257_v27 }
 0x320   :  { %6012 = vmatpush1.bf16.msra.mxu0 %v8255_v28 }
 0x321   :  { %6013 = vmatprep.subr.bf16.mxu0 %v8260_v30 }
 0x324   :  { %6014 = vmatpush1.bf16.msra.mxu0 %v8258_v31 }
 0x325   :  { %6015 = vmatprep.subr.bf16.mxu0 %v8263_v24 }
 0x328   :  { %6016 = vmatpush1.bf16.msra.mxu0 %v8261_v25 }
 0x329   :  { %6017 = vmatprep.subr.bf16.mxu0 %v8266_v34 }
 0x32c   :  { %6018 = vmatpush1.bf16.msra.mxu0 %v8264_v35 }
 0x32d   :  { %6019 = vmatprep.subr.bf16.mxu0 %v8269_v36 }
 0x330   :  { %6020 = vmatpush1.bf16.msra.mxu0 %v8267_v37 }
 0x331   :  { %6021 = vmatprep.subr.bf16.mxu0 %v8272_v38 }
 0x334   :  { %6022 = vmatpush1.bf16.msra.mxu0 %v8270_v20 }
 0x335   :  { %6023 = vmatprep.subr.bf16.mxu0 %v8275_v40 }
 0x338   :  { %6024 = vmatpush1.bf16.msra.mxu0 %v8273_v41 }
 0x339   :  { %6025 = vmatprep.subr.bf16.mxu0 %v8278_v42 }
 0x33c   :  { %6026 = vmatpush1.bf16.msra.mxu0 %v8276_v43 }
 0x33d   :  { %6027 = vmatprep.subr.bf16.mxu0 %v8281_v44 }
 0x340   :  { %6028 = vmatpush1.bf16.msra.mxu0 %v8279_v32 }
 0x343   :  { %6030 = vmatmul.mubr.bf16.vlgmr.msra.gmra.mrb[0].mxu0 %v6137_v46 }
 0x3d5   :  { %v5498_v47 = vpop.f32.mrb[0].mxu1 }
 0x3d6   :  { %v5500_v48 = vpop.f32.mrb[1].mxu1 }
 0x3d7   :  { %v5502_v49 = vpop.f32.mrb[2].mxu1 }
 0x3d8   :  { %v5503_v50 = vpop.f32.mrb[3].mxu1 }
 0x416   :  { %v6031_v29 = vpop.f32.mrb[0].mxu0 }
 0x417   :  { %v6940_v39 = vadd.f32 %v6031_v29, %v5498_v47  ;;  %v6033_v51 = vpop.f32.mrb[1].mxu0 }
 0x418   :  { %v6941_v54 = vadd.f32 %v6033_v51, %v5500_v48  ;;  %v6035_v33 = vpop.f32.mrb[2].mxu0 }
 0x419   :  { %6038 = vst [vmem:[%s10928_s2] sm:$0xff] %v6940_v39  ;;  %v6040_v45 = vrot.slane %v6940_v39, 4  ;;  %v6052_v55 = vmul.f32 %v6940_v39, %v6940_v39  ;;  %v6036_v56 = vpop.f32.mrb[3].mxu0 }
 0x41a   :  { %6039 = vst [vmem:[%s10928_s2 + $0x8] sm:$0xff] %v6941_v54  ;;  %v6046_v57 = vrot.slane %v6941_v54, 4  ;;  %v6053_v60 = vmul.f32 %v6941_v54, %v6941_v54 }
 0x41b   :  { %v6041_v52 = vadd.f32 %v6940_v39, %v6040_v45  ;;  %v6054_v53 = vrot.slane %v6052_v55, 4 }
 0x41c   :  { %v6047_v61 = vadd.f32 %v6941_v54, %v6046_v57  ;;  %v6060_v62 = vrot.slane %v6053_v60, 4 }
 0x41d   :  { %v6042_v63 = vrot.slane %v6041_v52, 2  ;;  %v6055_v2 = vadd.f32 %v6054_v53, %v6052_v55 }
 0x41e   :  { %v6048_v58 = vrot.slane %v6047_v61, 2  ;;  %v6061_v59 = vadd.f32 %v6060_v62, %v6053_v60 }
 0x41f   :  { %v6043_v3 = vadd.f32 %v6042_v63, %v6041_v52  ;;  %v6056_v4 = vrot.slane %v6055_v2, 2 }
 0x420   :  { %v6049_v5 = vadd.f32 %v6048_v58, %v6047_v61  ;;  %v6062_v8 = vrot.slane %v6061_v59, 2 }
 0x421   :  { %v6044_v0 = vrot.slane %v6043_v3, 1  ;;  %v6057_v1 = vadd.f32 %v6056_v4, %v6055_v2 }
 0x422   :  { %v6050_v9 = vrot.slane %v6049_v5, 1  ;;  %v6063_v10 = vadd.f32 %v6062_v8, %v6061_v59 }
 0x423   :  { %v6058_v11 = vrot.slane %v6057_v1, 1  ;;  %v6045_v13 = vadd.f32 %v6044_v0, %v6043_v3 }
 0x424   :  { %v6064_v12 = vrot.slane %v6063_v10, 1  ;;  %v6051_v6 = vadd.f32 %v6050_v9, %v6049_v5 }
 0x425   :  { %v6059_v14 = vadd.f32 %v6058_v11, %v6057_v1 }
 0x426   :  { %v6065_v7 = vadd.f32 %v6064_v12, %v6063_v10 }
 0x427   :  { %v6067_v15 = vsel %vm6066_vm0, %v6045_v13, %v6059_v14 }
 0x428   :  { %v6068_v16 = vsel %vm6066_vm0, %v6051_v6, %v6065_v7 }
 0x429   :  { %v6071_v17 = vcombine.low %v6067_v15, %v6068_v16 }
 0x42b   :  { %6939 = vst.sshfl [vmem:[%s10929_s3] sm:$0x33 pattern:$0x76325410] %v6071_v17 }

// kernel: discriminator_forward.17
= control target key start
LH: loop header
LB: loop body
LE: loop exit
PB: predicated region body
PF: predicated region fallthrough
CT: control target
= control target key end

     0   :  { %s6814_s20 = smov 0   ;;  %s7875_s0 = inlined_call_operand.vmem [shape: bf16[2,1024], index: 0, kind: input, shape index: {}]   ;;  %s7876_s1 = inlined_call_operand.vmem [shape: bf16[1024,2048], index: 1, kind: input, shape index: {}]   ;;  %s7877_s2 = inlined_call_operand.vmem [shape: f32[1,2048], index: 2, kind: input, shape index: {}]   ;;  %s7878_s3 = inlined_call_operand.vmem [shape: bf16[2048,1], index: 3, kind: input, shape index: {}]   ;;  %s7879_s4 = inlined_call_operand.<no memory space> [shape: f32[1,1], index: 4, kind: input, shape index: {}]   ;;  %s7880_s5 = inlined_call_operand.vmem [shape: f32[2,1], index: 5, kind: output, shape index: {}]  }
   0x1   :  { %v10_v0 = vstv %s7879_s4 }
   0x2   :  { %11 = vst [vmem:[#allocation3] sm:$0x1] %v10_v0 }
   0x3 LB: > { %s6820_s21 = sadd.s32 4294967295, %s6776_s20   ;;  %p5766_p0 = scmp.ge.s32.totalorder %s6776_s20, 1  ;;  %s6776_s20 = sphi %s6814_s20, %s17_s20  }
   0x4   : > { %p196_p1 = scmp.lt.s32.totalorder %s6776_s20, 3 }
   0x6   : > { %p197_p2 = pnand %p5766_p0, %p196_p1 }
   0x7   : > { %s5767_s4 = sshll.u32 (!%p197_p2), %s6820_s21, 2  ;;  %s5768_s22 = sshll.u32 (!%p197_p2), %s6820_s21, 6 }
   0x8   : > { %200 = sbr.rel (%p197_p2) target bundleno = 1110 (0x456), region = 40  ;;  %p225_p3 = scmp.lt.s32.totalorder (!%p197_p2), %s5767_s4, 7 }
   0x9   : > { %p230_p4 = scmp.lt.s32.totalorder (!%p197_p2), %s5768_s22, 127  ;;  %p5771_p5 = scmp.ne.s32.totalorder (!%p197_p2), %s6820_s21, 0 }
   0xf   : > { %s7882_s4 = smov (!%p225_p3, %s5767_s4), 7  ;;  %s7884_s22 = smov (!%p230_p4, %s5768_s22), 127 }
  0x10   : > { %s227_s25 = scalar_lea.vmem %s7875_s0, %s7882_s4  ;;  %s6418_s26 = sshll.u32 %s7884_s22, 6  ;;  %v6778_v1 = vmov (!%p5771_p5), 0.0  }
  0x11   : > { %s6835_s29 = scalar_lea.vmem %s7876_s1, %s6418_s26  ;;  %240 = sbr.rel (%p5771_p5) target bundleno = 24 (0x18), region = 44  ;;  %241 = vst [vmem:[#allocation2] sm:$0xff] (!%p5771_p5), %v6778_v1  ;;  %242 = vst [vmem:[#allocation2 + $0x8] sm:$0xff] (!%p5771_p5), %v6778_v1 }
  0x12   : > { %243 = vst [vmem:[#allocation2 + $0x10] sm:$0xff] (!%p5771_p5), %v6778_v1  ;;  %244 = vst [vmem:[#allocation2 + $0x18] sm:$0xff] (!%p5771_p5), %v6778_v1 }
  0x18 PF: > { %v250_v2 = vld [vmem:[%s6835_s29] sm:$0xff]  ;;  %v251_v4 = vld [vmem:[%s6835_s29 + $0x8] sm:$0xff]  ;;  %v6779_v37 = vmov 1966171168   ;;  %v774_v39 = vlaneseq  ;;  %p6285_p6 = scmp.ne.s32.totalorder %s6820_s21, 1 }
  0x19   : > { %v258_v3 = vld [vmem:[%s6835_s29 + $0x40] sm:$0xff]  ;;  %v259_v6 = vld [vmem:[%s6835_s29 + $0x48] sm:$0xff]  ;;  %v772_v38 = vunpack.c.l.s4 %v6779_v37  ;;  %vm5724_vm0 = vcmask (!%p6285_p6), 1024  }
  0x1a   : > { %v5774_v5 = vcombine.high %v250_v2, %v258_v3  ;;  %v5773_v7 = vcombine.low %v250_v2, %v258_v3  ;;  %v266_v8 = vld [vmem:[%s6835_s29 + $0x80] sm:$0xff]  ;;  %v5776_v10 = vcombine.high %v251_v4, %v259_v6  ;;  %v5775_v11 = vcombine.low %v251_v4, %v259_v6  ;;  %v267_v13 = vld [vmem:[%s6835_s29 + $0x88] sm:$0xff] }
  0x1b   : > { %v274_v9 = vld [vmem:[%s6835_s29 + $0xc0] sm:$0xff]  ;;  %v275_v14 = vld [vmem:[%s6835_s29 + $0xc8] sm:$0xff]  ;;  %v773_v48 = vunpack.c.0.s8 %v772_v38  ;;  %v6862_v49 = vshrl.u32 %v774_v39, 7 }
  0x1c   : > { %v5790_v12 = vcombine.high %v266_v8, %v274_v9  ;;  %v282_v15 = vld [vmem:[%s6835_s29 + $0x100] sm:$0xff]  ;;  %3351 = vmatprep.subr.bf16.mxu0 %v5774_v5  ;;  %v5792_v16 = vcombine.high %v267_v13, %v275_v14  ;;  %v283_v18 = vld [vmem:[%s6835_s29 + $0x108] sm:$0xff]  ;;  %3433 = vmatprep.subr.bf16.mxu1 %v5776_v10  ;;  %v5789_v20 = vcombine.low %v266_v8, %v274_v9 }
  0x1d   : > { %v290_v17 = vld [vmem:[%s6835_s29 + $0x140] sm:$0xff]  ;;  %v291_v19 = vld [vmem:[%s6835_s29 + $0x148] sm:$0xff]  ;;  %3352 = vmatpush1.bf16.msra.mxu0 %v5773_v7  ;;  %3434 = vmatpush1.bf16.msra.mxu1 %v5775_v11  ;;  %v5791_v21 = vcombine.low %v267_v13, %v275_v14  ;;  %v6869_v58 = vsub.s32 %v773_v48, %v6862_v49 }
  0x1e   : > { %3353 = vmatprep.subr.bf16.mxu0 %v5790_v12  ;;  %v5806_v22 = vcombine.high %v282_v15, %v290_v17  ;;  %3435 = vmatprep.subr.bf16.mxu1 %v5792_v16  ;;  %v5808_v23 = vcombine.high %v283_v18, %v291_v19  ;;  %v298_v24 = vld [vmem:[%s6835_s29 + $0x180] sm:$0xff]  ;;  %v299_v26 = vld [vmem:[%s6835_s29 + $0x188] sm:$0xff]  ;;  %v5805_v28 = vcombine.low %v282_v15, %v290_v17 }
  0x1f   : > { %v306_v25 = vld [vmem:[%s6835_s29 + $0x1c0] sm:$0xff]  ;;  %v307_v27 = vld [vmem:[%s6835_s29 + $0x1c8] sm:$0xff]  ;;  %v5807_v29 = vcombine.low %v283_v18, %v291_v19 }
  0x20   : > { %v5822_v30 = vcombine.high %v298_v24, %v306_v25  ;;  %v5824_v31 = vcombine.high %v299_v26, %v307_v27  ;;  %v314_v32 = vld [vmem:[%s6835_s29 + $0x200] sm:$0xff]  ;;  %v315_v34 = vld [vmem:[%s6835_s29 + $0x208] sm:$0xff]  ;;  %v5821_v36 = vcombine.low %v298_v24, %v306_v25  ;;  %v5823_v40 = vcombine.low %v299_v26, %v307_v27 }
  0x21   : > { %3354 = vmatpush1.bf16.msra.mxu0 %v5789_v20  ;;  %3436 = vmatpush1.bf16.msra.mxu1 %v5791_v21  ;;  %v322_v33 = vld [vmem:[%s6835_s29 + $0x240] sm:$0xff]  ;;  %v323_v35 = vld [vmem:[%s6835_s29 + $0x248] sm:$0xff] }
  0x22   : > { %3355 = vmatprep.subr.bf16.mxu0 %v5806_v22  ;;  %3437 = vmatprep.subr.bf16.mxu1 %v5808_v23  ;;  %v5838_v41 = vcombine.high %v314_v32, %v322_v33  ;;  %v5840_v42 = vcombine.high %v315_v34, %v323_v35  ;;  %v330_v43 = vld [vmem:[%s6835_s29 + $0x280] sm:$0xff]  ;;  %v331_v45 = vld [vmem:[%s6835_s29 + $0x288] sm:$0xff]  ;;  %v5837_v47 = vcombine.low %v314_v32, %v322_v33 }
  0x23   : > { %v338_v44 = vld [vmem:[%s6835_s29 + $0x2c0] sm:$0xff]  ;;  %v339_v46 = vld [vmem:[%s6835_s29 + $0x2c8] sm:$0xff]  ;;  %v5839_v50 = vcombine.low %v315_v34, %v323_v35 }
  0x24   : > { %v5854_v51 = vcombine.high %v330_v43, %v338_v44  ;;  %v5856_v52 = vcombine.high %v331_v45, %v339_v46  ;;  %v346_v53 = vld [vmem:[%s6835_s29 + $0x300] sm:$0xff]  ;;  %v347_v55 = vld [vmem:[%s6835_s29 + $0x308] sm:$0xff]  ;;  %v5853_v57 = vcombine.low %v330_v43, %v338_v44  ;;  %v5855_v59 = vcombine.low %v331_v45, %v339_v46 }
  0x25   : > { %3356 = vmatpush1.bf16.msra.mxu0 %v5805_v28  ;;  %3438 = vmatpush1.bf16.msra.mxu1 %v5807_v29  ;;  %v354_v54 = vld [vmem:[%s6835_s29 + $0x340] sm:$0xff]  ;;  %v355_v56 = vld [vmem:[%s6835_s29 + $0x348] sm:$0xff] }
  0x26   : > { %3357 = vmatprep.subr.bf16.mxu0 %v5822_v30  ;;  %3439 = vmatprep.subr.bf16.mxu1 %v5824_v31  ;;  %v5870_v60 = vcombine.high %v346_v53, %v354_v54  ;;  %v6876_v61 = vld.sshfl [vmem:[%s227_s25] sm:$0x33 pattern:$0x75316420]  ;;  %v5872_v62 = vcombine.high %v347_v55, %v355_v56  ;;  %v363_v2 = vld [vmem:[%s6835_s29 + $0x388] sm:$0xff]  ;;  %v5869_v4 = vcombine.low %v346_v53, %v354_v54 }
  0x27   : > { %v362_v63 = vld [vmem:[%s6835_s29 + $0x380] sm:$0xff]  ;;  %v770_v1 = vcombine.high %v6876_v61, %v6876_v61  ;;  %v371_v3 = vld [vmem:[%s6835_s29 + $0x3c8] sm:$0xff]  ;;  %v5871_v6 = vcombine.low %v347_v55, %v355_v56 }
  0x28   : > { %v370_v0 = vld [vmem:[%s6835_s29 + $0x3c0] sm:$0xff]  ;;  %v5888_v8 = vcombine.high %v363_v2, %v371_v3  ;;  %v379_v11 = vld [vmem:[%s6835_s29 + $0x408] sm:$0xff]  ;;  %v5887_v14 = vcombine.low %v363_v2, %v371_v3 }
  0x29   : > { %3358 = vmatpush1.bf16.msra.mxu0 %v5821_v36  ;;  %3440 = vmatpush1.bf16.msra.mxu1 %v5823_v40  ;;  %v6885_v5 = vrot.slane %v770_v1, %v6869_v58  ;;  %v5886_v7 = vcombine.high %v362_v63, %v370_v0  ;;  %v378_v9 = vld [vmem:[%s6835_s29 + $0x400] sm:$0xff]  ;;  %v387_v12 = vld [vmem:[%s6835_s29 + $0x448] sm:$0xff]  ;;  %v5885_v13 = vcombine.low %v362_v63, %v370_v0 }
  0x2a   : > { %3359 = vmatprep.subr.bf16.mxu0 %v5838_v41  ;;  %3441 = vmatprep.subr.bf16.mxu1 %v5840_v42  ;;  %v386_v10 = vld [vmem:[%s6835_s29 + $0x440] sm:$0xff]  ;;  %v5904_v16 = vcombine.high %v379_v11, %v387_v12  ;;  %v395_v19 = vld [vmem:[%s6835_s29 + $0x488] sm:$0xff]  ;;  %v5903_v22 = vcombine.low %v379_v11, %v387_v12 }
  0x2b   : > { %3383 = vmatprep.mubr.bf16.mxu0 %v6885_v5  ;;  %3465 = vmatprep.mubr.bf16.mxu1 %v6885_v5  ;;  %v5902_v15 = vcombine.high %v378_v9, %v386_v10  ;;  %v394_v17 = vld [vmem:[%s6835_s29 + $0x480] sm:$0xff]  ;;  %v403_v20 = vld [vmem:[%s6835_s29 + $0x4c8] sm:$0xff]  ;;  %v5901_v21 = vcombine.low %v378_v9, %v386_v10 }
  0x2c   : > { %v402_v18 = vld [vmem:[%s6835_s29 + $0x4c0] sm:$0xff]  ;;  %v5920_v24 = vcombine.high %v395_v19, %v403_v20  ;;  %v411_v27 = vld [vmem:[%s6835_s29 + $0x508] sm:$0xff]  ;;  %v5919_v30 = vcombine.low %v395_v19, %v403_v20 }
  0x2d   : > { %3360 = vmatpush1.bf16.msra.mxu0 %v5837_v47  ;;  %3442 = vmatpush1.bf16.msra.mxu1 %v5839_v50  ;;  %v5918_v23 = vcombine.high %v394_v17, %v402_v18  ;;  %v410_v25 = vld [vmem:[%s6835_s29 + $0x500] sm:$0xff]  ;;  %v419_v28 = vld [vmem:[%s6835_s29 + $0x548] sm:$0xff]  ;;  %v5917_v29 = vcombine.low %v394_v17, %v402_v18 }
  0x2e   : > { %3361 = vmatprep.subr.bf16.mxu0 %v5854_v51  ;;  %3443 = vmatprep.subr.bf16.mxu1 %v5856_v52  ;;  %v418_v26 = vld [vmem:[%s6835_s29 + $0x540] sm:$0xff]  ;;  %v5936_v32 = vcombine.high %v411_v27, %v419_v28  ;;  %v427_v35 = vld [vmem:[%s6835_s29 + $0x588] sm:$0xff]  ;;  %v5935_v38 = vcombine.low %v411_v27, %v419_v28 }
  0x2f   : > { %v5934_v31 = vcombine.high %v410_v25, %v418_v26  ;;  %v426_v33 = vld [vmem:[%s6835_s29 + $0x580] sm:$0xff]  ;;  %v435_v36 = vld [vmem:[%s6835_s29 + $0x5c8] sm:$0xff]  ;;  %v5933_v37 = vcombine.low %v410_v25, %v418_v26 }
  0x30   : > { %v434_v34 = vld [vmem:[%s6835_s29 + $0x5c0] sm:$0xff]  ;;  %v5952_v40 = vcombine.high %v427_v35, %v435_v36  ;;  %v443_v43 = vld [vmem:[%s6835_s29 + $0x608] sm:$0xff]  ;;  %v5951_v46 = vcombine.low %v427_v35, %v435_v36 }
  0x31   : > { %3362 = vmatpush1.bf16.msra.mxu0 %v5853_v57  ;;  %3444 = vmatpush1.bf16.msra.mxu1 %v5855_v59  ;;  %v5950_v39 = vcombine.high %v426_v33, %v434_v34  ;;  %v442_v41 = vld [vmem:[%s6835_s29 + $0x600] sm:$0xff]  ;;  %v451_v44 = vld [vmem:[%s6835_s29 + $0x648] sm:$0xff]  ;;  %v5949_v45 = vcombine.low %v426_v33, %v434_v34 }
  0x32   : > { %3363 = vmatprep.subr.bf16.mxu0 %v5870_v60  ;;  %3445 = vmatprep.subr.bf16.mxu1 %v5872_v62  ;;  %v450_v42 = vld [vmem:[%s6835_s29 + $0x640] sm:$0xff]  ;;  %v5968_v48 = vcombine.high %v443_v43, %v451_v44  ;;  %v459_v52 = vld [vmem:[%s6835_s29 + $0x688] sm:$0xff]  ;;  %v5967_v55 = vcombine.low %v443_v43, %v451_v44 }
  0x33   : > { %v5966_v47 = vcombine.high %v442_v41, %v450_v42  ;;  %v458_v50 = vld [vmem:[%s6835_s29 + $0x680] sm:$0xff]  ;;  %v467_v53 = vld [vmem:[%s6835_s29 + $0x6c8] sm:$0xff]  ;;  %v5965_v54 = vcombine.low %v442_v41, %v450_v42 }
  0x34   : > { %v466_v51 = vld [vmem:[%s6835_s29 + $0x6c0] sm:$0xff]  ;;  %v5984_v57 = vcombine.high %v459_v52, %v467_v53  ;;  %v475_v62 = vld [vmem:[%s6835_s29 + $0x708] sm:$0xff]  ;;  %v5983_v1 = vcombine.low %v459_v52, %v467_v53 }
  0x35   : > { %3364 = vmatpush1.bf16.msra.mxu0 %v5869_v4  ;;  %3446 = vmatpush1.bf16.msra.mxu1 %v5871_v6  ;;  %v5982_v56 = vcombine.high %v458_v50, %v466_v51  ;;  %v474_v59 = vld [vmem:[%s6835_s29 + $0x700] sm:$0xff]  ;;  %v483_v63 = vld [vmem:[%s6835_s29 + $0x748] sm:$0xff]  ;;  %v5981_v0 = vcombine.low %v458_v50, %v466_v51 }
  0x36   : > { %3365 = vmatprep.subr.bf16.mxu0 %v5886_v7  ;;  %3447 = vmatprep.subr.bf16.mxu1 %v5888_v8  ;;  %v482_v60 = vld [vmem:[%s6835_s29 + $0x740] sm:$0xff]  ;;  %v6000_v3 = vcombine.high %v475_v62, %v483_v63  ;;  %v491_v7 = vld [vmem:[%s6835_s29 + $0x788] sm:$0xff]  ;;  %v5999_v10 = vcombine.low %v475_v62, %v483_v63 }
  0x37   : > { %v5998_v2 = vcombine.high %v474_v59, %v482_v60  ;;  %v490_v4 = vld [vmem:[%s6835_s29 + $0x780] sm:$0xff]  ;;  %v499_v8 = vld [vmem:[%s6835_s29 + $0x7c8] sm:$0xff]  ;;  %v5997_v9 = vcombine.low %v474_v59, %v482_v60 }
  0x38   : > { %v498_v6 = vld [vmem:[%s6835_s29 + $0x7c0] sm:$0xff]  ;;  %v6016_v12 = vcombine.high %v491_v7, %v499_v8  ;;  %v6015_v18 = vcombine.low %v491_v7, %v499_v8  ;;  %v531_v25 = vld [vmem:[%s6835_s29 + $0x8c8] sm:$0xff] }
  0x39   : > { %3366 = vmatpush1.bf16.msra.mxu0 %v5885_v13  ;;  %3448 = vmatpush1.bf16.msra.mxu1 %v5887_v14  ;;  %v6014_v11 = vcombine.high %v490_v4, %v498_v6  ;;  %v506_v13 = vld [vmem:[%s6835_s29 + $0x800] sm:$0xff]  ;;  %v6013_v17 = vcombine.low %v490_v4, %v498_v6 }
  0x3a   : > { %3367 = vmatprep.subr.bf16.mxu0 %v5902_v15  ;;  %3449 = vmatprep.subr.bf16.mxu1 %v5904_v16  ;;  %v514_v14 = vld [vmem:[%s6835_s29 + $0x840] sm:$0xff]  ;;  %v507_v15 = vld [vmem:[%s6835_s29 + $0x808] sm:$0xff] }
  0x3b   : > { %v515_v16 = vld [vmem:[%s6835_s29 + $0x848] sm:$0xff]  ;;  %v6030_v19 = vcombine.high %v506_v13, %v514_v14  ;;  %v6029_v26 = vcombine.low %v506_v13, %v514_v14 }
  0x3c   : > { %v6032_v20 = vcombine.high %v507_v15, %v515_v16  ;;  %v6031_v27 = vcombine.low %v507_v15, %v515_v16 }
  0x3d   : > { %3368 = vmatpush1.bf16.msra.mxu0 %v5901_v21  ;;  %3450 = vmatpush1.bf16.msra.mxu1 %v5903_v22  ;;  %v522_v21 = vld [vmem:[%s6835_s29 + $0x880] sm:$0xff] }
  0x3e   : > { %3369 = vmatprep.subr.bf16.mxu0 %v5918_v23  ;;  %3451 = vmatprep.subr.bf16.mxu1 %v5920_v24  ;;  %v530_v22 = vld [vmem:[%s6835_s29 + $0x8c0] sm:$0xff]  ;;  %v6929_v23 = vrot.slane %v6876_v61, %v6869_v58  ;;  %v523_v24 = vld [vmem:[%s6835_s29 + $0x888] sm:$0xff] }
  0x3f   : > { %v6046_v28 = vcombine.high %v522_v21, %v530_v22  ;;  %v539_v58 = vld [vmem:[%s6835_s29 + $0x908] sm:$0xff]  ;;  %v6045_v33 = vcombine.low %v522_v21, %v530_v22  ;;  %v6047_v34 = vcombine.low %v523_v24, %v531_v25 }
  0x40   : > { %v547_v61 = vld [vmem:[%s6835_s29 + $0x948] sm:$0xff] }
  0x41   : > { %3370 = vmatpush1.bf16.msra.mxu0 %v5917_v29  ;;  %3452 = vmatpush1.bf16.msra.mxu1 %v5919_v30  ;;  %v6048_v29 = vcombine.high %v523_v24, %v531_v25  ;;  %v538_v30 = vld [vmem:[%s6835_s29 + $0x900] sm:$0xff]  ;;  %v6064_v36 = vcombine.high %v539_v58, %v547_v61  ;;  %v6063_v42 = vcombine.low %v539_v58, %v547_v61 }
  0x42   : > { %3371 = vmatprep.subr.bf16.mxu0 %v5934_v31  ;;  %3453 = vmatprep.subr.bf16.mxu1 %v5936_v32  ;;  %v546_v31 = vld [vmem:[%s6835_s29 + $0x940] sm:$0xff]  ;;  %v6937_v32 = vcombine.high %v6885_v5, %v6885_v5 }
  0x43   : > { %v6062_v35 = vcombine.high %v538_v30, %v546_v31  ;;  %v6061_v41 = vcombine.low %v538_v30, %v546_v31 }
  0x45   : > { %3372 = vmatpush1.bf16.msra.mxu0 %v5933_v37  ;;  %3454 = vmatpush1.bf16.msra.mxu1 %v5935_v38  ;;  %v554_v37 = vld [vmem:[%s6835_s29 + $0x980] sm:$0xff] }
  0x46   : > { %3373 = vmatprep.subr.bf16.mxu0 %v5950_v39  ;;  %3455 = vmatprep.subr.bf16.mxu1 %v5952_v40  ;;  %v562_v38 = vld [vmem:[%s6835_s29 + $0x9c0] sm:$0xff]  ;;  %v555_v39 = vld [vmem:[%s6835_s29 + $0x988] sm:$0xff] }
  0x47   : > { %v563_v40 = vld [vmem:[%s6835_s29 + $0x9c8] sm:$0xff]  ;;  %v6078_v43 = vcombine.high %v554_v37, %v562_v38  ;;  %v6077_v50 = vcombine.low %v554_v37, %v562_v38 }
  0x48   : > { %v6080_v44 = vcombine.high %v555_v39, %v563_v40  ;;  %v6079_v51 = vcombine.low %v555_v39, %v563_v40 }
  0x49   : > { %3374 = vmatpush1.bf16.msra.mxu0 %v5949_v45  ;;  %3456 = vmatpush1.bf16.msra.mxu1 %v5951_v46  ;;  %v570_v45 = vld [vmem:[%s6835_s29 + $0xa00] sm:$0xff] }
  0x4a   : > { %3375 = vmatprep.subr.bf16.mxu0 %v5966_v47  ;;  %3457 = vmatprep.subr.bf16.mxu1 %v5968_v48  ;;  %v578_v46 = vld [vmem:[%s6835_s29 + $0xa40] sm:$0xff]  ;;  %v571_v47 = vld [vmem:[%s6835_s29 + $0xa08] sm:$0xff] }
  0x4b   : > { %v579_v48 = vld [vmem:[%s6835_s29 + $0xa48] sm:$0xff]  ;;  %v6094_v52 = vcombine.high %v570_v45, %v578_v46  ;;  %v6093_v59 = vcombine.low %v570_v45, %v578_v46 }
  0x4c   : > { %v6096_v53 = vcombine.high %v571_v47, %v579_v48  ;;  %v6095_v60 = vcombine.low %v571_v47, %v579_v48 }
  0x4d   : > { %3376 = vmatpush1.bf16.msra.mxu0 %v5965_v54  ;;  %3458 = vmatpush1.bf16.msra.mxu1 %v5967_v55  ;;  %v586_v54 = vld [vmem:[%s6835_s29 + $0xa80] sm:$0xff] }
  0x4e   : > { %3377 = vmatprep.subr.bf16.mxu0 %v5982_v56  ;;  %3459 = vmatprep.subr.bf16.mxu1 %v5984_v57  ;;  %v594_v55 = vld [vmem:[%s6835_s29 + $0xac0] sm:$0xff]  ;;  %v587_v56 = vld [vmem:[%s6835_s29 + $0xa88] sm:$0xff] }
  0x4f   : > { %v595_v57 = vld [vmem:[%s6835_s29 + $0xac8] sm:$0xff]  ;;  %v6110_v62 = vcombine.high %v586_v54, %v594_v55  ;;  %v6109_v4 = vcombine.low %v586_v54, %v594_v55 }
  0x50   : > { %v6112_v63 = vcombine.high %v587_v56, %v595_v57  ;;  %v6111_v6 = vcombine.low %v587_v56, %v595_v57 }
  0x51   : > { %3378 = vmatpush1.bf16.msra.mxu0 %v5981_v0  ;;  %3460 = vmatpush1.bf16.msra.mxu1 %v5983_v1  ;;  %v602_v0 = vld [vmem:[%s6835_s29 + $0xb00] sm:$0xff] }
  0x52   : > { %3379 = vmatprep.subr.bf16.mxu0 %v5998_v2  ;;  %3461 = vmatprep.subr.bf16.mxu1 %v6000_v3  ;;  %v610_v1 = vld [vmem:[%s6835_s29 + $0xb40] sm:$0xff]  ;;  %v603_v2 = vld [vmem:[%s6835_s29 + $0xb08] sm:$0xff] }
  0x53   : > { %v611_v3 = vld [vmem:[%s6835_s29 + $0xb48] sm:$0xff]  ;;  %v6126_v7 = vcombine.high %v602_v0, %v610_v1  ;;  %v6125_v13 = vcombine.low %v602_v0, %v610_v1 }
  0x54   : > { %v6128_v8 = vcombine.high %v603_v2, %v611_v3  ;;  %v6127_v14 = vcombine.low %v603_v2, %v611_v3 }
  0x55   : > { %3380 = vmatpush1.bf16.msra.mxu0 %v5997_v9  ;;  %3462 = vmatpush1.bf16.msra.mxu1 %v5999_v10  ;;  %v618_v9 = vld [vmem:[%s6835_s29 + $0xb80] sm:$0xff] }
  0x56   : > { %3381 = vmatprep.subr.bf16.mxu0 %v6014_v11  ;;  %3463 = vmatprep.subr.bf16.mxu1 %v6016_v12  ;;  %v626_v10 = vld [vmem:[%s6835_s29 + $0xbc0] sm:$0xff]  ;;  %v619_v11 = vld [vmem:[%s6835_s29 + $0xb88] sm:$0xff] }
  0x57   : > { %v627_v12 = vld [vmem:[%s6835_s29 + $0xbc8] sm:$0xff]  ;;  %v6142_v15 = vcombine.high %v618_v9, %v626_v10  ;;  %v6141_v21 = vcombine.low %v618_v9, %v626_v10 }
  0x58   : > { %v6144_v16 = vcombine.high %v619_v11, %v627_v12  ;;  %v6143_v22 = vcombine.low %v619_v11, %v627_v12 }
  0x59   : > { %3382 = vmatpush1.bf16.msra.mxu0 %v6013_v17  ;;  %3464 = vmatpush1.bf16.msra.mxu1 %v6015_v18  ;;  %v634_v17 = vld [vmem:[%s6835_s29 + $0xc00] sm:$0xff] }
  0x5a   : > { %3392 = vmatprep.subr.bf16.mxu0 %v6030_v19  ;;  %3474 = vmatprep.subr.bf16.mxu1 %v6032_v20  ;;  %v642_v18 = vld [vmem:[%s6835_s29 + $0xc40] sm:$0xff]  ;;  %v635_v19 = vld [vmem:[%s6835_s29 + $0xc08] sm:$0xff] }
  0x5b   : > { %v643_v20 = vld [vmem:[%s6835_s29 + $0xc48] sm:$0xff]  ;;  %v6158_v24 = vcombine.high %v634_v17, %v642_v18  ;;  %v6157_v30 = vcombine.low %v634_v17, %v642_v18 }
  0x5c   : > { %3384 = vmatmul.mubr.bf16.vlgmr.msra.gmra.mrb[0].mxu0 %v6929_v23  ;;  %3466 = vmatmul.mubr.bf16.vlgmr.msra.gmra.mrb[0].mxu1 %v6929_v23  ;;  %v6160_v25 = vcombine.high %v635_v19, %v643_v20  ;;  %v6159_v31 = vcombine.low %v635_v19, %v643_v20 }
  0x5d   : > { %3393 = vmatpush1.bf16.msra.mxu0 %v6029_v26  ;;  %3475 = vmatpush1.bf16.msra.mxu1 %v6031_v27  ;;  %v650_v26 = vld [vmem:[%s6835_s29 + $0xc80] sm:$0xff] }
  0x5e   : > { %3394 = vmatprep.subr.bf16.mxu0 %v6046_v28  ;;  %3476 = vmatprep.subr.bf16.mxu1 %v6048_v29  ;;  %v658_v27 = vld [vmem:[%s6835_s29 + $0xcc0] sm:$0xff]  ;;  %v651_v28 = vld [vmem:[%s6835_s29 + $0xc88] sm:$0xff] }
  0x5f   : > { %3424 = vmatprep.mubr.bf16.mxu0 %v6937_v32  ;;  %3506 = vmatprep.mubr.bf16.mxu1 %v6937_v32  ;;  %v659_v29 = vld [vmem:[%s6835_s29 + $0xcc8] sm:$0xff]  ;;  %v6174_v58 = vcombine.high %v650_v26, %v658_v27  ;;  %v6173_v37 = vcombine.low %v650_v26, %v658_v27 }
  0x60   : > { %v6176_v61 = vcombine.high %v651_v28, %v659_v29  ;;  %v6175_v38 = vcombine.low %v651_v28, %v659_v29 }
  0x61   : > { %3395 = vmatpush1.bf16.msra.mxu0 %v6045_v33  ;;  %3477 = vmatpush1.bf16.msra.mxu1 %v6047_v34  ;;  %v666_v33 = vld [vmem:[%s6835_s29 + $0xd00] sm:$0xff] }
  0x62   : > { %3396 = vmatprep.subr.bf16.mxu0 %v6062_v35  ;;  %3478 = vmatprep.subr.bf16.mxu1 %v6064_v36  ;;  %v674_v34 = vld [vmem:[%s6835_s29 + $0xd40] sm:$0xff]  ;;  %v667_v35 = vld [vmem:[%s6835_s29 + $0xd08] sm:$0xff] }
  0x63   : > { %v675_v36 = vld [vmem:[%s6835_s29 + $0xd48] sm:$0xff]  ;;  %v6190_v39 = vcombine.high %v666_v33, %v674_v34  ;;  %v6189_v45 = vcombine.low %v666_v33, %v674_v34  ;;  %v277_v33 = vld [vmem:[%s6835_s29 + $0xd8] sm:$0xff] }
  0x64   : > { %v6192_v40 = vcombine.high %v667_v35, %v675_v36  ;;  %v6191_v46 = vcombine.low %v667_v35, %v675_v36 }
  0x65   : > { %3397 = vmatpush1.bf16.msra.mxu0 %v6061_v41  ;;  %3479 = vmatpush1.bf16.msra.mxu1 %v6063_v42  ;;  %v682_v41 = vld [vmem:[%s6835_s29 + $0xd80] sm:$0xff] }
  0x66   : > { %3398 = vmatprep.subr.bf16.mxu0 %v6078_v43  ;;  %3480 = vmatprep.subr.bf16.mxu1 %v6080_v44  ;;  %v690_v42 = vld [vmem:[%s6835_s29 + $0xdc0] sm:$0xff]  ;;  %v683_v43 = vld [vmem:[%s6835_s29 + $0xd88] sm:$0xff] }
  0x67   : > { %v691_v44 = vld [vmem:[%s6835_s29 + $0xdc8] sm:$0xff]  ;;  %v6206_v47 = vcombine.high %v682_v41, %v690_v42  ;;  %v6205_v54 = vcombine.low %v682_v41, %v690_v42  ;;  %v293_v41 = vld [vmem:[%s6835_s29 + $0x158] sm:$0xff] }
  0x68   : > { %v6208_v48 = vcombine.high %v683_v43, %v691_v44  ;;  %v6207_v55 = vcombine.low %v683_v43, %v691_v44 }
  0x69   : > { %3399 = vmatpush1.bf16.msra.mxu0 %v6077_v50  ;;  %3481 = vmatpush1.bf16.msra.mxu1 %v6079_v51  ;;  %v698_v50 = vld [vmem:[%s6835_s29 + $0xe00] sm:$0xff] }
  0x6a   : > { %3400 = vmatprep.subr.bf16.mxu0 %v6094_v52  ;;  %3482 = vmatprep.subr.bf16.mxu1 %v6096_v53  ;;  %v706_v51 = vld [vmem:[%s6835_s29 + $0xe40] sm:$0xff]  ;;  %v699_v52 = vld [vmem:[%s6835_s29 + $0xe08] sm:$0xff] }
  0x6b   : > { %v707_v53 = vld [vmem:[%s6835_s29 + $0xe48] sm:$0xff]  ;;  %v6222_v56 = vcombine.high %v698_v50, %v706_v51  ;;  %v6221_v0 = vcombine.low %v698_v50, %v706_v51  ;;  %v309_v50 = vld [vmem:[%s6835_s29 + $0x1d8] sm:$0xff] }
  0x6c   : > { %v6224_v57 = vcombine.high %v699_v52, %v707_v53  ;;  %v6223_v1 = vcombine.low %v699_v52, %v707_v53 }
  0x6d   : > { %3401 = vmatpush1.bf16.msra.mxu0 %v6093_v59  ;;  %3483 = vmatpush1.bf16.msra.mxu1 %v6095_v60  ;;  %v714_v59 = vld [vmem:[%s6835_s29 + $0xe80] sm:$0xff] }
  0x6e   : > { %3402 = vmatprep.subr.bf16.mxu0 %v6110_v62  ;;  %3484 = vmatprep.subr.bf16.mxu1 %v6112_v63  ;;  %v722_v60 = vld [vmem:[%s6835_s29 + $0xec0] sm:$0xff]  ;;  %v715_v62 = vld [vmem:[%s6835_s29 + $0xe88] sm:$0xff] }
  0x6f   : > { %v723_v63 = vld [vmem:[%s6835_s29 + $0xec8] sm:$0xff]  ;;  %v6238_v2 = vcombine.high %v714_v59, %v722_v60  ;;  %v6237_v9 = vcombine.low %v714_v59, %v722_v60  ;;  %v325_v59 = vld [vmem:[%s6835_s29 + $0x258] sm:$0xff] }
  0x70   : > { %v6240_v3 = vcombine.high %v715_v62, %v723_v63  ;;  %v6239_v10 = vcombine.low %v715_v62, %v723_v63 }
  0x71   : > { %3403 = vmatpush1.bf16.msra.mxu0 %v6109_v4  ;;  %3485 = vmatpush1.bf16.msra.mxu1 %v6111_v6  ;;  %v730_v4 = vld [vmem:[%s6835_s29 + $0xf00] sm:$0xff] }
  0x72   : > { %3404 = vmatprep.subr.bf16.mxu0 %v6126_v7  ;;  %3486 = vmatprep.subr.bf16.mxu1 %v6128_v8  ;;  %v738_v6 = vld [vmem:[%s6835_s29 + $0xf40] sm:$0xff]  ;;  %v731_v7 = vld [vmem:[%s6835_s29 + $0xf08] sm:$0xff] }
  0x73   : > { %v739_v8 = vld [vmem:[%s6835_s29 + $0xf48] sm:$0xff]  ;;  %v6254_v11 = vcombine.high %v730_v4, %v738_v6  ;;  %v6253_v17 = vcombine.low %v730_v4, %v738_v6  ;;  %v341_v4 = vld [vmem:[%s6835_s29 + $0x2d8] sm:$0xff] }
  0x74   : > { %v6256_v12 = vcombine.high %v731_v7, %v739_v8  ;;  %v6255_v18 = vcombine.low %v731_v7, %v739_v8 }
  0x75   : > { %3405 = vmatpush1.bf16.msra.mxu0 %v6125_v13  ;;  %3487 = vmatpush1.bf16.msra.mxu1 %v6127_v14  ;;  %v746_v13 = vld [vmem:[%s6835_s29 + $0xf80] sm:$0xff] }
  0x76   : > { %3406 = vmatprep.subr.bf16.mxu0 %v6142_v15  ;;  %3488 = vmatprep.subr.bf16.mxu1 %v6144_v16  ;;  %v754_v14 = vld [vmem:[%s6835_s29 + $0xfc0] sm:$0xff]  ;;  %v747_v15 = vld [vmem:[%s6835_s29 + $0xf88] sm:$0xff] }
  0x77   : > { %v755_v16 = vld [vmem:[%s6835_s29 + $0xfc8] sm:$0xff]  ;;  %v6270_v19 = vcombine.high %v746_v13, %v754_v14  ;;  %v6269_v26 = vcombine.low %v746_v13, %v754_v14  ;;  %v357_v13 = vld [vmem:[%s6835_s29 + $0x358] sm:$0xff] }
  0x78   : > { %v6272_v20 = vcombine.high %v747_v15, %v755_v16  ;;  %v6271_v27 = vcombine.low %v747_v15, %v755_v16 }
  0x79   : > { %3407 = vmatpush1.bf16.msra.mxu0 %v6141_v21  ;;  %3489 = vmatpush1.bf16.msra.mxu1 %v6143_v22  ;;  %v252_v21 = vld [vmem:[%s6835_s29 + $0x10] sm:$0xff] }
  0x7a   : > { %3408 = vmatprep.subr.bf16.mxu0 %v6158_v24  ;;  %3490 = vmatprep.subr.bf16.mxu1 %v6160_v25  ;;  %v260_v22 = vld [vmem:[%s6835_s29 + $0x50] sm:$0xff]  ;;  %v253_v24 = vld [vmem:[%s6835_s29 + $0x18] sm:$0xff] }
  0x7b   : > { %v261_v25 = vld [vmem:[%s6835_s29 + $0x58] sm:$0xff]  ;;  %v5778_v28 = vcombine.high %v252_v21, %v260_v22  ;;  %v5777_v34 = vcombine.low %v252_v21, %v260_v22 }
  0x7c   : > { %v5780_v29 = vcombine.high %v253_v24, %v261_v25  ;;  %v5779_v35 = vcombine.low %v253_v24, %v261_v25  ;;  %v373_v21 = vld [vmem:[%s6835_s29 + $0x3d8] sm:$0xff] }
  0x7d   : > { %3409 = vmatpush1.bf16.msra.mxu0 %v6157_v30  ;;  %3491 = vmatpush1.bf16.msra.mxu1 %v6159_v31  ;;  %v268_v30 = vld [vmem:[%s6835_s29 + $0x90] sm:$0xff] }
  0x7e   : > { %3410 = vmatprep.subr.bf16.mxu0 %v6174_v58  ;;  %3492 = vmatprep.subr.bf16.mxu1 %v6176_v61  ;;  %v276_v31 = vld [vmem:[%s6835_s29 + $0xd0] sm:$0xff]  ;;  %v7005_v58 = vcombine.high %v6929_v23, %v6929_v23  ;;  %v269_v61 = vld [vmem:[%s6835_s29 + $0x98] sm:$0xff] }
  0x7f   : > { %v5794_v36 = vcombine.high %v268_v30, %v276_v31  ;;  %v5793_v42 = vcombine.low %v268_v30, %v276_v31  ;;  %v5795_v43 = vcombine.low %v269_v61, %v277_v33  ;;  %v389_v30 = vld [vmem:[%s6835_s29 + $0x458] sm:$0xff] }
  0x81   : > { %3411 = vmatpush1.bf16.msra.mxu0 %v6173_v37  ;;  %3493 = vmatpush1.bf16.msra.mxu1 %v6175_v38  ;;  %v5796_v37 = vcombine.high %v269_v61, %v277_v33  ;;  %v284_v38 = vld [vmem:[%s6835_s29 + $0x110] sm:$0xff] }
  0x82   : > { %3412 = vmatprep.subr.bf16.mxu0 %v6190_v39  ;;  %3494 = vmatprep.subr.bf16.mxu1 %v6192_v40  ;;  %v292_v39 = vld [vmem:[%s6835_s29 + $0x150] sm:$0xff]  ;;  %v285_v40 = vld [vmem:[%s6835_s29 + $0x118] sm:$0xff] }
  0x83   : > { %v5810_v44 = vcombine.high %v284_v38, %v292_v39  ;;  %v5809_v51 = vcombine.low %v284_v38, %v292_v39  ;;  %v5811_v52 = vcombine.low %v285_v40, %v293_v41  ;;  %v405_v38 = vld [vmem:[%s6835_s29 + $0x4d8] sm:$0xff] }
  0x85   : > { %3413 = vmatpush1.bf16.msra.mxu0 %v6189_v45  ;;  %3495 = vmatpush1.bf16.msra.mxu1 %v6191_v46  ;;  %v5812_v45 = vcombine.high %v285_v40, %v293_v41  ;;  %v300_v46 = vld [vmem:[%s6835_s29 + $0x190] sm:$0xff] }
  0x86   : > { %3414 = vmatprep.subr.bf16.mxu0 %v6206_v47  ;;  %3496 = vmatprep.subr.bf16.mxu1 %v6208_v48  ;;  %v308_v47 = vld [vmem:[%s6835_s29 + $0x1d0] sm:$0xff]  ;;  %v301_v48 = vld [vmem:[%s6835_s29 + $0x198] sm:$0xff] }
  0x87   : > { %v5826_v53 = vcombine.high %v300_v46, %v308_v47  ;;  %v5825_v60 = vcombine.low %v300_v46, %v308_v47  ;;  %v5827_v62 = vcombine.low %v301_v48, %v309_v50  ;;  %v421_v46 = vld [vmem:[%s6835_s29 + $0x558] sm:$0xff] }
  0x89   : > { %3415 = vmatpush1.bf16.msra.mxu0 %v6205_v54  ;;  %3497 = vmatpush1.bf16.msra.mxu1 %v6207_v55  ;;  %v5828_v54 = vcombine.high %v301_v48, %v309_v50  ;;  %v316_v55 = vld [vmem:[%s6835_s29 + $0x210] sm:$0xff] }
  0x8a   : > { %3416 = vmatprep.subr.bf16.mxu0 %v6222_v56  ;;  %3498 = vmatprep.subr.bf16.mxu1 %v6224_v57  ;;  %v324_v56 = vld [vmem:[%s6835_s29 + $0x250] sm:$0xff]  ;;  %v317_v57 = vld [vmem:[%s6835_s29 + $0x218] sm:$0xff] }
  0x8b   : > { %v5842_v63 = vcombine.high %v316_v55, %v324_v56  ;;  %v5841_v6 = vcombine.low %v316_v55, %v324_v56  ;;  %v5843_v7 = vcombine.low %v317_v57, %v325_v59  ;;  %v437_v55 = vld [vmem:[%s6835_s29 + $0x5d8] sm:$0xff] }
  0x8d   : > { %3417 = vmatpush1.bf16.msra.mxu0 %v6221_v0  ;;  %3499 = vmatpush1.bf16.msra.mxu1 %v6223_v1  ;;  %v5844_v0 = vcombine.high %v317_v57, %v325_v59  ;;  %v332_v1 = vld [vmem:[%s6835_s29 + $0x290] sm:$0xff] }
  0x8e   : > { %3418 = vmatprep.subr.bf16.mxu0 %v6238_v2  ;;  %3500 = vmatprep.subr.bf16.mxu1 %v6240_v3  ;;  %v340_v2 = vld [vmem:[%s6835_s29 + $0x2d0] sm:$0xff]  ;;  %v333_v3 = vld [vmem:[%s6835_s29 + $0x298] sm:$0xff] }
  0x8f   : > { %v5858_v8 = vcombine.high %v332_v1, %v340_v2  ;;  %v5857_v14 = vcombine.low %v332_v1, %v340_v2  ;;  %v5859_v15 = vcombine.low %v333_v3, %v341_v4  ;;  %v453_v1 = vld [vmem:[%s6835_s29 + $0x658] sm:$0xff] }
  0x91   : > { %3419 = vmatpush1.bf16.msra.mxu0 %v6237_v9  ;;  %3501 = vmatpush1.bf16.msra.mxu1 %v6239_v10  ;;  %v5860_v9 = vcombine.high %v333_v3, %v341_v4  ;;  %v348_v10 = vld [vmem:[%s6835_s29 + $0x310] sm:$0xff] }
  0x92   : > { %3420 = vmatprep.subr.bf16.mxu0 %v6254_v11  ;;  %3502 = vmatprep.subr.bf16.mxu1 %v6256_v12  ;;  %v356_v11 = vld [vmem:[%s6835_s29 + $0x350] sm:$0xff]  ;;  %v349_v12 = vld [vmem:[%s6835_s29 + $0x318] sm:$0xff] }
  0x93   : > { %v5874_v16 = vcombine.high %v348_v10, %v356_v11  ;;  %v5873_v22 = vcombine.low %v348_v10, %v356_v11  ;;  %v5875_v24 = vcombine.low %v349_v12, %v357_v13  ;;  %v469_v10 = vld [vmem:[%s6835_s29 + $0x6d8] sm:$0xff] }
  0x95   : > { %3421 = vmatpush1.bf16.msra.mxu0 %v6253_v17  ;;  %3503 = vmatpush1.bf16.msra.mxu1 %v6255_v18  ;;  %v5876_v17 = vcombine.high %v349_v12, %v357_v13  ;;  %v364_v18 = vld [vmem:[%s6835_s29 + $0x390] sm:$0xff] }
  0x96   : > { %3422 = vmatprep.subr.bf16.mxu0 %v6270_v19  ;;  %3504 = vmatprep.subr.bf16.mxu1 %v6272_v20  ;;  %v372_v19 = vld [vmem:[%s6835_s29 + $0x3d0] sm:$0xff]  ;;  %v365_v20 = vld [vmem:[%s6835_s29 + $0x398] sm:$0xff] }
  0x97   : > { %v5890_v25 = vcombine.high %v364_v18, %v372_v19  ;;  %v5889_v31 = vcombine.low %v364_v18, %v372_v19  ;;  %v5891_v61 = vcombine.low %v365_v20, %v373_v21  ;;  %v485_v18 = vld [vmem:[%s6835_s29 + $0x758] sm:$0xff] }
  0x99   : > { %3423 = vmatpush1.bf16.msra.mxu0 %v6269_v26  ;;  %3505 = vmatpush1.bf16.msra.mxu1 %v6271_v27  ;;  %v5892_v26 = vcombine.high %v365_v20, %v373_v21  ;;  %v380_v27 = vld [vmem:[%s6835_s29 + $0x410] sm:$0xff] }
  0x9a   : > { %3515 = vmatprep.subr.bf16.mxu0 %v5778_v28  ;;  %3597 = vmatprep.subr.bf16.mxu1 %v5780_v29  ;;  %v388_v28 = vld [vmem:[%s6835_s29 + $0x450] sm:$0xff]  ;;  %v381_v29 = vld [vmem:[%s6835_s29 + $0x418] sm:$0xff] }
  0x9b   : > { %v5906_v33 = vcombine.high %v380_v27, %v388_v28  ;;  %v5905_v39 = vcombine.low %v380_v27, %v388_v28  ;;  %v5907_v40 = vcombine.low %v381_v29, %v389_v30  ;;  %v501_v27 = vld [vmem:[%s6835_s29 + $0x7d8] sm:$0xff] }
  0x9c   : > { %3425 = vmatmul.mubr.bf16.vlgmr.msra.gmra.mrb[0].mxu0 %v7005_v58  ;;  %3507 = vmatmul.mubr.bf16.vlgmr.msra.gmra.mrb[0].mxu1 %v7005_v58 }
  0x9d   : > { %3516 = vmatpush1.bf16.msra.mxu0 %v5777_v34  ;;  %3598 = vmatpush1.bf16.msra.mxu1 %v5779_v35  ;;  %v5908_v34 = vcombine.high %v381_v29, %v389_v30  ;;  %v396_v35 = vld [vmem:[%s6835_s29 + $0x490] sm:$0xff] }
  0x9e   : > { %3517 = vmatprep.subr.bf16.mxu0 %v5794_v36  ;;  %3599 = vmatprep.subr.bf16.mxu1 %v5796_v37  ;;  %v404_v36 = vld [vmem:[%s6835_s29 + $0x4d0] sm:$0xff]  ;;  %v397_v37 = vld [vmem:[%s6835_s29 + $0x498] sm:$0xff] }
  0x9f   : > { %3547 = vmatprep.mubr.bf16.mxu0 %v6885_v5  ;;  %3629 = vmatprep.mubr.bf16.mxu1 %v6885_v5  ;;  %v5922_v41 = vcombine.high %v396_v35, %v404_v36  ;;  %v5921_v47 = vcombine.low %v396_v35, %v404_v36  ;;  %v5923_v48 = vcombine.low %v397_v37, %v405_v38  ;;  %v517_v35 = vld [vmem:[%s6835_s29 + $0x858] sm:$0xff] }
  0xa1   : > { %3518 = vmatpush1.bf16.msra.mxu0 %v5793_v42  ;;  %3600 = vmatpush1.bf16.msra.mxu1 %v5795_v43  ;;  %v5924_v42 = vcombine.high %v397_v37, %v405_v38  ;;  %v412_v43 = vld [vmem:[%s6835_s29 + $0x510] sm:$0xff] }
  0xa2   : > { %3519 = vmatprep.subr.bf16.mxu0 %v5810_v44  ;;  %3601 = vmatprep.subr.bf16.mxu1 %v5812_v45  ;;  %v420_v44 = vld [vmem:[%s6835_s29 + $0x550] sm:$0xff]  ;;  %v413_v45 = vld [vmem:[%s6835_s29 + $0x518] sm:$0xff] }
  0xa3   : > { %v5938_v50 = vcombine.high %v412_v43, %v420_v44  ;;  %v5937_v56 = vcombine.low %v412_v43, %v420_v44  ;;  %v5939_v57 = vcombine.low %v413_v45, %v421_v46  ;;  %v533_v43 = vld [vmem:[%s6835_s29 + $0x8d8] sm:$0xff] }
  0xa5   : > { %3520 = vmatpush1.bf16.msra.mxu0 %v5809_v51  ;;  %3602 = vmatpush1.bf16.msra.mxu1 %v5811_v52  ;;  %v5940_v51 = vcombine.high %v413_v45, %v421_v46  ;;  %v428_v52 = vld [vmem:[%s6835_s29 + $0x590] sm:$0xff] }
  0xa6   : > { %3521 = vmatprep.subr.bf16.mxu0 %v5826_v53  ;;  %3603 = vmatprep.subr.bf16.mxu1 %v5828_v54  ;;  %v436_v53 = vld [vmem:[%s6835_s29 + $0x5d0] sm:$0xff]  ;;  %v429_v54 = vld [vmem:[%s6835_s29 + $0x598] sm:$0xff] }
  0xa7   : > { %v5954_v59 = vcombine.high %v428_v52, %v436_v53  ;;  %v5953_v2 = vcombine.low %v428_v52, %v436_v53  ;;  %v5955_v3 = vcombine.low %v429_v54, %v437_v55  ;;  %v549_v52 = vld [vmem:[%s6835_s29 + $0x958] sm:$0xff] }
  0xa9   : > { %3522 = vmatpush1.bf16.msra.mxu0 %v5825_v60  ;;  %3604 = vmatpush1.bf16.msra.mxu1 %v5827_v62  ;;  %v5956_v60 = vcombine.high %v429_v54, %v437_v55  ;;  %v444_v62 = vld [vmem:[%s6835_s29 + $0x610] sm:$0xff] }
  0xaa   : > { %3523 = vmatprep.subr.bf16.mxu0 %v5842_v63  ;;  %3605 = vmatprep.subr.bf16.mxu1 %v5844_v0  ;;  %v452_v63 = vld [vmem:[%s6835_s29 + $0x650] sm:$0xff]  ;;  %v445_v0 = vld [vmem:[%s6835_s29 + $0x618] sm:$0xff] }
  0xab   : > { %v5970_v4 = vcombine.high %v444_v62, %v452_v63  ;;  %v5969_v11 = vcombine.low %v444_v62, %v452_v63  ;;  %v5971_v12 = vcombine.low %v445_v0, %v453_v1  ;;  %v565_v62 = vld [vmem:[%s6835_s29 + $0x9d8] sm:$0xff] }
  0xad   : > { %3524 = vmatpush1.bf16.msra.mxu0 %v5841_v6  ;;  %3606 = vmatpush1.bf16.msra.mxu1 %v5843_v7  ;;  %v5972_v6 = vcombine.high %v445_v0, %v453_v1  ;;  %v460_v7 = vld [vmem:[%s6835_s29 + $0x690] sm:$0xff] }
  0xae   : > { %3525 = vmatprep.subr.bf16.mxu0 %v5858_v8  ;;  %3607 = vmatprep.subr.bf16.mxu1 %v5860_v9  ;;  %v468_v8 = vld [vmem:[%s6835_s29 + $0x6d0] sm:$0xff]  ;;  %v461_v9 = vld [vmem:[%s6835_s29 + $0x698] sm:$0xff] }
  0xaf   : > { %v5986_v13 = vcombine.high %v460_v7, %v468_v8  ;;  %v5985_v19 = vcombine.low %v460_v7, %v468_v8  ;;  %v5987_v20 = vcombine.low %v461_v9, %v469_v10  ;;  %v581_v7 = vld [vmem:[%s6835_s29 + $0xa58] sm:$0xff] }
  0xb1   : > { %3526 = vmatpush1.bf16.msra.mxu0 %v5857_v14  ;;  %3608 = vmatpush1.bf16.msra.mxu1 %v5859_v15  ;;  %v5988_v14 = vcombine.high %v461_v9, %v469_v10  ;;  %v476_v15 = vld [vmem:[%s6835_s29 + $0x710] sm:$0xff] }
  0xb2   : > { %3527 = vmatprep.subr.bf16.mxu0 %v5874_v16  ;;  %3609 = vmatprep.subr.bf16.mxu1 %v5876_v17  ;;  %v484_v16 = vld [vmem:[%s6835_s29 + $0x750] sm:$0xff]  ;;  %v477_v17 = vld [vmem:[%s6835_s29 + $0x718] sm:$0xff] }
  0xb3   : > { %v6002_v21 = vcombine.high %v476_v15, %v484_v16  ;;  %v6001_v28 = vcombine.low %v476_v15, %v484_v16  ;;  %v6003_v29 = vcombine.low %v477_v17, %v485_v18  ;;  %v597_v15 = vld [vmem:[%s6835_s29 + $0xad8] sm:$0xff] }
  0xb5   : > { %3528 = vmatpush1.bf16.msra.mxu0 %v5873_v22  ;;  %3610 = vmatpush1.bf16.msra.mxu1 %v5875_v24  ;;  %v6004_v22 = vcombine.high %v477_v17, %v485_v18  ;;  %v492_v24 = vld [vmem:[%s6835_s29 + $0x790] sm:$0xff] }
  0xb6   : > { %3529 = vmatprep.subr.bf16.mxu0 %v5890_v25  ;;  %3611 = vmatprep.subr.bf16.mxu1 %v5892_v26  ;;  %v500_v25 = vld [vmem:[%s6835_s29 + $0x7d0] sm:$0xff]  ;;  %v493_v26 = vld [vmem:[%s6835_s29 + $0x798] sm:$0xff] }
  0xb7   : > { %v6018_v30 = vcombine.high %v492_v24, %v500_v25  ;;  %v6017_v36 = vcombine.low %v492_v24, %v500_v25  ;;  %v6019_v37 = vcombine.low %v493_v26, %v501_v27  ;;  %v613_v24 = vld [vmem:[%s6835_s29 + $0xb58] sm:$0xff] }
  0xb9   : > { %3530 = vmatpush1.bf16.msra.mxu0 %v5889_v31  ;;  %3612 = vmatpush1.bf16.msra.mxu1 %v5891_v61  ;;  %v6020_v31 = vcombine.high %v493_v26, %v501_v27  ;;  %v508_v61 = vld [vmem:[%s6835_s29 + $0x810] sm:$0xff] }
  0xba   : > { %3531 = vmatprep.subr.bf16.mxu0 %v5906_v33  ;;  %3613 = vmatprep.subr.bf16.mxu1 %v5908_v34  ;;  %v516_v33 = vld [vmem:[%s6835_s29 + $0x850] sm:$0xff]  ;;  %v509_v34 = vld [vmem:[%s6835_s29 + $0x818] sm:$0xff] }
  0xbb   : > { %v6034_v38 = vcombine.high %v508_v61, %v516_v33  ;;  %v6033_v44 = vcombine.low %v508_v61, %v516_v33  ;;  %v6035_v45 = vcombine.low %v509_v34, %v517_v35  ;;  %v629_v61 = vld [vmem:[%s6835_s29 + $0xbd8] sm:$0xff] }
  0xbd   : > { %3532 = vmatpush1.bf16.msra.mxu0 %v5905_v39  ;;  %3614 = vmatpush1.bf16.msra.mxu1 %v5907_v40  ;;  %v6036_v39 = vcombine.high %v509_v34, %v517_v35  ;;  %v524_v40 = vld [vmem:[%s6835_s29 + $0x890] sm:$0xff] }
  0xbe   : > { %3533 = vmatprep.subr.bf16.mxu0 %v5922_v41  ;;  %3615 = vmatprep.subr.bf16.mxu1 %v5924_v42  ;;  %v532_v41 = vld [vmem:[%s6835_s29 + $0x8d0] sm:$0xff]  ;;  %v525_v42 = vld [vmem:[%s6835_s29 + $0x898] sm:$0xff] }
  0xbf   : > { %v6050_v46 = vcombine.high %v524_v40, %v532_v41  ;;  %v6049_v53 = vcombine.low %v524_v40, %v532_v41  ;;  %v6051_v54 = vcombine.low %v525_v42, %v533_v43  ;;  %v645_v40 = vld [vmem:[%s6835_s29 + $0xc58] sm:$0xff] }
  0xc1   : > { %3534 = vmatpush1.bf16.msra.mxu0 %v5921_v47  ;;  %3616 = vmatpush1.bf16.msra.mxu1 %v5923_v48  ;;  %v6052_v47 = vcombine.high %v525_v42, %v533_v43  ;;  %v540_v48 = vld [vmem:[%s6835_s29 + $0x910] sm:$0xff] }
  0xc2   : > { %3535 = vmatprep.subr.bf16.mxu0 %v5938_v50  ;;  %3617 = vmatprep.subr.bf16.mxu1 %v5940_v51  ;;  %v548_v50 = vld [vmem:[%s6835_s29 + $0x950] sm:$0xff]  ;;  %v541_v51 = vld [vmem:[%s6835_s29 + $0x918] sm:$0xff] }
  0xc3   : > { %v6066_v55 = vcombine.high %v540_v48, %v548_v50  ;;  %v6065_v63 = vcombine.low %v540_v48, %v548_v50  ;;  %v6067_v0 = vcombine.low %v541_v51, %v549_v52  ;;  %v661_v48 = vld [vmem:[%s6835_s29 + $0xcd8] sm:$0xff] }
  0xc5   : > { %3536 = vmatpush1.bf16.msra.mxu0 %v5937_v56  ;;  %3618 = vmatpush1.bf16.msra.mxu1 %v5939_v57  ;;  %v6068_v56 = vcombine.high %v541_v51, %v549_v52  ;;  %v556_v57 = vld [vmem:[%s6835_s29 + $0x990] sm:$0xff] }
  0xc6   : > { %3537 = vmatprep.subr.bf16.mxu0 %v5954_v59  ;;  %3619 = vmatprep.subr.bf16.mxu1 %v5956_v60  ;;  %v564_v59 = vld [vmem:[%s6835_s29 + $0x9d0] sm:$0xff]  ;;  %v557_v60 = vld [vmem:[%s6835_s29 + $0x998] sm:$0xff] }
  0xc7   : > { %v6082_v1 = vcombine.high %v556_v57, %v564_v59  ;;  %v6081_v8 = vcombine.low %v556_v57, %v564_v59  ;;  %v6083_v9 = vcombine.low %v557_v60, %v565_v62  ;;  %v677_v57 = vld [vmem:[%s6835_s29 + $0xd58] sm:$0xff] }
  0xc9   : > { %3538 = vmatpush1.bf16.msra.mxu0 %v5953_v2  ;;  %3620 = vmatpush1.bf16.msra.mxu1 %v5955_v3  ;;  %v6084_v2 = vcombine.high %v557_v60, %v565_v62  ;;  %v572_v3 = vld [vmem:[%s6835_s29 + $0xa10] sm:$0xff] }
  0xca   : > { %3539 = vmatprep.subr.bf16.mxu0 %v5970_v4  ;;  %3621 = vmatprep.subr.bf16.mxu1 %v5972_v6  ;;  %v580_v4 = vld [vmem:[%s6835_s29 + $0xa50] sm:$0xff]  ;;  %v573_v6 = vld [vmem:[%s6835_s29 + $0xa18] sm:$0xff] }
  0xcb   : > { %v6098_v10 = vcombine.high %v572_v3, %v580_v4  ;;  %v6097_v16 = vcombine.low %v572_v3, %v580_v4  ;;  %v6099_v17 = vcombine.low %v573_v6, %v581_v7  ;;  %v693_v3 = vld [vmem:[%s6835_s29 + $0xdd8] sm:$0xff] }
  0xcd   : > { %3540 = vmatpush1.bf16.msra.mxu0 %v5969_v11  ;;  %3622 = vmatpush1.bf16.msra.mxu1 %v5971_v12  ;;  %v6100_v11 = vcombine.high %v573_v6, %v581_v7  ;;  %v588_v12 = vld [vmem:[%s6835_s29 + $0xa90] sm:$0xff] }
  0xce   : > { %3541 = vmatprep.subr.bf16.mxu0 %v5986_v13  ;;  %3623 = vmatprep.subr.bf16.mxu1 %v5988_v14  ;;  %v596_v13 = vld [vmem:[%s6835_s29 + $0xad0] sm:$0xff]  ;;  %v589_v14 = vld [vmem:[%s6835_s29 + $0xa98] sm:$0xff] }
  0xcf   : > { %v6114_v18 = vcombine.high %v588_v12, %v596_v13  ;;  %v6113_v25 = vcombine.low %v588_v12, %v596_v13  ;;  %v6115_v26 = vcombine.low %v589_v14, %v597_v15  ;;  %v709_v12 = vld [vmem:[%s6835_s29 + $0xe58] sm:$0xff] }
  0xd1   : > { %3542 = vmatpush1.bf16.msra.mxu0 %v5985_v19  ;;  %3624 = vmatpush1.bf16.msra.mxu1 %v5987_v20  ;;  %v6116_v19 = vcombine.high %v589_v14, %v597_v15  ;;  %v604_v20 = vld [vmem:[%s6835_s29 + $0xb10] sm:$0xff] }
  0xd2   : > { %3543 = vmatprep.subr.bf16.mxu0 %v6002_v21  ;;  %3625 = vmatprep.subr.bf16.mxu1 %v6004_v22  ;;  %v612_v21 = vld [vmem:[%s6835_s29 + $0xb50] sm:$0xff]  ;;  %v605_v22 = vld [vmem:[%s6835_s29 + $0xb18] sm:$0xff] }
  0xd3   : > { %v6130_v27 = vcombine.high %v604_v20, %v612_v21  ;;  %v6129_v33 = vcombine.low %v604_v20, %v612_v21  ;;  %v6131_v34 = vcombine.low %v605_v22, %v613_v24  ;;  %v725_v20 = vld [vmem:[%s6835_s29 + $0xed8] sm:$0xff] }
  0xd5   : > { %3544 = vmatpush1.bf16.msra.mxu0 %v6001_v28  ;;  %3626 = vmatpush1.bf16.msra.mxu1 %v6003_v29  ;;  %v6132_v28 = vcombine.high %v605_v22, %v613_v24  ;;  %v620_v29 = vld [vmem:[%s6835_s29 + $0xb90] sm:$0xff] }
  0xd6   : > { %3545 = vmatprep.subr.bf16.mxu0 %v6018_v30  ;;  %3627 = vmatprep.subr.bf16.mxu1 %v6020_v31  ;;  %v628_v30 = vld [vmem:[%s6835_s29 + $0xbd0] sm:$0xff]  ;;  %v621_v31 = vld [vmem:[%s6835_s29 + $0xb98] sm:$0xff] }
  0xd7   : > { %v6146_v35 = vcombine.high %v620_v29, %v628_v30  ;;  %v6145_v41 = vcombine.low %v620_v29, %v628_v30  ;;  %v6147_v42 = vcombine.low %v621_v31, %v629_v61  ;;  %v741_v29 = vld [vmem:[%s6835_s29 + $0xf58] sm:$0xff] }
  0xd9   : > { %3546 = vmatpush1.bf16.msra.mxu0 %v6017_v36  ;;  %3628 = vmatpush1.bf16.msra.mxu1 %v6019_v37  ;;  %v6148_v36 = vcombine.high %v621_v31, %v629_v61  ;;  %v636_v37 = vld [vmem:[%s6835_s29 + $0xc10] sm:$0xff] }
  0xda   : > { %3556 = vmatprep.subr.bf16.mxu0 %v6034_v38  ;;  %3638 = vmatprep.subr.bf16.mxu1 %v6036_v39  ;;  %v644_v38 = vld [vmem:[%s6835_s29 + $0xc50] sm:$0xff]  ;;  %v637_v39 = vld [vmem:[%s6835_s29 + $0xc18] sm:$0xff] }
  0xdb   : > { %v6162_v43 = vcombine.high %v636_v37, %v644_v38  ;;  %v6161_v50 = vcombine.low %v636_v37, %v644_v38  ;;  %v6163_v51 = vcombine.low %v637_v39, %v645_v40  ;;  %v757_v37 = vld [vmem:[%s6835_s29 + $0xfd8] sm:$0xff] }
  0xdc   : > { %3548 = vmatmul.mubr.bf16.vlgmr.msra.gmra.mrb[4].mxu0 %v6929_v23  ;;  %3630 = vmatmul.mubr.bf16.vlgmr.msra.gmra.mrb[4].mxu1 %v6929_v23 }
  0xdd   : > { %3557 = vmatpush1.bf16.msra.mxu0 %v6033_v44  ;;  %3639 = vmatpush1.bf16.msra.mxu1 %v6035_v45  ;;  %v6164_v44 = vcombine.high %v637_v39, %v645_v40  ;;  %v652_v45 = vld [vmem:[%s6835_s29 + $0xc90] sm:$0xff] }
  0xde   : > { %3558 = vmatprep.subr.bf16.mxu0 %v6050_v46  ;;  %3640 = vmatprep.subr.bf16.mxu1 %v6052_v47  ;;  %v660_v46 = vld [vmem:[%s6835_s29 + $0xcd0] sm:$0xff]  ;;  %v653_v47 = vld [vmem:[%s6835_s29 + $0xc98] sm:$0xff] }
  0xdf   : > { %3588 = vmatprep.mubr.bf16.mxu0 %v6937_v32  ;;  %3670 = vmatprep.mubr.bf16.mxu1 %v6937_v32  ;;  %v6178_v52 = vcombine.high %v652_v45, %v660_v46  ;;  %v6177_v59 = vcombine.low %v652_v45, %v660_v46  ;;  %v6179_v60 = vcombine.low %v653_v47, %v661_v48  ;;  %v263_v45 = vld [vmem:[%s6835_s29 + $0x68] sm:$0xff] }
  0xe1   : > { %3559 = vmatpush1.bf16.msra.mxu0 %v6049_v53  ;;  %3641 = vmatpush1.bf16.msra.mxu1 %v6051_v54  ;;  %v6180_v53 = vcombine.high %v653_v47, %v661_v48  ;;  %v668_v54 = vld [vmem:[%s6835_s29 + $0xd10] sm:$0xff] }
  0xe2   : > { %3560 = vmatprep.subr.bf16.mxu0 %v6066_v55  ;;  %3642 = vmatprep.subr.bf16.mxu1 %v6068_v56  ;;  %v676_v55 = vld [vmem:[%s6835_s29 + $0xd50] sm:$0xff]  ;;  %v669_v56 = vld [vmem:[%s6835_s29 + $0xd18] sm:$0xff] }
  0xe3   : > { %v6194_v62 = vcombine.high %v668_v54, %v676_v55  ;;  %v6193_v4 = vcombine.low %v668_v54, %v676_v55  ;;  %v6195_v6 = vcombine.low %v669_v56, %v677_v57  ;;  %v279_v54 = vld [vmem:[%s6835_s29 + $0xe8] sm:$0xff] }
  0xe5   : > { %3561 = vmatpush1.bf16.msra.mxu0 %v6065_v63  ;;  %3643 = vmatpush1.bf16.msra.mxu1 %v6067_v0  ;;  %v6196_v63 = vcombine.high %v669_v56, %v677_v57  ;;  %v684_v0 = vld [vmem:[%s6835_s29 + $0xd90] sm:$0xff] }
  0xe6   : > { %3562 = vmatprep.subr.bf16.mxu0 %v6082_v1  ;;  %3644 = vmatprep.subr.bf16.mxu1 %v6084_v2  ;;  %v692_v1 = vld [vmem:[%s6835_s29 + $0xdd0] sm:$0xff]  ;;  %v685_v2 = vld [vmem:[%s6835_s29 + $0xd98] sm:$0xff] }
  0xe7   : > { %v6210_v7 = vcombine.high %v684_v0, %v692_v1  ;;  %v6209_v13 = vcombine.low %v684_v0, %v692_v1  ;;  %v6211_v14 = vcombine.low %v685_v2, %v693_v3  ;;  %v295_v0 = vld [vmem:[%s6835_s29 + $0x168] sm:$0xff] }
  0xe9   : > { %3563 = vmatpush1.bf16.msra.mxu0 %v6081_v8  ;;  %3645 = vmatpush1.bf16.msra.mxu1 %v6083_v9  ;;  %v6212_v8 = vcombine.high %v685_v2, %v693_v3  ;;  %v700_v9 = vld [vmem:[%s6835_s29 + $0xe10] sm:$0xff] }
  0xea   : > { %3564 = vmatprep.subr.bf16.mxu0 %v6098_v10  ;;  %3646 = vmatprep.subr.bf16.mxu1 %v6100_v11  ;;  %v708_v10 = vld [vmem:[%s6835_s29 + $0xe50] sm:$0xff]  ;;  %v701_v11 = vld [vmem:[%s6835_s29 + $0xe18] sm:$0xff] }
  0xeb   : > { %v6226_v15 = vcombine.high %v700_v9, %v708_v10  ;;  %v6225_v21 = vcombine.low %v700_v9, %v708_v10  ;;  %v6227_v22 = vcombine.low %v701_v11, %v709_v12  ;;  %v311_v9 = vld [vmem:[%s6835_s29 + $0x1e8] sm:$0xff] }
  0xed   : > { %3565 = vmatpush1.bf16.msra.mxu0 %v6097_v16  ;;  %3647 = vmatpush1.bf16.msra.mxu1 %v6099_v17  ;;  %v6228_v16 = vcombine.high %v701_v11, %v709_v12  ;;  %v716_v17 = vld [vmem:[%s6835_s29 + $0xe90] sm:$0xff] }
  0xee   : > { %3566 = vmatprep.subr.bf16.mxu0 %v6114_v18  ;;  %3648 = vmatprep.subr.bf16.mxu1 %v6116_v19  ;;  %v724_v18 = vld [vmem:[%s6835_s29 + $0xed0] sm:$0xff]  ;;  %v717_v19 = vld [vmem:[%s6835_s29 + $0xe98] sm:$0xff] }
  0xef   : > { %v6242_v24 = vcombine.high %v716_v17, %v724_v18  ;;  %v6241_v30 = vcombine.low %v716_v17, %v724_v18  ;;  %v6243_v31 = vcombine.low %v717_v19, %v725_v20  ;;  %v327_v17 = vld [vmem:[%s6835_s29 + $0x268] sm:$0xff] }
  0xf1   : > { %3567 = vmatpush1.bf16.msra.mxu0 %v6113_v25  ;;  %3649 = vmatpush1.bf16.msra.mxu1 %v6115_v26  ;;  %v6244_v25 = vcombine.high %v717_v19, %v725_v20  ;;  %v732_v26 = vld [vmem:[%s6835_s29 + $0xf10] sm:$0xff] }
  0xf2   : > { %3568 = vmatprep.subr.bf16.mxu0 %v6130_v27  ;;  %3650 = vmatprep.subr.bf16.mxu1 %v6132_v28  ;;  %v740_v27 = vld [vmem:[%s6835_s29 + $0xf50] sm:$0xff]  ;;  %v733_v28 = vld [vmem:[%s6835_s29 + $0xf18] sm:$0xff] }
  0xf3   : > { %v6258_v61 = vcombine.high %v732_v26, %v740_v27  ;;  %v6257_v38 = vcombine.low %v732_v26, %v740_v27  ;;  %v6259_v39 = vcombine.low %v733_v28, %v741_v29  ;;  %v343_v26 = vld [vmem:[%s6835_s29 + $0x2e8] sm:$0xff] }
  0xf5   : > { %3569 = vmatpush1.bf16.msra.mxu0 %v6129_v33  ;;  %3651 = vmatpush1.bf16.msra.mxu1 %v6131_v34  ;;  %v6260_v33 = vcombine.high %v733_v28, %v741_v29  ;;  %v748_v34 = vld [vmem:[%s6835_s29 + $0xf90] sm:$0xff] }
  0xf6   : > { %3570 = vmatprep.subr.bf16.mxu0 %v6146_v35  ;;  %3652 = vmatprep.subr.bf16.mxu1 %v6148_v36  ;;  %v756_v35 = vld [vmem:[%s6835_s29 + $0xfd0] sm:$0xff]  ;;  %v749_v36 = vld [vmem:[%s6835_s29 + $0xf98] sm:$0xff] }
  0xf7   : > { %v6274_v40 = vcombine.high %v748_v34, %v756_v35  ;;  %v6273_v46 = vcombine.low %v748_v34, %v756_v35  ;;  %v6275_v47 = vcombine.low %v749_v36, %v757_v37  ;;  %v359_v34 = vld [vmem:[%s6835_s29 + $0x368] sm:$0xff] }
  0xf9   : > { %3571 = vmatpush1.bf16.msra.mxu0 %v6145_v41  ;;  %3653 = vmatpush1.bf16.msra.mxu1 %v6147_v42  ;;  %v6276_v41 = vcombine.high %v749_v36, %v757_v37  ;;  %v254_v42 = vld [vmem:[%s6835_s29 + $0x20] sm:$0xff] }
  0xfa   : > { %3572 = vmatprep.subr.bf16.mxu0 %v6162_v43  ;;  %3654 = vmatprep.subr.bf16.mxu1 %v6164_v44  ;;  %v262_v43 = vld [vmem:[%s6835_s29 + $0x60] sm:$0xff]  ;;  %v255_v44 = vld [vmem:[%s6835_s29 + $0x28] sm:$0xff] }
  0xfb   : > { %v5782_v48 = vcombine.high %v254_v42, %v262_v43  ;;  %v5781_v55 = vcombine.low %v254_v42, %v262_v43  ;;  %v5783_v56 = vcombine.low %v255_v44, %v263_v45  ;;  %v375_v42 = vld [vmem:[%s6835_s29 + $0x3e8] sm:$0xff] }
  0xfd   : > { %3573 = vmatpush1.bf16.msra.mxu0 %v6161_v50  ;;  %3655 = vmatpush1.bf16.msra.mxu1 %v6163_v51  ;;  %v5784_v50 = vcombine.high %v255_v44, %v263_v45  ;;  %v270_v51 = vld [vmem:[%s6835_s29 + $0xa0] sm:$0xff] }
  0xfe   : > { %3574 = vmatprep.subr.bf16.mxu0 %v6178_v52  ;;  %3656 = vmatprep.subr.bf16.mxu1 %v6180_v53  ;;  %v278_v52 = vld [vmem:[%s6835_s29 + $0xe0] sm:$0xff]  ;;  %v271_v53 = vld [vmem:[%s6835_s29 + $0xa8] sm:$0xff] }
  0xff   : > { %v5798_v57 = vcombine.high %v270_v51, %v278_v52  ;;  %v5797_v1 = vcombine.low %v270_v51, %v278_v52  ;;  %v5799_v2 = vcombine.low %v271_v53, %v279_v54  ;;  %v391_v51 = vld [vmem:[%s6835_s29 + $0x468] sm:$0xff] }
 0x101   : > { %3575 = vmatpush1.bf16.msra.mxu0 %v6177_v59  ;;  %3657 = vmatpush1.bf16.msra.mxu1 %v6179_v60  ;;  %v5800_v59 = vcombine.high %v271_v53, %v279_v54  ;;  %v286_v60 = vld [vmem:[%s6835_s29 + $0x120] sm:$0xff] }
 0x102   : > { %3576 = vmatprep.subr.bf16.mxu0 %v6194_v62  ;;  %3658 = vmatprep.subr.bf16.mxu1 %v6196_v63  ;;  %v294_v62 = vld [vmem:[%s6835_s29 + $0x160] sm:$0xff]  ;;  %v287_v63 = vld [vmem:[%s6835_s29 + $0x128] sm:$0xff] }
 0x103   : > { %v5814_v3 = vcombine.high %v286_v60, %v294_v62  ;;  %v5813_v10 = vcombine.low %v286_v60, %v294_v62  ;;  %v5815_v11 = vcombine.low %v287_v63, %v295_v0  ;;  %v407_v60 = vld [vmem:[%s6835_s29 + $0x4e8] sm:$0xff] }
 0x105   : > { %3577 = vmatpush1.bf16.msra.mxu0 %v6193_v4  ;;  %3659 = vmatpush1.bf16.msra.mxu1 %v6195_v6  ;;  %v5816_v4 = vcombine.high %v287_v63, %v295_v0  ;;  %v302_v6 = vld [vmem:[%s6835_s29 + $0x1a0] sm:$0xff] }
 0x106   : > { %3578 = vmatprep.subr.bf16.mxu0 %v6210_v7  ;;  %3660 = vmatprep.subr.bf16.mxu1 %v6212_v8  ;;  %v310_v7 = vld [vmem:[%s6835_s29 + $0x1e0] sm:$0xff]  ;;  %v303_v8 = vld [vmem:[%s6835_s29 + $0x1a8] sm:$0xff] }
 0x107   : > { %v5830_v12 = vcombine.high %v302_v6, %v310_v7  ;;  %v5829_v18 = vcombine.low %v302_v6, %v310_v7  ;;  %v5831_v19 = vcombine.low %v303_v8, %v311_v9  ;;  %v423_v6 = vld [vmem:[%s6835_s29 + $0x568] sm:$0xff] }
 0x109   : > { %3579 = vmatpush1.bf16.msra.mxu0 %v6209_v13  ;;  %3661 = vmatpush1.bf16.msra.mxu1 %v6211_v14  ;;  %v5832_v13 = vcombine.high %v303_v8, %v311_v9  ;;  %v318_v14 = vld [vmem:[%s6835_s29 + $0x220] sm:$0xff] }
 0x10a   : > { %3580 = vmatprep.subr.bf16.mxu0 %v6226_v15  ;;  %3662 = vmatprep.subr.bf16.mxu1 %v6228_v16  ;;  %v326_v15 = vld [vmem:[%s6835_s29 + $0x260] sm:$0xff]  ;;  %v319_v16 = vld [vmem:[%s6835_s29 + $0x228] sm:$0xff] }
 0x10b   : > { %v5846_v20 = vcombine.high %v318_v14, %v326_v15  ;;  %v5845_v27 = vcombine.low %v318_v14, %v326_v15  ;;  %v5847_v28 = vcombine.low %v319_v16, %v327_v17  ;;  %v439_v14 = vld [vmem:[%s6835_s29 + $0x5e8] sm:$0xff] }
 0x10d   : > { %3581 = vmatpush1.bf16.msra.mxu0 %v6225_v21  ;;  %3663 = vmatpush1.bf16.msra.mxu1 %v6227_v22  ;;  %v5848_v21 = vcombine.high %v319_v16, %v327_v17  ;;  %v334_v22 = vld [vmem:[%s6835_s29 + $0x2a0] sm:$0xff] }
 0x10e   : > { %3582 = vmatprep.subr.bf16.mxu0 %v6242_v24  ;;  %3664 = vmatprep.subr.bf16.mxu1 %v6244_v25  ;;  %v342_v24 = vld [vmem:[%s6835_s29 + $0x2e0] sm:$0xff]  ;;  %v335_v25 = vld [vmem:[%s6835_s29 + $0x2a8] sm:$0xff] }
 0x10f   : > { %v5862_v29 = vcombine.high %v334_v22, %v342_v24  ;;  %v5861_v35 = vcombine.low %v334_v22, %v342_v24  ;;  %v5863_v36 = vcombine.low %v335_v25, %v343_v26  ;;  %v455_v22 = vld [vmem:[%s6835_s29 + $0x668] sm:$0xff] }
 0x111   : > { %3583 = vmatpush1.bf16.msra.mxu0 %v6241_v30  ;;  %3665 = vmatpush1.bf16.msra.mxu1 %v6243_v31  ;;  %v5864_v30 = vcombine.high %v335_v25, %v343_v26  ;;  %v350_v31 = vld [vmem:[%s6835_s29 + $0x320] sm:$0xff] }
 0x112   : > { %3584 = vmatprep.subr.bf16.mxu0 %v6258_v61  ;;  %3666 = vmatprep.subr.bf16.mxu1 %v6260_v33  ;;  %v358_v61 = vld [vmem:[%s6835_s29 + $0x360] sm:$0xff]  ;;  %v351_v33 = vld [vmem:[%s6835_s29 + $0x328] sm:$0xff] }
 0x113   : > { %v5878_v37 = vcombine.high %v350_v31, %v358_v61  ;;  %v5877_v43 = vcombine.low %v350_v31, %v358_v61  ;;  %v5879_v44 = vcombine.low %v351_v33, %v359_v34  ;;  %v471_v31 = vld [vmem:[%s6835_s29 + $0x6e8] sm:$0xff] }
 0x115   : > { %3585 = vmatpush1.bf16.msra.mxu0 %v6257_v38  ;;  %3667 = vmatpush1.bf16.msra.mxu1 %v6259_v39  ;;  %v5880_v38 = vcombine.high %v351_v33, %v359_v34  ;;  %v366_v39 = vld [vmem:[%s6835_s29 + $0x3a0] sm:$0xff] }
 0x116   : > { %3586 = vmatprep.subr.bf16.mxu0 %v6274_v40  ;;  %3668 = vmatprep.subr.bf16.mxu1 %v6276_v41  ;;  %v374_v40 = vld [vmem:[%s6835_s29 + $0x3e0] sm:$0xff]  ;;  %v367_v41 = vld [vmem:[%s6835_s29 + $0x3a8] sm:$0xff] }
 0x117   : > { %v5894_v45 = vcombine.high %v366_v39, %v374_v40  ;;  %v5893_v52 = vcombine.low %v366_v39, %v374_v40  ;;  %v5895_v53 = vcombine.low %v367_v41, %v375_v42  ;;  %v487_v39 = vld [vmem:[%s6835_s29 + $0x768] sm:$0xff] }
 0x119   : > { %3587 = vmatpush1.bf16.msra.mxu0 %v6273_v46  ;;  %3669 = vmatpush1.bf16.msra.mxu1 %v6275_v47  ;;  %v5896_v46 = vcombine.high %v367_v41, %v375_v42  ;;  %v382_v47 = vld [vmem:[%s6835_s29 + $0x420] sm:$0xff] }
 0x11a   : > { %3679 = vmatprep.subr.bf16.mxu0 %v5782_v48  ;;  %3761 = vmatprep.subr.bf16.mxu1 %v5784_v50  ;;  %v390_v48 = vld [vmem:[%s6835_s29 + $0x460] sm:$0xff]  ;;  %v383_v50 = vld [vmem:[%s6835_s29 + $0x428] sm:$0xff] }
 0x11b   : > { %v5910_v54 = vcombine.high %v382_v47, %v390_v48  ;;  %v5909_v62 = vcombine.low %v382_v47, %v390_v48  ;;  %v5911_v63 = vcombine.low %v383_v50, %v391_v51  ;;  %v503_v47 = vld [vmem:[%s6835_s29 + $0x7e8] sm:$0xff] }
 0x11c   : > { %3589 = vmatmul.mubr.bf16.vlgmr.msra.gmra.mrb[4].mxu0 %v7005_v58  ;;  %3671 = vmatmul.mubr.bf16.vlgmr.msra.gmra.mrb[4].mxu1 %v7005_v58 }
 0x11d   : > { %3680 = vmatpush1.bf16.msra.mxu0 %v5781_v55  ;;  %3762 = vmatpush1.bf16.msra.mxu1 %v5783_v56  ;;  %v5912_v55 = vcombine.high %v383_v50, %v391_v51  ;;  %v398_v56 = vld [vmem:[%s6835_s29 + $0x4a0] sm:$0xff] }
 0x11e   : > { %3681 = vmatprep.subr.bf16.mxu0 %v5798_v57  ;;  %3763 = vmatprep.subr.bf16.mxu1 %v5800_v59  ;;  %v406_v57 = vld [vmem:[%s6835_s29 + $0x4e0] sm:$0xff]  ;;  %v399_v59 = vld [vmem:[%s6835_s29 + $0x4a8] sm:$0xff] }
 0x11f   : > { %3711 = vmatprep.mubr.bf16.mxu0 %v6885_v5  ;;  %3793 = vmatprep.mubr.bf16.mxu1 %v6885_v5  ;;  %v5926_v0 = vcombine.high %v398_v56, %v406_v57  ;;  %v5925_v7 = vcombine.low %v398_v56, %v406_v57  ;;  %v5927_v8 = vcombine.low %v399_v59, %v407_v60  ;;  %v519_v56 = vld [vmem:[%s6835_s29 + $0x868] sm:$0xff] }
 0x121   : > { %3682 = vmatpush1.bf16.msra.mxu0 %v5797_v1  ;;  %3764 = vmatpush1.bf16.msra.mxu1 %v5799_v2  ;;  %v5928_v1 = vcombine.high %v399_v59, %v407_v60  ;;  %v414_v2 = vld [vmem:[%s6835_s29 + $0x520] sm:$0xff] }
 0x122   : > { %3683 = vmatprep.subr.bf16.mxu0 %v5814_v3  ;;  %3765 = vmatprep.subr.bf16.mxu1 %v5816_v4  ;;  %v422_v3 = vld [vmem:[%s6835_s29 + $0x560] sm:$0xff]  ;;  %v415_v4 = vld [vmem:[%s6835_s29 + $0x528] sm:$0xff] }
 0x123   : > { %v5942_v9 = vcombine.high %v414_v2, %v422_v3  ;;  %v5941_v15 = vcombine.low %v414_v2, %v422_v3  ;;  %v5943_v16 = vcombine.low %v415_v4, %v423_v6  ;;  %v535_v2 = vld [vmem:[%s6835_s29 + $0x8e8] sm:$0xff] }
 0x125   : > { %3684 = vmatpush1.bf16.msra.mxu0 %v5813_v10  ;;  %3766 = vmatpush1.bf16.msra.mxu1 %v5815_v11  ;;  %v5944_v10 = vcombine.high %v415_v4, %v423_v6  ;;  %v430_v11 = vld [vmem:[%s6835_s29 + $0x5a0] sm:$0xff] }
 0x126   : > { %3685 = vmatprep.subr.bf16.mxu0 %v5830_v12  ;;  %3767 = vmatprep.subr.bf16.mxu1 %v5832_v13  ;;  %v438_v12 = vld [vmem:[%s6835_s29 + $0x5e0] sm:$0xff]  ;;  %v431_v13 = vld [vmem:[%s6835_s29 + $0x5a8] sm:$0xff] }
 0x127   : > { %v5958_v17 = vcombine.high %v430_v11, %v438_v12  ;;  %v5957_v24 = vcombine.low %v430_v11, %v438_v12  ;;  %v5959_v25 = vcombine.low %v431_v13, %v439_v14  ;;  %v551_v11 = vld [vmem:[%s6835_s29 + $0x968] sm:$0xff] }
 0x129   : > { %3686 = vmatpush1.bf16.msra.mxu0 %v5829_v18  ;;  %3768 = vmatpush1.bf16.msra.mxu1 %v5831_v19  ;;  %v5960_v18 = vcombine.high %v431_v13, %v439_v14  ;;  %v446_v19 = vld [vmem:[%s6835_s29 + $0x620] sm:$0xff] }
 0x12a   : > { %3687 = vmatprep.subr.bf16.mxu0 %v5846_v20  ;;  %3769 = vmatprep.subr.bf16.mxu1 %v5848_v21  ;;  %v454_v20 = vld [vmem:[%s6835_s29 + $0x660] sm:$0xff]  ;;  %v447_v21 = vld [vmem:[%s6835_s29 + $0x628] sm:$0xff] }
 0x12b   : > { %v5974_v26 = vcombine.high %v446_v19, %v454_v20  ;;  %v5973_v61 = vcombine.low %v446_v19, %v454_v20  ;;  %v5975_v33 = vcombine.low %v447_v21, %v455_v22  ;;  %v567_v19 = vld [vmem:[%s6835_s29 + $0x9e8] sm:$0xff] }
 0x12d   : > { %3688 = vmatpush1.bf16.msra.mxu0 %v5845_v27  ;;  %3770 = vmatpush1.bf16.msra.mxu1 %v5847_v28  ;;  %v5976_v27 = vcombine.high %v447_v21, %v455_v22  ;;  %v462_v28 = vld [vmem:[%s6835_s29 + $0x6a0] sm:$0xff] }
 0x12e   : > { %3689 = vmatprep.subr.bf16.mxu0 %v5862_v29  ;;  %3771 = vmatprep.subr.bf16.mxu1 %v5864_v30  ;;  %v470_v29 = vld [vmem:[%s6835_s29 + $0x6e0] sm:$0xff]  ;;  %v463_v30 = vld [vmem:[%s6835_s29 + $0x6a8] sm:$0xff] }
 0x12f   : > { %v5990_v34 = vcombine.high %v462_v28, %v470_v29  ;;  %v5989_v40 = vcombine.low %v462_v28, %v470_v29  ;;  %v5991_v41 = vcombine.low %v463_v30, %v471_v31  ;;  %v583_v28 = vld [vmem:[%s6835_s29 + $0xa68] sm:$0xff] }
 0x131   : > { %3690 = vmatpush1.bf16.msra.mxu0 %v5861_v35  ;;  %3772 = vmatpush1.bf16.msra.mxu1 %v5863_v36  ;;  %v5992_v35 = vcombine.high %v463_v30, %v471_v31  ;;  %v478_v36 = vld [vmem:[%s6835_s29 + $0x720] sm:$0xff] }
 0x132   : > { %3691 = vmatprep.subr.bf16.mxu0 %v5878_v37  ;;  %3773 = vmatprep.subr.bf16.mxu1 %v5880_v38  ;;  %v486_v37 = vld [vmem:[%s6835_s29 + $0x760] sm:$0xff]  ;;  %v479_v38 = vld [vmem:[%s6835_s29 + $0x728] sm:$0xff] }
 0x133   : > { %v6006_v42 = vcombine.high %v478_v36, %v486_v37  ;;  %v6005_v48 = vcombine.low %v478_v36, %v486_v37  ;;  %v6007_v50 = vcombine.low %v479_v38, %v487_v39  ;;  %v598_v36 = vld [vmem:[%s6835_s29 + $0xae0] sm:$0xff]  ;;  %v591_v37 = vld [vmem:[%s6835_s29 + $0xaa8] sm:$0xff] }
 0x135   : > { %3692 = vmatpush1.bf16.msra.mxu0 %v5877_v43  ;;  %3774 = vmatpush1.bf16.msra.mxu1 %v5879_v44  ;;  %v6008_v43 = vcombine.high %v479_v38, %v487_v39  ;;  %v494_v44 = vld [vmem:[%s6835_s29 + $0x7a0] sm:$0xff]  ;;  %v599_v38 = vld [vmem:[%s6835_s29 + $0xae8] sm:$0xff] }
 0x136   : > { %3693 = vmatprep.subr.bf16.mxu0 %v5894_v45  ;;  %3775 = vmatprep.subr.bf16.mxu1 %v5896_v46  ;;  %v502_v45 = vld [vmem:[%s6835_s29 + $0x7e0] sm:$0xff]  ;;  %v495_v46 = vld [vmem:[%s6835_s29 + $0x7a8] sm:$0xff] }
 0x137   : > { %v6022_v51 = vcombine.high %v494_v44, %v502_v45  ;;  %v6021_v57 = vcombine.low %v494_v44, %v502_v45  ;;  %v6023_v59 = vcombine.low %v495_v46, %v503_v47  ;;  %v606_v44 = vld [vmem:[%s6835_s29 + $0xb20] sm:$0xff] }
 0x138   : > { %v614_v45 = vld [vmem:[%s6835_s29 + $0xb60] sm:$0xff] }
 0x139   : > { %3694 = vmatpush1.bf16.msra.mxu0 %v5893_v52  ;;  %3776 = vmatpush1.bf16.msra.mxu1 %v5895_v53  ;;  %v6024_v52 = vcombine.high %v495_v46, %v503_v47  ;;  %v510_v53 = vld [vmem:[%s6835_s29 + $0x820] sm:$0xff]  ;;  %v607_v46 = vld [vmem:[%s6835_s29 + $0xb28] sm:$0xff] }
 0x13a   : > { %3695 = vmatprep.subr.bf16.mxu0 %v5910_v54  ;;  %3777 = vmatprep.subr.bf16.mxu1 %v5912_v55  ;;  %v518_v54 = vld [vmem:[%s6835_s29 + $0x860] sm:$0xff]  ;;  %v511_v55 = vld [vmem:[%s6835_s29 + $0x828] sm:$0xff] }
 0x13b   : > { %v6038_v60 = vcombine.high %v510_v53, %v518_v54  ;;  %v6037_v3 = vcombine.low %v510_v53, %v518_v54  ;;  %v6039_v4 = vcombine.low %v511_v55, %v519_v56  ;;  %v615_v47 = vld [vmem:[%s6835_s29 + $0xb68] sm:$0xff] }
 0x13c   : > { %v6136_v54 = vcombine.high %v607_v46, %v615_v47 }
 0x13d   : > { %3696 = vmatpush1.bf16.msra.mxu0 %v5909_v62  ;;  %3778 = vmatpush1.bf16.msra.mxu1 %v5911_v63  ;;  %v6040_v62 = vcombine.high %v511_v55, %v519_v56  ;;  %v526_v63 = vld [vmem:[%s6835_s29 + $0x8a0] sm:$0xff] }
 0x13e   : > { %3697 = vmatprep.subr.bf16.mxu0 %v5926_v0  ;;  %3779 = vmatprep.subr.bf16.mxu1 %v5928_v1  ;;  %v534_v0 = vld [vmem:[%s6835_s29 + $0x8e0] sm:$0xff]  ;;  %v527_v1 = vld [vmem:[%s6835_s29 + $0x8a8] sm:$0xff] }
 0x13f   : > { %v6054_v6 = vcombine.high %v526_v63, %v534_v0  ;;  %v6053_v12 = vcombine.low %v526_v63, %v534_v0  ;;  %v6055_v13 = vcombine.low %v527_v1, %v535_v2  ;;  %v622_v55 = vld [vmem:[%s6835_s29 + $0xba0] sm:$0xff] }
 0x140   : > { %v630_v56 = vld [vmem:[%s6835_s29 + $0xbe0] sm:$0xff] }
 0x141   : > { %3698 = vmatpush1.bf16.msra.mxu0 %v5925_v7  ;;  %3780 = vmatpush1.bf16.msra.mxu1 %v5927_v8  ;;  %v6056_v7 = vcombine.high %v527_v1, %v535_v2  ;;  %v542_v8 = vld [vmem:[%s6835_s29 + $0x920] sm:$0xff]  ;;  %v6133_v2 = vcombine.low %v606_v44, %v614_v45 }
 0x142   : > { %3699 = vmatprep.subr.bf16.mxu0 %v5942_v9  ;;  %3781 = vmatprep.subr.bf16.mxu1 %v5944_v10  ;;  %v550_v9 = vld [vmem:[%s6835_s29 + $0x960] sm:$0xff]  ;;  %v543_v10 = vld [vmem:[%s6835_s29 + $0x928] sm:$0xff] }
 0x143   : > { %v6070_v14 = vcombine.high %v542_v8, %v550_v9  ;;  %v6069_v20 = vcombine.low %v542_v8, %v550_v9  ;;  %v6071_v21 = vcombine.low %v543_v10, %v551_v11  ;;  %v6150_v8 = vcombine.high %v622_v55, %v630_v56 }
 0x145   : > { %3700 = vmatpush1.bf16.msra.mxu0 %v5941_v15  ;;  %3782 = vmatpush1.bf16.msra.mxu1 %v5943_v16  ;;  %v6072_v15 = vcombine.high %v543_v10, %v551_v11  ;;  %v558_v16 = vld [vmem:[%s6835_s29 + $0x9a0] sm:$0xff] }
 0x146   : > { %3701 = vmatprep.subr.bf16.mxu0 %v5958_v17  ;;  %3783 = vmatprep.subr.bf16.mxu1 %v5960_v18  ;;  %v566_v17 = vld [vmem:[%s6835_s29 + $0x9e0] sm:$0xff]  ;;  %v559_v18 = vld [vmem:[%s6835_s29 + $0x9a8] sm:$0xff] }
 0x147   : > { %v6086_v22 = vcombine.high %v558_v16, %v566_v17  ;;  %v6085_v29 = vcombine.low %v558_v16, %v566_v17  ;;  %v6087_v30 = vcombine.low %v559_v18, %v567_v19  ;;  %v647_v16 = vld [vmem:[%s6835_s29 + $0xc68] sm:$0xff]  ;;  %v245_v17 = vld [vmem:[#allocation2] sm:$0xff] }
 0x149   : > { %3702 = vmatpush1.bf16.msra.mxu0 %v5957_v24  ;;  %3784 = vmatpush1.bf16.msra.mxu1 %v5959_v25  ;;  %v6088_v24 = vcombine.high %v559_v18, %v567_v19  ;;  %v574_v25 = vld [vmem:[%s6835_s29 + $0xa20] sm:$0xff]  ;;  %v6149_v18 = vcombine.low %v622_v55, %v630_v56 }
 0x14a   : > { %3703 = vmatprep.subr.bf16.mxu0 %v5974_v26  ;;  %3785 = vmatprep.subr.bf16.mxu1 %v5976_v27  ;;  %v582_v26 = vld [vmem:[%s6835_s29 + $0xa60] sm:$0xff]  ;;  %v575_v27 = vld [vmem:[%s6835_s29 + $0xa28] sm:$0xff] }
 0x14b   : > { %v6102_v31 = vcombine.high %v574_v25, %v582_v26  ;;  %v6101_v39 = vcombine.low %v574_v25, %v582_v26  ;;  %v662_v25 = vld [vmem:[%s6835_s29 + $0xce0] sm:$0xff] }
 0x14d   : > { %3704 = vmatpush1.bf16.msra.mxu0 %v5973_v61  ;;  %3786 = vmatpush1.bf16.msra.mxu1 %v5975_v33  ;;  %v6104_v61 = vcombine.high %v575_v27, %v583_v28  ;;  %v6780_v33 = vmov 1983009808  }
 0x14e   : > { %3705 = vmatprep.subr.bf16.mxu0 %v5990_v34  ;;  %3787 = vmatprep.subr.bf16.mxu1 %v5992_v35  ;;  %v4026_v34 = vunpack.c.l.s4 %v6780_v33  ;;  %v590_v35 = vld [vmem:[%s6835_s29 + $0xaa0] sm:$0xff] }
 0x14f   : > { %v670_v33 = vld [vmem:[%s6835_s29 + $0xd20] sm:$0xff] }
 0x151   : > { %3706 = vmatpush1.bf16.msra.mxu0 %v5989_v40  ;;  %3788 = vmatpush1.bf16.msra.mxu1 %v5991_v41  ;;  %v6103_v40 = vcombine.low %v575_v27, %v583_v28  ;;  %v6118_v41 = vcombine.high %v590_v35, %v598_v36  ;;  %v655_v27 = vld [vmem:[%s6835_s29 + $0xca8] sm:$0xff] }
 0x152   : > { %3707 = vmatprep.subr.bf16.mxu0 %v6006_v42  ;;  %3789 = vmatprep.subr.bf16.mxu1 %v6008_v43  ;;  %v4027_v42 = vunpack.c.0.s8 %v4026_v34  ;;  %v6120_v43 = vcombine.high %v591_v37, %v599_v38  ;;  %v663_v28 = vld [vmem:[%s6835_s29 + $0xce8] sm:$0xff]  ;;  %v678_v34 = vld [vmem:[%s6835_s29 + $0xd60] sm:$0xff] }
 0x154   : > { %v7238_v53 = vsub.s32 %v4027_v42, %v6862_v49  ;;  %v694_v42 = vld [vmem:[%s6835_s29 + $0xde0] sm:$0xff] }
 0x155   : > { %3708 = vmatpush1.bf16.msra.mxu0 %v6005_v48  ;;  %3790 = vmatpush1.bf16.msra.mxu1 %v6007_v50  ;;  %v6117_v48 = vcombine.low %v590_v35, %v598_v36  ;;  %v6119_v50 = vcombine.low %v591_v37, %v599_v38  ;;  %v671_v35 = vld [vmem:[%s6835_s29 + $0xd28] sm:$0xff]  ;;  %v6183_v38 = vcombine.low %v655_v27, %v663_v28 }
 0x156   : > { %3709 = vmatprep.subr.bf16.mxu0 %v6022_v51  ;;  %3791 = vmatprep.subr.bf16.mxu1 %v6024_v52  ;;  %v6134_v51 = vcombine.high %v606_v44, %v614_v45  ;;  %v679_v36 = vld [vmem:[%s6835_s29 + $0xd68] sm:$0xff]  ;;  %v6197_v45 = vcombine.low %v670_v33, %v678_v34 }
 0x157   : > { %v695_v44 = vld [vmem:[%s6835_s29 + $0xde8] sm:$0xff] }
 0x159   : > { %3710 = vmatpush1.bf16.msra.mxu0 %v6021_v57  ;;  %3792 = vmatpush1.bf16.msra.mxu1 %v6023_v59 }
 0x15a   : > { %3720 = vmatprep.subr.bf16.mxu0 %v6038_v60  ;;  %3802 = vmatprep.subr.bf16.mxu1 %v6040_v62  ;;  %v623_v60 = vld [vmem:[%s6835_s29 + $0xba8] sm:$0xff] }
 0x15b   : > { %v631_v62 = vld [vmem:[%s6835_s29 + $0xbe8] sm:$0xff] }
 0x15c   : > { %3712 = vmatmul.mubr.bf16.vlgmr.msra.gmra.mrb[8].mxu0 %v6929_v23  ;;  %3794 = vmatmul.mubr.bf16.vlgmr.msra.gmra.mrb[8].mxu1 %v6929_v23  ;;  %v6152_v11 = vcombine.high %v623_v60, %v631_v62 }
 0x15d   : > { %3721 = vmatpush1.bf16.msra.mxu0 %v6037_v3  ;;  %3803 = vmatpush1.bf16.msra.mxu1 %v6039_v4 }
 0x15e   : > { %3722 = vmatprep.subr.bf16.mxu0 %v6054_v6  ;;  %3804 = vmatprep.subr.bf16.mxu1 %v6056_v7  ;;  %v6135_v7 = vcombine.low %v607_v46, %v615_v47  ;;  %v6199_v46 = vcombine.low %v671_v35, %v679_v36 }
 0x15f   : > { %3752 = vmatprep.mubr.bf16.mxu0 %v6937_v32  ;;  %3834 = vmatprep.mubr.bf16.mxu1 %v6937_v32 }
 0x161   : > { %3723 = vmatpush1.bf16.msra.mxu0 %v6053_v12  ;;  %3805 = vmatpush1.bf16.msra.mxu1 %v6055_v13  ;;  %v638_v12 = vld [vmem:[%s6835_s29 + $0xc20] sm:$0xff] }
 0x162   : > { %3724 = vmatprep.subr.bf16.mxu0 %v6070_v14  ;;  %3806 = vmatprep.subr.bf16.mxu1 %v6072_v15  ;;  %v646_v13 = vld [vmem:[%s6835_s29 + $0xc60] sm:$0xff]  ;;  %v639_v15 = vld [vmem:[%s6835_s29 + $0xc28] sm:$0xff] }
 0x165   : > { %3725 = vmatpush1.bf16.msra.mxu0 %v6069_v20  ;;  %3807 = vmatpush1.bf16.msra.mxu1 %v6071_v21  ;;  %v6151_v20 = vcombine.low %v623_v60, %v631_v62  ;;  %v6166_v21 = vcombine.high %v638_v12, %v646_v13  ;;  %v718_v60 = vld [vmem:[%s6835_s29 + $0xea0] sm:$0xff] }
 0x166   : > { %3726 = vmatprep.subr.bf16.mxu0 %v6086_v22  ;;  %3808 = vmatprep.subr.bf16.mxu1 %v6088_v24  ;;  %v6168_v22 = vcombine.high %v639_v15, %v647_v16  ;;  %v654_v24 = vld [vmem:[%s6835_s29 + $0xca0] sm:$0xff] }
 0x167   : > { %v6181_v37 = vcombine.low %v654_v24, %v662_v25  ;;  %v726_v62 = vld [vmem:[%s6835_s29 + $0xee0] sm:$0xff] }
 0x169   : > { %3727 = vmatpush1.bf16.msra.mxu0 %v6085_v29  ;;  %3809 = vmatpush1.bf16.msra.mxu1 %v6087_v30  ;;  %v6165_v29 = vcombine.low %v638_v12, %v646_v13  ;;  %v6167_v30 = vcombine.low %v639_v15, %v647_v16  ;;  %v758_v15 = vld [vmem:[%s6835_s29 + $0xfe0] sm:$0xff]  ;;  %v751_v16 = vld [vmem:[%s6835_s29 + $0xfa8] sm:$0xff] }
 0x16a   : > { %3728 = vmatprep.subr.bf16.mxu0 %v6102_v31  ;;  %3810 = vmatprep.subr.bf16.mxu1 %v6104_v61  ;;  %v6182_v31 = vcombine.high %v654_v24, %v662_v25  ;;  %v6184_v61 = vcombine.high %v655_v27, %v663_v28  ;;  %v264_v24 = vld [vmem:[%s6835_s29 + $0x70] sm:$0xff]  ;;  %v257_v25 = vld [vmem:[%s6835_s29 + $0x38] sm:$0xff] }
 0x16d   : > { %3729 = vmatpush1.bf16.msra.mxu0 %v6101_v39  ;;  %3811 = vmatpush1.bf16.msra.mxu1 %v6103_v40  ;;  %v6198_v39 = vcombine.high %v670_v33, %v678_v34  ;;  %v6200_v40 = vcombine.high %v671_v35, %v679_v36  ;;  %v273_v33 = vld [vmem:[%s6835_s29 + $0xb8] sm:$0xff] }
 0x16e   : > { %3730 = vmatprep.subr.bf16.mxu0 %v6118_v41  ;;  %3812 = vmatprep.subr.bf16.mxu1 %v6120_v43  ;;  %v686_v41 = vld [vmem:[%s6835_s29 + $0xda0] sm:$0xff]  ;;  %v687_v43 = vld [vmem:[%s6835_s29 + $0xda8] sm:$0xff]  ;;  %v281_v34 = vld [vmem:[%s6835_s29 + $0xf8] sm:$0xff] }
 0x16f   : > { %v3426_v52 = vpop.f32.mrb[0].mxu0  ;;  %v3508_v57 = vpop.f32.mrb[0].mxu1  ;;  %v6214_v47 = vcombine.high %v686_v41, %v694_v42  ;;  %v6213_v55 = vcombine.low %v686_v41, %v694_v42  ;;  %v6215_v56 = vcombine.low %v687_v43, %v695_v44  ;;  %v289_v41 = vld [vmem:[%s6835_s29 + $0x138] sm:$0xff] }
 0x170   : > { %v3428_v59 = vpop.f32.mrb[1].mxu0  ;;  %v3510_v0 = vpop.f32.mrb[1].mxu1  ;;  %v297_v42 = vld [vmem:[%s6835_s29 + $0x178] sm:$0xff] }
 0x171   : > { %v4023_v63 = vcombine.low %v3426_v52, %v3428_v59  ;;  %v3430_v1 = vpop.f32.mrb[2].mxu0  ;;  %3731 = vmatpush1.bf16.msra.mxu0 %v6117_v48  ;;  %v4024_v3 = vcombine.low %v3508_v57, %v3510_v0  ;;  %v3512_v4 = vpop.f32.mrb[2].mxu1  ;;  %3813 = vmatpush1.bf16.msra.mxu1 %v6119_v50  ;;  %v6216_v48 = vcombine.high %v687_v43, %v695_v44  ;;  %v702_v50 = vld [vmem:[%s6835_s29 + $0xe20] sm:$0xff]  ;;  %v703_v52 = vld [vmem:[%s6835_s29 + $0xe28] sm:$0xff] }
 0x172   : > { %v3431_v6 = vpop.f32.mrb[3].mxu0  ;;  %3732 = vmatprep.subr.bf16.mxu0 %v6134_v51  ;;  %v3513_v10 = vpop.f32.mrb[3].mxu1  ;;  %3814 = vmatprep.subr.bf16.mxu1 %v6136_v54  ;;  %v710_v51 = vld [vmem:[%s6835_s29 + $0xe60] sm:$0xff]  ;;  %v711_v54 = vld [vmem:[%s6835_s29 + $0xe68] sm:$0xff]  ;;  %v5803_v44 = vcombine.low %v273_v33, %v281_v34 }
 0x173   : > { %v4031_v9 = vrot.slane %v4023_v63, %v7238_v53  ;;  %v4038_v14 = vrot.slane %v4024_v3, %v7238_v53  ;;  %v6230_v57 = vcombine.high %v702_v50, %v710_v51  ;;  %v6232_v59 = vcombine.high %v703_v52, %v711_v54  ;;  %v719_v63 = vld [vmem:[%s6835_s29 + $0xea8] sm:$0xff]  ;;  %v734_v6 = vld [vmem:[%s6835_s29 + $0xf20] sm:$0xff] }
 0x174   : > { %v727_v0 = vld [vmem:[%s6835_s29 + $0xee8] sm:$0xff]  ;;  %v6229_v1 = vcombine.low %v702_v50, %v710_v51  ;;  %v6246_v3 = vcombine.high %v718_v60, %v726_v62  ;;  %v6245_v10 = vcombine.low %v718_v60, %v726_v62  ;;  %v305_v50 = vld [vmem:[%s6835_s29 + $0x1b8] sm:$0xff] }
 0x175   : > { %3733 = vmatpush1.bf16.msra.mxu0 %v6133_v2  ;;  %v4039_v19 = vcombine.low %v4031_v9, %v4038_v14  ;;  %3815 = vmatpush1.bf16.msra.mxu1 %v6135_v7  ;;  %v6231_v2 = vcombine.low %v703_v52, %v711_v54  ;;  %v6248_v4 = vcombine.high %v719_v63, %v727_v0  ;;  %v742_v7 = vld [vmem:[%s6835_s29 + $0xf60] sm:$0xff]  ;;  %v743_v9 = vld [vmem:[%s6835_s29 + $0xf68] sm:$0xff]  ;;  %v313_v51 = vld [vmem:[%s6835_s29 + $0x1f8] sm:$0xff] }
 0x176   : > { %3734 = vmatprep.subr.bf16.mxu0 %v6150_v8  ;;  %3816 = vmatprep.subr.bf16.mxu1 %v6152_v11  ;;  %v735_v8 = vld [vmem:[%s6835_s29 + $0xf28] sm:$0xff]  ;;  %v6247_v11 = vcombine.low %v719_v63, %v727_v0  ;;  %v6262_v12 = vcombine.high %v734_v6, %v742_v7  ;;  %v750_v14 = vld [vmem:[%s6835_s29 + $0xfa0] sm:$0xff]  ;;  %v5819_v54 = vcombine.low %v289_v41, %v297_v42  ;;  %v321_v60 = vld [vmem:[%s6835_s29 + $0x238] sm:$0xff] }
 0x177   : > { %v4095_v26 = vadd.f32 %v4039_v19, %v245_v17  ;;  %v6264_v13 = vcombine.high %v735_v8, %v743_v9  ;;  %v759_v17 = vld [vmem:[%s6835_s29 + $0xfe8] sm:$0xff]  ;;  %v6263_v19 = vcombine.low %v735_v8, %v743_v9  ;;  %v6277_v27 = vcombine.low %v750_v14, %v758_v15  ;;  %v329_v62 = vld [vmem:[%s6835_s29 + $0x278] sm:$0xff] }
 0x178   : > { %v6279_v28 = vcombine.low %v751_v16, %v759_v17  ;;  %v5851_v8 = vcombine.low %v321_v60, %v329_v62 }
 0x179   : > { %3735 = vmatpush1.bf16.msra.mxu0 %v6149_v18  ;;  %4099 = vst [vmem:[#allocation2] sm:$0xff] %v4095_v26  ;;  %3817 = vmatpush1.bf16.msra.mxu1 %v6151_v20  ;;  %v6261_v18 = vcombine.low %v734_v6, %v742_v7  ;;  %v6278_v20 = vcombine.high %v750_v14, %v758_v15  ;;  %v265_v26 = vld [vmem:[%s6835_s29 + $0x78] sm:$0xff] }
 0x17a   : > { %3736 = vmatprep.subr.bf16.mxu0 %v6166_v21  ;;  %3818 = vmatprep.subr.bf16.mxu1 %v6168_v22  ;;  %v6280_v21 = vcombine.high %v751_v16, %v759_v17  ;;  %v256_v22 = vld [vmem:[%s6835_s29 + $0x30] sm:$0xff]  ;;  %v5787_v36 = vcombine.low %v257_v25, %v265_v26  ;;  %v345_v6 = vld [vmem:[%s6835_s29 + $0x2f8] sm:$0xff] }
 0x17b   : > { %v5785_v35 = vcombine.low %v256_v22, %v264_v24  ;;  %v361_v14 = vld [vmem:[%s6835_s29 + $0x378] sm:$0xff] }
 0x17d   : > { %3737 = vmatpush1.bf16.msra.mxu0 %v6165_v29  ;;  %3819 = vmatpush1.bf16.msra.mxu1 %v6167_v30  ;;  %v5786_v29 = vcombine.high %v256_v22, %v264_v24  ;;  %v5788_v30 = vcombine.high %v257_v25, %v265_v26  ;;  %v377_v22 = vld [vmem:[%s6835_s29 + $0x3f8] sm:$0xff] }
 0x17e   : > { %3738 = vmatprep.subr.bf16.mxu0 %v6182_v31  ;;  %3820 = vmatprep.subr.bf16.mxu1 %v6184_v61  ;;  %v272_v31 = vld [vmem:[%s6835_s29 + $0xb0] sm:$0xff] }
 0x17f   : > { %v280_v61 = vld [vmem:[%s6835_s29 + $0xf0] sm:$0xff] }
 0x180   : > { %v5801_v43 = vcombine.low %v272_v31, %v280_v61 }
 0x181   : > { %3739 = vmatpush1.bf16.msra.mxu0 %v6181_v37  ;;  %3821 = vmatpush1.bf16.msra.mxu1 %v6183_v38  ;;  %v5802_v37 = vcombine.high %v272_v31, %v280_v61  ;;  %v5804_v38 = vcombine.high %v273_v33, %v281_v34  ;;  %v393_v31 = vld [vmem:[%s6835_s29 + $0x478] sm:$0xff] }
 0x182   : > { %3740 = vmatprep.subr.bf16.mxu0 %v6198_v39  ;;  %3822 = vmatprep.subr.bf16.mxu1 %v6200_v40  ;;  %v288_v39 = vld [vmem:[%s6835_s29 + $0x130] sm:$0xff] }
 0x183   : > { %v296_v40 = vld [vmem:[%s6835_s29 + $0x170] sm:$0xff] }
 0x184   : > { %v5817_v52 = vcombine.low %v288_v39, %v296_v40 }
 0x185   : > { %3741 = vmatpush1.bf16.msra.mxu0 %v6197_v45  ;;  %3823 = vmatpush1.bf16.msra.mxu1 %v6199_v46  ;;  %v5818_v45 = vcombine.high %v288_v39, %v296_v40  ;;  %v5820_v46 = vcombine.high %v289_v41, %v297_v42  ;;  %v409_v39 = vld [vmem:[%s6835_s29 + $0x4f8] sm:$0xff] }
 0x186   : > { %3742 = vmatprep.subr.bf16.mxu0 %v6214_v47  ;;  %3824 = vmatprep.subr.bf16.mxu1 %v6216_v48  ;;  %v304_v47 = vld [vmem:[%s6835_s29 + $0x1b0] sm:$0xff] }
 0x187   : > { %v312_v48 = vld [vmem:[%s6835_s29 + $0x1f0] sm:$0xff] }
 0x188   : > { %v5833_v63 = vcombine.low %v304_v47, %v312_v48 }
 0x189   : > { %3743 = vmatpush1.bf16.msra.mxu0 %v6213_v55  ;;  %3825 = vmatpush1.bf16.msra.mxu1 %v6215_v56  ;;  %v5834_v55 = vcombine.high %v304_v47, %v312_v48  ;;  %v5836_v56 = vcombine.high %v305_v50, %v313_v51  ;;  %v425_v47 = vld [vmem:[%s6835_s29 + $0x578] sm:$0xff] }
 0x18a   : > { %3744 = vmatprep.subr.bf16.mxu0 %v6230_v57  ;;  %3826 = vmatprep.subr.bf16.mxu1 %v6232_v59  ;;  %v320_v57 = vld [vmem:[%s6835_s29 + $0x230] sm:$0xff] }
 0x18b   : > { %v328_v59 = vld [vmem:[%s6835_s29 + $0x270] sm:$0xff] }
 0x18c   : > { %v5850_v0 = vcombine.high %v320_v57, %v328_v59  ;;  %v5849_v7 = vcombine.low %v320_v57, %v328_v59  ;;  %v441_v57 = vld [vmem:[%s6835_s29 + $0x5f8] sm:$0xff] }
 0x18d   : > { %3745 = vmatpush1.bf16.msra.mxu0 %v6229_v1  ;;  %3827 = vmatpush1.bf16.msra.mxu1 %v6231_v2  ;;  %v5852_v1 = vcombine.high %v321_v60, %v329_v62  ;;  %v336_v2 = vld [vmem:[%s6835_s29 + $0x2b0] sm:$0xff] }
 0x18e   : > { %3746 = vmatprep.subr.bf16.mxu0 %v6246_v3  ;;  %3828 = vmatprep.subr.bf16.mxu1 %v6248_v4  ;;  %v344_v3 = vld [vmem:[%s6835_s29 + $0x2f0] sm:$0xff]  ;;  %v337_v4 = vld [vmem:[%s6835_s29 + $0x2b8] sm:$0xff] }
 0x18f   : > { %v5866_v9 = vcombine.high %v336_v2, %v344_v3  ;;  %v5865_v15 = vcombine.low %v336_v2, %v344_v3  ;;  %v5867_v16 = vcombine.low %v337_v4, %v345_v6  ;;  %v457_v2 = vld [vmem:[%s6835_s29 + $0x678] sm:$0xff] }
 0x191   : > { %3747 = vmatpush1.bf16.msra.mxu0 %v6245_v10  ;;  %3829 = vmatpush1.bf16.msra.mxu1 %v6247_v11  ;;  %v5868_v10 = vcombine.high %v337_v4, %v345_v6  ;;  %v352_v11 = vld [vmem:[%s6835_s29 + $0x330] sm:$0xff] }
 0x192   : > { %3748 = vmatprep.subr.bf16.mxu0 %v6262_v12  ;;  %3830 = vmatprep.subr.bf16.mxu1 %v6264_v13  ;;  %v360_v12 = vld [vmem:[%s6835_s29 + $0x370] sm:$0xff]  ;;  %v353_v13 = vld [vmem:[%s6835_s29 + $0x338] sm:$0xff] }
 0x193   : > { %v5882_v17 = vcombine.high %v352_v11, %v360_v12  ;;  %v5881_v24 = vcombine.low %v352_v11, %v360_v12  ;;  %v5883_v25 = vcombine.low %v353_v13, %v361_v14  ;;  %v473_v11 = vld [vmem:[%s6835_s29 + $0x6f8] sm:$0xff] }
 0x195   : > { %3749 = vmatpush1.bf16.msra.mxu0 %v6261_v18  ;;  %3831 = vmatpush1.bf16.msra.mxu1 %v6263_v19  ;;  %v5884_v18 = vcombine.high %v353_v13, %v361_v14  ;;  %v368_v19 = vld [vmem:[%s6835_s29 + $0x3b0] sm:$0xff] }
 0x196   : > { %3750 = vmatprep.subr.bf16.mxu0 %v6278_v20  ;;  %3832 = vmatprep.subr.bf16.mxu1 %v6280_v21  ;;  %v376_v20 = vld [vmem:[%s6835_s29 + $0x3f0] sm:$0xff]  ;;  %v369_v21 = vld [vmem:[%s6835_s29 + $0x3b8] sm:$0xff] }
 0x197   : > { %v5898_v26 = vcombine.high %v368_v19, %v376_v20  ;;  %v5897_v61 = vcombine.low %v368_v19, %v376_v20  ;;  %v5899_v33 = vcombine.low %v369_v21, %v377_v22  ;;  %v489_v19 = vld [vmem:[%s6835_s29 + $0x778] sm:$0xff] }
 0x199   : > { %3751 = vmatpush1.bf16.msra.mxu0 %v6277_v27  ;;  %3833 = vmatpush1.bf16.msra.mxu1 %v6279_v28  ;;  %v5900_v27 = vcombine.high %v369_v21, %v377_v22  ;;  %v384_v28 = vld [vmem:[%s6835_s29 + $0x430] sm:$0xff] }
 0x19a   : > { %3843 = vmatprep.subr.bf16.mxu0 %v5786_v29  ;;  %3925 = vmatprep.subr.bf16.mxu1 %v5788_v30  ;;  %v392_v29 = vld [vmem:[%s6835_s29 + $0x470] sm:$0xff]  ;;  %v385_v30 = vld [vmem:[%s6835_s29 + $0x438] sm:$0xff] }
 0x19b   : > { %v5914_v34 = vcombine.high %v384_v28, %v392_v29  ;;  %v5913_v40 = vcombine.low %v384_v28, %v392_v29  ;;  %v5915_v41 = vcombine.low %v385_v30, %v393_v31  ;;  %v505_v28 = vld [vmem:[%s6835_s29 + $0x7f8] sm:$0xff] }
 0x19c   : > { %3753 = vmatmul.mubr.bf16.vlgmr.msra.gmra.mrb[8].mxu0 %v7005_v58  ;;  %3835 = vmatmul.mubr.bf16.vlgmr.msra.gmra.mrb[8].mxu1 %v7005_v58 }
 0x19d   : > { %3844 = vmatpush1.bf16.msra.mxu0 %v5785_v35  ;;  %3926 = vmatpush1.bf16.msra.mxu1 %v5787_v36  ;;  %v5916_v35 = vcombine.high %v385_v30, %v393_v31  ;;  %v400_v36 = vld [vmem:[%s6835_s29 + $0x4b0] sm:$0xff] }
 0x19e   : > { %3845 = vmatprep.subr.bf16.mxu0 %v5802_v37  ;;  %3927 = vmatprep.subr.bf16.mxu1 %v5804_v38  ;;  %v408_v37 = vld [vmem:[%s6835_s29 + $0x4f0] sm:$0xff]  ;;  %v401_v38 = vld [vmem:[%s6835_s29 + $0x4b8] sm:$0xff] }
 0x19f   : > { %3875 = vmatprep.mubr.bf16.mxu0 %v6885_v5  ;;  %3957 = vmatprep.mubr.bf16.mxu1 %v6885_v5  ;;  %v5835_v5 = vcombine.low %v305_v50, %v313_v51  ;;  %v5930_v42 = vcombine.high %v400_v36, %v408_v37  ;;  %v5929_v48 = vcombine.low %v400_v36, %v408_v37  ;;  %v521_v36 = vld [vmem:[%s6835_s29 + $0x878] sm:$0xff] }
 0x1a0   : > { %v5931_v50 = vcombine.low %v401_v38, %v409_v39 }
 0x1a1   : > { %3846 = vmatpush1.bf16.msra.mxu0 %v5801_v43  ;;  %3928 = vmatpush1.bf16.msra.mxu1 %v5803_v44  ;;  %v5932_v43 = vcombine.high %v401_v38, %v409_v39  ;;  %v416_v44 = vld [vmem:[%s6835_s29 + $0x530] sm:$0xff] }
 0x1a2   : > { %3847 = vmatprep.subr.bf16.mxu0 %v5818_v45  ;;  %3929 = vmatprep.subr.bf16.mxu1 %v5820_v46  ;;  %v424_v45 = vld [vmem:[%s6835_s29 + $0x570] sm:$0xff]  ;;  %v417_v46 = vld [vmem:[%s6835_s29 + $0x538] sm:$0xff] }
 0x1a3   : > { %v5946_v51 = vcombine.high %v416_v44, %v424_v45  ;;  %v5945_v59 = vcombine.low %v416_v44, %v424_v45  ;;  %v5947_v60 = vcombine.low %v417_v46, %v425_v47  ;;  %v537_v44 = vld [vmem:[%s6835_s29 + $0x8f8] sm:$0xff] }
 0x1a5   : > { %3848 = vmatpush1.bf16.msra.mxu0 %v5817_v52  ;;  %3930 = vmatpush1.bf16.msra.mxu1 %v5819_v54  ;;  %v5948_v52 = vcombine.high %v417_v46, %v425_v47  ;;  %v432_v54 = vld [vmem:[%s6835_s29 + $0x5b0] sm:$0xff] }
 0x1a6   : > { %3849 = vmatprep.subr.bf16.mxu0 %v5834_v55  ;;  %3931 = vmatprep.subr.bf16.mxu1 %v5836_v56  ;;  %v440_v55 = vld [vmem:[%s6835_s29 + $0x5f0] sm:$0xff]  ;;  %v433_v56 = vld [vmem:[%s6835_s29 + $0x5b8] sm:$0xff] }
 0x1a7   : > { %v5962_v62 = vcombine.high %v432_v54, %v440_v55  ;;  %v5961_v3 = vcombine.low %v432_v54, %v440_v55  ;;  %v5963_v4 = vcombine.low %v433_v56, %v441_v57  ;;  %v553_v54 = vld [vmem:[%s6835_s29 + $0x978] sm:$0xff] }
 0x1a9   : > { %3850 = vmatpush1.bf16.msra.mxu0 %v5833_v63  ;;  %3932 = vmatpush1.bf16.msra.mxu1 %v5835_v5  ;;  %v5964_v63 = vcombine.high %v433_v56, %v441_v57  ;;  %v448_v5 = vld [vmem:[%s6835_s29 + $0x630] sm:$0xff] }
 0x1aa   : > { %3851 = vmatprep.subr.bf16.mxu0 %v5850_v0  ;;  %3933 = vmatprep.subr.bf16.mxu1 %v5852_v1  ;;  %v456_v0 = vld [vmem:[%s6835_s29 + $0x670] sm:$0xff]  ;;  %v449_v1 = vld [vmem:[%s6835_s29 + $0x638] sm:$0xff] }
 0x1ab   : > { %v5978_v6 = vcombine.high %v448_v5, %v456_v0  ;;  %v5977_v12 = vcombine.low %v448_v5, %v456_v0  ;;  %v5979_v13 = vcombine.low %v449_v1, %v457_v2  ;;  %v569_v5 = vld [vmem:[%s6835_s29 + $0x9f8] sm:$0xff] }
 0x1ad   : > { %3852 = vmatpush1.bf16.msra.mxu0 %v5849_v7  ;;  %3934 = vmatpush1.bf16.msra.mxu1 %v5851_v8  ;;  %v5980_v7 = vcombine.high %v449_v1, %v457_v2  ;;  %v464_v8 = vld [vmem:[%s6835_s29 + $0x6b0] sm:$0xff] }
 0x1ae   : > { %3853 = vmatprep.subr.bf16.mxu0 %v5866_v9  ;;  %3935 = vmatprep.subr.bf16.mxu1 %v5868_v10  ;;  %v472_v9 = vld [vmem:[%s6835_s29 + $0x6f0] sm:$0xff]  ;;  %v465_v10 = vld [vmem:[%s6835_s29 + $0x6b8] sm:$0xff] }
 0x1af   : > { %v5994_v14 = vcombine.high %v464_v8, %v472_v9  ;;  %v5993_v20 = vcombine.low %v464_v8, %v472_v9  ;;  %v5995_v21 = vcombine.low %v465_v10, %v473_v11 }
 0x1b1   : > { %3854 = vmatpush1.bf16.msra.mxu0 %v5865_v15  ;;  %3936 = vmatpush1.bf16.msra.mxu1 %v5867_v16  ;;  %v5996_v15 = vcombine.high %v465_v10, %v473_v11  ;;  %v480_v16 = vld [vmem:[%s6835_s29 + $0x730] sm:$0xff] }
 0x1b2   : > { %3855 = vmatprep.subr.bf16.mxu0 %v5882_v17  ;;  %3937 = vmatprep.subr.bf16.mxu1 %v5884_v18  ;;  %v488_v17 = vld [vmem:[%s6835_s29 + $0x770] sm:$0xff]  ;;  %v481_v18 = vld [vmem:[%s6835_s29 + $0x738] sm:$0xff] }
 0x1b3   : > { %v6010_v22 = vcombine.high %v480_v16, %v488_v17  ;;  %v6009_v29 = vcombine.low %v480_v16, %v488_v17  ;;  %v6011_v30 = vcombine.low %v481_v18, %v489_v19  ;;  %v592_v11 = vld [vmem:[%s6835_s29 + $0xab0] sm:$0xff] }
 0x1b5   : > { %3856 = vmatpush1.bf16.msra.mxu0 %v5881_v24  ;;  %3938 = vmatpush1.bf16.msra.mxu1 %v5883_v25  ;;  %v6012_v24 = vcombine.high %v481_v18, %v489_v19  ;;  %v496_v25 = vld [vmem:[%s6835_s29 + $0x7b0] sm:$0xff] }
 0x1b6   : > { %3857 = vmatprep.subr.bf16.mxu0 %v5898_v26  ;;  %3939 = vmatprep.subr.bf16.mxu1 %v5900_v27  ;;  %v504_v26 = vld [vmem:[%s6835_s29 + $0x7f0] sm:$0xff]  ;;  %v497_v27 = vld [vmem:[%s6835_s29 + $0x7b8] sm:$0xff] }
 0x1b7   : > { %v6026_v31 = vcombine.high %v496_v25, %v504_v26  ;;  %v6025_v37 = vcombine.low %v496_v25, %v504_v26  ;;  %v6027_v38 = vcombine.low %v497_v27, %v505_v28  ;;  %v608_v19 = vld [vmem:[%s6835_s29 + $0xb30] sm:$0xff] }
 0x1b9   : > { %3858 = vmatpush1.bf16.msra.mxu0 %v5897_v61  ;;  %3940 = vmatpush1.bf16.msra.mxu1 %v5899_v33  ;;  %v6028_v61 = vcombine.high %v497_v27, %v505_v28  ;;  %v512_v33 = vld [vmem:[%s6835_s29 + $0x830] sm:$0xff] }
 0x1ba   : > { %3859 = vmatprep.subr.bf16.mxu0 %v5914_v34  ;;  %3941 = vmatprep.subr.bf16.mxu1 %v5916_v35  ;;  %v520_v34 = vld [vmem:[%s6835_s29 + $0x870] sm:$0xff]  ;;  %v513_v35 = vld [vmem:[%s6835_s29 + $0x838] sm:$0xff] }
 0x1bb   : > { %v6042_v39 = vcombine.high %v512_v33, %v520_v34  ;;  %v6041_v45 = vcombine.low %v512_v33, %v520_v34  ;;  %v6043_v46 = vcombine.low %v513_v35, %v521_v36  ;;  %v625_v33 = vld [vmem:[%s6835_s29 + $0xbb8] sm:$0xff] }
 0x1bc   : > { %v633_v34 = vld [vmem:[%s6835_s29 + $0xbf8] sm:$0xff] }
 0x1bd   : > { %3860 = vmatpush1.bf16.msra.mxu0 %v5913_v40  ;;  %3942 = vmatpush1.bf16.msra.mxu1 %v5915_v41  ;;  %v6044_v40 = vcombine.high %v513_v35, %v521_v36  ;;  %v528_v41 = vld [vmem:[%s6835_s29 + $0x8b0] sm:$0xff] }
 0x1be   : > { %3861 = vmatprep.subr.bf16.mxu0 %v5930_v42  ;;  %3943 = vmatprep.subr.bf16.mxu1 %v5932_v43  ;;  %v536_v42 = vld [vmem:[%s6835_s29 + $0x8f0] sm:$0xff]  ;;  %v529_v43 = vld [vmem:[%s6835_s29 + $0x8b8] sm:$0xff] }
 0x1bf   : > { %v6058_v47 = vcombine.high %v528_v41, %v536_v42  ;;  %v6057_v55 = vcombine.low %v528_v41, %v536_v42  ;;  %v6059_v56 = vcombine.low %v529_v43, %v537_v44 }
 0x1c1   : > { %3862 = vmatpush1.bf16.msra.mxu0 %v5929_v48  ;;  %3944 = vmatpush1.bf16.msra.mxu1 %v5931_v50  ;;  %v6060_v48 = vcombine.high %v529_v43, %v537_v44  ;;  %v544_v50 = vld [vmem:[%s6835_s29 + $0x930] sm:$0xff] }
 0x1c2   : > { %3863 = vmatprep.subr.bf16.mxu0 %v5946_v51  ;;  %3945 = vmatprep.subr.bf16.mxu1 %v5948_v52  ;;  %v552_v51 = vld [vmem:[%s6835_s29 + $0x970] sm:$0xff]  ;;  %v545_v52 = vld [vmem:[%s6835_s29 + $0x938] sm:$0xff] }
 0x1c3   : > { %v6074_v57 = vcombine.high %v544_v50, %v552_v51  ;;  %v6075_v0 = vcombine.low %v545_v52, %v553_v54 }
 0x1c5   : > { %3864 = vmatpush1.bf16.msra.mxu0 %v5945_v59  ;;  %3946 = vmatpush1.bf16.msra.mxu1 %v5947_v60  ;;  %v6076_v59 = vcombine.high %v545_v52, %v553_v54  ;;  %v560_v60 = vld [vmem:[%s6835_s29 + $0x9b0] sm:$0xff]  ;;  %v649_v52 = vld [vmem:[%s6835_s29 + $0xc78] sm:$0xff]  ;;  %v246_v54 = vld [vmem:[#allocation2 + $0x8] sm:$0xff] }
 0x1c6   : > { %3865 = vmatprep.subr.bf16.mxu0 %v5962_v62  ;;  %3947 = vmatprep.subr.bf16.mxu1 %v5964_v63  ;;  %v568_v62 = vld [vmem:[%s6835_s29 + $0x9f0] sm:$0xff]  ;;  %v561_v63 = vld [vmem:[%s6835_s29 + $0x9b8] sm:$0xff] }
 0x1c7   : > { %v6090_v1 = vcombine.high %v560_v60, %v568_v62  ;;  %v6092_v2 = vcombine.high %v561_v63, %v569_v5  ;;  %v6089_v8 = vcombine.low %v560_v60, %v568_v62  ;;  %v656_v62 = vld [vmem:[%s6835_s29 + $0xcb0] sm:$0xff] }
 0x1c9   : > { %3866 = vmatpush1.bf16.msra.mxu0 %v5961_v3  ;;  %3948 = vmatpush1.bf16.msra.mxu1 %v5963_v4  ;;  %v576_v3 = vld [vmem:[%s6835_s29 + $0xa30] sm:$0xff] }
 0x1ca   : > { %3867 = vmatprep.subr.bf16.mxu0 %v5978_v6  ;;  %3949 = vmatprep.subr.bf16.mxu1 %v5980_v7  ;;  %v584_v4 = vld [vmem:[%s6835_s29 + $0xa70] sm:$0xff]  ;;  %v577_v6 = vld [vmem:[%s6835_s29 + $0xa38] sm:$0xff] }
 0x1cb   : > { %v585_v7 = vld [vmem:[%s6835_s29 + $0xa78] sm:$0xff]  ;;  %v6106_v9 = vcombine.high %v576_v3, %v584_v4 }
 0x1cc   : > { %v6108_v10 = vcombine.high %v577_v6, %v585_v7  ;;  %v6107_v16 = vcombine.low %v577_v6, %v585_v7  ;;  %v672_v6 = vld [vmem:[%s6835_s29 + $0xd30] sm:$0xff] }
 0x1cd   : > { %3868 = vmatpush1.bf16.msra.mxu0 %v5977_v12  ;;  %3950 = vmatpush1.bf16.msra.mxu1 %v5979_v13  ;;  %v600_v12 = vld [vmem:[%s6835_s29 + $0xaf0] sm:$0xff]  ;;  %v593_v13 = vld [vmem:[%s6835_s29 + $0xab8] sm:$0xff] }
 0x1ce   : > { %3869 = vmatprep.subr.bf16.mxu0 %v5994_v14  ;;  %3951 = vmatprep.subr.bf16.mxu1 %v5996_v15  ;;  %v601_v14 = vld [vmem:[%s6835_s29 + $0xaf8] sm:$0xff]  ;;  %v6105_v15 = vcombine.low %v576_v3, %v584_v4  ;;  %v6122_v17 = vcombine.high %v592_v11, %v600_v12  ;;  %v680_v7 = vld [vmem:[%s6835_s29 + $0xd70] sm:$0xff] }
 0x1cf   : > { %v6124_v18 = vcombine.high %v593_v13, %v601_v14  ;;  %v6123_v25 = vcombine.low %v593_v13, %v601_v14  ;;  %v688_v13 = vld [vmem:[%s6835_s29 + $0xdb0] sm:$0xff] }
 0x1d0   : > { %v696_v14 = vld [vmem:[%s6835_s29 + $0xdf0] sm:$0xff] }
 0x1d1   : > { %3870 = vmatpush1.bf16.msra.mxu0 %v5993_v20  ;;  %3952 = vmatpush1.bf16.msra.mxu1 %v5995_v21  ;;  %v616_v20 = vld [vmem:[%s6835_s29 + $0xb70] sm:$0xff]  ;;  %v609_v21 = vld [vmem:[%s6835_s29 + $0xb38] sm:$0xff] }
 0x1d2   : > { %3871 = vmatprep.subr.bf16.mxu0 %v6010_v22  ;;  %3953 = vmatprep.subr.bf16.mxu1 %v6012_v24  ;;  %v617_v22 = vld [vmem:[%s6835_s29 + $0xb78] sm:$0xff]  ;;  %v6121_v24 = vcombine.low %v592_v11, %v600_v12  ;;  %v6138_v26 = vcombine.high %v608_v19, %v616_v20  ;;  %v6202_v11 = vcombine.high %v672_v6, %v680_v7 }
 0x1d3   : > { %v6140_v28 = vcombine.high %v609_v21, %v617_v22  ;;  %v6139_v42 = vcombine.low %v609_v21, %v617_v22  ;;  %v704_v21 = vld [vmem:[%s6835_s29 + $0xe30] sm:$0xff] }
 0x1d4   : > { %v712_v22 = vld [vmem:[%s6835_s29 + $0xe70] sm:$0xff] }
 0x1d5   : > { %3872 = vmatpush1.bf16.msra.mxu0 %v6009_v29  ;;  %3954 = vmatpush1.bf16.msra.mxu1 %v6011_v30  ;;  %v624_v29 = vld [vmem:[%s6835_s29 + $0xbb0] sm:$0xff] }
 0x1d6   : > { %3873 = vmatprep.subr.bf16.mxu0 %v6026_v31  ;;  %3955 = vmatprep.subr.bf16.mxu1 %v6028_v61  ;;  %v632_v30 = vld [vmem:[%s6835_s29 + $0xbf0] sm:$0xff] }
 0x1d7   : > { %v6154_v43 = vcombine.high %v624_v29, %v632_v30 }
 0x1d9   : > { %3874 = vmatpush1.bf16.msra.mxu0 %v6025_v37  ;;  %3956 = vmatpush1.bf16.msra.mxu1 %v6027_v38  ;;  %v6137_v38 = vcombine.low %v608_v19, %v616_v20  ;;  %v6218_v19 = vcombine.high %v688_v13, %v696_v14 }
 0x1da   : > { %3884 = vmatprep.subr.bf16.mxu0 %v6042_v39  ;;  %3966 = vmatprep.subr.bf16.mxu1 %v6044_v40 }
 0x1dc   : > { %3876 = vmatmul.mubr.bf16.vlgmr.msra.gmra.mrb[12].mxu0 %v6929_v23  ;;  %3958 = vmatmul.mubr.bf16.vlgmr.msra.gmra.mrb[12].mxu1 %v6929_v23  ;;  %v6073_v23 = vcombine.low %v544_v50, %v552_v51  ;;  %v641_v51 = vld [vmem:[%s6835_s29 + $0xc38] sm:$0xff] }
 0x1dd   : > { %3885 = vmatpush1.bf16.msra.mxu0 %v6041_v45  ;;  %3967 = vmatpush1.bf16.msra.mxu1 %v6043_v46  ;;  %v6156_v46 = vcombine.high %v625_v33, %v633_v34  ;;  %v6172_v60 = vcombine.high %v641_v51, %v649_v52 }
 0x1de   : > { %3886 = vmatprep.subr.bf16.mxu0 %v6058_v47  ;;  %3968 = vmatprep.subr.bf16.mxu1 %v6060_v48  ;;  %v640_v47 = vld [vmem:[%s6835_s29 + $0xc30] sm:$0xff] }
 0x1df   : > { %3916 = vmatprep.mubr.bf16.mxu0 %v6937_v32  ;;  %3998 = vmatprep.mubr.bf16.mxu1 %v6937_v32  ;;  %v6091_v32 = vcombine.low %v561_v63, %v569_v5  ;;  %v648_v48 = vld [vmem:[%s6835_s29 + $0xc70] sm:$0xff] }
 0x1e0   : > { %v664_v63 = vld [vmem:[%s6835_s29 + $0xcf0] sm:$0xff] }
 0x1e1   : > { %3887 = vmatpush1.bf16.msra.mxu0 %v6057_v55  ;;  %3969 = vmatpush1.bf16.msra.mxu1 %v6059_v56  ;;  %v6153_v55 = vcombine.low %v624_v29, %v632_v30  ;;  %v6186_v3 = vcombine.high %v656_v62, %v664_v63  ;;  %v720_v30 = vld [vmem:[%s6835_s29 + $0xeb0] sm:$0xff] }
 0x1e2   : > { %3888 = vmatprep.subr.bf16.mxu0 %v6074_v57  ;;  %3970 = vmatprep.subr.bf16.mxu1 %v6076_v59  ;;  %v6155_v57 = vcombine.low %v625_v33, %v633_v34  ;;  %v6170_v59 = vcombine.high %v640_v47, %v648_v48  ;;  %v729_v33 = vld [vmem:[%s6835_s29 + $0xef8] sm:$0xff]  ;;  %v6233_v34 = vcombine.low %v704_v21, %v712_v22 }
 0x1e5   : > { %3889 = vmatpush1.bf16.msra.mxu0 %v6073_v23  ;;  %3971 = vmatpush1.bf16.msra.mxu1 %v6075_v0  ;;  %v657_v23 = vld [vmem:[%s6835_s29 + $0xcb8] sm:$0xff] }
 0x1e6   : > { %3890 = vmatprep.subr.bf16.mxu0 %v6090_v1  ;;  %3972 = vmatprep.subr.bf16.mxu1 %v6092_v2  ;;  %v665_v0 = vld [vmem:[%s6835_s29 + $0xcf8] sm:$0xff]  ;;  %v6169_v1 = vcombine.low %v640_v47, %v648_v48  ;;  %v6171_v2 = vcombine.low %v641_v51, %v649_v52  ;;  %v760_v47 = vld [vmem:[%s6835_s29 + $0xff0] sm:$0xff] }
 0x1e7   : > { %v6188_v4 = vcombine.high %v657_v23, %v665_v0  ;;  %v753_v48 = vld [vmem:[%s6835_s29 + $0xfb8] sm:$0xff] }
 0x1e9   : > { %3891 = vmatpush1.bf16.msra.mxu0 %v6089_v8  ;;  %3973 = vmatpush1.bf16.msra.mxu1 %v6091_v32  ;;  %v673_v8 = vld [vmem:[%s6835_s29 + $0xd38] sm:$0xff] }
 0x1ea   : > { %3892 = vmatprep.subr.bf16.mxu0 %v6106_v9  ;;  %3974 = vmatprep.subr.bf16.mxu1 %v6108_v10  ;;  %v681_v32 = vld [vmem:[%s6835_s29 + $0xd78] sm:$0xff]  ;;  %v6185_v9 = vcombine.low %v656_v62, %v664_v63  ;;  %v6187_v10 = vcombine.low %v657_v23, %v665_v0 }
 0x1eb   : > { %v6204_v12 = vcombine.high %v673_v8, %v681_v32 }
 0x1ed   : > { %3893 = vmatpush1.bf16.msra.mxu0 %v6105_v15  ;;  %3975 = vmatpush1.bf16.msra.mxu1 %v6107_v16  ;;  %v689_v15 = vld [vmem:[%s6835_s29 + $0xdb8] sm:$0xff] }
 0x1ee   : > { %3894 = vmatprep.subr.bf16.mxu0 %v6122_v17  ;;  %3976 = vmatprep.subr.bf16.mxu1 %v6124_v18  ;;  %v697_v16 = vld [vmem:[%s6835_s29 + $0xdf8] sm:$0xff]  ;;  %v6201_v17 = vcombine.low %v672_v6, %v680_v7  ;;  %v6203_v18 = vcombine.low %v673_v8, %v681_v32  ;;  %v247_v7 = vld [vmem:[#allocation2 + $0x10] sm:$0xff] }
 0x1ef   : > { %v3590_v27 = vpop.f32.mrb[4].mxu0  ;;  %v3672_v31 = vpop.f32.mrb[4].mxu1  ;;  %v6220_v20 = vcombine.high %v689_v15, %v697_v16 }
 0x1f0   : > { %v3592_v61 = vpop.f32.mrb[5].mxu0  ;;  %v3674_v36 = vpop.f32.mrb[5].mxu1 }
 0x1f1   : > { %v4040_v35 = vcombine.low %v3590_v27, %v3592_v61  ;;  %v3594_v37 = vpop.f32.mrb[6].mxu0  ;;  %3895 = vmatpush1.bf16.msra.mxu0 %v6121_v24  ;;  %v4041_v39 = vcombine.low %v3672_v31, %v3674_v36  ;;  %v3676_v40 = vpop.f32.mrb[6].mxu1  ;;  %3977 = vmatpush1.bf16.msra.mxu1 %v6123_v25  ;;  %v705_v24 = vld [vmem:[%s6835_s29 + $0xe38] sm:$0xff]  ;;  %v6219_v27 = vcombine.low %v689_v15, %v697_v16  ;;  %v728_v31 = vld [vmem:[%s6835_s29 + $0xef0] sm:$0xff] }
 0x1f2   : > { %v3595_v41 = vpop.f32.mrb[7].mxu0  ;;  %3896 = vmatprep.subr.bf16.mxu0 %v6138_v26  ;;  %v3677_v45 = vpop.f32.mrb[7].mxu1  ;;  %3978 = vmatprep.subr.bf16.mxu1 %v6140_v28  ;;  %v713_v25 = vld [vmem:[%s6835_s29 + $0xe78] sm:$0xff]  ;;  %v6217_v26 = vcombine.low %v688_v13, %v696_v14  ;;  %v6234_v28 = vcombine.high %v704_v21, %v712_v22  ;;  %v6250_v36 = vcombine.high %v720_v30, %v728_v31 }
 0x1f3   : > { %v4048_v44 = vrot.slane %v4040_v35, %v7238_v53  ;;  %v4055_v50 = vrot.slane %v4041_v39, %v7238_v53  ;;  %v6236_v29 = vcombine.high %v705_v24, %v713_v25  ;;  %v721_v61 = vld [vmem:[%s6835_s29 + $0xeb8] sm:$0xff]  ;;  %v6235_v35 = vcombine.low %v705_v24, %v713_v25  ;;  %v744_v39 = vld [vmem:[%s6835_s29 + $0xf70] sm:$0xff]  ;;  %v6638_v24 = vld [vmem:[%s7878_s3 + $0x40] sm:$0xff] (!%p6285_p6)  }
 0x1f4   : > { %v6252_v37 = vcombine.high %v721_v61, %v729_v33  ;;  %v737_v40 = vld [vmem:[%s6835_s29 + $0xf38] sm:$0xff]  ;;  %v6639_v25 = vld [vmem:[%s7878_s3 + $0xc0] sm:$0xff] (!%p6285_p6)  }
 0x1f5   : > { %3897 = vmatpush1.bf16.msra.mxu0 %v6137_v38  ;;  %v4056_v56 = vcombine.low %v4048_v44, %v4055_v50  ;;  %3979 = vmatpush1.bf16.msra.mxu1 %v6139_v42  ;;  %v736_v38 = vld [vmem:[%s6835_s29 + $0xf30] sm:$0xff]  ;;  %v745_v41 = vld [vmem:[%s6835_s29 + $0xf78] sm:$0xff]  ;;  %v6249_v42 = vcombine.low %v720_v30, %v728_v31  ;;  %v6644_v30 = vld [vmem:[%s7878_s3 + $0x8] sm:$0xff] (!%p6285_p6)  }
 0x1f6   : > { %3898 = vmatprep.subr.bf16.mxu0 %v6154_v43  ;;  %3980 = vmatprep.subr.bf16.mxu1 %v6156_v46  ;;  %v6251_v43 = vcombine.low %v721_v61, %v729_v33  ;;  %v6266_v44 = vcombine.high %v736_v38, %v744_v39  ;;  %v6268_v45 = vcombine.high %v737_v40, %v745_v41  ;;  %v752_v46 = vld [vmem:[%s6835_s29 + $0xfb0] sm:$0xff]  ;;  %v761_v50 = vld [vmem:[%s6835_s29 + $0xff8] sm:$0xff]  ;;  %v6645_v31 = vld [vmem:[%s7878_s3 + $0x88] sm:$0xff] (!%p6285_p6)  }
 0x1f7   : > { %v4096_v5 = vadd.f32 %v4056_v56, %v246_v54  ;;  %v6265_v51 = vcombine.low %v736_v38, %v744_v39  ;;  %v6267_v52 = vcombine.low %v737_v40, %v745_v41  ;;  %v6282_v54 = vcombine.high %v752_v46, %v760_v47  ;;  %v6646_v61 = vld [vmem:[%s7878_s3 + $0x50] sm:$0xff] (!%p6285_p6)   ;;  %v6652_v38 = vld [vmem:[%s7878_s3 + $0x18] sm:$0xff] (!%p6285_p6)   ;;  %v6654_v40 = vld [vmem:[%s7878_s3 + $0x60] sm:$0xff] (!%p6285_p6)  }
 0x1f8   : > { %v6281_v56 = vcombine.low %v752_v46, %v760_v47  ;;  %v6647_v33 = vld [vmem:[%s7878_s3 + $0xd0] sm:$0xff] (!%p6285_p6)   ;;  %v6653_v39 = vld [vmem:[%s7878_s3 + $0x98] sm:$0xff] (!%p6285_p6)   ;;  %v6655_v41 = vld [vmem:[%s7878_s3 + $0xe0] sm:$0xff] (!%p6285_p6)  }
 0x1f9   : > { %3899 = vmatpush1.bf16.msra.mxu0 %v6153_v55  ;;  %4100 = vst [vmem:[#allocation2 + $0x8] sm:$0xff] %v4096_v5  ;;  %3981 = vmatpush1.bf16.msra.mxu1 %v6155_v57  ;;  %v6284_v55 = vcombine.high %v753_v48, %v761_v50  ;;  %v6283_v57 = vcombine.low %v753_v48, %v761_v50  ;;  %v6660_v46 = vld [vmem:[%s7878_s3 + $0x28] sm:$0xff] (!%p6285_p6)   ;;  %v6662_v48 = vld [vmem:[%s7878_s3 + $0x70] sm:$0xff] (!%p6285_p6)  }
 0x1fa   : > { %3900 = vmatprep.subr.bf16.mxu0 %v6170_v59  ;;  %3982 = vmatprep.subr.bf16.mxu1 %v6172_v60  ;;  %v6661_v47 = vld [vmem:[%s7878_s3 + $0xa8] sm:$0xff] (!%p6285_p6)   ;;  %v6663_v50 = vld [vmem:[%s7878_s3 + $0xf0] sm:$0xff] (!%p6285_p6)  }
 0x1fd   : > { %3901 = vmatpush1.bf16.msra.mxu0 %v6169_v1  ;;  %3983 = vmatpush1.bf16.msra.mxu1 %v6171_v2 }
 0x1fe   : > { %3902 = vmatprep.subr.bf16.mxu0 %v6186_v3  ;;  %3984 = vmatprep.subr.bf16.mxu1 %v6188_v4 }
 0x201   : > { %3903 = vmatpush1.bf16.msra.mxu0 %v6185_v9  ;;  %3985 = vmatpush1.bf16.msra.mxu1 %v6187_v10 }
 0x202   : > { %3904 = vmatprep.subr.bf16.mxu0 %v6202_v11  ;;  %3986 = vmatprep.subr.bf16.mxu1 %v6204_v12 }
 0x205   : > { %3905 = vmatpush1.bf16.msra.mxu0 %v6201_v17  ;;  %3987 = vmatpush1.bf16.msra.mxu1 %v6203_v18 }
 0x206   : > { %3906 = vmatprep.subr.bf16.mxu0 %v6218_v19  ;;  %3988 = vmatprep.subr.bf16.mxu1 %v6220_v20  ;;  %v248_v20 = vld [vmem:[#allocation2 + $0x18] sm:$0xff] }
 0x209   : > { %3907 = vmatpush1.bf16.msra.mxu0 %v6217_v26  ;;  %3989 = vmatpush1.bf16.msra.mxu1 %v6219_v27  ;;  %v6640_v26 = vld [vmem:[%s7878_s3] sm:$0xff] (!%p6285_p6)  }
 0x20a   : > { %3908 = vmatprep.subr.bf16.mxu0 %v6234_v28  ;;  %3990 = vmatprep.subr.bf16.mxu1 %v6236_v29  ;;  %v6641_v27 = vld [vmem:[%s7878_s3 + $0x80] sm:$0xff] (!%p6285_p6)   ;;  %v6642_v28 = vld [vmem:[%s7878_s3 + $0x48] sm:$0xff] (!%p6285_p6)  }
 0x20b   : > { %v6643_v29 = vld [vmem:[%s7878_s3 + $0xc8] sm:$0xff] (!%p6285_p6)  }
 0x20d   : > { %3909 = vmatpush1.bf16.msra.mxu0 %v6233_v34  ;;  %3991 = vmatpush1.bf16.msra.mxu1 %v6235_v35  ;;  %v6648_v34 = vld [vmem:[%s7878_s3 + $0x10] sm:$0xff] (!%p6285_p6)  }
 0x20e   : > { %3910 = vmatprep.subr.bf16.mxu0 %v6250_v36  ;;  %3992 = vmatprep.subr.bf16.mxu1 %v6252_v37  ;;  %v6649_v35 = vld [vmem:[%s7878_s3 + $0x90] sm:$0xff] (!%p6285_p6)   ;;  %v6650_v36 = vld [vmem:[%s7878_s3 + $0x58] sm:$0xff] (!%p6285_p6)  }
 0x20f   : > { %v6651_v37 = vld [vmem:[%s7878_s3 + $0xd8] sm:$0xff] (!%p6285_p6)  }
 0x211   : > { %3911 = vmatpush1.bf16.msra.mxu0 %v6249_v42  ;;  %3993 = vmatpush1.bf16.msra.mxu1 %v6251_v43  ;;  %v6656_v42 = vld [vmem:[%s7878_s3 + $0x20] sm:$0xff] (!%p6285_p6)  }
 0x212   : > { %3912 = vmatprep.subr.bf16.mxu0 %v6266_v44  ;;  %3994 = vmatprep.subr.bf16.mxu1 %v6268_v45  ;;  %v6657_v43 = vld [vmem:[%s7878_s3 + $0xa0] sm:$0xff] (!%p6285_p6)   ;;  %v6658_v44 = vld [vmem:[%s7878_s3 + $0x68] sm:$0xff] (!%p6285_p6)  }
 0x213   : > { %v6659_v45 = vld [vmem:[%s7878_s3 + $0xe8] sm:$0xff] (!%p6285_p6)  }
 0x215   : > { %3913 = vmatpush1.bf16.msra.mxu0 %v6265_v51  ;;  %3995 = vmatpush1.bf16.msra.mxu1 %v6267_v52  ;;  %v6664_v51 = vld [vmem:[%s7878_s3 + $0x30] sm:$0xff] (!%p6285_p6)   ;;  %v4117_v52 = vsub.s32 (!%p6285_p6), 0, %v6862_v49 }
 0x216   : > { %3914 = vmatprep.subr.bf16.mxu0 %v6282_v54  ;;  %3996 = vmatprep.subr.bf16.mxu1 %v6284_v55  ;;  %v6665_v54 = vld [vmem:[%s7878_s3 + $0xb0] sm:$0xff] (!%p6285_p6)   ;;  %v4121_v55 = vsub.s32 (!%p6285_p6), 1, %v6862_v49 }
 0x219   : > { %3915 = vmatpush1.bf16.msra.mxu0 %v6281_v56  ;;  %3997 = vmatpush1.bf16.msra.mxu1 %v6283_v57  ;;  %v6666_v56 = vld [vmem:[%s7878_s3 + $0x78] sm:$0xff] (!%p6285_p6)   ;;  %v4125_v57 = vsub.s32 (!%p6285_p6), 2, %v6862_v49 }
 0x21a   : > { %6419 = vmatprep.subr.bf16.mxu0 (!%p6285_p6), %v6638_v24  ;;  %6441 = vmatprep.subr.bf16.mxu1 (!%p6285_p6), %v6639_v25 }
 0x21c   : > { %3917 = vmatmul.mubr.bf16.vlgmr.msra.gmra.mrb[12].mxu0 %v7005_v58  ;;  %3999 = vmatmul.mubr.bf16.vlgmr.msra.gmra.mrb[12].mxu1 %v7005_v58 }
 0x21d   : > { %6420 = vmatpush3.bf16.msra.mxu0 (!%p6285_p6), %v6640_v26  ;;  %6442 = vmatpush3.bf16.msra.mxu1 (!%p6285_p6), %v6641_v27  ;;  %v6672_v27 = vld [vmem:[%s7878_s3 + $0x100] sm:$0xff] (!%p6285_p6)  }
 0x21e   : > { %6421 = vmatprep.subr.bf16.mxu0 (!%p6285_p6), %v6642_v28  ;;  %6443 = vmatprep.subr.bf16.mxu1 (!%p6285_p6), %v6643_v29 }
 0x221   : > { %6422 = vmatpush3.bf16.msra.mxu0 (!%p6285_p6), %v6644_v30  ;;  %6444 = vmatpush3.bf16.msra.mxu1 (!%p6285_p6), %v6645_v31  ;;  %v6673_v30 = vld [vmem:[%s7878_s3 + $0x180] sm:$0xff] (!%p6285_p6)  }
 0x222   : > { %6423 = vmatprep.subr.bf16.mxu0 (!%p6285_p6), %v6646_v61  ;;  %6445 = vmatprep.subr.bf16.mxu1 (!%p6285_p6), %v6647_v33  ;;  %v6674_v61 = vld [vmem:[%s7878_s3 + $0x148] sm:$0xff] (!%p6285_p6)  }
 0x225   : > { %6424 = vmatpush3.bf16.msra.mxu0 (!%p6285_p6), %v6648_v34  ;;  %6446 = vmatpush3.bf16.msra.mxu1 (!%p6285_p6), %v6649_v35  ;;  %v6675_v34 = vld [vmem:[%s7878_s3 + $0x1c8] sm:$0xff] (!%p6285_p6)  }
 0x226   : > { %6425 = vmatprep.subr.bf16.mxu0 (!%p6285_p6), %v6650_v36  ;;  %6447 = vmatprep.subr.bf16.mxu1 (!%p6285_p6), %v6651_v37  ;;  %v6676_v37 = vld [vmem:[%s7878_s3 + $0x108] sm:$0xff] (!%p6285_p6)  }
 0x229   : > { %6426 = vmatpush3.bf16.msra.mxu0 (!%p6285_p6), %v6652_v38  ;;  %6448 = vmatpush3.bf16.msra.mxu1 (!%p6285_p6), %v6653_v39  ;;  %v6677_v38 = vld [vmem:[%s7878_s3 + $0x188] sm:$0xff] (!%p6285_p6)   ;;  %v6678_v39 = vld [vmem:[%s7878_s3 + $0x150] sm:$0xff] (!%p6285_p6)  }
 0x22a   : > { %6427 = vmatprep.subr.bf16.mxu0 (!%p6285_p6), %v6654_v40  ;;  %6449 = vmatprep.subr.bf16.mxu1 (!%p6285_p6), %v6655_v41  ;;  %v6679_v40 = vld [vmem:[%s7878_s3 + $0x1d0] sm:$0xff] (!%p6285_p6)  }
 0x22d   : > { %6428 = vmatpush3.bf16.msra.mxu0 (!%p6285_p6), %v6656_v42  ;;  %6450 = vmatpush3.bf16.msra.mxu1 (!%p6285_p6), %v6657_v43  ;;  %v6680_v43 = vld [vmem:[%s7878_s3 + $0x110] sm:$0xff] (!%p6285_p6)  }
 0x22e   : > { %6429 = vmatprep.subr.bf16.mxu0 (!%p6285_p6), %v6658_v44  ;;  %6451 = vmatprep.subr.bf16.mxu1 (!%p6285_p6), %v6659_v45  ;;  %v6681_v44 = vld [vmem:[%s7878_s3 + $0x190] sm:$0xff] (!%p6285_p6)   ;;  %v6682_v45 = vld [vmem:[%s7878_s3 + $0x158] sm:$0xff] (!%p6285_p6)  }
 0x231   : > { %6430 = vmatpush3.bf16.msra.mxu0 (!%p6285_p6), %v6660_v46  ;;  %6452 = vmatpush3.bf16.msra.mxu1 (!%p6285_p6), %v6661_v47  ;;  %v6683_v46 = vld [vmem:[%s7878_s3 + $0x1d8] sm:$0xff] (!%p6285_p6)  }
 0x232   : > { %6431 = vmatprep.subr.bf16.mxu0 (!%p6285_p6), %v6662_v48  ;;  %6453 = vmatprep.subr.bf16.mxu1 (!%p6285_p6), %v6663_v50  ;;  %v6684_v48 = vld [vmem:[%s7878_s3 + $0x118] sm:$0xff] (!%p6285_p6)  }
 0x233   : > { %v6685_v50 = vld [vmem:[%s7878_s3 + $0x198] sm:$0xff] (!%p6285_p6)  }
 0x235   : > { %6432 = vmatpush3.bf16.msra.mxu0 (!%p6285_p6), %v6664_v51  ;;  %6454 = vmatpush3.bf16.msra.mxu1 (!%p6285_p6), %v6665_v54  ;;  %v6686_v51 = vld [vmem:[%s7878_s3 + $0x160] sm:$0xff] (!%p6285_p6)   ;;  %v4108_v54 = vld [vmem:[#allocation2 + $0x8] sm:$0xff] (!%p6285_p6) }
 0x236   : > { %6433 = vmatprep.subr.bf16.mxu0 (!%p6285_p6), %v6666_v56  ;;  %v6687_v56 = vld [vmem:[%s7878_s3 + $0x1e0] sm:$0xff] (!%p6285_p6)  }
 0x26f   : > { %v3754_v59 = vpop.f32.mrb[8].mxu0  ;;  %v3836_v60 = vpop.f32.mrb[8].mxu1 }
 0x270   : > { %v3756_v62 = vpop.f32.mrb[9].mxu0  ;;  %v3838_v5 = vpop.f32.mrb[9].mxu1 }
 0x271   : > { %v4057_v63 = vcombine.low %v3754_v59, %v3756_v62  ;;  %v3758_v23 = vpop.f32.mrb[10].mxu0  ;;  %v4058_v0 = vcombine.low %v3836_v60, %v3838_v5  ;;  %v3840_v1 = vpop.f32.mrb[10].mxu1  ;;  %v6667_v59 = vld [vmem:[%s7878_s3 + $0xf8] sm:$0xff] (!%p6285_p6)   ;;  %v4129_v60 = vsub.s32 (!%p6285_p6), 3, %v6862_v49  ;;  %v4111_v5 = vld [vmem:[%s7877_s2] sm:$0xff] (!%p6285_p6) }
 0x272   : > { %v3759_v2 = vpop.f32.mrb[11].mxu0  ;;  %v3841_v4 = vpop.f32.mrb[11].mxu1  ;;  %v6668_v62 = vld [vmem:[%s7878_s3 + $0x38] sm:$0xff] (!%p6285_p6)   ;;  %6455 = vmatprep.subr.bf16.mxu1 (!%p6285_p6), %v6667_v59  ;;  %v4118_v23 = vrot.slane (!%p6285_p6), %v4111_v5, %v4117_v52  ;;  %v4126_v1 = vrot.slane (!%p6285_p6), %v4111_v5, %v4125_v57 }
 0x273   : > { %v4065_v3 = vrot.slane %v4057_v63, %v7238_v53  ;;  %v4072_v6 = vrot.slane %v4058_v0, %v7238_v53  ;;  %v6669_v63 = vld [vmem:[%s7878_s3 + $0xb8] sm:$0xff] (!%p6285_p6)   ;;  %6434 = vmatpush3.bf16.msra.mxu0 (!%p6285_p6), %v6668_v62  ;;  %v4122_v0 = vrot.slane (!%p6285_p6), %v4111_v5, %v4121_v55  ;;  %v4130_v2 = vrot.slane (!%p6285_p6), %v4111_v5, %v4129_v60  ;;  %v6671_v4 = vld [vmem:[%s7878_s3 + $0x1c0] sm:$0xff] (!%p6285_p6)  }
 0x274   : > { %6456 = vmatpush3.bf16.msra.mxu1 (!%p6285_p6), %v6669_v63  ;;  %v6688_v62 = vld [vmem:[%s7878_s3 + $0x120] sm:$0xff] (!%p6285_p6)  }
 0x275   : > { %v4073_v8 = vcombine.low %v4065_v3, %v4072_v6  ;;  %v6670_v3 = vld [vmem:[%s7878_s3 + $0x140] sm:$0xff] (!%p6285_p6)   ;;  %v4179_v6 = vcombine.low (!%p6285_p6), %v4118_v23, %v4122_v0  ;;  %6485 = vmatprep.subr.bf16.mxu1 (!%p6285_p6), %v6671_v4 }
 0x276   : > { %6463 = vmatprep.subr.bf16.mxu0 (!%p6285_p6), %v6670_v3  ;;  %v6689_v23 = vld [vmem:[%s7878_s3 + $0x1a0] sm:$0xff] (!%p6285_p6)  }
 0x277   : > { %v4097_v32 = vadd.f32 %v4073_v8, %v247_v7  ;;  %v4180_v7 = vcombine.low (!%p6285_p6), %v4126_v1, %v4130_v2  ;;  %v4187_v8 = vrot.slane (!%p6285_p6), %v4179_v6, %v7238_v53  ;;  %v6691_v1 = vld [vmem:[%s7878_s3 + $0x1e8] sm:$0xff] (!%p6285_p6)   ;;  %v6694_v6 = vld [vmem:[%s7878_s3 + $0x170] sm:$0xff] (!%p6285_p6)  }
 0x278   : > { %v6692_v2 = vld [vmem:[%s7878_s3 + $0x128] sm:$0xff] (!%p6285_p6)  }
 0x279   : > { %4101 = vst [vmem:[#allocation2 + $0x10] sm:$0xff] %v4097_v32  ;;  %v4194_v32 = vrot.slane (!%p6285_p6), %v4180_v7, %v7238_v53  ;;  %v6693_v7 = vld [vmem:[%s7878_s3 + $0x1a8] sm:$0xff] (!%p6285_p6)  }
 0x2ef   : > { %v3918_v9 = vpop.f32.mrb[12].mxu0  ;;  %v4000_v58 = vpop.f32.mrb[12].mxu1 }
 0x2f0   : > { %v3920_v10 = vpop.f32.mrb[13].mxu0  ;;  %v4002_v12 = vpop.f32.mrb[13].mxu1 }
 0x2f1   : > { %v4074_v11 = vcombine.low %v3918_v9, %v3920_v10  ;;  %v3922_v13 = vpop.f32.mrb[14].mxu0  ;;  %v4075_v14 = vcombine.low %v4000_v58, %v4002_v12  ;;  %v4004_v15 = vpop.f32.mrb[14].mxu1  ;;  %v4107_v9 = vld [vmem:[#allocation2] sm:$0xff] (!%p6285_p6)  ;;  %v4195_v58 = vcombine.low (!%p6285_p6), %v4187_v8, %v4194_v32  ;;  %v4133_v12 = vsub.s32 (!%p6285_p6), 4, %v6862_v49 }
 0x2f2   : > { %v3923_v16 = vpop.f32.mrb[15].mxu0  ;;  %v4005_v18 = vpop.f32.mrb[15].mxu1  ;;  %v4137_v13 = vsub.s32 (!%p6285_p6), 5, %v6862_v49  ;;  %v4141_v15 = vsub.s32 (!%p6285_p6), 6, %v6862_v49 }
 0x2f3   : > { %v4082_v17 = vrot.slane %v4074_v11, %v7238_v53  ;;  %v4089_v19 = vrot.slane %v4075_v14, %v7238_v53  ;;  %4106 = sbr.rel (%p6285_p6) target bundleno = 1110 (0x456), region = 48  ;;  %v4251_v10 = vadd.f32 (!%p6285_p6), %v4195_v58, %v4107_v9  ;;  %v4145_v16 = vsub.s32 (!%p6285_p6), 7, %v6862_v49  ;;  %v6695_v9 = vld [vmem:[%s7878_s3 + $0x1f0] sm:$0xff] (!%p6285_p6)   ;;  %v6737_v49 = vld [vmem:[%s7878_s3 + $0x380] sm:$0xff] (!%p6285_p6)  }
 0x2f4   : > { %v4142_v24 = vrot.slane (!%p6285_p6), %v4111_v5, %v4141_v15  ;;  %v6696_v58 = vld [vmem:[%s7878_s3 + $0x130] sm:$0xff] (!%p6285_p6)  }
 0x2f5   : > { %v4090_v21 = vcombine.low %v4082_v17, %v4089_v19  ;;  %v4255_v11 = vmul.f32 (!%p6285_p6), 0.2, %v4251_v10  ;;  %v4134_v19 = vrot.slane (!%p6285_p6), %v4111_v5, %v4133_v12  ;;  %v4146_v25 = vrot.slane (!%p6285_p6), %v4111_v5, %v4145_v16 }
 0x2f7   : > { %v4098_v22 = vadd.f32 %v4090_v21, %v248_v20  ;;  %v4259_v14 = vmax.f32 (!%p6285_p6), %v4251_v10, %v4255_v11  ;;  %v4138_v20 = vrot.slane (!%p6285_p6), %v4111_v5, %v4137_v13  ;;  %v4197_v36 = vcombine.low (!%p6285_p6), %v4142_v24, %v4146_v25  ;;  %v6690_v5 = vld [vmem:[%s7878_s3 + $0x168] sm:$0xff] (!%p6285_p6)   ;;  %v6703_v25 = vld [vmem:[%s7878_s3 + $0x2c0] sm:$0xff] (!%p6285_p6)  }
 0x2f9   : > { %4102 = vst [vmem:[#allocation2 + $0x18] sm:$0xff] %v4098_v22  ;;  %v4274_v17 = vrot.slane (!%p6285_p6), %v4259_v14, %v7238_v53  ;;  %v4267_v18 = vcombine.high (!%p6285_p6), %v4259_v14, %v4259_v14  ;;  %v4196_v35 = vcombine.low (!%p6285_p6), %v4134_v19, %v4138_v20  ;;  %v4211_v42 = vrot.slane (!%p6285_p6), %v4197_v36, %v7238_v53  ;;  %v6698_v14 = vld [vmem:[%s7878_s3 + $0x178] sm:$0xff] (!%p6285_p6)  }
 0x2fa   : > { %v6699_v19 = vld [vmem:[%s7878_s3 + $0x1f8] sm:$0xff]  }
 0x2fb   : > { %v4282_v21 = vcombine.high %v4274_v17, %v4274_v17  ;;  %v4281_v22 = vrot.slane %v4267_v18, %v7238_v53  ;;  %v4351_v26 = vpack.c.bf16 %v4274_v17, %v4274_v17  ;;  %v4204_v41 = vrot.slane %v4196_v35, %v7238_v53  ;;  %v6697_v17 = vld [vmem:[%s7878_s3 + $0x1b0] sm:$0xff]   ;;  %v6700_v20 = vld [vmem:[%s7878_s3 + $0x138] sm:$0xff]  }
 0x2fc   : > { %v6712_v35 = vld [vmem:[%s7878_s3 + $0x210] sm:$0xff]   ;;  %v6714_v36 = vld [vmem:[%s7878_s3 + $0x258] sm:$0xff]  }
 0x2fd   : > { %v4352_v28 = vpack.c.bf16 %v4282_v21, %v4282_v21  ;;  %v4283_v29 = vcombine.high %v4281_v22, %v4281_v22  ;;  %v4353_v31 = vpack.c.bf16 %v4281_v22, %v4281_v22  ;;  %v4212_v47 = vcombine.low %v4204_v41, %v4211_v42  ;;  %v6702_v21 = vld [vmem:[%s7878_s3 + $0x240] sm:$0xff]   ;;  %v6701_v22 = vld [vmem:[%s7878_s3 + $0x1b8] sm:$0xff]  }
 0x2fe   : > { %v6717_v41 = vld [vmem:[%s7878_s3 + $0x298] sm:$0xff]   ;;  %v6719_v42 = vld [vmem:[%s7878_s3 + $0x2e0] sm:$0xff]  }
 0x2ff   : > { %5430 = vmatprep.mubr.bf16.mxu0 %v4352_v28  ;;  %v4354_v33 = vpack.c.bf16 %v4283_v29, %v4283_v29  ;;  %v4252_v59 = vadd.f32 %v4212_v47, %v4108_v54  ;;  %v6706_v28 = vld [vmem:[%s7878_s3 + $0x248] sm:$0xff]   ;;  %v6705_v29 = vld [vmem:[%s7878_s3 + $0x280] sm:$0xff]  }
 0x300   : > { %5431 = vmatmul.mubr.bf16.vlgmr.msra.gmra.mrb[0].mxu0 %v4351_v26  ;;  %v6704_v26 = vld [vmem:[%s7878_s3 + $0x200] sm:$0xff]  }
 0x301   : > { %5470 = vmatprep.mubr.bf16.mxu1 %v4354_v33  ;;  %6464 = vmatpush3.bf16.msra.mxu0 %v6672_v27  ;;  %v4256_v63 = vmul.f32 0.2, %v4252_v59  ;;  %v6709_v33 = vld [vmem:[%s7878_s3 + $0x288] sm:$0xff]  }
 0x302   : > { %5471 = vmatmul.mubr.bf16.vlgmr.msra.gmra.mrb[0].mxu1 %v4353_v31  ;;  %6465 = vmatprep.subr.bf16.mxu0 %v6674_v61  ;;  %v6708_v31 = vld [vmem:[%s7878_s3 + $0x208] sm:$0xff]   ;;  %v6710_v61 = vld [vmem:[%s7878_s3 + $0x250] sm:$0xff]  }
 0x303   : > { %6486 = vmatpush3.bf16.msra.mxu1 %v6673_v30  ;;  %v4260_v0 = vmax.f32 %v4252_v59, %v4256_v63  ;;  %v6707_v30 = vld [vmem:[%s7878_s3 + $0x2c8] sm:$0xff]   ;;  %v6726_v63 = vld [vmem:[%s7878_s3 + $0x270] sm:$0xff]  }
 0x304   : > { %6487 = vmatprep.subr.bf16.mxu1 %v6675_v34  ;;  %v6711_v34 = vld [vmem:[%s7878_s3 + $0x2d0] sm:$0xff]   ;;  %v6725_v59 = vld [vmem:[%s7878_s3 + $0x2a8] sm:$0xff]  }
 0x305   : > { %6466 = vmatpush3.bf16.msra.mxu0 %v6676_v37  ;;  %v4291_v3 = vrot.slane %v4260_v0, %v7238_v53  ;;  %v4284_v4 = vcombine.high %v4260_v0, %v4260_v0  ;;  %v6713_v37 = vld [vmem:[%s7878_s3 + $0x290] sm:$0xff]  }
 0x306   : > { %6467 = vmatprep.subr.bf16.mxu0 %v6678_v39  ;;  %v6716_v39 = vld [vmem:[%s7878_s3 + $0x218] sm:$0xff]   ;;  %v6728_v0 = vld [vmem:[%s7878_s3 + $0x230] sm:$0xff]  }
 0x307   : > { %6488 = vmatpush3.bf16.msra.mxu1 %v6677_v38  ;;  %v4299_v8 = vcombine.high %v4291_v3, %v4291_v3  ;;  %v4298_v32 = vrot.slane %v4284_v4, %v7238_v53  ;;  %v4355_v24 = vpack.c.bf16 %v4291_v3, %v4291_v3  ;;  %v6715_v38 = vld [vmem:[%s7878_s3 + $0x2d8] sm:$0xff]   ;;  %v6729_v4 = vld [vmem:[%s7878_s3 + $0x2b0] sm:$0xff]  }
 0x308   : > { %6489 = vmatprep.subr.bf16.mxu1 %v6679_v40  ;;  %v6718_v40 = vld [vmem:[%s7878_s3 + $0x260] sm:$0xff]  }
 0x309   : > { %6468 = vmatpush3.bf16.msra.mxu0 %v6680_v43  ;;  %v4356_v10 = vpack.c.bf16 %v4299_v8, %v4299_v8  ;;  %v4300_v11 = vcombine.high %v4298_v32, %v4298_v32  ;;  %v4357_v27 = vpack.c.bf16 %v4298_v32, %v4298_v32  ;;  %v4112_v43 = vld [vmem:[%s7877_s2 + $0x8] sm:$0xff]  ;;  %v6732_v8 = vld [vmem:[%s7878_s3 + $0x238] sm:$0xff]  }
 0x30a   : > { %6469 = vmatprep.subr.bf16.mxu0 %v6682_v45  ;;  %v4150_v45 = vrot.slane %v4112_v43, %v4117_v52  ;;  %v4158_v47 = vrot.slane %v4112_v43, %v4125_v57  ;;  %v6724_v57 = vld [vmem:[%s7878_s3 + $0x228] sm:$0xff]  }
 0x30b   : > { %6490 = vmatpush3.bf16.msra.mxu1 %v6681_v44  ;;  %5510 = vmatprep.mubr.bf16.mxu0 %v4356_v10  ;;  %v4358_v18 = vpack.c.bf16 %v4300_v11, %v4300_v11  ;;  %v6720_v44 = vld [vmem:[%s7878_s3 + $0x220] sm:$0xff]   ;;  %v6733_v10 = vld [vmem:[%s7878_s3 + $0x2b8] sm:$0xff]  }
 0x30c   : > { %6491 = vmatprep.subr.bf16.mxu1 %v6683_v46  ;;  %v4154_v46 = vrot.slane %v4112_v43, %v4121_v55  ;;  %v6723_v55 = vld [vmem:[%s7878_s3 + $0x2e8] sm:$0xff]  }
 0x30d   : > { %6470 = vmatpush3.bf16.msra.mxu0 %v6684_v48  ;;  %5550 = vmatprep.mubr.bf16.mxu1 %v4358_v18  ;;  %v4162_v48 = vrot.slane %v4112_v43, %v4129_v60  ;;  %v4166_v18 = vrot.slane %v4112_v43, %v4133_v12 }
 0x30e   : > { %6471 = vmatprep.subr.bf16.mxu0 %v6686_v51  ;;  %v6722_v51 = vld [vmem:[%s7878_s3 + $0x268] sm:$0xff]   ;;  %v4213_v52 = vcombine.low %v4150_v45, %v4154_v46  ;;  %v6752_v46 = vld [vmem:[%s7878_s3 + $0x320] sm:$0xff]  }
 0x30f   : > { %6492 = vmatpush3.bf16.msra.mxu1 %v6685_v50  ;;  %v6721_v50 = vld [vmem:[%s7878_s3 + $0x2a0] sm:$0xff]   ;;  %v4214_v54 = vcombine.low %v4158_v47, %v4162_v48  ;;  %v6754_v47 = vld [vmem:[%s7878_s3 + $0x368] sm:$0xff]  }
 0x310   : > { %6493 = vmatprep.subr.bf16.mxu1 %v6687_v56  ;;  %v4221_v60 = vrot.slane %v4213_v52, %v7238_v53 }
 0x311   : > { %6472 = vmatpush3.bf16.msra.mxu0 %v6688_v62  ;;  %v4228_v56 = vrot.slane %v4214_v54, %v7238_v53  ;;  %v4109_v62 = vld [vmem:[#allocation2 + $0x10] sm:$0xff]  ;;  %v6756_v54 = vld [vmem:[%s7878_s3 + $0x328] sm:$0xff]  }
 0x312   : > { %6473 = vmatprep.subr.bf16.mxu0 %v6690_v5 }
 0x313   : > { %6494 = vmatpush3.bf16.msra.mxu1 %v6689_v23  ;;  %v4229_v5 = vcombine.low %v4221_v60, %v4228_v56  ;;  %v6727_v23 = vld [vmem:[%s7878_s3 + $0x2f0] sm:$0xff]   ;;  %v6757_v56 = vld [vmem:[%s7878_s3 + $0x3a8] sm:$0xff]  }
 0x314   : > { %6495 = vmatprep.subr.bf16.mxu1 %v6691_v1 }
 0x315   : > { %6474 = vmatpush3.bf16.msra.mxu0 %v6692_v2  ;;  %v4253_v1 = vadd.f32 %v4229_v5, %v4109_v62  ;;  %v6730_v2 = vld [vmem:[%s7878_s3 + $0x278] sm:$0xff]   ;;  %v6760_v5 = vld [vmem:[%s7878_s3 + $0x330] sm:$0xff]  }
 0x316   : > { %6475 = vmatprep.subr.bf16.mxu0 %v6694_v6  ;;  %v6731_v6 = vld [vmem:[%s7878_s3 + $0x2f8] sm:$0xff]  }
 0x317   : > { %6496 = vmatpush3.bf16.msra.mxu1 %v6693_v7  ;;  %v4257_v3 = vmul.f32 0.2, %v4253_v1 }
 0x318   : > { %6497 = vmatprep.subr.bf16.mxu1 %v6695_v9 }
 0x319   : > { %6476 = vmatpush3.bf16.msra.mxu0 %v6696_v58  ;;  %v4261_v7 = vmax.f32 %v4253_v1, %v4257_v3  ;;  %v6734_v58 = vld [vmem:[%s7878_s3 + $0x340] sm:$0xff]  }
 0x31a   : > { %6477 = vmatprep.subr.bf16.mxu0 %v6698_v14 }
 0x31b   : > { %6498 = vmatpush3.bf16.msra.mxu1 %v6697_v17  ;;  %v4308_v32 = vrot.slane %v4261_v7, %v7238_v53  ;;  %v4301_v9 = vcombine.high %v4261_v7, %v4261_v7  ;;  %v6735_v17 = vld [vmem:[%s7878_s3 + $0x3c0] sm:$0xff]  }
 0x31c   : > { %6499 = vmatprep.subr.bf16.mxu1 %v6699_v19 }
 0x31d   : > { %6478 = vmatpush3.bf16.msra.mxu0 %v6700_v20  ;;  %v4316_v11 = vcombine.high %v4308_v32, %v4308_v32  ;;  %v4315_v14 = vrot.slane %v4301_v9, %v7238_v53  ;;  %v4359_v19 = vpack.c.bf16 %v4308_v32, %v4308_v32  ;;  %v4170_v20 = vrot.slane %v4112_v43, %v4137_v13  ;;  %v6286_v9 = vld [vmem:[#allocation3] ss:$0 sm:$0xff] }
 0x31e   : > { %6507 = vmatprep.subr.bf16.mxu0 %v6702_v21  ;;  %v4174_v21 = vrot.slane %v4112_v43, %v4141_v15  ;;  %v6739_v15 = vld [vmem:[%s7878_s3 + $0x3c8] sm:$0xff]  }
 0x31f   : > { %6500 = vmatpush3.bf16.msra.mxu1 %v6701_v22  ;;  %v4178_v22 = vrot.slane %v4112_v43, %v4145_v16  ;;  %v4361_v12 = vpack.c.bf16 %v4315_v14, %v4315_v14  ;;  %v4230_v16 = vcombine.low %v4166_v18, %v4170_v20  ;;  %v4110_v43 = vld [vmem:[#allocation2 + $0x18] sm:$0xff] }
 0x320   : > { %5511 = vmatmul.mubr.bf16.vlgmr.msra.gmra.mrb[4].mxu0 %v4355_v24  ;;  %6529 = vmatprep.subr.bf16.mxu1 %v6703_v25  ;;  %v4360_v24 = vpack.c.bf16 %v4316_v11, %v4316_v11  ;;  %v4317_v25 = vcombine.high %v4315_v14, %v4315_v14 }
 0x321   : > { %6508 = vmatpush3.bf16.msra.mxu0 %v6704_v26  ;;  %v6736_v26 = vld [vmem:[%s7878_s3 + $0x300] sm:$0xff]  }
 0x322   : > { %5551 = vmatmul.mubr.bf16.vlgmr.msra.gmra.mrb[4].mxu1 %v4357_v27  ;;  %6509 = vmatprep.subr.bf16.mxu0 %v6706_v28  ;;  %v6738_v27 = vld [vmem:[%s7878_s3 + $0x348] sm:$0xff]   ;;  %v4362_v13 = vpack.c.bf16 %v4317_v25, %v4317_v25  ;;  %v4231_v28 = vcombine.low %v4174_v21, %v4178_v22 }
 0x323   : > { %6530 = vmatpush3.bf16.msra.mxu1 %v6705_v29  ;;  %5590 = vmatprep.mubr.bf16.mxu0 %v4360_v24  ;;  %v6740_v29 = vld [vmem:[%s7878_s3 + $0x308] sm:$0xff]  }
 0x324   : > { %6531 = vmatprep.subr.bf16.mxu1 %v6707_v30  ;;  %5630 = vmatprep.mubr.bf16.mxu1 %v4362_v13  ;;  %v6742_v30 = vld [vmem:[%s7878_s3 + $0x350] sm:$0xff]  }
 0x325   : > { %6510 = vmatpush3.bf16.msra.mxu0 %v6708_v31  ;;  %v6741_v31 = vld [vmem:[%s7878_s3 + $0x388] sm:$0xff]  }
 0x326   : > { %6511 = vmatprep.subr.bf16.mxu0 %v6710_v61  ;;  %v6743_v61 = vld [vmem:[%s7878_s3 + $0x3d0] sm:$0xff]  }
 0x327   : > { %6532 = vmatpush3.bf16.msra.mxu1 %v6709_v33  ;;  %v4238_v33 = vrot.slane %v4230_v16, %v7238_v53 }
 0x328   : > { %6533 = vmatprep.subr.bf16.mxu1 %v6711_v34  ;;  %v4245_v34 = vrot.slane %v4231_v28, %v7238_v53 }
 0x329   : > { %6512 = vmatpush3.bf16.msra.mxu0 %v6712_v35  ;;  %v6744_v35 = vld [vmem:[%s7878_s3 + $0x310] sm:$0xff]  }
 0x32a   : > { %6513 = vmatprep.subr.bf16.mxu0 %v6714_v36  ;;  %v6746_v36 = vld [vmem:[%s7878_s3 + $0x358] sm:$0xff]  }
 0x32b   : > { %6534 = vmatpush3.bf16.msra.mxu1 %v6713_v37  ;;  %v6745_v37 = vld [vmem:[%s7878_s3 + $0x390] sm:$0xff]  }
 0x32c   : > { %6535 = vmatprep.subr.bf16.mxu1 %v6715_v38  ;;  %v6747_v38 = vld [vmem:[%s7878_s3 + $0x3d8] sm:$0xff]  }
 0x32d   : > { %6514 = vmatpush3.bf16.msra.mxu0 %v6716_v39  ;;  %v4246_v39 = vcombine.low %v4238_v33, %v4245_v34 }
 0x32e   : > { %6515 = vmatprep.subr.bf16.mxu0 %v6718_v40  ;;  %v6748_v40 = vld [vmem:[%s7878_s3 + $0x318] sm:$0xff]  }
 0x32f   : > { %6536 = vmatpush3.bf16.msra.mxu1 %v6717_v41  ;;  %v6750_v41 = vld [vmem:[%s7878_s3 + $0x360] sm:$0xff]   ;;  %v4254_v45 = vadd.f32 %v4246_v39, %v4110_v43 }
 0x330   : > { %6537 = vmatprep.subr.bf16.mxu1 %v6719_v42  ;;  %v6749_v42 = vld [vmem:[%s7878_s3 + $0x398] sm:$0xff]  }
 0x331   : > { %6516 = vmatpush3.bf16.msra.mxu0 %v6720_v44  ;;  %v6751_v44 = vld [vmem:[%s7878_s3 + $0x3e0] sm:$0xff]   ;;  %v4258_v48 = vmul.f32 0.2, %v4254_v45 }
 0x332   : > { %6517 = vmatprep.subr.bf16.mxu0 %v6722_v51  ;;  %v6755_v51 = vld [vmem:[%s7878_s3 + $0x3e8] sm:$0xff]  }
 0x333   : > { %6538 = vmatpush3.bf16.msra.mxu1 %v6721_v50  ;;  %v6753_v50 = vld [vmem:[%s7878_s3 + $0x3a0] sm:$0xff]   ;;  %v4262_v52 = vmax.f32 %v4254_v45, %v4258_v48 }
 0x334   : > { %6539 = vmatprep.subr.bf16.mxu1 %v6723_v55  ;;  %v6758_v55 = vld [vmem:[%s7878_s3 + $0x370] sm:$0xff]  }
 0x335   : > { %6518 = vmatpush3.bf16.msra.mxu0 %v6724_v57  ;;  %v4325_v57 = vrot.slane %v4262_v52, %v7238_v53  ;;  %v4318_v60 = vcombine.high %v4262_v52, %v4262_v52 }
 0x336   : > { %6519 = vmatprep.subr.bf16.mxu0 %v6726_v63 }
 0x337   : > { %6540 = vmatpush3.bf16.msra.mxu1 %v6725_v59  ;;  %v6759_v59 = vld [vmem:[%s7878_s3 + $0x3f0] sm:$0xff]   ;;  %v4333_v62 = vcombine.high %v4325_v57, %v4325_v57  ;;  %v4332_v63 = vrot.slane %v4318_v60, %v7238_v53  ;;  %v6763_v53 = vld [vmem:[%s7878_s3 + $0x3f8] sm:$0xff]   ;;  %v4363_v7 = vpack.c.bf16 %v4325_v57, %v4325_v57 }
 0x338   : > { %6541 = vmatprep.subr.bf16.mxu1 %v6727_v23  ;;  %v6762_v23 = vld [vmem:[%s7878_s3 + $0x378] sm:$0xff]  }
 0x339   : > { %6520 = vmatpush3.bf16.msra.mxu0 %v6728_v0  ;;  %v4364_v0 = vpack.c.bf16 %v4333_v62, %v4333_v62  ;;  %v4334_v1 = vcombine.high %v4332_v63, %v4332_v63 }
 0x33a   : > { %6521 = vmatprep.subr.bf16.mxu0 %v6730_v2  ;;  %v6761_v2 = vld [vmem:[%s7878_s3 + $0x3b0] sm:$0xff]  }
 0x33b   : > { %6542 = vmatpush3.bf16.msra.mxu1 %v6729_v4  ;;  %v4366_v3 = vpack.c.bf16 %v4334_v1, %v4334_v1  ;;  %v6764_v4 = vld [vmem:[%s7878_s3 + $0x338] sm:$0xff]  }
 0x33c   : > { %6543 = vmatprep.subr.bf16.mxu1 %v6731_v6  ;;  %v6765_v6 = vld [vmem:[%s7878_s3 + $0x3b8] sm:$0xff]  }
 0x33d   : > { %6522 = vmatpush3.bf16.msra.mxu0 %v6732_v8  ;;  %v4365_v8 = vpack.c.bf16 %v4332_v63, %v4332_v63 }
 0x33e   : > { %6551 = vmatprep.subr.bf16.mxu0 %v6734_v58 }
 0x33f   : > { %6544 = vmatpush3.bf16.msra.mxu1 %v6733_v10 }
 0x340   : > { %6573 = vmatprep.subr.bf16.mxu1 %v6735_v17  ;;  %5591 = vmatmul.mubr.bf16.vlgmr.msra.gmra.mrb[8].mxu0 %v4359_v19 }
 0x341   : > { %6552 = vmatpush3.bf16.msra.mxu0 %v6736_v26  ;;  %5670 = vmatprep.mubr.bf16.mxu0 %v4364_v0 }
 0x342   : > { %5631 = vmatmul.mubr.bf16.vlgmr.msra.gmra.mrb[8].mxu1 %v4361_v12  ;;  %6553 = vmatprep.subr.bf16.mxu0 %v6738_v27 }
 0x343   : > { %6574 = vmatpush3.bf16.msra.mxu1 %v6737_v49  ;;  %5710 = vmatprep.mubr.bf16.mxu1 %v4366_v3 }
 0x344   : > { %6575 = vmatprep.subr.bf16.mxu1 %v6739_v15 }
 0x345   : > { %6554 = vmatpush3.bf16.msra.mxu0 %v6740_v29 }
 0x346   : > { %6555 = vmatprep.subr.bf16.mxu0 %v6742_v30 }
 0x347   : > { %6576 = vmatpush3.bf16.msra.mxu1 %v6741_v31 }
 0x348   : > { %6577 = vmatprep.subr.bf16.mxu1 %v6743_v61 }
 0x349   : > { %6556 = vmatpush3.bf16.msra.mxu0 %v6744_v35 }
 0x34a   : > { %6557 = vmatprep.subr.bf16.mxu0 %v6746_v36 }
 0x34b   : > { %6578 = vmatpush3.bf16.msra.mxu1 %v6745_v37 }
 0x34c   : > { %6579 = vmatprep.subr.bf16.mxu1 %v6747_v38 }
 0x34d   : > { %6558 = vmatpush3.bf16.msra.mxu0 %v6748_v40 }
 0x34e   : > { %6559 = vmatprep.subr.bf16.mxu0 %v6750_v41 }
 0x34f   : > { %6580 = vmatpush3.bf16.msra.mxu1 %v6749_v42 }
 0x350   : > { %6581 = vmatprep.subr.bf16.mxu1 %v6751_v44 }
 0x351   : > { %6560 = vmatpush3.bf16.msra.mxu0 %v6752_v46 }
 0x352   : > { %6561 = vmatprep.subr.bf16.mxu0 %v6754_v47 }
 0x353   : > { %6582 = vmatpush3.bf16.msra.mxu1 %v6753_v50 }
 0x354   : > { %6583 = vmatprep.subr.bf16.mxu1 %v6755_v51 }
 0x355   : > { %6562 = vmatpush3.bf16.msra.mxu0 %v6756_v54 }
 0x356   : > { %6563 = vmatprep.subr.bf16.mxu0 %v6758_v55 }
 0x357   : > { %6584 = vmatpush3.bf16.msra.mxu1 %v6757_v56 }
 0x358   : > { %6585 = vmatprep.subr.bf16.mxu1 %v6759_v59 }
 0x359   : > { %6564 = vmatpush3.bf16.msra.mxu0 %v6760_v5 }
 0x35a   : > { %6565 = vmatprep.subr.bf16.mxu0 %v6762_v23 }
 0x35b   : > { %6586 = vmatpush3.bf16.msra.mxu1 %v6761_v2 }
 0x35c   : > { %6587 = vmatprep.subr.bf16.mxu1 %v6763_v53 }
 0x35d   : > { %6566 = vmatpush3.bf16.msra.mxu0 %v6764_v4 }
 0x35f   : > { %6588 = vmatpush3.bf16.msra.mxu1 %v6765_v6 }
 0x360   : > { %5671 = vmatmul.mubr.bf16.vlgmr.msra.gmra.mrb[12].mxu0 %v4363_v7 }
 0x362   : > { %5711 = vmatmul.mubr.bf16.vlgmr.msra.gmra.mrb[12].mxu1 %v4365_v8 }
 0x3d3   : > { %v6435_v32 = vpop.f32.mrb[0].mxu0 }
 0x3d4   : > { %v6436_v58 = vpop.f32.mrb[1].mxu0 }
 0x3d5   : > { %v6457_v10 = vpop.f32.mrb[0].mxu1  ;;  %v6437_v11 = vadd.f32 %v6436_v58, %v6435_v32  ;;  %v6438_v14 = vpop.f32.mrb[2].mxu0 }
 0x3d6   : > { %v6458_v17 = vpop.f32.mrb[1].mxu1  ;;  %v6439_v18 = vpop.f32.mrb[3].mxu0 }
 0x3d7   : > { %v5433_v19 = vadd.f32 %v6437_v11, %v6286_v9  ;;  %v6459_v20 = vadd.f32 %v6458_v17, %v6457_v10  ;;  %v6460_v21 = vpop.f32.mrb[2].mxu1 }
 0x3d8   : > { %v6461_v22 = vpop.f32.mrb[3].mxu1 }
 0x3d9   : > { %v5473_v24 = vadd.f32 %v6459_v20, %v5433_v19 }
 0x3f3   : > { %v6479_v25 = vpop.f32.mrb[4].mxu0 }
 0x3f4   : > { %v6480_v26 = vpop.f32.mrb[5].mxu0 }
 0x3f5   : > { %v6501_v12 = vpop.f32.mrb[4].mxu1  ;;  %v6481_v27 = vadd.f32 %v6480_v26, %v6479_v25  ;;  %v6482_v13 = vpop.f32.mrb[6].mxu0 }
 0x3f6   : > { %v6502_v49 = vpop.f32.mrb[5].mxu1  ;;  %v6483_v15 = vpop.f32.mrb[7].mxu0 }
 0x3f7   : > { %v5513_v16 = vadd.f32 %v6481_v27, %v5473_v24  ;;  %v6503_v28 = vadd.f32 %v6502_v49, %v6501_v12  ;;  %v6504_v29 = vpop.f32.mrb[6].mxu1 }
 0x3f8   : > { %v6505_v30 = vpop.f32.mrb[7].mxu1 }
 0x3f9   : > { %v5553_v31 = vadd.f32 %v6503_v28, %v5513_v16 }
 0x413   : > { %v6523_v61 = vpop.f32.mrb[8].mxu0 }
 0x414   : > { %v6524_v33 = vpop.f32.mrb[9].mxu0 }
 0x415   : > { %v6545_v34 = vpop.f32.mrb[8].mxu1  ;;  %v6525_v35 = vadd.f32 %v6524_v33, %v6523_v61  ;;  %v6526_v36 = vpop.f32.mrb[10].mxu0 }
 0x416   : > { %v6546_v37 = vpop.f32.mrb[9].mxu1  ;;  %v6527_v38 = vpop.f32.mrb[11].mxu0 }
 0x417   : > { %v5593_v39 = vadd.f32 %v6525_v35, %v5553_v31  ;;  %v6547_v40 = vadd.f32 %v6546_v37, %v6545_v34  ;;  %v6548_v41 = vpop.f32.mrb[10].mxu1 }
 0x418   : > { %v6549_v42 = vpop.f32.mrb[11].mxu1 }
 0x419   : > { %v5633_v43 = vadd.f32 %v6547_v40, %v5593_v39 }
 0x433   : > { %v6567_v44 = vpop.f32.mrb[12].mxu0 }
 0x434   : > { %v6568_v45 = vpop.f32.mrb[13].mxu0 }
 0x435   : > { %v6589_v46 = vpop.f32.mrb[12].mxu1  ;;  %v6569_v47 = vadd.f32 %v6568_v45, %v6567_v44  ;;  %v6570_v48 = vpop.f32.mrb[14].mxu0 }
 0x436   : > { %v6590_v50 = vpop.f32.mrb[13].mxu1  ;;  %v6571_v51 = vpop.f32.mrb[15].mxu0 }
 0x437   : > { %v5673_v52 = vadd.f32 %v6569_v47, %v5633_v43  ;;  %v6591_v54 = vadd.f32 %v6590_v50, %v6589_v46  ;;  %v6592_v55 = vpop.f32.mrb[14].mxu1 }
 0x438   : > { %v6593_v57 = vpop.f32.mrb[15].mxu1 }
 0x439   : > { %v5713_v60 = vadd.f32 %v6591_v54, %v5673_v52 }
 0x43b   : > { %v6415_v56 = vmul.f32 -1.442695, %v5713_v60 }
 0x43d   : > { %6766 = vpow2.f32 %v6415_v56 }
 0x447   : > { %v6767_v59 = vpop.eup %6766 }
 0x448   : > { %v5721_v62 = vadd.f32 1.0, %v6767_v59 }
 0x44a   : > { %6768 = vrcp.f32 %v5721_v62 }
 0x454   : > { %v6769_v63 = vpop.eup %6768 }
 0x455   : > { %5725 = vst.msk [vmem:[%s7880_s5] sm:$0x3] %vm5724_vm0, %v6769_v63 }
 0x456 PF: > { %s17_s20 = sadd.s32 1, %s6776_s20  }
 0x457   : > { %p14_p7 = scmp.ge.s32.totalorder %s17_s20, 4  }
 0x459   :  { %16 = sbr.rel (!%p14_p7) target bundleno = 3 (0x3), region = 77 }

</bundles_post_ra>
